<compile_context>
chip_gen: v5e
topology: v5e:2x2
jax: 0.10.0
libtpu: 0.0.40
codegen_flags: <defaults>
</compile_context>

<pallas_src>
import functools
import math

import jax
import jax.numpy as jnp
from jax.experimental import pallas as pl
from jax.experimental.pallas import tpu as pltpu

# ----------------------------------------------------------------------------
# Architecture config (scaled-down VGG11: 8 convs, 5 maxpools, 3 linears)
# ----------------------------------------------------------------------------
IN_CH = 3
IMG = 32
NUM_CLASSES = 10
CLS_HIDDEN = 128
POOL_HW = 7                      # AdaptiveAvgPool2d((7, 7)) before the classifier
CFG = [8, 'M', 16, 'M', 32, 32, 'M', 64, 64, 'M', 64, 64, 'M']
FEATURE_LAYERS = 4               # number of convs assigned to the featurizer


def _build_arch():
    feats = []
    c = IN_CH
    for v in CFG:
        if v == 'M':
            feats.append(('M',))
        else:
            feats.append(('C', c, v))        # every conv is followed by ReLU
            c = v
    last_conv_ch = c
    conv_idx = [i for i, l in enumerate(feats) if l[0] == 'C']
    n_convs = len(conv_idx)
    assert 0 < FEATURE_LAYERS <= n_convs
    split = len(feats) if FEATURE_LAYERS == n_convs else conv_idx[FEATURE_LAYERS]
    featurizer_ops = feats[:split]
    task_feat_ops = feats[split:]
    cls_in = last_conv_ch * POOL_HW * POOL_HW
    # classifier: (fin, fout, relu_after).  Dropout layers are eval-mode identity.
    classifier = [(cls_in, CLS_HIDDEN, True),
                  (CLS_HIDDEN, CLS_HIDDEN, True),
                  (CLS_HIDDEN, NUM_CLASSES, False)]
    # adversary branch: Conv2d/Linear of the task branch -> 1x1 convs;
    # MaxPool / Dropout / AvgPool / Flatten are skipped.
    adv = [(op[1], op[2], True) for op in task_feat_ops if op[0] == 'C']
    first_linear = True
    for (fin, fout, relu) in classifier:
        cin = last_conv_ch if first_linear else fin  # the "512" hardcode == last conv width
        adv.append((cin, fout, relu))
        first_linear = False
    return featurizer_ops, task_feat_ops, classifier, adv, last_conv_ch


def _conv_blocks(ops):
    """Collapse a conv/'M' op list into (cin, cout, pool_after) conv blocks."""
    blocks, i = [], 0
    while i < len(ops):
        assert ops[i][0] == 'C', 'every maxpool in this CFG directly follows a conv'
        pool = (i + 1 < len(ops)) and ops[i + 1][0] == 'M'
        blocks.append((ops[i][1], ops[i][2], pool))
        i += 2 if pool else 1
    return blocks


ARCH = _build_arch()
FEAT_BLOCKS = _conv_blocks(ARCH[0])
TASK_BLOCKS = _conv_blocks(ARCH[1])


# ----------------------------------------------------------------------------
# Pallas kernels (all grid=(1,), everything VMEM-resident)
# ----------------------------------------------------------------------------
def _conv_block_kernel(p_ref, w_ref, b_ref, o_ref, *, relu):
    """Fused 3x3 conv + bias + ReLU (+ optional fused 2x2 maxpool).

    p_ref: (G, M, 9*Cin) im2col patches.  G == 1 (no pool) or G == 4 (the four
    2x2-window corners of each pooled output pixel).  One big-K matmul per
    corner; corners are combined with an elementwise max (maxpool commutes
    with the monotone bias-add + ReLU epilogue).
    """
    w = w_ref[...]
    acc = jnp.dot(p_ref[0], w, preferred_element_type=jnp.float32)
    for g in range(1, p_ref.shape[0]):
        acc = jnp.maximum(acc, jnp.dot(p_ref[g], w, preferred_element_type=jnp.float32))
    y = acc + b_ref[...]
    if relu:
        y = jnp.maximum(y, 0.0)
    o_ref[...] = y


def _mlp3_kernel(x_ref, w1_ref, b1_ref, w2_ref, b2_ref, w3_ref, b3_ref, o_ref):
    """Fused 3-layer classifier MLP (Linear+ReLU, Linear+ReLU, Linear)."""
    h = jnp.dot(x_ref[...], w1_ref[...], preferred_element_type=jnp.float32) + b1_ref[...]
    h = jnp.maximum(h, 0.0)
    h = jnp.dot(h, w2_ref[...], preferred_element_type=jnp.float32) + b2_ref[...]
    h = jnp.maximum(h, 0.0)
    o_ref[...] = jnp.dot(h, w3_ref[...], preferred_element_type=jnp.float32) + b3_ref[...]


def _adversary_kernel(x_ref, pool_ref, *refs, relus):
    """Entire adversary branch: chained 1x1 convs + global avg pool + flatten.

    x_ref: (N*H*W, Cin) feature pixels.  refs = (w0, b0, ..., wK, bK, out).
    pool_ref: (N, N*H*W) block-averaging matrix implementing
    AdaptiveAvgPool2d((1,1)) + Flatten(1) as a single matmul (keeps the whole
    kernel 2-D / reshape-free).
    """
    o_ref = refs[-1]
    z = x_ref[...]
    for i, relu in enumerate(relus):
        w = refs[2 * i][...]
        b = refs[2 * i + 1][...]
        z = jnp.dot(z, w, preferred_element_type=jnp.float32) + b
        if relu:
            z = jnp.maximum(z, 0.0)
    o_ref[...] = jnp.dot(pool_ref[...], z, preferred_element_type=jnp.float32)


# ----------------------------------------------------------------------------
# pallas_call wrappers
# ----------------------------------------------------------------------------
def _full_spec(shape):
    n = len(shape)
    return pl.BlockSpec(shape, lambda i, _n=n: (0,) * _n)


def _call(kernel, inputs, out_shape):
    """Single-step grid, whole operands resident in VMEM (all operands are tiny)."""
    return pl.pallas_call(
        kernel,
        grid=(1,),
        in_specs=[_full_spec(a.shape) for a in inputs],
        out_specs=_full_spec(out_shape),
        out_shape=jax.ShapeDtypeStruct(out_shape, jnp.float32),
        compiler_params=pltpu.CompilerParams(dimension_semantics=("arbitrary",)),
    )(*inputs)


def _im2col(x):
    """(N,H,W,Cin) -> (N,H,W,9*Cin): 3x3 taps (padding=1) concatenated on channels."""
    N, H, W, _ = x.shape
    xp = jnp.pad(x, ((0, 0), (1, 1), (1, 1), (0, 0)))
    taps = [xp[:, kh:kh + H, kw:kw + W, :] for kh in range(3) for kw in range(3)]
    return jnp.concatenate(taps, axis=-1)


def conv3x3_block(x, w, b, *, relu=True, pool=False):
    """3x3 conv (pad=1) + bias + ReLU (+ fused 2x2 maxpool) in one pallas_call."""
    N, H, W, Cin = x.shape
    Cout = w.shape[-1]
    K9 = 9 * Cin
    p = _im2col(x)                                          # (N, H, W, 9*Cin)
    if pool:
        Ho, Wo = H // 2, W // 2
        Mo = N * Ho * Wo
        # Order rows as (corner, n, ho, wo); corner = (dh, dw) of the 2x2 window.
        p = (p.reshape(N, Ho, 2, Wo, 2, K9)
               .transpose(2, 4, 0, 1, 3, 5)
               .reshape(4, Mo, K9))
    else:
        Ho, Wo = H, W
        Mo = N * H * W
        p = p.reshape(1, Mo, K9)
    kern = functools.partial(_conv_block_kernel, relu=relu)
    y = _call(kern, [p, w, b], (Mo, Cout))
    return y.reshape(N, Ho, Wo, Cout)


def classifier_head(xv, w1, b1, w2, b2, w3, b3):
    return _call(_mlp3_kernel, [xv, w1, b1, w2, b2, w3, b3],
                 (xv.shape[0], w3.shape[1]))


def adversary_head(feat, adv_params, relus, num_out):
    N, H, W, C = feat.shape
    z = feat.reshape(N * H * W, C)
    # Block-diagonal averaging matrix: (N, N*H*W) with 1/(H*W) on each batch block.
    pool = jnp.repeat(jnp.eye(N, dtype=jnp.float32), H * W, axis=1) / float(H * W)
    inputs = [z, pool]
    for (w, b) in adv_params:
        inputs += [w, b]
    kern = functools.partial(_adversary_kernel, relus=tuple(relus))
    return _call(kern, inputs, (N, num_out))


def adaptive_avg_pool(x, out_hw):
    # General PyTorch AdaptiveAvgPool2d bin semantics (fallback path only; with
    # this CFG/IMG the pooled input is 1x1 and the pool is folded into W1).
    N, H, W, C = x.shape
    OH, OW = out_hw
    rows = []
    for i in range(OH):
        h0, h1 = (i * H) // OH, -(-((i + 1) * H) // OH)
        cols = []
        for j in range(OW):
            w0, w1 = (j * W) // OW, -(-((j + 1) * W) // OW)
            cols.append(jnp.mean(x[:, h0:h1, w0:w1, :], axis=(1, 2)))
        rows.append(jnp.stack(cols, axis=1))
    return jnp.stack(rows, axis=1)                                  # (N, OH, OW, C)


# ----------------------------------------------------------------------------
# Parameter init (mirrors VGG_Adversarial._initialize_weights)
# ----------------------------------------------------------------------------
def init_params(key):
    _, _, classifier, adv, _ = ARCH
    params = {'featurizer': [], 'task': [], 'adversary': []}

    def next_key():
        nonlocal key
        key, sub = jax.random.split(key)
        return sub

    def conv3_init(cin, cout):
        std = math.sqrt(2.0 / (cout * 9))                 # kaiming_normal_, fan_out, relu
        w = jax.random.normal(next_key(), (9 * cin, cout), jnp.float32) * std
        return w, jnp.zeros((1, cout), jnp.float32)

    def conv1_init(cin, cout):
        std = math.sqrt(2.0 / cout)                       # kaiming_normal_, fan_out, 1x1
        w = jax.random.normal(next_key(), (cin, cout), jnp.float32) * std
        return w, jnp.zeros((1, cout), jnp.float32)

    def linear_init(fin, fout):
        w = jax.random.normal(next_key(), (fin, fout), jnp.float32) * 0.01
        return w, jnp.zeros((1, fout), jnp.float32)

    for (cin, cout, _) in FEAT_BLOCKS:
        params['featurizer'].append(conv3_init(cin, cout))
    for (cin, cout, _) in TASK_BLOCKS:
        params['task'].append(conv3_init(cin, cout))
    for (fin, fout, _) in classifier:
        params['task'].append(linear_init(fin, fout))
    for (cin, cout, _) in adv:
        params['adversary'].append(conv1_init(cin, cout))
    return params


# ----------------------------------------------------------------------------
# Forward pass:  x -> featurizer -> (task_branch, adversary_branch)
# ----------------------------------------------------------------------------
@jax.jit
def vgg_adversarial_forward(params, x_nchw):
    _, _, classifier, adv, _ = ARCH
    x = jnp.transpose(x_nchw, (0, 2, 3, 1)).astype(jnp.float32)     # NCHW -> NHWC

    # --- featurizer (fused conv+ReLU+maxpool blocks) ---
    for (_, _, pool), (w, b) in zip(FEAT_BLOCKS, params['featurizer']):
        x = conv3x3_block(x, w, b, relu=True, pool=pool)
    feat = x

    # --- task branch: remaining conv blocks ---
    y = feat
    for (_, _, pool), (w, b) in zip(TASK_BLOCKS, params['task'][:len(TASK_BLOCKS)]):
        y = conv3x3_block(y, w, b, relu=True, pool=pool)

    # --- AdaptiveAvgPool2d((7,7)) + Flatten(1) + classifier (one fused kernel) ---
    (w1, b1), (w2, b2), (w3, b3) = params['task'][len(TASK_BLOCKS):]
    N, H, W, C = y.shape
    if (H, W) == (1, 1):
        # Pooling a 1x1 map to 7x7 is a broadcast; fold the 49 identical flatten
        # positions per channel into the first classifier weight (exact, trace-time).
        xv = y.reshape(N, C)
        w1_eff = w1.reshape(C, POOL_HW * POOL_HW, w1.shape[1]).sum(axis=1)
    else:
        # General fallback (not hit with this CFG/IMG); NCHW-order flatten.
        yp = adaptive_avg_pool(y, (POOL_HW, POOL_HW))
        xv = jnp.transpose(yp, (0, 3, 1, 2)).reshape(N, -1)
        w1_eff = w1
    # TODO(synk): nn.Dropout in the classifier treated as eval-mode identity (no RNG mask).
    y1 = classifier_head(xv, w1_eff, b1, w2, b2, w3, b3)

    # --- adversary branch: one fused kernel (1x1 convs + global avg pool + flatten) ---
    relus = [r for (_, _, r) in adv]
    y2 = adversary_head(feat, params['adversary'], relus, NUM_CLASSES)

    return y1, y2


if __name__ == "__main__":
    key = jax.random.PRNGKey(0)
    pkey, xkey = jax.random.split(key)
    params = init_params(pkey)
    x = jax.random.normal(xkey, (2, IN_CH, IMG, IMG), dtype=jnp.float32)
    y1, y2 = vgg_adversarial_forward(params, x)
    jax.block_until_ready((y1, y2))
    assert y1.shape == (2, NUM_CLASSES) and y2.shape == (2, NUM_CLASSES)
    assert bool(jnp.all(jnp.isfinite(y1))) and bool(jnp.all(jnp.isfinite(y2)))
    print("KERNEL_OK")
</pallas_src>

<mosaic_0001>
module attributes {stable_mosaic.version = 11 : i64} {
  func.func @_conv_block_kernel(%arg0: i32, %arg1: memref<4x512x27xf32, #tpu.memory_space<vmem>>, %arg2: memref<27x8xf32, #tpu.memory_space<vmem>>, %arg3: memref<1x8xf32, #tpu.memory_space<vmem>>, %arg4: memref<512x8xf32, #tpu.memory_space<vmem>>) attributes {dimension_semantics = [#tpu.dimension_semantics<arbitrary>], iteration_bounds = array<i64: 1>, scalar_prefetch = 0 : i64, scratch_operands = 0 : i64, tpu.core_type = #tpu.core_type<tc>, window_params = [{pipeline_mode = #tpu.pipeline_mode<synchronous>, transform_indices = @transform_0, window_bounds = array<i64: 4, 512, 27>}, {pipeline_mode = #tpu.pipeline_mode<synchronous>, transform_indices = @transform_1, window_bounds = array<i64: 27, 8>}, {pipeline_mode = #tpu.pipeline_mode<synchronous>, transform_indices = @transform_2, window_bounds = array<i64: 1, 8>}, {pipeline_mode = #tpu.pipeline_mode<synchronous>, transform_indices = @transform_3, window_bounds = array<i64: 512, 8>}]} {
    %c0 = arith.constant 0 : index
    %c0_0 = arith.constant 0 : index
    %0 = vector.load %arg2[%c0, %c0_0] : memref<27x8xf32, #tpu.memory_space<vmem>>, vector<27x8xf32>
    %c0_1 = arith.constant 0 : index
    %c0_2 = arith.constant 0 : index
    %c0_3 = arith.constant 0 : index
    %1 = vector.load %arg1[%c0_1, %c0_2, %c0_3] : memref<4x512x27xf32, #tpu.memory_space<vmem>>, vector<1x512x27xf32>
    %2 = vector.shape_cast %1 : vector<1x512x27xf32> to vector<512x27xf32>
    %cst = arith.constant dense<0.000000e+00> : vector<512x8xf32>
    %3 = tpu.matmul %2, %0, %cst {dimension_numbers = #tpu.dot_dimension_numbers<[1], [0], [0], [1], [0, 0, 1, 1], [], []>} : vector<512x27xf32>, vector<27x8xf32>, vector<512x8xf32> -> vector<512x8xf32>
    %c1 = arith.constant 1 : index
    %c0_4 = arith.constant 0 : index
    %c0_5 = arith.constant 0 : index
    %4 = vector.load %arg1[%c1, %c0_4, %c0_5] : memref<4x512x27xf32, #tpu.memory_space<vmem>>, vector<1x512x27xf32>
    %5 = vector.shape_cast %4 : vector<1x512x27xf32> to vector<512x27xf32>
    %cst_6 = arith.constant dense<0.000000e+00> : vector<512x8xf32>
    %6 = tpu.matmul %5, %0, %cst_6 {dimension_numbers = #tpu.dot_dimension_numbers<[1], [0], [0], [1], [0, 0, 1, 1], [], []>} : vector<512x27xf32>, vector<27x8xf32>, vector<512x8xf32> -> vector<512x8xf32>
    %7 = arith.maximumf %3, %6 : vector<512x8xf32>
    %c2 = arith.constant 2 : index
    %c0_7 = arith.constant 0 : index
    %c0_8 = arith.constant 0 : index
    %8 = vector.load %arg1[%c2, %c0_7, %c0_8] : memref<4x512x27xf32, #tpu.memory_space<vmem>>, vector<1x512x27xf32>
    %9 = vector.shape_cast %8 : vector<1x512x27xf32> to vector<512x27xf32>
    %cst_9 = arith.constant dense<0.000000e+00> : vector<512x8xf32>
    %10 = tpu.matmul %9, %0, %cst_9 {dimension_numbers = #tpu.dot_dimension_numbers<[1], [0], [0], [1], [0, 0, 1, 1], [], []>} : vector<512x27xf32>, vector<27x8xf32>, vector<512x8xf32> -> vector<512x8xf32>
    %11 = arith.maximumf %7, %10 : vector<512x8xf32>
    %c3 = arith.constant 3 : index
    %c0_10 = arith.constant 0 : index
    %c0_11 = arith.constant 0 : index
    %12 = vector.load %arg1[%c3, %c0_10, %c0_11] : memref<4x512x27xf32, #tpu.memory_space<vmem>>, vector<1x512x27xf32>
    %13 = vector.shape_cast %12 : vector<1x512x27xf32> to vector<512x27xf32>
    %cst_12 = arith.constant dense<0.000000e+00> : vector<512x8xf32>
    %14 = tpu.matmul %13, %0, %cst_12 {dimension_numbers = #tpu.dot_dimension_numbers<[1], [0], [0], [1], [0, 0, 1, 1], [], []>} : vector<512x27xf32>, vector<27x8xf32>, vector<512x8xf32> -> vector<512x8xf32>
    %15 = arith.maximumf %11, %14 : vector<512x8xf32>
    %c0_13 = arith.constant 0 : index
    %c0_14 = arith.constant 0 : index
    %16 = vector.load %arg3[%c0_13, %c0_14] : memref<1x8xf32, #tpu.memory_space<vmem>>, vector<1x8xf32>
    %17 = vector.broadcast %16 : vector<1x8xf32> to vector<512x8xf32>
    %18 = arith.addf %15, %17 : vector<512x8xf32>
    %cst_15 = arith.constant 0.000000e+00 : f32
    %19 = vector.broadcast %cst_15 : f32 to vector<512x8xf32>
    %20 = arith.maximumf %18, %19 : vector<512x8xf32>
    %c0_16 = arith.constant 0 : index
    %c0_17 = arith.constant 0 : index
    %21 = vector.load %arg4[%c0_16, %c0_17] : memref<512x8xf32, #tpu.memory_space<vmem>>, vector<512x8xf32>
    tpu.vector_store %arg4[%c0_16, %c0_17], %20 {strides = array<i32>} : memref<512x8xf32, #tpu.memory_space<vmem>>, vector<512x8xf32>,
    return
  }
  func.func @transform_0(%arg0: i32) -> (i32, i32, i32) {
    %c0_i32 = arith.constant 0 : i32
    %c0_i32_0 = arith.constant 0 : i32
    %c0_i32_1 = arith.constant 0 : i32
    %c0_i32_2 = arith.constant 0 : i32
    return %c0_i32, %c0_i32_0, %c0_i32_1 : i32, i32, i32
  }
  func.func @transform_1(%arg0: i32) -> (i32, i32) {
    %c0_i32 = arith.constant 0 : i32
    %c0_i32_0 = arith.constant 0 : i32
    %c0_i32_1 = arith.constant 0 : i32
    return %c0_i32, %c0_i32_0 : i32, i32
  }
  func.func @transform_2(%arg0: i32) -> (i32, i32) {
    %c0_i32 = arith.constant 0 : i32
    %c0_i32_0 = arith.constant 0 : i32
    %c0_i32_1 = arith.constant 0 : i32
    return %c0_i32, %c0_i32_0 : i32, i32
  }
  func.func @transform_3(%arg0: i32) -> (i32, i32) {
    %c0_i32 = arith.constant 0 : i32
    %c0_i32_0 = arith.constant 0 : i32
    %c0_i32_1 = arith.constant 0 : i32
    return %c0_i32, %c0_i32_0 : i32, i32
  }
}

module attributes {stable_mosaic.version = 11 : i64} {
  func.func @_conv_block_kernel(%arg0: i32, %arg1: memref<4x128x72xf32, #tpu.memory_space<vmem>>, %arg2: memref<72x16xf32, #tpu.memory_space<vmem>>, %arg3: memref<1x16xf32, #tpu.memory_space<vmem>>, %arg4: memref<128x16xf32, #tpu.memory_space<vmem>>) attributes {dimension_semantics = [#tpu.dimension_semantics<arbitrary>], iteration_bounds = array<i64: 1>, scalar_prefetch = 0 : i64, scratch_operands = 0 : i64, tpu.core_type = #tpu.core_type<tc>, window_params = [{pipeline_mode = #tpu.pipeline_mode<synchronous>, transform_indices = @transform_0, window_bounds = array<i64: 4, 128, 72>}, {pipeline_mode = #tpu.pipeline_mode<synchronous>, transform_indices = @transform_1, window_bounds = array<i64: 72, 16>}, {pipeline_mode = #tpu.pipeline_mode<synchronous>, transform_indices = @transform_2, window_bounds = array<i64: 1, 16>}, {pipeline_mode = #tpu.pipeline_mode<synchronous>, transform_indices = @transform_3, window_bounds = array<i64: 128, 16>}]} {
    %c0 = arith.constant 0 : index
    %c0_0 = arith.constant 0 : index
    %0 = vector.load %arg2[%c0, %c0_0] : memref<72x16xf32, #tpu.memory_space<vmem>>, vector<72x16xf32>
    %c0_1 = arith.constant 0 : index
    %c0_2 = arith.constant 0 : index
    %c0_3 = arith.constant 0 : index
    %1 = vector.load %arg1[%c0_1, %c0_2, %c0_3] : memref<4x128x72xf32, #tpu.memory_space<vmem>>, vector<1x128x72xf32>
    %2 = vector.shape_cast %1 : vector<1x128x72xf32> to vector<128x72xf32>
    %cst = arith.constant dense<0.000000e+00> : vector<128x16xf32>
    %3 = tpu.matmul %2, %0, %cst {dimension_numbers = #tpu.dot_dimension_numbers<[1], [0], [0], [1], [0, 0, 1, 1], [], []>} : vector<128x72xf32>, vector<72x16xf32>, vector<128x16xf32> -> vector<128x16xf32>
    %c1 = arith.constant 1 : index
    %c0_4 = arith.constant 0 : index
    %c0_5 = arith.constant 0 : index
    %4 = vector.load %arg1[%c1, %c0_4, %c0_5] : memref<4x128x72xf32, #tpu.memory_space<vmem>>, vector<1x128x72xf32>
    %5 = vector.shape_cast %4 : vector<1x128x72xf32> to vector<128x72xf32>
    %cst_6 = arith.constant dense<0.000000e+00> : vector<128x16xf32>
    %6 = tpu.matmul %5, %0, %cst_6 {dimension_numbers = #tpu.dot_dimension_numbers<[1], [0], [0], [1], [0, 0, 1, 1], [], []>} : vector<128x72xf32>, vector<72x16xf32>, vector<128x16xf32> -> vector<128x16xf32>
    %7 = arith.maximumf %3, %6 : vector<128x16xf32>
    %c2 = arith.constant 2 : index
    %c0_7 = arith.constant 0 : index
    %c0_8 = arith.constant 0 : index
    %8 = vector.load %arg1[%c2, %c0_7, %c0_8] : memref<4x128x72xf32, #tpu.memory_space<vmem>>, vector<1x128x72xf32>
    %9 = vector.shape_cast %8 : vector<1x128x72xf32> to vector<128x72xf32>
    %cst_9 = arith.constant dense<0.000000e+00> : vector<128x16xf32>
    %10 = tpu.matmul %9, %0, %cst_9 {dimension_numbers = #tpu.dot_dimension_numbers<[1], [0], [0], [1], [0, 0, 1, 1], [], []>} : vector<128x72xf32>, vector<72x16xf32>, vector<128x16xf32> -> vector<128x16xf32>
    %11 = arith.maximumf %7, %10 : vector<128x16xf32>
    %c3 = arith.constant 3 : index
    %c0_10 = arith.constant 0 : index
    %c0_11 = arith.constant 0 : index
    %12 = vector.load %arg1[%c3, %c0_10, %c0_11] : memref<4x128x72xf32, #tpu.memory_space<vmem>>, vector<1x128x72xf32>
    %13 = vector.shape_cast %12 : vector<1x128x72xf32> to vector<128x72xf32>
    %cst_12 = arith.constant dense<0.000000e+00> : vector<128x16xf32>
    %14 = tpu.matmul %13, %0, %cst_12 {dimension_numbers = #tpu.dot_dimension_numbers<[1], [0], [0], [1], [0, 0, 1, 1], [], []>} : vector<128x72xf32>, vector<72x16xf32>, vector<128x16xf32> -> vector<128x16xf32>
    %15 = arith.maximumf %11, %14 : vector<128x16xf32>
    %c0_13 = arith.constant 0 : index
    %c0_14 = arith.constant 0 : index
    %16 = vector.load %arg3[%c0_13, %c0_14] : memref<1x16xf32, #tpu.memory_space<vmem>>, vector<1x16xf32>
    %17 = vector.broadcast %16 : vector<1x16xf32> to vector<128x16xf32>
    %18 = arith.addf %15, %17 : vector<128x16xf32>
    %cst_15 = arith.constant 0.000000e+00 : f32
    %19 = vector.broadcast %cst_15 : f32 to vector<128x16xf32>
    %20 = arith.maximumf %18, %19 : vector<128x16xf32>
    %c0_16 = arith.constant 0 : index
    %c0_17 = arith.constant 0 : index
    %21 = vector.load %arg4[%c0_16, %c0_17] : memref<128x16xf32, #tpu.memory_space<vmem>>, vector<128x16xf32>
    tpu.vector_store %arg4[%c0_16, %c0_17], %20 {strides = array<i32>} : memref<128x16xf32, #tpu.memory_space<vmem>>, vector<128x16xf32>,
    return
  }
  func.func @transform_0(%arg0: i32) -> (i32, i32, i32) {
    %c0_i32 = arith.constant 0 : i32
    %c0_i32_0 = arith.constant 0 : i32
    %c0_i32_1 = arith.constant 0 : i32
    %c0_i32_2 = arith.constant 0 : i32
    return %c0_i32, %c0_i32_0, %c0_i32_1 : i32, i32, i32
  }
  func.func @transform_1(%arg0: i32) -> (i32, i32) {
    %c0_i32 = arith.constant 0 : i32
    %c0_i32_0 = arith.constant 0 : i32
    %c0_i32_1 = arith.constant 0 : i32
    return %c0_i32, %c0_i32_0 : i32, i32
  }
  func.func @transform_2(%arg0: i32) -> (i32, i32) {
    %c0_i32 = arith.constant 0 : i32
    %c0_i32_0 = arith.constant 0 : i32
    %c0_i32_1 = arith.constant 0 : i32
    return %c0_i32, %c0_i32_0 : i32, i32
  }
  func.func @transform_3(%arg0: i32) -> (i32, i32) {
    %c0_i32 = arith.constant 0 : i32
    %c0_i32_0 = arith.constant 0 : i32
    %c0_i32_1 = arith.constant 0 : i32
    return %c0_i32, %c0_i32_0 : i32, i32
  }
}

module attributes {stable_mosaic.version = 11 : i64} {
  func.func @_conv_block_kernel(%arg0: i32, %arg1: memref<1x128x144xf32, #tpu.memory_space<vmem>>, %arg2: memref<144x32xf32, #tpu.memory_space<vmem>>, %arg3: memref<1x32xf32, #tpu.memory_space<vmem>>, %arg4: memref<128x32xf32, #tpu.memory_space<vmem>>) attributes {dimension_semantics = [#tpu.dimension_semantics<arbitrary>], iteration_bounds = array<i64: 1>, scalar_prefetch = 0 : i64, scratch_operands = 0 : i64, tpu.core_type = #tpu.core_type<tc>, window_params = [{pipeline_mode = #tpu.pipeline_mode<synchronous>, transform_indices = @transform_0, window_bounds = array<i64: 1, 128, 144>}, {pipeline_mode = #tpu.pipeline_mode<synchronous>, transform_indices = @transform_1, window_bounds = array<i64: 144, 32>}, {pipeline_mode = #tpu.pipeline_mode<synchronous>, transform_indices = @transform_2, window_bounds = array<i64: 1, 32>}, {pipeline_mode = #tpu.pipeline_mode<synchronous>, transform_indices = @transform_3, window_bounds = array<i64: 128, 32>}]} {
    %c0 = arith.constant 0 : index
    %c0_0 = arith.constant 0 : index
    %0 = vector.load %arg2[%c0, %c0_0] : memref<144x32xf32, #tpu.memory_space<vmem>>, vector<144x32xf32>
    %c0_1 = arith.constant 0 : index
    %c0_2 = arith.constant 0 : index
    %c0_3 = arith.constant 0 : index
    %1 = vector.load %arg1[%c0_1, %c0_2, %c0_3] : memref<1x128x144xf32, #tpu.memory_space<vmem>>, vector<1x128x144xf32>
    %2 = vector.shape_cast %1 : vector<1x128x144xf32> to vector<128x144xf32>
    %cst = arith.constant dense<0.000000e+00> : vector<128x32xf32>
    %3 = tpu.matmul %2, %0, %cst {dimension_numbers = #tpu.dot_dimension_numbers<[1], [0], [0], [1], [0, 0, 1, 1], [], []>} : vector<128x144xf32>, vector<144x32xf32>, vector<128x32xf32> -> vector<128x32xf32>
    %c0_4 = arith.constant 0 : index
    %c0_5 = arith.constant 0 : index
    %4 = vector.load %arg3[%c0_4, %c0_5] : memref<1x32xf32, #tpu.memory_space<vmem>>, vector<1x32xf32>
    %5 = vector.broadcast %4 : vector<1x32xf32> to vector<128x32xf32>
    %6 = arith.addf %3, %5 : vector<128x32xf32>
    %cst_6 = arith.constant 0.000000e+00 : f32
    %7 = vector.broadcast %cst_6 : f32 to vector<128x32xf32>
    %8 = arith.maximumf %6, %7 : vector<128x32xf32>
    %c0_7 = arith.constant 0 : index
    %c0_8 = arith.constant 0 : index
    %9 = vector.load %arg4[%c0_7, %c0_8] : memref<128x32xf32, #tpu.memory_space<vmem>>, vector<128x32xf32>
    tpu.vector_store %arg4[%c0_7, %c0_8], %8 {strides = array<i32>} : memref<128x32xf32, #tpu.memory_space<vmem>>, vector<128x32xf32>,
    return
  }
  func.func @transform_0(%arg0: i32) -> (i32, i32, i32) {
    %c0_i32 = arith.constant 0 : i32
    %c0_i32_0 = arith.constant 0 : i32
    %c0_i32_1 = arith.constant 0 : i32
    %c0_i32_2 = arith.constant 0 : i32
    return %c0_i32, %c0_i32_0, %c0_i32_1 : i32, i32, i32
  }
  func.func @transform_1(%arg0: i32) -> (i32, i32) {
    %c0_i32 = arith.constant 0 : i32
    %c0_i32_0 = arith.constant 0 : i32
    %c0_i32_1 = arith.constant 0 : i32
    return %c0_i32, %c0_i32_0 : i32, i32
  }
  func.func @transform_2(%arg0: i32) -> (i32, i32) {
    %c0_i32 = arith.constant 0 : i32
    %c0_i32_0 = arith.constant 0 : i32
    %c0_i32_1 = arith.constant 0 : i32
    return %c0_i32, %c0_i32_0 : i32, i32
  }
  func.func @transform_3(%arg0: i32) -> (i32, i32) {
    %c0_i32 = arith.constant 0 : i32
    %c0_i32_0 = arith.constant 0 : i32
    %c0_i32_1 = arith.constant 0 : i32
    return %c0_i32, %c0_i32_0 : i32, i32
  }
}

module attributes {stable_mosaic.version = 11 : i64} {
  func.func @_conv_block_kernel(%arg0: i32, %arg1: memref<4x32x288xf32, #tpu.memory_space<vmem>>, %arg2: memref<288x32xf32, #tpu.memory_space<vmem>>, %arg3: memref<1x32xf32, #tpu.memory_space<vmem>>, %arg4: memref<32x32xf32, #tpu.memory_space<vmem>>) attributes {dimension_semantics = [#tpu.dimension_semantics<arbitrary>], iteration_bounds = array<i64: 1>, scalar_prefetch = 0 : i64, scratch_operands = 0 : i64, tpu.core_type = #tpu.core_type<tc>, window_params = [{pipeline_mode = #tpu.pipeline_mode<synchronous>, transform_indices = @transform_0, window_bounds = array<i64: 4, 32, 288>}, {pipeline_mode = #tpu.pipeline_mode<synchronous>, transform_indices = @transform_1, window_bounds = array<i64: 288, 32>}, {pipeline_mode = #tpu.pipeline_mode<synchronous>, transform_indices = @transform_2, window_bounds = array<i64: 1, 32>}, {pipeline_mode = #tpu.pipeline_mode<synchronous>, transform_indices = @transform_3, window_bounds = array<i64: 32, 32>}]} {
    %c0 = arith.constant 0 : index
    %c0_0 = arith.constant 0 : index
    %0 = vector.load %arg2[%c0, %c0_0] : memref<288x32xf32, #tpu.memory_space<vmem>>, vector<288x32xf32>
    %c0_1 = arith.constant 0 : index
    %c0_2 = arith.constant 0 : index
    %c0_3 = arith.constant 0 : index
    %1 = vector.load %arg1[%c0_1, %c0_2, %c0_3] : memref<4x32x288xf32, #tpu.memory_space<vmem>>, vector<1x32x288xf32>
    %2 = vector.shape_cast %1 : vector<1x32x288xf32> to vector<32x288xf32>
    %cst = arith.constant dense<0.000000e+00> : vector<32x32xf32>
    %3 = tpu.matmul %2, %0, %cst {dimension_numbers = #tpu.dot_dimension_numbers<[1], [0], [0], [1], [0, 0, 1, 1], [], []>} : vector<32x288xf32>, vector<288x32xf32>, vector<32x32xf32> -> vector<32x32xf32>
    %c1 = arith.constant 1 : index
    %c0_4 = arith.constant 0 : index
    %c0_5 = arith.constant 0 : index
    %4 = vector.load %arg1[%c1, %c0_4, %c0_5] : memref<4x32x288xf32, #tpu.memory_space<vmem>>, vector<1x32x288xf32>
    %5 = vector.shape_cast %4 : vector<1x32x288xf32> to vector<32x288xf32>
    %cst_6 = arith.constant dense<0.000000e+00> : vector<32x32xf32>
    %6 = tpu.matmul %5, %0, %cst_6 {dimension_numbers = #tpu.dot_dimension_numbers<[1], [0], [0], [1], [0, 0, 1, 1], [], []>} : vector<32x288xf32>, vector<288x32xf32>, vector<32x32xf32> -> vector<32x32xf32>
    %7 = arith.maximumf %3, %6 : vector<32x32xf32>
    %c2 = arith.constant 2 : index
    %c0_7 = arith.constant 0 : index
    %c0_8 = arith.constant 0 : index
    %8 = vector.load %arg1[%c2, %c0_7, %c0_8] : memref<4x32x288xf32, #tpu.memory_space<vmem>>, vector<1x32x288xf32>
    %9 = vector.shape_cast %8 : vector<1x32x288xf32> to vector<32x288xf32>
    %cst_9 = arith.constant dense<0.000000e+00> : vector<32x32xf32>
    %10 = tpu.matmul %9, %0, %cst_9 {dimension_numbers = #tpu.dot_dimension_numbers<[1], [0], [0], [1], [0, 0, 1, 1], [], []>} : vector<32x288xf32>, vector<288x32xf32>, vector<32x32xf32> -> vector<32x32xf32>
    %11 = arith.maximumf %7, %10 : vector<32x32xf32>
    %c3 = arith.constant 3 : index
    %c0_10 = arith.constant 0 : index
    %c0_11 = arith.constant 0 : index
    %12 = vector.load %arg1[%c3, %c0_10, %c0_11] : memref<4x32x288xf32, #tpu.memory_space<vmem>>, vector<1x32x288xf32>
    %13 = vector.shape_cast %12 : vector<1x32x288xf32> to vector<32x288xf32>
    %cst_12 = arith.constant dense<0.000000e+00> : vector<32x32xf32>
    %14 = tpu.matmul %13, %0, %cst_12 {dimension_numbers = #tpu.dot_dimension_numbers<[1], [0], [0], [1], [0, 0, 1, 1], [], []>} : vector<32x288xf32>, vector<288x32xf32>, vector<32x32xf32> -> vector<32x32xf32>
    %15 = arith.maximumf %11, %14 : vector<32x32xf32>
    %c0_13 = arith.constant 0 : index
    %c0_14 = arith.constant 0 : index
    %16 = vector.load %arg3[%c0_13, %c0_14] : memref<1x32xf32, #tpu.memory_space<vmem>>, vector<1x32xf32>
    %17 = vector.broadcast %16 : vector<1x32xf32> to vector<32x32xf32>
    %18 = arith.addf %15, %17 : vector<32x32xf32>
    %cst_15 = arith.constant 0.000000e+00 : f32
    %19 = vector.broadcast %cst_15 : f32 to vector<32x32xf32>
    %20 = arith.maximumf %18, %19 : vector<32x32xf32>
    %c0_16 = arith.constant 0 : index
    %c0_17 = arith.constant 0 : index
    %21 = vector.load %arg4[%c0_16, %c0_17] : memref<32x32xf32, #tpu.memory_space<vmem>>, vector<32x32xf32>
    tpu.vector_store %arg4[%c0_16, %c0_17], %20 {strides = array<i32>} : memref<32x32xf32, #tpu.memory_space<vmem>>, vector<32x32xf32>,
    return
  }
  func.func @transform_0(%arg0: i32) -> (i32, i32, i32) {
    %c0_i32 = arith.constant 0 : i32
    %c0_i32_0 = arith.constant 0 : i32
    %c0_i32_1 = arith.constant 0 : i32
    %c0_i32_2 = arith.constant 0 : i32
    return %c0_i32, %c0_i32_0, %c0_i32_1 : i32, i32, i32
  }
  func.func @transform_1(%arg0: i32) -> (i32, i32) {
    %c0_i32 = arith.constant 0 : i32
    %c0_i32_0 = arith.constant 0 : i32
    %c0_i32_1 = arith.constant 0 : i32
    return %c0_i32, %c0_i32_0 : i32, i32
  }
  func.func @transform_2(%arg0: i32) -> (i32, i32) {
    %c0_i32 = arith.constant 0 : i32
    %c0_i32_0 = arith.constant 0 : i32
    %c0_i32_1 = arith.constant 0 : i32
    return %c0_i32, %c0_i32_0 : i32, i32
  }
  func.func @transform_3(%arg0: i32) -> (i32, i32) {
    %c0_i32 = arith.constant 0 : i32
    %c0_i32_0 = arith.constant 0 : i32
    %c0_i32_1 = arith.constant 0 : i32
    return %c0_i32, %c0_i32_0 : i32, i32
  }
}

module attributes {stable_mosaic.version = 11 : i64} {
  func.func @_conv_block_kernel(%arg0: i32, %arg1: memref<1x32x288xf32, #tpu.memory_space<vmem>>, %arg2: memref<288x64xf32, #tpu.memory_space<vmem>>, %arg3: memref<1x64xf32, #tpu.memory_space<vmem>>, %arg4: memref<32x64xf32, #tpu.memory_space<vmem>>) attributes {dimension_semantics = [#tpu.dimension_semantics<arbitrary>], iteration_bounds = array<i64: 1>, scalar_prefetch = 0 : i64, scratch_operands = 0 : i64, tpu.core_type = #tpu.core_type<tc>, window_params = [{pipeline_mode = #tpu.pipeline_mode<synchronous>, transform_indices = @transform_0, window_bounds = array<i64: 1, 32, 288>}, {pipeline_mode = #tpu.pipeline_mode<synchronous>, transform_indices = @transform_1, window_bounds = array<i64: 288, 64>}, {pipeline_mode = #tpu.pipeline_mode<synchronous>, transform_indices = @transform_2, window_bounds = array<i64: 1, 64>}, {pipeline_mode = #tpu.pipeline_mode<synchronous>, transform_indices = @transform_3, window_bounds = array<i64: 32, 64>}]} {
    %c0 = arith.constant 0 : index
    %c0_0 = arith.constant 0 : index
    %0 = vector.load %arg2[%c0, %c0_0] : memref<288x64xf32, #tpu.memory_space<vmem>>, vector<288x64xf32>
    %c0_1 = arith.constant 0 : index
    %c0_2 = arith.constant 0 : index
    %c0_3 = arith.constant 0 : index
    %1 = vector.load %arg1[%c0_1, %c0_2, %c0_3] : memref<1x32x288xf32, #tpu.memory_space<vmem>>, vector<1x32x288xf32>
    %2 = vector.shape_cast %1 : vector<1x32x288xf32> to vector<32x288xf32>
    %cst = arith.constant dense<0.000000e+00> : vector<32x64xf32>
    %3 = tpu.matmul %2, %0, %cst {dimension_numbers = #tpu.dot_dimension_numbers<[1], [0], [0], [1], [0, 0, 1, 1], [], []>} : vector<32x288xf32>, vector<288x64xf32>, vector<32x64xf32> -> vector<32x64xf32>
    %c0_4 = arith.constant 0 : index
    %c0_5 = arith.constant 0 : index
    %4 = vector.load %arg3[%c0_4, %c0_5] : memref<1x64xf32, #tpu.memory_space<vmem>>, vector<1x64xf32>
    %5 = vector.broadcast %4 : vector<1x64xf32> to vector<32x64xf32>
    %6 = arith.addf %3, %5 : vector<32x64xf32>
    %cst_6 = arith.constant 0.000000e+00 : f32
    %7 = vector.broadcast %cst_6 : f32 to vector<32x64xf32>
    %8 = arith.maximumf %6, %7 : vector<32x64xf32>
    %c0_7 = arith.constant 0 : index
    %c0_8 = arith.constant 0 : index
    %9 = vector.load %arg4[%c0_7, %c0_8] : memref<32x64xf32, #tpu.memory_space<vmem>>, vector<32x64xf32>
    tpu.vector_store %arg4[%c0_7, %c0_8], %8 {strides = array<i32>} : memref<32x64xf32, #tpu.memory_space<vmem>>, vector<32x64xf32>,
    return
  }
  func.func @transform_0(%arg0: i32) -> (i32, i32, i32) {
    %c0_i32 = arith.constant 0 : i32
    %c0_i32_0 = arith.constant 0 : i32
    %c0_i32_1 = arith.constant 0 : i32
    %c0_i32_2 = arith.constant 0 : i32
    return %c0_i32, %c0_i32_0, %c0_i32_1 : i32, i32, i32
  }
  func.func @transform_1(%arg0: i32) -> (i32, i32) {
    %c0_i32 = arith.constant 0 : i32
    %c0_i32_0 = arith.constant 0 : i32
    %c0_i32_1 = arith.constant 0 : i32
    return %c0_i32, %c0_i32_0 : i32, i32
  }
  func.func @transform_2(%arg0: i32) -> (i32, i32) {
    %c0_i32 = arith.constant 0 : i32
    %c0_i32_0 = arith.constant 0 : i32
    %c0_i32_1 = arith.constant 0 : i32
    return %c0_i32, %c0_i32_0 : i32, i32
  }
  func.func @transform_3(%arg0: i32) -> (i32, i32) {
    %c0_i32 = arith.constant 0 : i32
    %c0_i32_0 = arith.constant 0 : i32
    %c0_i32_1 = arith.constant 0 : i32
    return %c0_i32, %c0_i32_0 : i32, i32
  }
}

module attributes {stable_mosaic.version = 11 : i64} {
  func.func @_conv_block_kernel(%arg0: i32, %arg1: memref<4x8x576xf32, #tpu.memory_space<vmem>>, %arg2: memref<576x64xf32, #tpu.memory_space<vmem>>, %arg3: memref<1x64xf32, #tpu.memory_space<vmem>>, %arg4: memref<8x64xf32, #tpu.memory_space<vmem>>) attributes {dimension_semantics = [#tpu.dimension_semantics<arbitrary>], iteration_bounds = array<i64: 1>, scalar_prefetch = 0 : i64, scratch_operands = 0 : i64, tpu.core_type = #tpu.core_type<tc>, window_params = [{pipeline_mode = #tpu.pipeline_mode<synchronous>, transform_indices = @transform_0, window_bounds = array<i64: 4, 8, 576>}, {pipeline_mode = #tpu.pipeline_mode<synchronous>, transform_indices = @transform_1, window_bounds = array<i64: 576, 64>}, {pipeline_mode = #tpu.pipeline_mode<synchronous>, transform_indices = @transform_2, window_bounds = array<i64: 1, 64>}, {pipeline_mode = #tpu.pipeline_mode<synchronous>, transform_indices = @transform_3, window_bounds = array<i64: 8, 64>}]} {
    %c0 = arith.constant 0 : index
    %c0_0 = arith.constant 0 : index
    %0 = vector.load %arg2[%c0, %c0_0] : memref<576x64xf32, #tpu.memory_space<vmem>>, vector<576x64xf32>
    %c0_1 = arith.constant 0 : index
    %c0_2 = arith.constant 0 : index
    %c0_3 = arith.constant 0 : index
    %1 = vector.load %arg1[%c0_1, %c0_2, %c0_3] : memref<4x8x576xf32, #tpu.memory_space<vmem>>, vector<1x8x576xf32>
    %2 = vector.shape_cast %1 : vector<1x8x576xf32> to vector<8x576xf32>
    %cst = arith.constant dense<0.000000e+00> : vector<8x64xf32>
    %3 = tpu.matmul %2, %0, %cst {dimension_numbers = #tpu.dot_dimension_numbers<[1], [0], [0], [1], [0, 0, 1, 1], [], []>} : vector<8x576xf32>, vector<576x64xf32>, vector<8x64xf32> -> vector<8x64xf32>
    %c1 = arith.constant 1 : index
    %c0_4 = arith.constant 0 : index
    %c0_5 = arith.constant 0 : index
    %4 = vector.load %arg1[%c1, %c0_4, %c0_5] : memref<4x8x576xf32, #tpu.memory_space<vmem>>, vector<1x8x576xf32>
    %5 = vector.shape_cast %4 : vector<1x8x576xf32> to vector<8x576xf32>
    %cst_6 = arith.constant dense<0.000000e+00> : vector<8x64xf32>
    %6 = tpu.matmul %5, %0, %cst_6 {dimension_numbers = #tpu.dot_dimension_numbers<[1], [0], [0], [1], [0, 0, 1, 1], [], []>} : vector<8x576xf32>, vector<576x64xf32>, vector<8x64xf32> -> vector<8x64xf32>
    %7 = arith.maximumf %3, %6 : vector<8x64xf32>
    %c2 = arith.constant 2 : index
    %c0_7 = arith.constant 0 : index
    %c0_8 = arith.constant 0 : index
    %8 = vector.load %arg1[%c2, %c0_7, %c0_8] : memref<4x8x576xf32, #tpu.memory_space<vmem>>, vector<1x8x576xf32>
    %9 = vector.shape_cast %8 : vector<1x8x576xf32> to vector<8x576xf32>
    %cst_9 = arith.constant dense<0.000000e+00> : vector<8x64xf32>
    %10 = tpu.matmul %9, %0, %cst_9 {dimension_numbers = #tpu.dot_dimension_numbers<[1], [0], [0], [1], [0, 0, 1, 1], [], []>} : vector<8x576xf32>, vector<576x64xf32>, vector<8x64xf32> -> vector<8x64xf32>
    %11 = arith.maximumf %7, %10 : vector<8x64xf32>
    %c3 = arith.constant 3 : index
    %c0_10 = arith.constant 0 : index
    %c0_11 = arith.constant 0 : index
    %12 = vector.load %arg1[%c3, %c0_10, %c0_11] : memref<4x8x576xf32, #tpu.memory_space<vmem>>, vector<1x8x576xf32>
    %13 = vector.shape_cast %12 : vector<1x8x576xf32> to vector<8x576xf32>
    %cst_12 = arith.constant dense<0.000000e+00> : vector<8x64xf32>
    %14 = tpu.matmul %13, %0, %cst_12 {dimension_numbers = #tpu.dot_dimension_numbers<[1], [0], [0], [1], [0, 0, 1, 1], [], []>} : vector<8x576xf32>, vector<576x64xf32>, vector<8x64xf32> -> vector<8x64xf32>
    %15 = arith.maximumf %11, %14 : vector<8x64xf32>
    %c0_13 = arith.constant 0 : index
    %c0_14 = arith.constant 0 : index
    %16 = vector.load %arg3[%c0_13, %c0_14] : memref<1x64xf32, #tpu.memory_space<vmem>>, vector<1x64xf32>
    %17 = vector.broadcast %16 : vector<1x64xf32> to vector<8x64xf32>
    %18 = arith.addf %15, %17 : vector<8x64xf32>
    %cst_15 = arith.constant 0.000000e+00 : f32
    %19 = vector.broadcast %cst_15 : f32 to vector<8x64xf32>
    %20 = arith.maximumf %18, %19 : vector<8x64xf32>
    %c0_16 = arith.constant 0 : index
    %c0_17 = arith.constant 0 : index
    %21 = vector.load %arg4[%c0_16, %c0_17] : memref<8x64xf32, #tpu.memory_space<vmem>>, vector<8x64xf32>
    tpu.vector_store %arg4[%c0_16, %c0_17], %20 {strides = array<i32>} : memref<8x64xf32, #tpu.memory_space<vmem>>, vector<8x64xf32>,
    return
  }
  func.func @transform_0(%arg0: i32) -> (i32, i32, i32) {
    %c0_i32 = arith.constant 0 : i32
    %c0_i32_0 = arith.constant 0 : i32
    %c0_i32_1 = arith.constant 0 : i32
    %c0_i32_2 = arith.constant 0 : i32
    return %c0_i32, %c0_i32_0, %c0_i32_1 : i32, i32, i32
  }
  func.func @transform_1(%arg0: i32) -> (i32, i32) {
    %c0_i32 = arith.constant 0 : i32
    %c0_i32_0 = arith.constant 0 : i32
    %c0_i32_1 = arith.constant 0 : i32
    return %c0_i32, %c0_i32_0 : i32, i32
  }
  func.func @transform_2(%arg0: i32) -> (i32, i32) {
    %c0_i32 = arith.constant 0 : i32
    %c0_i32_0 = arith.constant 0 : i32
    %c0_i32_1 = arith.constant 0 : i32
    return %c0_i32, %c0_i32_0 : i32, i32
  }
  func.func @transform_3(%arg0: i32) -> (i32, i32) {
    %c0_i32 = arith.constant 0 : i32
    %c0_i32_0 = arith.constant 0 : i32
    %c0_i32_1 = arith.constant 0 : i32
    return %c0_i32, %c0_i32_0 : i32, i32
  }
}

module attributes {stable_mosaic.version = 11 : i64} {
  func.func @_conv_block_kernel(%arg0: i32, %arg1: memref<1x8x576xf32, #tpu.memory_space<vmem>>, %arg2: memref<576x64xf32, #tpu.memory_space<vmem>>, %arg3: memref<1x64xf32, #tpu.memory_space<vmem>>, %arg4: memref<8x64xf32, #tpu.memory_space<vmem>>) attributes {dimension_semantics = [#tpu.dimension_semantics<arbitrary>], iteration_bounds = array<i64: 1>, scalar_prefetch = 0 : i64, scratch_operands = 0 : i64, tpu.core_type = #tpu.core_type<tc>, window_params = [{pipeline_mode = #tpu.pipeline_mode<synchronous>, transform_indices = @transform_0, window_bounds = array<i64: 1, 8, 576>}, {pipeline_mode = #tpu.pipeline_mode<synchronous>, transform_indices = @transform_1, window_bounds = array<i64: 576, 64>}, {pipeline_mode = #tpu.pipeline_mode<synchronous>, transform_indices = @transform_2, window_bounds = array<i64: 1, 64>}, {pipeline_mode = #tpu.pipeline_mode<synchronous>, transform_indices = @transform_3, window_bounds = array<i64: 8, 64>}]} {
    %c0 = arith.constant 0 : index
    %c0_0 = arith.constant 0 : index
    %0 = vector.load %arg2[%c0, %c0_0] : memref<576x64xf32, #tpu.memory_space<vmem>>, vector<576x64xf32>
    %c0_1 = arith.constant 0 : index
    %c0_2 = arith.constant 0 : index
    %c0_3 = arith.constant 0 : index
    %1 = vector.load %arg1[%c0_1, %c0_2, %c0_3] : memref<1x8x576xf32, #tpu.memory_space<vmem>>, vector<1x8x576xf32>
    %2 = vector.shape_cast %1 : vector<1x8x576xf32> to vector<8x576xf32>
    %cst = arith.constant dense<0.000000e+00> : vector<8x64xf32>
    %3 = tpu.matmul %2, %0, %cst {dimension_numbers = #tpu.dot_dimension_numbers<[1], [0], [0], [1], [0, 0, 1, 1], [], []>} : vector<8x576xf32>, vector<576x64xf32>, vector<8x64xf32> -> vector<8x64xf32>
    %c0_4 = arith.constant 0 : index
    %c0_5 = arith.constant 0 : index
    %4 = vector.load %arg3[%c0_4, %c0_5] : memref<1x64xf32, #tpu.memory_space<vmem>>, vector<1x64xf32>
    %5 = vector.broadcast %4 : vector<1x64xf32> to vector<8x64xf32>
    %6 = arith.addf %3, %5 : vector<8x64xf32>
    %cst_6 = arith.constant 0.000000e+00 : f32
    %7 = vector.broadcast %cst_6 : f32 to vector<8x64xf32>
    %8 = arith.maximumf %6, %7 : vector<8x64xf32>
    %c0_7 = arith.constant 0 : index
    %c0_8 = arith.constant 0 : index
    %9 = vector.load %arg4[%c0_7, %c0_8] : memref<8x64xf32, #tpu.memory_space<vmem>>, vector<8x64xf32>
    tpu.vector_store %arg4[%c0_7, %c0_8], %8 {strides = array<i32>} : memref<8x64xf32, #tpu.memory_space<vmem>>, vector<8x64xf32>,
    return
  }
  func.func @transform_0(%arg0: i32) -> (i32, i32, i32) {
    %c0_i32 = arith.constant 0 : i32
    %c0_i32_0 = arith.constant 0 : i32
    %c0_i32_1 = arith.constant 0 : i32
    %c0_i32_2 = arith.constant 0 : i32
    return %c0_i32, %c0_i32_0, %c0_i32_1 : i32, i32, i32
  }
  func.func @transform_1(%arg0: i32) -> (i32, i32) {
    %c0_i32 = arith.constant 0 : i32
    %c0_i32_0 = arith.constant 0 : i32
    %c0_i32_1 = arith.constant 0 : i32
    return %c0_i32, %c0_i32_0 : i32, i32
  }
  func.func @transform_2(%arg0: i32) -> (i32, i32) {
    %c0_i32 = arith.constant 0 : i32
    %c0_i32_0 = arith.constant 0 : i32
    %c0_i32_1 = arith.constant 0 : i32
    return %c0_i32, %c0_i32_0 : i32, i32
  }
  func.func @transform_3(%arg0: i32) -> (i32, i32) {
    %c0_i32 = arith.constant 0 : i32
    %c0_i32_0 = arith.constant 0 : i32
    %c0_i32_1 = arith.constant 0 : i32
    return %c0_i32, %c0_i32_0 : i32, i32
  }
}

module attributes {stable_mosaic.version = 11 : i64} {
  func.func @_conv_block_kernel(%arg0: i32, %arg1: memref<4x2x576xf32, #tpu.memory_space<vmem>>, %arg2: memref<576x64xf32, #tpu.memory_space<vmem>>, %arg3: memref<1x64xf32, #tpu.memory_space<vmem>>, %arg4: memref<2x64xf32, #tpu.memory_space<vmem>>) attributes {dimension_semantics = [#tpu.dimension_semantics<arbitrary>], iteration_bounds = array<i64: 1>, scalar_prefetch = 0 : i64, scratch_operands = 0 : i64, tpu.core_type = #tpu.core_type<tc>, window_params = [{pipeline_mode = #tpu.pipeline_mode<synchronous>, transform_indices = @transform_0, window_bounds = array<i64: 4, 2, 576>}, {pipeline_mode = #tpu.pipeline_mode<synchronous>, transform_indices = @transform_1, window_bounds = array<i64: 576, 64>}, {pipeline_mode = #tpu.pipeline_mode<synchronous>, transform_indices = @transform_2, window_bounds = array<i64: 1, 64>}, {pipeline_mode = #tpu.pipeline_mode<synchronous>, transform_indices = @transform_3, window_bounds = array<i64: 2, 64>}]} {
    %c0 = arith.constant 0 : index
    %c0_0 = arith.constant 0 : index
    %0 = vector.load %arg2[%c0, %c0_0] : memref<576x64xf32, #tpu.memory_space<vmem>>, vector<576x64xf32>
    %c0_1 = arith.constant 0 : index
    %c0_2 = arith.constant 0 : index
    %c0_3 = arith.constant 0 : index
    %1 = vector.load %arg1[%c0_1, %c0_2, %c0_3] : memref<4x2x576xf32, #tpu.memory_space<vmem>>, vector<1x2x576xf32>
    %2 = vector.shape_cast %1 : vector<1x2x576xf32> to vector<2x576xf32>
    %cst = arith.constant dense<0.000000e+00> : vector<2x64xf32>
    %3 = tpu.matmul %2, %0, %cst {dimension_numbers = #tpu.dot_dimension_numbers<[1], [0], [0], [1], [0, 0, 1, 1], [], []>} : vector<2x576xf32>, vector<576x64xf32>, vector<2x64xf32> -> vector<2x64xf32>
    %c1 = arith.constant 1 : index
    %c0_4 = arith.constant 0 : index
    %c0_5 = arith.constant 0 : index
    %4 = vector.load %arg1[%c1, %c0_4, %c0_5] : memref<4x2x576xf32, #tpu.memory_space<vmem>>, vector<1x2x576xf32>
    %5 = vector.shape_cast %4 : vector<1x2x576xf32> to vector<2x576xf32>
    %cst_6 = arith.constant dense<0.000000e+00> : vector<2x64xf32>
    %6 = tpu.matmul %5, %0, %cst_6 {dimension_numbers = #tpu.dot_dimension_numbers<[1], [0], [0], [1], [0, 0, 1, 1], [], []>} : vector<2x576xf32>, vector<576x64xf32>, vector<2x64xf32> -> vector<2x64xf32>
    %7 = arith.maximumf %3, %6 : vector<2x64xf32>
    %c2 = arith.constant 2 : index
    %c0_7 = arith.constant 0 : index
    %c0_8 = arith.constant 0 : index
    %8 = vector.load %arg1[%c2, %c0_7, %c0_8] : memref<4x2x576xf32, #tpu.memory_space<vmem>>, vector<1x2x576xf32>
    %9 = vector.shape_cast %8 : vector<1x2x576xf32> to vector<2x576xf32>
    %cst_9 = arith.constant dense<0.000000e+00> : vector<2x64xf32>
    %10 = tpu.matmul %9, %0, %cst_9 {dimension_numbers = #tpu.dot_dimension_numbers<[1], [0], [0], [1], [0, 0, 1, 1], [], []>} : vector<2x576xf32>, vector<576x64xf32>, vector<2x64xf32> -> vector<2x64xf32>
    %11 = arith.maximumf %7, %10 : vector<2x64xf32>
    %c3 = arith.constant 3 : index
    %c0_10 = arith.constant 0 : index
    %c0_11 = arith.constant 0 : index
    %12 = vector.load %arg1[%c3, %c0_10, %c0_11] : memref<4x2x576xf32, #tpu.memory_space<vmem>>, vector<1x2x576xf32>
    %13 = vector.shape_cast %12 : vector<1x2x576xf32> to vector<2x576xf32>
    %cst_12 = arith.constant dense<0.000000e+00> : vector<2x64xf32>
    %14 = tpu.matmul %13, %0, %cst_12 {dimension_numbers = #tpu.dot_dimension_numbers<[1], [0], [0], [1], [0, 0, 1, 1], [], []>} : vector<2x576xf32>, vector<576x64xf32>, vector<2x64xf32> -> vector<2x64xf32>
    %15 = arith.maximumf %11, %14 : vector<2x64xf32>
    %c0_13 = arith.constant 0 : index
    %c0_14 = arith.constant 0 : index
    %16 = vector.load %arg3[%c0_13, %c0_14] : memref<1x64xf32, #tpu.memory_space<vmem>>, vector<1x64xf32>
    %17 = vector.broadcast %16 : vector<1x64xf32> to vector<2x64xf32>
    %18 = arith.addf %15, %17 : vector<2x64xf32>
    %cst_15 = arith.constant 0.000000e+00 : f32
    %19 = vector.broadcast %cst_15 : f32 to vector<2x64xf32>
    %20 = arith.maximumf %18, %19 : vector<2x64xf32>
    %c0_16 = arith.constant 0 : index
    %c0_17 = arith.constant 0 : index
    %21 = vector.load %arg4[%c0_16, %c0_17] : memref<2x64xf32, #tpu.memory_space<vmem>>, vector<2x64xf32>
    tpu.vector_store %arg4[%c0_16, %c0_17], %20 {strides = array<i32>} : memref<2x64xf32, #tpu.memory_space<vmem>>, vector<2x64xf32>,
    return
  }
  func.func @transform_0(%arg0: i32) -> (i32, i32, i32) {
    %c0_i32 = arith.constant 0 : i32
    %c0_i32_0 = arith.constant 0 : i32
    %c0_i32_1 = arith.constant 0 : i32
    %c0_i32_2 = arith.constant 0 : i32
    return %c0_i32, %c0_i32_0, %c0_i32_1 : i32, i32, i32
  }
  func.func @transform_1(%arg0: i32) -> (i32, i32) {
    %c0_i32 = arith.constant 0 : i32
    %c0_i32_0 = arith.constant 0 : i32
    %c0_i32_1 = arith.constant 0 : i32
    return %c0_i32, %c0_i32_0 : i32, i32
  }
  func.func @transform_2(%arg0: i32) -> (i32, i32) {
    %c0_i32 = arith.constant 0 : i32
    %c0_i32_0 = arith.constant 0 : i32
    %c0_i32_1 = arith.constant 0 : i32
    return %c0_i32, %c0_i32_0 : i32, i32
  }
  func.func @transform_3(%arg0: i32) -> (i32, i32) {
    %c0_i32 = arith.constant 0 : i32
    %c0_i32_0 = arith.constant 0 : i32
    %c0_i32_1 = arith.constant 0 : i32
    return %c0_i32, %c0_i32_0 : i32, i32
  }
}

module attributes {stable_mosaic.version = 11 : i64} {
  func.func @_mlp3_kernel(%arg0: i32, %arg1: memref<2x64xf32, #tpu.memory_space<vmem>>, %arg2: memref<64x128xf32, #tpu.memory_space<vmem>>, %arg3: memref<1x128xf32, #tpu.memory_space<vmem>>, %arg4: memref<128x128xf32, #tpu.memory_space<vmem>>, %arg5: memref<1x128xf32, #tpu.memory_space<vmem>>, %arg6: memref<128x10xf32, #tpu.memory_space<vmem>>, %arg7: memref<1x10xf32, #tpu.memory_space<vmem>>, %arg8: memref<2x10xf32, #tpu.memory_space<vmem>>) attributes {dimension_semantics = [#tpu.dimension_semantics<arbitrary>], iteration_bounds = array<i64: 1>, scalar_prefetch = 0 : i64, scratch_operands = 0 : i64, tpu.core_type = #tpu.core_type<tc>, window_params = [{pipeline_mode = #tpu.pipeline_mode<synchronous>, transform_indices = @transform_0, window_bounds = array<i64: 2, 64>}, {pipeline_mode = #tpu.pipeline_mode<synchronous>, transform_indices = @transform_1, window_bounds = array<i64: 64, 128>}, {pipeline_mode = #tpu.pipeline_mode<synchronous>, transform_indices = @transform_2, window_bounds = array<i64: 1, 128>}, {pipeline_mode = #tpu.pipeline_mode<synchronous>, transform_indices = @transform_3, window_bounds = array<i64: 128, 128>}, {pipeline_mode = #tpu.pipeline_mode<synchronous>, transform_indices = @transform_4, window_bounds = array<i64: 1, 128>}, {pipeline_mode = #tpu.pipeline_mode<synchronous>, transform_indices = @transform_5, window_bounds = array<i64: 128, 10>}, {pipeline_mode = #tpu.pipeline_mode<synchronous>, transform_indices = @transform_6, window_bounds = array<i64: 1, 10>}, {pipeline_mode = #tpu.pipeline_mode<synchronous>, transform_indices = @transform_7, window_bounds = array<i64: 2, 10>}]} {
    %c0 = arith.constant 0 : index
    %c0_0 = arith.constant 0 : index
    %0 = vector.load %arg1[%c0, %c0_0] : memref<2x64xf32, #tpu.memory_space<vmem>>, vector<2x64xf32>
    %c0_1 = arith.constant 0 : index
    %c0_2 = arith.constant 0 : index
    %1 = vector.load %arg2[%c0_1, %c0_2] : memref<64x128xf32, #tpu.memory_space<vmem>>, vector<64x128xf32>
    %cst = arith.constant dense<0.000000e+00> : vector<2x128xf32>
    %2 = tpu.matmul %0, %1, %cst {dimension_numbers = #tpu.dot_dimension_numbers<[1], [0], [0], [1], [0, 0, 1, 1], [], []>} : vector<2x64xf32>, vector<64x128xf32>, vector<2x128xf32> -> vector<2x128xf32>
    %c0_3 = arith.constant 0 : index
    %c0_4 = arith.constant 0 : index
    %3 = vector.load %arg3[%c0_3, %c0_4] : memref<1x128xf32, #tpu.memory_space<vmem>>, vector<1x128xf32>
    %4 = vector.broadcast %3 : vector<1x128xf32> to vector<2x128xf32>
    %5 = arith.addf %2, %4 : vector<2x128xf32>
    %cst_5 = arith.constant 0.000000e+00 : f32
    %6 = vector.broadcast %cst_5 : f32 to vector<2x128xf32>
    %7 = arith.maximumf %5, %6 : vector<2x128xf32>
    %c0_6 = arith.constant 0 : index
    %c0_7 = arith.constant 0 : index
    %8 = vector.load %arg4[%c0_6, %c0_7] : memref<128x128xf32, #tpu.memory_space<vmem>>, vector<128x128xf32>
    %cst_8 = arith.constant dense<0.000000e+00> : vector<2x128xf32>
    %9 = tpu.matmul %7, %8, %cst_8 {dimension_numbers = #tpu.dot_dimension_numbers<[1], [0], [0], [1], [0, 0, 1, 1], [], []>} : vector<2x128xf32>, vector<128x128xf32>, vector<2x128xf32> -> vector<2x128xf32>
    %c0_9 = arith.constant 0 : index
    %c0_10 = arith.constant 0 : index
    %10 = vector.load %arg5[%c0_9, %c0_10] : memref<1x128xf32, #tpu.memory_space<vmem>>, vector<1x128xf32>
    %11 = vector.broadcast %10 : vector<1x128xf32> to vector<2x128xf32>
    %12 = arith.addf %9, %11 : vector<2x128xf32>
    %cst_11 = arith.constant 0.000000e+00 : f32
    %13 = vector.broadcast %cst_11 : f32 to vector<2x128xf32>
    %14 = arith.maximumf %12, %13 : vector<2x128xf32>
    %c0_12 = arith.constant 0 : index
    %c0_13 = arith.constant 0 : index
    %15 = vector.load %arg6[%c0_12, %c0_13] : memref<128x10xf32, #tpu.memory_space<vmem>>, vector<128x10xf32>
    %cst_14 = arith.constant dense<0.000000e+00> : vector<2x10xf32>
    %16 = tpu.matmul %14, %15, %cst_14 {dimension_numbers = #tpu.dot_dimension_numbers<[1], [0], [0], [1], [0, 0, 1, 1], [], []>} : vector<2x128xf32>, vector<128x10xf32>, vector<2x10xf32> -> vector<2x10xf32>
    %c0_15 = arith.constant 0 : index
    %c0_16 = arith.constant 0 : index
    %17 = vector.load %arg7[%c0_15, %c0_16] : memref<1x10xf32, #tpu.memory_space<vmem>>, vector<1x10xf32>
    %18 = vector.broadcast %17 : vector<1x10xf32> to vector<2x10xf32>
    %19 = arith.addf %16, %18 : vector<2x10xf32>
    %c0_17 = arith.constant 0 : index
    %c0_18 = arith.constant 0 : index
    %20 = vector.load %arg8[%c0_17, %c0_18] : memref<2x10xf32, #tpu.memory_space<vmem>>, vector<2x10xf32>
    tpu.vector_store %arg8[%c0_17, %c0_18], %19 {strides = array<i32>} : memref<2x10xf32, #tpu.memory_space<vmem>>, vector<2x10xf32>,
    return
  }
  func.func @transform_0(%arg0: i32) -> (i32, i32) {
    %c0_i32 = arith.constant 0 : i32
    %c0_i32_0 = arith.constant 0 : i32
    %c0_i32_1 = arith.constant 0 : i32
    return %c0_i32, %c0_i32_0 : i32, i32
  }
  func.func @transform_1(%arg0: i32) -> (i32, i32) {
    %c0_i32 = arith.constant 0 : i32
    %c0_i32_0 = arith.constant 0 : i32
    %c0_i32_1 = arith.constant 0 : i32
    return %c0_i32, %c0_i32_0 : i32, i32
  }
  func.func @transform_2(%arg0: i32) -> (i32, i32) {
    %c0_i32 = arith.constant 0 : i32
    %c0_i32_0 = arith.constant 0 : i32
    %c0_i32_1 = arith.constant 0 : i32
    return %c0_i32, %c0_i32_0 : i32, i32
  }
  func.func @transform_3(%arg0: i32) -> (i32, i32) {
    %c0_i32 = arith.constant 0 : i32
    %c0_i32_0 = arith.constant 0 : i32
    %c0_i32_1 = arith.constant 0 : i32
    return %c0_i32, %c0_i32_0 : i32, i32
  }
  func.func @transform_4(%arg0: i32) -> (i32, i32) {
    %c0_i32 = arith.constant 0 : i32
    %c0_i32_0 = arith.constant 0 : i32
    %c0_i32_1 = arith.constant 0 : i32
    return %c0_i32, %c0_i32_0 : i32, i32
  }
  func.func @transform_5(%arg0: i32) -> (i32, i32) {
    %c0_i32 = arith.constant 0 : i32
    %c0_i32_0 = arith.constant 0 : i32
    %c0_i32_1 = arith.constant 0 : i32
    return %c0_i32, %c0_i32_0 : i32, i32
  }
  func.func @transform_6(%arg0: i32) -> (i32, i32) {
    %c0_i32 = arith.constant 0 : i32
    %c0_i32_0 = arith.constant 0 : i32
    %c0_i32_1 = arith.constant 0 : i32
    return %c0_i32, %c0_i32_0 : i32, i32
  }
  func.func @transform_7(%arg0: i32) -> (i32, i32) {
    %c0_i32 = arith.constant 0 : i32
    %c0_i32_0 = arith.constant 0 : i32
    %c0_i32_1 = arith.constant 0 : i32
    return %c0_i32, %c0_i32_0 : i32, i32
  }
}

module attributes {stable_mosaic.version = 11 : i64} {
  func.func @_adversary_kernel(%arg0: i32, %arg1: memref<32x32xf32, #tpu.memory_space<vmem>>, %arg2: memref<2x32xf32, #tpu.memory_space<vmem>>, %arg3: memref<32x64xf32, #tpu.memory_space<vmem>>, %arg4: memref<1x64xf32, #tpu.memory_space<vmem>>, %arg5: memref<64x64xf32, #tpu.memory_space<vmem>>, %arg6: memref<1x64xf32, #tpu.memory_space<vmem>>, %arg7: memref<64x64xf32, #tpu.memory_space<vmem>>, %arg8: memref<1x64xf32, #tpu.memory_space<vmem>>, %arg9: memref<64x64xf32, #tpu.memory_space<vmem>>, %arg10: memref<1x64xf32, #tpu.memory_space<vmem>>, %arg11: memref<64x128xf32, #tpu.memory_space<vmem>>, %arg12: memref<1x128xf32, #tpu.memory_space<vmem>>, %arg13: memref<128x128xf32, #tpu.memory_space<vmem>>, %arg14: memref<1x128xf32, #tpu.memory_space<vmem>>, %arg15: memref<128x10xf32, #tpu.memory_space<vmem>>, %arg16: memref<1x10xf32, #tpu.memory_space<vmem>>, %arg17: memref<2x10xf32, #tpu.memory_space<vmem>>) attributes {dimension_semantics = [#tpu.dimension_semantics<arbitrary>], iteration_bounds = array<i64: 1>, scalar_prefetch = 0 : i64, scratch_operands = 0 : i64, tpu.core_type = #tpu.core_type<tc>, window_params = [{pipeline_mode = #tpu.pipeline_mode<synchronous>, transform_indices = @transform_0, window_bounds = array<i64: 32, 32>}, {pipeline_mode = #tpu.pipeline_mode<synchronous>, transform_indices = @transform_1, window_bounds = array<i64: 2, 32>}, {pipeline_mode = #tpu.pipeline_mode<synchronous>, transform_indices = @transform_2, window_bounds = array<i64: 32, 64>}, {pipeline_mode = #tpu.pipeline_mode<synchronous>, transform_indices = @transform_3, window_bounds = array<i64: 1, 64>}, {pipeline_mode = #tpu.pipeline_mode<synchronous>, transform_indices = @transform_4, window_bounds = array<i64: 64, 64>}, {pipeline_mode = #tpu.pipeline_mode<synchronous>, transform_indices = @transform_5, window_bounds = array<i64: 1, 64>}, {pipeline_mode = #tpu.pipeline_mode<synchronous>, transform_indices = @transform_6, window_bounds = array<i64: 64, 64>}, {pipeline_mode = #tpu.pipeline_mode<synchronous>, transform_indices = @transform_7, window_bounds = array<i64: 1, 64>}, {pipeline_mode = #tpu.pipeline_mode<synchronous>, transform_indices = @transform_8, window_bounds = array<i64: 64, 64>}, {pipeline_mode = #tpu.pipeline_mode<synchronous>, transform_indices = @transform_9, window_bounds = array<i64: 1, 64>}, {pipeline_mode = #tpu.pipeline_mode<synchronous>, transform_indices = @transform_10, window_bounds = array<i64: 64, 128>}, {pipeline_mode = #tpu.pipeline_mode<synchronous>, transform_indices = @transform_11, window_bounds = array<i64: 1, 128>}, {pipeline_mode = #tpu.pipeline_mode<synchronous>, transform_indices = @transform_12, window_bounds = array<i64: 128, 128>}, {pipeline_mode = #tpu.pipeline_mode<synchronous>, transform_indices = @transform_13, window_bounds = array<i64: 1, 128>}, {pipeline_mode = #tpu.pipeline_mode<synchronous>, transform_indices = @transform_14, window_bounds = array<i64: 128, 10>}, {pipeline_mode = #tpu.pipeline_mode<synchronous>, transform_indices = @transform_15, window_bounds = array<i64: 1, 10>}, {pipeline_mode = #tpu.pipeline_mode<synchronous>, transform_indices = @transform_16, window_bounds = array<i64: 2, 10>}]} {
    %c0 = arith.constant 0 : index
    %c0_0 = arith.constant 0 : index
    %0 = vector.load %arg1[%c0, %c0_0] : memref<32x32xf32, #tpu.memory_space<vmem>>, vector<32x32xf32>
    %c0_1 = arith.constant 0 : index
    %c0_2 = arith.constant 0 : index
    %1 = vector.load %arg3[%c0_1, %c0_2] : memref<32x64xf32, #tpu.memory_space<vmem>>, vector<32x64xf32>
    %c0_3 = arith.constant 0 : index
    %c0_4 = arith.constant 0 : index
    %2 = vector.load %arg4[%c0_3, %c0_4] : memref<1x64xf32, #tpu.memory_space<vmem>>, vector<1x64xf32>
    %cst = arith.constant dense<0.000000e+00> : vector<32x64xf32>
    %3 = tpu.matmul %0, %1, %cst {dimension_numbers = #tpu.dot_dimension_numbers<[1], [0], [0], [1], [0, 0, 1, 1], [], []>} : vector<32x32xf32>, vector<32x64xf32>, vector<32x64xf32> -> vector<32x64xf32>
    %4 = vector.broadcast %2 : vector<1x64xf32> to vector<32x64xf32>
    %5 = arith.addf %3, %4 : vector<32x64xf32>
    %cst_5 = arith.constant 0.000000e+00 : f32
    %6 = vector.broadcast %cst_5 : f32 to vector<32x64xf32>
    %7 = arith.maximumf %5, %6 : vector<32x64xf32>
    %c0_6 = arith.constant 0 : index
    %c0_7 = arith.constant 0 : index
    %8 = vector.load %arg5[%c0_6, %c0_7] : memref<64x64xf32, #tpu.memory_space<vmem>>, vector<64x64xf32>
    %c0_8 = arith.constant 0 : index
    %c0_9 = arith.constant 0 : index
    %9 = vector.load %arg6[%c0_8, %c0_9] : memref<1x64xf32, #tpu.memory_space<vmem>>, vector<1x64xf32>
    %cst_10 = arith.constant dense<0.000000e+00> : vector<32x64xf32>
    %10 = tpu.matmul %7, %8, %cst_10 {dimension_numbers = #tpu.dot_dimension_numbers<[1], [0], [0], [1], [0, 0, 1, 1], [], []>} : vector<32x64xf32>, vector<64x64xf32>, vector<32x64xf32> -> vector<32x64xf32>
    %11 = vector.broadcast %9 : vector<1x64xf32> to vector<32x64xf32>
    %12 = arith.addf %10, %11 : vector<32x64xf32>
    %cst_11 = arith.constant 0.000000e+00 : f32
    %13 = vector.broadcast %cst_11 : f32 to vector<32x64xf32>
    %14 = arith.maximumf %12, %13 : vector<32x64xf32>
    %c0_12 = arith.constant 0 : index
    %c0_13 = arith.constant 0 : index
    %15 = vector.load %arg7[%c0_12, %c0_13] : memref<64x64xf32, #tpu.memory_space<vmem>>, vector<64x64xf32>
    %c0_14 = arith.constant 0 : index
    %c0_15 = arith.constant 0 : index
    %16 = vector.load %arg8[%c0_14, %c0_15] : memref<1x64xf32, #tpu.memory_space<vmem>>, vector<1x64xf32>
    %cst_16 = arith.constant dense<0.000000e+00> : vector<32x64xf32>
    %17 = tpu.matmul %14, %15, %cst_16 {dimension_numbers = #tpu.dot_dimension_numbers<[1], [0], [0], [1], [0, 0, 1, 1], [], []>} : vector<32x64xf32>, vector<64x64xf32>, vector<32x64xf32> -> vector<32x64xf32>
    %18 = vector.broadcast %16 : vector<1x64xf32> to vector<32x64xf32>
    %19 = arith.addf %17, %18 : vector<32x64xf32>
    %cst_17 = arith.constant 0.000000e+00 : f32
    %20 = vector.broadcast %cst_17 : f32 to vector<32x64xf32>
    %21 = arith.maximumf %19, %20 : vector<32x64xf32>
    %c0_18 = arith.constant 0 : index
    %c0_19 = arith.constant 0 : index
    %22 = vector.load %arg9[%c0_18, %c0_19] : memref<64x64xf32, #tpu.memory_space<vmem>>, vector<64x64xf32>
    %c0_20 = arith.constant 0 : index
    %c0_21 = arith.constant 0 : index
    %23 = vector.load %arg10[%c0_20, %c0_21] : memref<1x64xf32, #tpu.memory_space<vmem>>, vector<1x64xf32>
    %cst_22 = arith.constant dense<0.000000e+00> : vector<32x64xf32>
    %24 = tpu.matmul %21, %22, %cst_22 {dimension_numbers = #tpu.dot_dimension_numbers<[1], [0], [0], [1], [0, 0, 1, 1], [], []>} : vector<32x64xf32>, vector<64x64xf32>, vector<32x64xf32> -> vector<32x64xf32>
    %25 = vector.broadcast %23 : vector<1x64xf32> to vector<32x64xf32>
    %26 = arith.addf %24, %25 : vector<32x64xf32>
    %cst_23 = arith.constant 0.000000e+00 : f32
    %27 = vector.broadcast %cst_23 : f32 to vector<32x64xf32>
    %28 = arith.maximumf %26, %27 : vector<32x64xf32>
    %c0_24 = arith.constant 0 : index
    %c0_25 = arith.constant 0 : index
    %29 = vector.load %arg11[%c0_24, %c0_25] : memref<64x128xf32, #tpu.memory_space<vmem>>, vector<64x128xf32>
    %c0_26 = arith.constant 0 : index
    %c0_27 = arith.constant 0 : index
    %30 = vector.load %arg12[%c0_26, %c0_27] : memref<1x128xf32, #tpu.memory_space<vmem>>, vector<1x128xf32>
    %cst_28 = arith.constant dense<0.000000e+00> : vector<32x128xf32>
    %31 = tpu.matmul %28, %29, %cst_28 {dimension_numbers = #tpu.dot_dimension_numbers<[1], [0], [0], [1], [0, 0, 1, 1], [], []>} : vector<32x64xf32>, vector<64x128xf32>, vector<32x128xf32> -> vector<32x128xf32>
    %32 = vector.broadcast %30 : vector<1x128xf32> to vector<32x128xf32>
    %33 = arith.addf %31, %32 : vector<32x128xf32>
    %cst_29 = arith.constant 0.000000e+00 : f32
    %34 = vector.broadcast %cst_29 : f32 to vector<32x128xf32>
    %35 = arith.maximumf %33, %34 : vector<32x128xf32>
    %c0_30 = arith.constant 0 : index
    %c0_31 = arith.constant 0 : index
    %36 = vector.load %arg13[%c0_30, %c0_31] : memref<128x128xf32, #tpu.memory_space<vmem>>, vector<128x128xf32>
    %c0_32 = arith.constant 0 : index
    %c0_33 = arith.constant 0 : index
    %37 = vector.load %arg14[%c0_32, %c0_33] : memref<1x128xf32, #tpu.memory_space<vmem>>, vector<1x128xf32>
    %cst_34 = arith.constant dense<0.000000e+00> : vector<32x128xf32>
    %38 = tpu.matmul %35, %36, %cst_34 {dimension_numbers = #tpu.dot_dimension_numbers<[1], [0], [0], [1], [0, 0, 1, 1], [], []>} : vector<32x128xf32>, vector<128x128xf32>, vector<32x128xf32> -> vector<32x128xf32>
    %39 = vector.broadcast %37 : vector<1x128xf32> to vector<32x128xf32>
    %40 = arith.addf %38, %39 : vector<32x128xf32>
    %cst_35 = arith.constant 0.000000e+00 : f32
    %41 = vector.broadcast %cst_35 : f32 to vector<32x128xf32>
    %42 = arith.maximumf %40, %41 : vector<32x128xf32>
    %c0_36 = arith.constant 0 : index
    %c0_37 = arith.constant 0 : index
    %43 = vector.load %arg15[%c0_36, %c0_37] : memref<128x10xf32, #tpu.memory_space<vmem>>, vector<128x10xf32>
    %c0_38 = arith.constant 0 : index
    %c0_39 = arith.constant 0 : index
    %44 = vector.load %arg16[%c0_38, %c0_39] : memref<1x10xf32, #tpu.memory_space<vmem>>, vector<1x10xf32>
    %cst_40 = arith.constant dense<0.000000e+00> : vector<32x10xf32>
    %45 = tpu.matmul %42, %43, %cst_40 {dimension_numbers = #tpu.dot_dimension_numbers<[1], [0], [0], [1], [0, 0, 1, 1], [], []>} : vector<32x128xf32>, vector<128x10xf32>, vector<32x10xf32> -> vector<32x10xf32>
    %46 = vector.broadcast %44 : vector<1x10xf32> to vector<32x10xf32>
    %47 = arith.addf %45, %46 : vector<32x10xf32>
    %c0_41 = arith.constant 0 : index
    %c0_42 = arith.constant 0 : index
    %48 = vector.load %arg2[%c0_41, %c0_42] : memref<2x32xf32, #tpu.memory_space<vmem>>, vector<2x32xf32>
    %cst_43 = arith.constant dense<0.000000e+00> : vector<2x10xf32>
    %49 = tpu.matmul %48, %47, %cst_43 {dimension_numbers = #tpu.dot_dimension_numbers<[1], [0], [0], [1], [0, 0, 1, 1], [], []>} : vector<2x32xf32>, vector<32x10xf32>, vector<2x10xf32> -> vector<2x10xf32>
    %c0_44 = arith.constant 0 : index
    %c0_45 = arith.constant 0 : index
    %50 = vector.load %arg17[%c0_44, %c0_45] : memref<2x10xf32, #tpu.memory_space<vmem>>, vector<2x10xf32>
    tpu.vector_store %arg17[%c0_44, %c0_45], %49 {strides = array<i32>} : memref<2x10xf32, #tpu.memory_space<vmem>>, vector<2x10xf32>,
    return
  }
  func.func @transform_0(%arg0: i32) -> (i32, i32) {
    %c0_i32 = arith.constant 0 : i32
    %c0_i32_0 = arith.constant 0 : i32
    %c0_i32_1 = arith.constant 0 : i32
    return %c0_i32, %c0_i32_0 : i32, i32
  }
  func.func @transform_1(%arg0: i32) -> (i32, i32) {
    %c0_i32 = arith.constant 0 : i32
    %c0_i32_0 = arith.constant 0 : i32
    %c0_i32_1 = arith.constant 0 : i32
    return %c0_i32, %c0_i32_0 : i32, i32
  }
  func.func @transform_2(%arg0: i32) -> (i32, i32) {
    %c0_i32 = arith.constant 0 : i32
    %c0_i32_0 = arith.constant 0 : i32
    %c0_i32_1 = arith.constant 0 : i32
    return %c0_i32, %c0_i32_0 : i32, i32
  }
  func.func @transform_3(%arg0: i32) -> (i32, i32) {
    %c0_i32 = arith.constant 0 : i32
    %c0_i32_0 = arith.constant 0 : i32
    %c0_i32_1 = arith.constant 0 : i32
    return %c0_i32, %c0_i32_0 : i32, i32
  }
  func.func @transform_4(%arg0: i32) -> (i32, i32) {
    %c0_i32 = arith.constant 0 : i32
    %c0_i32_0 = arith.constant 0 : i32
    %c0_i32_1 = arith.constant 0 : i32
    return %c0_i32, %c0_i32_0 : i32, i32
  }
  func.func @transform_5(%arg0: i32) -> (i32, i32) {
    %c0_i32 = arith.constant 0 : i32
    %c0_i32_0 = arith.constant 0 : i32
    %c0_i32_1 = arith.constant 0 : i32
    return %c0_i32, %c0_i32_0 : i32, i32
  }
  func.func @transform_6(%arg0: i32) -> (i32, i32) {
    %c0_i32 = arith.constant 0 : i32
    %c0_i32_0 = arith.constant 0 : i32
    %c0_i32_1 = arith.constant 0 : i32
    return %c0_i32, %c0_i32_0 : i32, i32
  }
  func.func @transform_7(%arg0: i32) -> (i32, i32) {
    %c0_i32 = arith.constant 0 : i32
    %c0_i32_0 = arith.constant 0 : i32
    %c0_i32_1 = arith.constant 0 : i32
    return %c0_i32, %c0_i32_0 : i32, i32
  }
  func.func @transform_8(%arg0: i32) -> (i32, i32) {
    %c0_i32 = arith.constant 0 : i32
    %c0_i32_0 = arith.constant 0 : i32
    %c0_i32_1 = arith.constant 0 : i32
    return %c0_i32, %c0_i32_0 : i32, i32
  }
  func.func @transform_9(%arg0: i32) -> (i32, i32) {
    %c0_i32 = arith.constant 0 : i32
    %c0_i32_0 = arith.constant 0 : i32
    %c0_i32_1 = arith.constant 0 : i32
    return %c0_i32, %c0_i32_0 : i32, i32
  }
  func.func @transform_10(%arg0: i32) -> (i32, i32) {
    %c0_i32 = arith.constant 0 : i32
    %c0_i32_0 = arith.constant 0 : i32
    %c0_i32_1 = arith.constant 0 : i32
    return %c0_i32, %c0_i32_0 : i32, i32
  }
  func.func @transform_11(%arg0: i32) -> (i32, i32) {
    %c0_i32 = arith.constant 0 : i32
    %c0_i32_0 = arith.constant 0 : i32
    %c0_i32_1 = arith.constant 0 : i32
    return %c0_i32, %c0_i32_0 : i32, i32
  }
  func.func @transform_12(%arg0: i32) -> (i32, i32) {
    %c0_i32 = arith.constant 0 : i32
    %c0_i32_0 = arith.constant 0 : i32
    %c0_i32_1 = arith.constant 0 : i32
    return %c0_i32, %c0_i32_0 : i32, i32
  }
  func.func @transform_13(%arg0: i32) -> (i32, i32) {
    %c0_i32 = arith.constant 0 : i32
    %c0_i32_0 = arith.constant 0 : i32
    %c0_i32_1 = arith.constant 0 : i32
    return %c0_i32, %c0_i32_0 : i32, i32
  }
  func.func @transform_14(%arg0: i32) -> (i32, i32) {
    %c0_i32 = arith.constant 0 : i32
    %c0_i32_0 = arith.constant 0 : i32
    %c0_i32_1 = arith.constant 0 : i32
    return %c0_i32, %c0_i32_0 : i32, i32
  }
  func.func @transform_15(%arg0: i32) -> (i32, i32) {
    %c0_i32 = arith.constant 0 : i32
    %c0_i32_0 = arith.constant 0 : i32
    %c0_i32_1 = arith.constant 0 : i32
    return %c0_i32, %c0_i32_0 : i32, i32
  }
  func.func @transform_16(%arg0: i32) -> (i32, i32) {
    %c0_i32 = arith.constant 0 : i32
    %c0_i32_0 = arith.constant 0 : i32
    %c0_i32_1 = arith.constant 0 : i32
    return %c0_i32, %c0_i32_0 : i32, i32
  }
}

</mosaic_0001>

<bundles_post_ra>
// kernel: vgg_adversarial_forward.10
= control target key start
LH: loop header
LB: loop body
LE: loop exit
PB: predicated region body
PF: predicated region fallthrough
CT: control target
= control target key end

     0   :  { %vm275_vm0 = vcmask 1042432   ;;  %vm82_vm1 = vcmask 220160   ;;  %vm2210_vm2 = vcmask 64512   ;;  %s4119_s1 = inlined_call_operand.vmem [shape: f32[27,8], index: 1, kind: input, shape index: {}]   ;;  %s4120_s0 = inlined_call_operand.vmem [shape: f32[4,512,27], index: 0, kind: input, shape index: {}]   ;;  %s4121_s2 = inlined_call_operand.vmem [shape: f32[1,8], index: 2, kind: input, shape index: {}]   ;;  %s4122_s3 = inlined_call_operand.vmem [shape: f32[512,8], index: 3, kind: output, shape index: {}]  }
   0x1   :  { %v17_v0 = vld [vmem:[%s4119_s1 + $0x18] sm:$0x7]  ;;  %v16_v1 = vld [vmem:[%s4119_s1 + $0x10] sm:$0xff]  ;;  %v15_v2 = vld [vmem:[%s4119_s1 + $0x8] sm:$0xff] }
   0x2   :  { %2537 = vmatpush.msk.msra.mxu2 %vm275_vm0, %v17_v0  ;;  %2666 = vmatpush.msk.msra.mxu3 %vm275_vm0, %v17_v0  ;;  %v14_v3 = vld [vmem:[%s4119_s1] sm:$0xff]  ;;  %v2474_v8 = vld [vmem:[%s4120_s0 + $0x408] sm:$0xff]  ;;  %v2475_v12 = vld [vmem:[%s4120_s0 + $0x410] sm:$0xff] }
   0x3   :  { %2279 = vmatpush.msk.msra.mxu0 %vm275_vm0, %v17_v0  ;;  %2408 = vmatpush.msk.msra.mxu1 %vm275_vm0, %v17_v0  ;;  %v2473_v4 = vld [vmem:[%s4120_s0 + $0x400] sm:$0xff]  ;;  %v2603_v9 = vld [vmem:[%s4120_s0 + $0x608] sm:$0xff]  ;;  %v2604_v13 = vld [vmem:[%s4120_s0 + $0x610] sm:$0xff] }
   0x4   :  { %1288 = vmatpush.msra.mxu2 %v16_v1  ;;  %1818 = vmatpush.msra.mxu3 %v16_v1  ;;  %v2602_v5 = vld [vmem:[%s4120_s0 + $0x600] sm:$0xff]  ;;  %v19_v10 = vld [vmem:[%s4120_s0 + $0x8] sm:$0xff]  ;;  %v20_v14 = vld [vmem:[%s4120_s0 + $0x10] sm:$0xff] }
   0x5   :  { %292 = vmatpush.msra.mxu0 %v16_v1  ;;  %758 = vmatpush.msra.mxu1 %v16_v1  ;;  %v18_v6 = vld [vmem:[%s4120_s0] sm:$0xff]  ;;  %v2345_v11 = vld [vmem:[%s4120_s0 + $0x208] sm:$0xff]  ;;  %v2346_v15 = vld [vmem:[%s4120_s0 + $0x210] sm:$0xff] }
   0x6   :  { %1289 = vmatpush.msra.mxu2 %v15_v2  ;;  %1819 = vmatpush.msra.mxu3 %v15_v2  ;;  %v2344_v7 = vld [vmem:[%s4120_s0 + $0x200] sm:$0xff]  ;;  %v2476_v16 = vld [vmem:[%s4120_s0 + $0x418] sm:$0xff]  ;;  %v2478_v24 = vld [vmem:[%s4120_s0 + $0x428] sm:$0xff] }
   0x7   :  { %293 = vmatpush.msra.mxu0 %v15_v2  ;;  %759 = vmatpush.msra.mxu1 %v15_v2  ;;  %v2605_v17 = vld [vmem:[%s4120_s0 + $0x618] sm:$0xff]  ;;  %v2477_v20 = vld [vmem:[%s4120_s0 + $0x420] sm:$0xff]  ;;  %v2607_v25 = vld [vmem:[%s4120_s0 + $0x628] sm:$0xff] }
   0x8   :  { %1290 = vmatpush.msra.mxu2 %v14_v3  ;;  %1820 = vmatpush.msra.mxu3 %v14_v3  ;;  %v21_v18 = vld [vmem:[%s4120_s0 + $0x18] sm:$0xff]  ;;  %v2606_v21 = vld [vmem:[%s4120_s0 + $0x620] sm:$0xff]  ;;  %v23_v26 = vld [vmem:[%s4120_s0 + $0x28] sm:$0xff] }
   0x9   :  { %2538 = vmatmul.msk.f32.vlgmr.msra.gmra.mxu2 %vm82_vm1, %v2473_v4  ;;  %2667 = vmatmul.msk.f32.vlgmr.msra.gmra.mxu3 %vm82_vm1, %v2602_v5  ;;  %v2347_v19 = vld [vmem:[%s4120_s0 + $0x218] sm:$0xff]  ;;  %v22_v22 = vld [vmem:[%s4120_s0 + $0x20] sm:$0xff]  ;;  %v2349_v27 = vld [vmem:[%s4120_s0 + $0x228] sm:$0xff] }
   0xa   :  { %294 = vmatpush.msra.mxu0 %v14_v3  ;;  %760 = vmatpush.msra.mxu1 %v14_v3  ;;  %v2348_v23 = vld [vmem:[%s4120_s0 + $0x220] sm:$0xff]  ;;  %v2479_v28 = vld [vmem:[%s4120_s0 + $0x430] sm:$0xff]  ;;  %v2480_v32 = vld [vmem:[%s4120_s0 + $0x438] sm:$0xff] }
   0xb   :  { %2280 = vmatmul.msk.f32.vlgmr.msra.gmra.mxu0 %vm82_vm1, %v18_v6  ;;  %2409 = vmatmul.msk.f32.vlgmr.msra.gmra.mxu1 %vm82_vm1, %v2344_v7  ;;  %v2608_v29 = vld [vmem:[%s4120_s0 + $0x630] sm:$0xff]  ;;  %v2609_v33 = vld [vmem:[%s4120_s0 + $0x638] sm:$0xff]  ;;  %v2481_v36 = vld [vmem:[%s4120_s0 + $0x440] sm:$0xff] }
   0xc   :  { %v24_v30 = vld [vmem:[%s4120_s0 + $0x30] sm:$0xff]  ;;  %v25_v34 = vld [vmem:[%s4120_s0 + $0x38] sm:$0xff]  ;;  %v2610_v37 = vld [vmem:[%s4120_s0 + $0x640] sm:$0xff] }
   0xd   :  { %v2350_v31 = vld [vmem:[%s4120_s0 + $0x230] sm:$0xff]  ;;  %v2351_v35 = vld [vmem:[%s4120_s0 + $0x238] sm:$0xff]  ;;  %v26_v38 = vld [vmem:[%s4120_s0 + $0x40] sm:$0xff] }
   0xe   :  { %v2352_v39 = vld [vmem:[%s4120_s0 + $0x240] sm:$0xff]  ;;  %v2482_v40 = vld [vmem:[%s4120_s0 + $0x448] sm:$0xff]  ;;  %v2483_v44 = vld [vmem:[%s4120_s0 + $0x450] sm:$0xff] }
   0xf   :  { %v2611_v41 = vld [vmem:[%s4120_s0 + $0x648] sm:$0xff]  ;;  %v2612_v45 = vld [vmem:[%s4120_s0 + $0x650] sm:$0xff]  ;;  %v2484_v48 = vld [vmem:[%s4120_s0 + $0x458] sm:$0xff] }
  0x10   :  { %v27_v42 = vld [vmem:[%s4120_s0 + $0x48] sm:$0xff]  ;;  %v28_v46 = vld [vmem:[%s4120_s0 + $0x50] sm:$0xff]  ;;  %v2613_v49 = vld [vmem:[%s4120_s0 + $0x658] sm:$0xff] }
  0x11   :  { %2539 = vmatmul.msk.f32.gmra.mxu2 %vm82_vm1, %v2474_v8  ;;  %2668 = vmatmul.msk.f32.gmra.mxu3 %vm82_vm1, %v2603_v9  ;;  %v2353_v43 = vld [vmem:[%s4120_s0 + $0x248] sm:$0xff]  ;;  %v2354_v47 = vld [vmem:[%s4120_s0 + $0x250] sm:$0xff]  ;;  %v29_v50 = vld [vmem:[%s4120_s0 + $0x58] sm:$0xff] }
  0x12   :  { %v2355_v51 = vld [vmem:[%s4120_s0 + $0x258] sm:$0xff]  ;;  %v2485_v52 = vld [vmem:[%s4120_s0 + $0x460] sm:$0xff]  ;;  %v2486_v56 = vld [vmem:[%s4120_s0 + $0x468] sm:$0xff] }
  0x13   :  { %2281 = vmatmul.msk.f32.gmra.mxu0 %vm82_vm1, %v19_v10  ;;  %2410 = vmatmul.msk.f32.gmra.mxu1 %vm82_vm1, %v2345_v11  ;;  %v2614_v53 = vld [vmem:[%s4120_s0 + $0x660] sm:$0xff]  ;;  %v2615_v57 = vld [vmem:[%s4120_s0 + $0x668] sm:$0xff]  ;;  %v2487_v60 = vld [vmem:[%s4120_s0 + $0x470] sm:$0xff] }
  0x14   :  { %v30_v54 = vld [vmem:[%s4120_s0 + $0x60] sm:$0xff]  ;;  %v31_v58 = vld [vmem:[%s4120_s0 + $0x68] sm:$0xff]  ;;  %v2616_v61 = vld [vmem:[%s4120_s0 + $0x670] sm:$0xff] }
  0x15   :  { %v2356_v55 = vld [vmem:[%s4120_s0 + $0x260] sm:$0xff]  ;;  %v2357_v59 = vld [vmem:[%s4120_s0 + $0x268] sm:$0xff]  ;;  %v32_v62 = vld [vmem:[%s4120_s0 + $0x70] sm:$0xff] }
  0x16   :  { %v2358_v63 = vld [vmem:[%s4120_s0 + $0x270] sm:$0xff]  ;;  %v2488_v0 = vld [vmem:[%s4120_s0 + $0x478] sm:$0xff]  ;;  %v2489_v4 = vld [vmem:[%s4120_s0 + $0x480] sm:$0xff] }
  0x17   :  { %v2617_v1 = vld [vmem:[%s4120_s0 + $0x678] sm:$0xff]  ;;  %v2618_v5 = vld [vmem:[%s4120_s0 + $0x680] sm:$0xff] }
  0x18   :  { %v33_v2 = vld [vmem:[%s4120_s0 + $0x78] sm:$0xff]  ;;  %v34_v8 = vld [vmem:[%s4120_s0 + $0x80] sm:$0xff] }
  0x19   :  { %2540 = vmatmul.msk.f32.gmra.mxu2 %vm82_vm1, %v2475_v12  ;;  %2669 = vmatmul.msk.f32.gmra.mxu3 %vm82_vm1, %v2604_v13  ;;  %v2359_v3 = vld [vmem:[%s4120_s0 + $0x278] sm:$0xff]  ;;  %v2360_v9 = vld [vmem:[%s4120_s0 + $0x280] sm:$0xff] }
  0x1b   :  { %2282 = vmatmul.msk.f32.gmra.mxu0 %vm82_vm1, %v20_v14  ;;  %2411 = vmatmul.msk.f32.gmra.mxu1 %vm82_vm1, %v2346_v15  ;;  %v3040_v14 = vld [vmem:[%s4121_s2] ss:$0 sm:$0xff]  ;;  %v2490_v15 = vld [vmem:[%s4120_s0 + $0x488] sm:$0xff] }
  0x21   :  { %2541 = vmatmul.msk.f32.gmra.mxu2 %vm82_vm1, %v2476_v16  ;;  %2670 = vmatmul.msk.f32.gmra.mxu3 %vm82_vm1, %v2605_v17  ;;  %v2619_v16 = vld [vmem:[%s4120_s0 + $0x688] sm:$0xff] }
  0x23   :  { %2283 = vmatmul.msk.f32.gmra.mxu0 %vm82_vm1, %v21_v18  ;;  %2412 = vmatmul.msk.f32.gmra.mxu1 %vm82_vm1, %v2347_v19 }
  0x29   :  { %2542 = vmatmul.msk.f32.gmra.mxu2 %vm82_vm1, %v2477_v20  ;;  %2671 = vmatmul.msk.f32.gmra.mxu3 %vm82_vm1, %v2606_v21  ;;  %v35_v20 = vld [vmem:[%s4120_s0 + $0x88] sm:$0xff] }
  0x2a   :  { %v2361_v21 = vld [vmem:[%s4120_s0 + $0x288] sm:$0xff] }
  0x2b   :  { %2284 = vmatmul.msk.f32.gmra.mxu0 %vm82_vm1, %v22_v22  ;;  %2413 = vmatmul.msk.f32.gmra.mxu1 %vm82_vm1, %v2348_v23 }
  0x31   :  { %2543 = vmatmul.msk.f32.gmra.mxu2 %vm82_vm1, %v2478_v24  ;;  %2672 = vmatmul.msk.f32.gmra.mxu3 %vm82_vm1, %v2607_v25 }
  0x33   :  { %2285 = vmatmul.msk.f32.gmra.mxu0 %vm82_vm1, %v23_v26  ;;  %2414 = vmatmul.msk.f32.gmra.mxu1 %vm82_vm1, %v2349_v27 }
  0x39   :  { %2544 = vmatmul.msk.f32.gmra.mxu2 %vm82_vm1, %v2479_v28  ;;  %2673 = vmatmul.msk.f32.gmra.mxu3 %vm82_vm1, %v2608_v29  ;;  %v2491_v28 = vld [vmem:[%s4120_s0 + $0x490] sm:$0xff] }
  0x3a   :  { %v2620_v29 = vld [vmem:[%s4120_s0 + $0x690] sm:$0xff] }
  0x3b   :  { %2286 = vmatmul.msk.f32.gmra.mxu0 %vm82_vm1, %v24_v30  ;;  %2415 = vmatmul.msk.f32.gmra.mxu1 %vm82_vm1, %v2350_v31 }
  0x41   :  { %2545 = vmatmul.msk.f32.gmra.mxu2 %vm82_vm1, %v2480_v32  ;;  %2674 = vmatmul.msk.f32.gmra.mxu3 %vm82_vm1, %v2609_v33  ;;  %v36_v33 = vld [vmem:[%s4120_s0 + $0x90] sm:$0xff] }
  0x43   :  { %2287 = vmatmul.msk.f32.gmra.mxu0 %vm82_vm1, %v25_v34  ;;  %2416 = vmatmul.msk.f32.gmra.mxu1 %vm82_vm1, %v2351_v35  ;;  %v2362_v34 = vld [vmem:[%s4120_s0 + $0x290] sm:$0xff] }
  0x49   :  { %2546 = vmatmul.msk.f32.gmra.mxu2 %vm82_vm1, %v2481_v36  ;;  %2675 = vmatmul.msk.f32.gmra.mxu3 %vm82_vm1, %v2610_v37 }
  0x4b   :  { %2288 = vmatmul.msk.f32.gmra.mxu0 %vm82_vm1, %v26_v38  ;;  %2417 = vmatmul.msk.f32.gmra.mxu1 %vm82_vm1, %v2352_v39 }
  0x51   :  { %2547 = vmatmul.msk.f32.gmra.mxu2 %vm82_vm1, %v2482_v40  ;;  %2676 = vmatmul.msk.f32.gmra.mxu3 %vm82_vm1, %v2611_v41  ;;  %v2492_v41 = vld [vmem:[%s4120_s0 + $0x498] sm:$0xff] }
  0x53   :  { %2289 = vmatmul.msk.f32.gmra.mxu0 %vm82_vm1, %v27_v42  ;;  %2418 = vmatmul.msk.f32.gmra.mxu1 %vm82_vm1, %v2353_v43  ;;  %v2621_v42 = vld [vmem:[%s4120_s0 + $0x698] sm:$0xff] }
  0x59   :  { %2548 = vmatmul.msk.f32.gmra.mxu2 %vm82_vm1, %v2483_v44  ;;  %2677 = vmatmul.msk.f32.gmra.mxu3 %vm82_vm1, %v2612_v45 }
  0x5b   :  { %2290 = vmatmul.msk.f32.gmra.mxu0 %vm82_vm1, %v28_v46  ;;  %2419 = vmatmul.msk.f32.gmra.mxu1 %vm82_vm1, %v2354_v47  ;;  %v37_v46 = vld [vmem:[%s4120_s0 + $0x98] sm:$0xff] }
  0x5c   :  { %v2363_v47 = vld [vmem:[%s4120_s0 + $0x298] sm:$0xff] }
  0x61   :  { %2549 = vmatmul.msk.f32.gmra.mxu2 %vm82_vm1, %v2484_v48  ;;  %2678 = vmatmul.msk.f32.gmra.mxu3 %vm82_vm1, %v2613_v49 }
  0x63   :  { %2291 = vmatmul.msk.f32.gmra.mxu0 %vm82_vm1, %v29_v50  ;;  %2420 = vmatmul.msk.f32.gmra.mxu1 %vm82_vm1, %v2355_v51 }
  0x69   :  { %2550 = vmatmul.msk.f32.gmra.mxu2 %vm82_vm1, %v2485_v52  ;;  %2679 = vmatmul.msk.f32.gmra.mxu3 %vm82_vm1, %v2614_v53 }
  0x6b   :  { %2292 = vmatmul.msk.f32.gmra.mxu0 %vm82_vm1, %v30_v54  ;;  %2421 = vmatmul.msk.f32.gmra.mxu1 %vm82_vm1, %v2356_v55  ;;  %v2493_v54 = vld [vmem:[%s4120_s0 + $0x4a0] sm:$0xff] }
  0x6c   :  { %v2622_v55 = vld [vmem:[%s4120_s0 + $0x6a0] sm:$0xff] }
  0x71   :  { %2551 = vmatmul.msk.f32.gmra.mxu2 %vm82_vm1, %v2486_v56  ;;  %2680 = vmatmul.msk.f32.gmra.mxu3 %vm82_vm1, %v2615_v57 }
  0x73   :  { %2293 = vmatmul.msk.f32.gmra.mxu0 %vm82_vm1, %v31_v58  ;;  %2422 = vmatmul.msk.f32.gmra.mxu1 %vm82_vm1, %v2357_v59  ;;  %v38_v59 = vld [vmem:[%s4120_s0 + $0xa0] sm:$0xff] }
  0x79   :  { %2552 = vmatmul.msk.f32.gmra.mxu2 %vm82_vm1, %v2487_v60  ;;  %2681 = vmatmul.msk.f32.gmra.mxu3 %vm82_vm1, %v2616_v61  ;;  %v2364_v60 = vld [vmem:[%s4120_s0 + $0x2a0] sm:$0xff] }
  0x7b   :  { %2294 = vmatmul.msk.f32.gmra.mxu0 %vm82_vm1, %v32_v62  ;;  %2423 = vmatmul.msk.f32.gmra.mxu1 %vm82_vm1, %v2358_v63 }
  0x81   :  { %2553 = vmatmul.msk.f32.gmra.mxu2 %vm82_vm1, %v2488_v0  ;;  %2682 = vmatmul.msk.f32.gmra.mxu3 %vm82_vm1, %v2617_v1 }
  0x83   :  { %2295 = vmatmul.msk.f32.gmra.mxu0 %vm82_vm1, %v33_v2  ;;  %2424 = vmatmul.msk.f32.gmra.mxu1 %vm82_vm1, %v2359_v3  ;;  %v2494_v3 = vld [vmem:[%s4120_s0 + $0x4a8] sm:$0xff] }
  0x88   :  { %v296_v6 = vpop.f32.mrf.mxu0  ;;  %v762_v7 = vpop.f32.mrf.mxu1 }
  0x89   :  { %2554 = vmatmul.msk.f32.gmra.mxu2 %vm82_vm1, %v2489_v4  ;;  %v954_v10 = vmax.f32 %v296_v6, %v762_v7  ;;  %2683 = vmatmul.msk.f32.gmra.mxu3 %vm82_vm1, %v2618_v5  ;;  %v2623_v4 = vld [vmem:[%s4120_s0 + $0x6a8] sm:$0xff] }
  0x8b   :  { %2296 = vmatmul.msk.f32.gmra.mxu0 %vm82_vm1, %v34_v8  ;;  %2425 = vmatmul.msk.f32.gmra.mxu1 %vm82_vm1, %v2360_v9  ;;  %v39_v8 = vld [vmem:[%s4120_s0 + $0xa8] sm:$0xff] }
  0x8c   :  { %v1292_v11 = vpop.f32.mrf.mxu2  ;;  %v1822_v12 = vpop.f32.mrf.mxu3  ;;  %v2365_v9 = vld [vmem:[%s4120_s0 + $0x2a8] sm:$0xff] }
  0x8d   :  { %v1484_v13 = vmax.f32 %v954_v10, %v1292_v11 }
  0x8f   :  { %v2014_v17 = vmax.f32 %v1484_v13, %v1822_v12 }
  0x90   :  { %v299_v18 = vpop.f32.mrf.mxu0  ;;  %v765_v19 = vpop.f32.mrf.mxu1 }
  0x91   :  { %v2082_v22 = vadd.f32 %v3040_v14, %v2014_v17  ;;  %2555 = vmatmul.msk.f32.gmra.mxu2 %vm82_vm1, %v2490_v15  ;;  %v955_v23 = vmax.f32 %v299_v18, %v765_v19  ;;  %2684 = vmatmul.msk.f32.gmra.mxu3 %vm82_vm1, %v2619_v16  ;;  %v2495_v17 = vld [vmem:[%s4120_s0 + $0x4b0] sm:$0xff] }
  0x92   :  { %v2624_v18 = vld [vmem:[%s4120_s0 + $0x6b0] sm:$0xff] }
  0x93   :  { %v2146_v24 = vmax.f32 %v2082_v22, 0.0  ;;  %2297 = vmatmul.msk.f32.gmra.mxu0 %vm82_vm1, %v35_v20  ;;  %2426 = vmatmul.msk.f32.gmra.mxu1 %vm82_vm1, %v2361_v21  ;;  %v40_v22 = vld [vmem:[%s4120_s0 + $0xb0] sm:$0xff] }
  0x94   :  { %v1295_v25 = vpop.f32.mrf.mxu2  ;;  %v1825_v26 = vpop.f32.mrf.mxu3 }
  0x95   :  { %2211 = vst.msk [vmem:[%s4122_s3] sm:$0xff] %vm2210_vm2, %v2146_v24  ;;  %v1485_v27 = vmax.f32 %v955_v23, %v1295_v25  ;;  %v2366_v23 = vld [vmem:[%s4120_s0 + $0x2b0] sm:$0xff] }
  0x97   :  { %v2015_v30 = vmax.f32 %v1485_v27, %v1825_v26 }
  0x98   :  { %v302_v31 = vpop.f32.mrf.mxu0  ;;  %v768_v32 = vpop.f32.mrf.mxu1 }
  0x99   :  { %v2083_v35 = vadd.f32 %v3040_v14, %v2015_v30  ;;  %2556 = vmatmul.msk.f32.gmra.mxu2 %vm82_vm1, %v2491_v28  ;;  %v956_v36 = vmax.f32 %v302_v31, %v768_v32  ;;  %2685 = vmatmul.msk.f32.gmra.mxu3 %vm82_vm1, %v2620_v29  ;;  %v2496_v30 = vld [vmem:[%s4120_s0 + $0x4b8] sm:$0xff] }
  0x9a   :  { %v2625_v31 = vld [vmem:[%s4120_s0 + $0x6b8] sm:$0xff] }
  0x9b   :  { %v2147_v37 = vmax.f32 %v2083_v35, 0.0  ;;  %2298 = vmatmul.msk.f32.gmra.mxu0 %vm82_vm1, %v36_v33  ;;  %2427 = vmatmul.msk.f32.gmra.mxu1 %vm82_vm1, %v2362_v34  ;;  %v41_v35 = vld [vmem:[%s4120_s0 + $0xb8] sm:$0xff] }
  0x9c   :  { %v1298_v38 = vpop.f32.mrf.mxu2  ;;  %v1828_v39 = vpop.f32.mrf.mxu3 }
  0x9d   :  { %2212 = vst.msk [vmem:[%s4122_s3 + $0x8] sm:$0xff] %vm2210_vm2, %v2147_v37  ;;  %v1486_v40 = vmax.f32 %v956_v36, %v1298_v38  ;;  %v2367_v36 = vld [vmem:[%s4120_s0 + $0x2b8] sm:$0xff] }
  0x9f   :  { %v2016_v43 = vmax.f32 %v1486_v40, %v1828_v39 }
  0xa0   :  { %v305_v44 = vpop.f32.mrf.mxu0  ;;  %v771_v45 = vpop.f32.mrf.mxu1 }
  0xa1   :  { %v2084_v48 = vadd.f32 %v3040_v14, %v2016_v43  ;;  %2557 = vmatmul.msk.f32.gmra.mxu2 %vm82_vm1, %v2492_v41  ;;  %v957_v49 = vmax.f32 %v305_v44, %v771_v45  ;;  %2686 = vmatmul.msk.f32.gmra.mxu3 %vm82_vm1, %v2621_v42  ;;  %v2497_v43 = vld [vmem:[%s4120_s0 + $0x4c0] sm:$0xff] }
  0xa2   :  { %v2626_v44 = vld [vmem:[%s4120_s0 + $0x6c0] sm:$0xff] }
  0xa3   :  { %v2148_v50 = vmax.f32 %v2084_v48, 0.0  ;;  %2299 = vmatmul.msk.f32.gmra.mxu0 %vm82_vm1, %v37_v46  ;;  %2428 = vmatmul.msk.f32.gmra.mxu1 %vm82_vm1, %v2363_v47  ;;  %v42_v48 = vld [vmem:[%s4120_s0 + $0xc0] sm:$0xff] }
  0xa4   :  { %v1301_v51 = vpop.f32.mrf.mxu2  ;;  %v1831_v52 = vpop.f32.mrf.mxu3 }
  0xa5   :  { %2213 = vst.msk [vmem:[%s4122_s3 + $0x10] sm:$0xff] %vm2210_vm2, %v2148_v50  ;;  %v1487_v53 = vmax.f32 %v957_v49, %v1301_v51  ;;  %v2368_v49 = vld [vmem:[%s4120_s0 + $0x2c0] sm:$0xff] }
  0xa7   :  { %v2017_v56 = vmax.f32 %v1487_v53, %v1831_v52 }
  0xa8   :  { %v308_v57 = vpop.f32.mrf.mxu0  ;;  %v774_v58 = vpop.f32.mrf.mxu1 }
  0xa9   :  { %v2085_v61 = vadd.f32 %v3040_v14, %v2017_v56  ;;  %2558 = vmatmul.msk.f32.gmra.mxu2 %vm82_vm1, %v2493_v54  ;;  %v958_v62 = vmax.f32 %v308_v57, %v774_v58  ;;  %2687 = vmatmul.msk.f32.gmra.mxu3 %vm82_vm1, %v2622_v55  ;;  %v2498_v56 = vld [vmem:[%s4120_s0 + $0x4c8] sm:$0xff] }
  0xaa   :  { %v2627_v57 = vld [vmem:[%s4120_s0 + $0x6c8] sm:$0xff] }
  0xab   :  { %v2149_v63 = vmax.f32 %v2085_v61, 0.0  ;;  %2300 = vmatmul.msk.f32.gmra.mxu0 %vm82_vm1, %v38_v59  ;;  %2429 = vmatmul.msk.f32.gmra.mxu1 %vm82_vm1, %v2364_v60  ;;  %v43_v61 = vld [vmem:[%s4120_s0 + $0xc8] sm:$0xff] }
  0xac   :  { %v1304_v0 = vpop.f32.mrf.mxu2  ;;  %v1834_v1 = vpop.f32.mrf.mxu3 }
  0xad   :  { %2214 = vst.msk [vmem:[%s4122_s3 + $0x18] sm:$0xff] %vm2210_vm2, %v2149_v63  ;;  %v1488_v2 = vmax.f32 %v958_v62, %v1304_v0  ;;  %v2369_v62 = vld [vmem:[%s4120_s0 + $0x2c8] sm:$0xff] }
  0xaf   :  { %v2018_v5 = vmax.f32 %v1488_v2, %v1834_v1 }
  0xb0   :  { %v311_v6 = vpop.f32.mrf.mxu0  ;;  %v777_v7 = vpop.f32.mrf.mxu1 }
  0xb1   :  { %v2086_v10 = vadd.f32 %v3040_v14, %v2018_v5  ;;  %2559 = vmatmul.msk.f32.gmra.mxu2 %vm82_vm1, %v2494_v3  ;;  %v959_v11 = vmax.f32 %v311_v6, %v777_v7  ;;  %2688 = vmatmul.msk.f32.gmra.mxu3 %vm82_vm1, %v2623_v4  ;;  %v2499_v5 = vld [vmem:[%s4120_s0 + $0x4d0] sm:$0xff] }
  0xb2   :  { %v2628_v6 = vld [vmem:[%s4120_s0 + $0x6d0] sm:$0xff] }
  0xb3   :  { %v2150_v12 = vmax.f32 %v2086_v10, 0.0  ;;  %2301 = vmatmul.msk.f32.gmra.mxu0 %vm82_vm1, %v39_v8  ;;  %2430 = vmatmul.msk.f32.gmra.mxu1 %vm82_vm1, %v2365_v9  ;;  %v44_v10 = vld [vmem:[%s4120_s0 + $0xd0] sm:$0xff] }
  0xb4   :  { %v1307_v13 = vpop.f32.mrf.mxu2  ;;  %v1837_v15 = vpop.f32.mrf.mxu3 }
  0xb5   :  { %2215 = vst.msk [vmem:[%s4122_s3 + $0x20] sm:$0xff] %vm2210_vm2, %v2150_v12  ;;  %v1489_v16 = vmax.f32 %v959_v11, %v1307_v13  ;;  %v2370_v11 = vld [vmem:[%s4120_s0 + $0x2d0] sm:$0xff] }
  0xb7   :  { %v2019_v19 = vmax.f32 %v1489_v16, %v1837_v15 }
  0xb8   :  { %v314_v20 = vpop.f32.mrf.mxu0  ;;  %v780_v21 = vpop.f32.mrf.mxu1 }
  0xb9   :  { %v2087_v24 = vadd.f32 %v3040_v14, %v2019_v19  ;;  %2560 = vmatmul.msk.f32.gmra.mxu2 %vm82_vm1, %v2495_v17  ;;  %v960_v25 = vmax.f32 %v314_v20, %v780_v21  ;;  %2689 = vmatmul.msk.f32.gmra.mxu3 %vm82_vm1, %v2624_v18  ;;  %v2500_v19 = vld [vmem:[%s4120_s0 + $0x4d8] sm:$0xff] }
  0xba   :  { %v2629_v20 = vld [vmem:[%s4120_s0 + $0x6d8] sm:$0xff] }
  0xbb   :  { %v2151_v26 = vmax.f32 %v2087_v24, 0.0  ;;  %2302 = vmatmul.msk.f32.gmra.mxu0 %vm82_vm1, %v40_v22  ;;  %2431 = vmatmul.msk.f32.gmra.mxu1 %vm82_vm1, %v2366_v23  ;;  %v45_v24 = vld [vmem:[%s4120_s0 + $0xd8] sm:$0xff] }
  0xbc   :  { %v1310_v27 = vpop.f32.mrf.mxu2  ;;  %v1840_v28 = vpop.f32.mrf.mxu3 }
  0xbd   :  { %2216 = vst.msk [vmem:[%s4122_s3 + $0x28] sm:$0xff] %vm2210_vm2, %v2151_v26  ;;  %v1490_v29 = vmax.f32 %v960_v25, %v1310_v27  ;;  %v2371_v25 = vld [vmem:[%s4120_s0 + $0x2d8] sm:$0xff] }
  0xbf   :  { %v2020_v32 = vmax.f32 %v1490_v29, %v1840_v28 }
  0xc0   :  { %v317_v33 = vpop.f32.mrf.mxu0  ;;  %v783_v34 = vpop.f32.mrf.mxu1 }
  0xc1   :  { %v2088_v37 = vadd.f32 %v3040_v14, %v2020_v32  ;;  %2561 = vmatmul.msk.f32.gmra.mxu2 %vm82_vm1, %v2496_v30  ;;  %v961_v38 = vmax.f32 %v317_v33, %v783_v34  ;;  %2690 = vmatmul.msk.f32.gmra.mxu3 %vm82_vm1, %v2625_v31  ;;  %v2501_v32 = vld [vmem:[%s4120_s0 + $0x4e0] sm:$0xff] }
  0xc2   :  { %v2630_v33 = vld [vmem:[%s4120_s0 + $0x6e0] sm:$0xff] }
  0xc3   :  { %v2152_v39 = vmax.f32 %v2088_v37, 0.0  ;;  %2303 = vmatmul.msk.f32.gmra.mxu0 %vm82_vm1, %v41_v35  ;;  %2432 = vmatmul.msk.f32.gmra.mxu1 %vm82_vm1, %v2367_v36  ;;  %v46_v37 = vld [vmem:[%s4120_s0 + $0xe0] sm:$0xff] }
  0xc4   :  { %v1313_v40 = vpop.f32.mrf.mxu2  ;;  %v1843_v41 = vpop.f32.mrf.mxu3 }
  0xc5   :  { %2217 = vst.msk [vmem:[%s4122_s3 + $0x30] sm:$0xff] %vm2210_vm2, %v2152_v39  ;;  %v1491_v42 = vmax.f32 %v961_v38, %v1313_v40  ;;  %v2372_v38 = vld [vmem:[%s4120_s0 + $0x2e0] sm:$0xff] }
  0xc7   :  { %v2021_v45 = vmax.f32 %v1491_v42, %v1843_v41 }
  0xc8   :  { %v320_v46 = vpop.f32.mrf.mxu0  ;;  %v786_v47 = vpop.f32.mrf.mxu1 }
  0xc9   :  { %v2089_v50 = vadd.f32 %v3040_v14, %v2021_v45  ;;  %2562 = vmatmul.msk.f32.gmra.mxu2 %vm82_vm1, %v2497_v43  ;;  %v962_v51 = vmax.f32 %v320_v46, %v786_v47  ;;  %2691 = vmatmul.msk.f32.gmra.mxu3 %vm82_vm1, %v2626_v44  ;;  %v2502_v45 = vld [vmem:[%s4120_s0 + $0x4e8] sm:$0xff] }
  0xca   :  { %v2631_v46 = vld [vmem:[%s4120_s0 + $0x6e8] sm:$0xff] }
  0xcb   :  { %v2153_v52 = vmax.f32 %v2089_v50, 0.0  ;;  %2304 = vmatmul.msk.f32.gmra.mxu0 %vm82_vm1, %v42_v48  ;;  %2433 = vmatmul.msk.f32.gmra.mxu1 %vm82_vm1, %v2368_v49  ;;  %v47_v50 = vld [vmem:[%s4120_s0 + $0xe8] sm:$0xff] }
  0xcc   :  { %v1316_v53 = vpop.f32.mrf.mxu2  ;;  %v1846_v54 = vpop.f32.mrf.mxu3 }
  0xcd   :  { %2218 = vst.msk [vmem:[%s4122_s3 + $0x38] sm:$0xff] %vm2210_vm2, %v2153_v52  ;;  %v1492_v55 = vmax.f32 %v962_v51, %v1316_v53  ;;  %v2373_v51 = vld [vmem:[%s4120_s0 + $0x2e8] sm:$0xff] }
  0xcf   :  { %v2022_v58 = vmax.f32 %v1492_v55, %v1846_v54 }
  0xd0   :  { %v323_v59 = vpop.f32.mrf.mxu0  ;;  %v789_v60 = vpop.f32.mrf.mxu1 }
  0xd1   :  { %v2090_v63 = vadd.f32 %v3040_v14, %v2022_v58  ;;  %2563 = vmatmul.msk.f32.gmra.mxu2 %vm82_vm1, %v2498_v56  ;;  %v963_v0 = vmax.f32 %v323_v59, %v789_v60  ;;  %2692 = vmatmul.msk.f32.gmra.mxu3 %vm82_vm1, %v2627_v57  ;;  %v2503_v58 = vld [vmem:[%s4120_s0 + $0x4f0] sm:$0xff] }
  0xd2   :  { %v2632_v59 = vld [vmem:[%s4120_s0 + $0x6f0] sm:$0xff] }
  0xd3   :  { %v2154_v1 = vmax.f32 %v2090_v63, 0.0  ;;  %2305 = vmatmul.msk.f32.gmra.mxu0 %vm82_vm1, %v43_v61  ;;  %2434 = vmatmul.msk.f32.gmra.mxu1 %vm82_vm1, %v2369_v62  ;;  %v48_v63 = vld [vmem:[%s4120_s0 + $0xf0] sm:$0xff] }
  0xd4   :  { %v1319_v2 = vpop.f32.mrf.mxu2  ;;  %v1849_v3 = vpop.f32.mrf.mxu3 }
  0xd5   :  { %2219 = vst.msk [vmem:[%s4122_s3 + $0x40] sm:$0xff] %vm2210_vm2, %v2154_v1  ;;  %v1493_v4 = vmax.f32 %v963_v0, %v1319_v2  ;;  %v2374_v0 = vld [vmem:[%s4120_s0 + $0x2f0] sm:$0xff] }
  0xd7   :  { %v2023_v7 = vmax.f32 %v1493_v4, %v1849_v3 }
  0xd8   :  { %v326_v8 = vpop.f32.mrf.mxu0  ;;  %v792_v9 = vpop.f32.mrf.mxu1 }
  0xd9   :  { %v2091_v12 = vadd.f32 %v3040_v14, %v2023_v7  ;;  %2564 = vmatmul.msk.f32.gmra.mxu2 %vm82_vm1, %v2499_v5  ;;  %v964_v13 = vmax.f32 %v326_v8, %v792_v9  ;;  %2693 = vmatmul.msk.f32.gmra.mxu3 %vm82_vm1, %v2628_v6  ;;  %v2504_v7 = vld [vmem:[%s4120_s0 + $0x4f8] sm:$0xff] }
  0xda   :  { %v2633_v8 = vld [vmem:[%s4120_s0 + $0x6f8] sm:$0xff] }
  0xdb   :  { %v2155_v15 = vmax.f32 %v2091_v12, 0.0  ;;  %2306 = vmatmul.msk.f32.gmra.mxu0 %vm82_vm1, %v44_v10  ;;  %2435 = vmatmul.msk.f32.gmra.mxu1 %vm82_vm1, %v2370_v11  ;;  %v49_v12 = vld [vmem:[%s4120_s0 + $0xf8] sm:$0xff] }
  0xdc   :  { %v1322_v16 = vpop.f32.mrf.mxu2  ;;  %v1852_v17 = vpop.f32.mrf.mxu3 }
  0xdd   :  { %2220 = vst.msk [vmem:[%s4122_s3 + $0x48] sm:$0xff] %vm2210_vm2, %v2155_v15  ;;  %v1494_v18 = vmax.f32 %v964_v13, %v1322_v16  ;;  %v2375_v13 = vld [vmem:[%s4120_s0 + $0x2f8] sm:$0xff] }
  0xdf   :  { %v2024_v21 = vmax.f32 %v1494_v18, %v1852_v17 }
  0xe0   :  { %v329_v22 = vpop.f32.mrf.mxu0  ;;  %v795_v23 = vpop.f32.mrf.mxu1 }
  0xe1   :  { %v2092_v26 = vadd.f32 %v3040_v14, %v2024_v21  ;;  %2565 = vmatmul.msk.f32.gmra.mxu2 %vm82_vm1, %v2500_v19  ;;  %v965_v27 = vmax.f32 %v329_v22, %v795_v23  ;;  %2694 = vmatmul.msk.f32.gmra.mxu3 %vm82_vm1, %v2629_v20  ;;  %v2505_v21 = vld [vmem:[%s4120_s0 + $0x500] sm:$0xff] }
  0xe2   :  { %v2634_v22 = vld [vmem:[%s4120_s0 + $0x700] sm:$0xff] }
  0xe3   :  { %v2156_v28 = vmax.f32 %v2092_v26, 0.0  ;;  %2307 = vmatmul.msk.f32.gmra.mxu0 %vm82_vm1, %v45_v24  ;;  %2436 = vmatmul.msk.f32.gmra.mxu1 %vm82_vm1, %v2371_v25  ;;  %v50_v26 = vld [vmem:[%s4120_s0 + $0x100] sm:$0xff] }
  0xe4   :  { %v1325_v29 = vpop.f32.mrf.mxu2  ;;  %v1855_v30 = vpop.f32.mrf.mxu3 }
  0xe5   :  { %2221 = vst.msk [vmem:[%s4122_s3 + $0x50] sm:$0xff] %vm2210_vm2, %v2156_v28  ;;  %v1495_v31 = vmax.f32 %v965_v27, %v1325_v29  ;;  %v2376_v27 = vld [vmem:[%s4120_s0 + $0x300] sm:$0xff] }
  0xe7   :  { %v2025_v34 = vmax.f32 %v1495_v31, %v1855_v30 }
  0xe8   :  { %v332_v35 = vpop.f32.mrf.mxu0  ;;  %v798_v36 = vpop.f32.mrf.mxu1 }
  0xe9   :  { %v2093_v39 = vadd.f32 %v3040_v14, %v2025_v34  ;;  %2566 = vmatmul.msk.f32.gmra.mxu2 %vm82_vm1, %v2501_v32  ;;  %v966_v40 = vmax.f32 %v332_v35, %v798_v36  ;;  %2695 = vmatmul.msk.f32.gmra.mxu3 %vm82_vm1, %v2630_v33  ;;  %v2506_v34 = vld [vmem:[%s4120_s0 + $0x508] sm:$0xff] }
  0xea   :  { %v2635_v35 = vld [vmem:[%s4120_s0 + $0x708] sm:$0xff] }
  0xeb   :  { %v2157_v41 = vmax.f32 %v2093_v39, 0.0  ;;  %2308 = vmatmul.msk.f32.gmra.mxu0 %vm82_vm1, %v46_v37  ;;  %2437 = vmatmul.msk.f32.gmra.mxu1 %vm82_vm1, %v2372_v38  ;;  %v51_v39 = vld [vmem:[%s4120_s0 + $0x108] sm:$0xff] }
  0xec   :  { %v1328_v42 = vpop.f32.mrf.mxu2  ;;  %v1858_v43 = vpop.f32.mrf.mxu3 }
  0xed   :  { %2222 = vst.msk [vmem:[%s4122_s3 + $0x58] sm:$0xff] %vm2210_vm2, %v2157_v41  ;;  %v1496_v44 = vmax.f32 %v966_v40, %v1328_v42  ;;  %v2377_v40 = vld [vmem:[%s4120_s0 + $0x308] sm:$0xff] }
  0xef   :  { %v2026_v47 = vmax.f32 %v1496_v44, %v1858_v43 }
  0xf0   :  { %v335_v48 = vpop.f32.mrf.mxu0  ;;  %v801_v49 = vpop.f32.mrf.mxu1 }
  0xf1   :  { %v2094_v52 = vadd.f32 %v3040_v14, %v2026_v47  ;;  %2567 = vmatmul.msk.f32.gmra.mxu2 %vm82_vm1, %v2502_v45  ;;  %v967_v53 = vmax.f32 %v335_v48, %v801_v49  ;;  %2696 = vmatmul.msk.f32.gmra.mxu3 %vm82_vm1, %v2631_v46  ;;  %v2507_v47 = vld [vmem:[%s4120_s0 + $0x510] sm:$0xff] }
  0xf2   :  { %v2636_v48 = vld [vmem:[%s4120_s0 + $0x710] sm:$0xff] }
  0xf3   :  { %v2158_v54 = vmax.f32 %v2094_v52, 0.0  ;;  %2309 = vmatmul.msk.f32.gmra.mxu0 %vm82_vm1, %v47_v50  ;;  %2438 = vmatmul.msk.f32.gmra.mxu1 %vm82_vm1, %v2373_v51  ;;  %v52_v52 = vld [vmem:[%s4120_s0 + $0x110] sm:$0xff] }
  0xf4   :  { %v1331_v55 = vpop.f32.mrf.mxu2  ;;  %v1861_v56 = vpop.f32.mrf.mxu3 }
  0xf5   :  { %2223 = vst.msk [vmem:[%s4122_s3 + $0x60] sm:$0xff] %vm2210_vm2, %v2158_v54  ;;  %v1497_v57 = vmax.f32 %v967_v53, %v1331_v55  ;;  %v2378_v53 = vld [vmem:[%s4120_s0 + $0x310] sm:$0xff] }
  0xf7   :  { %v2027_v60 = vmax.f32 %v1497_v57, %v1861_v56 }
  0xf8   :  { %v338_v61 = vpop.f32.mrf.mxu0  ;;  %v804_v62 = vpop.f32.mrf.mxu1 }
  0xf9   :  { %v2095_v1 = vadd.f32 %v3040_v14, %v2027_v60  ;;  %2568 = vmatmul.msk.f32.gmra.mxu2 %vm82_vm1, %v2503_v58  ;;  %v968_v2 = vmax.f32 %v338_v61, %v804_v62  ;;  %2697 = vmatmul.msk.f32.gmra.mxu3 %vm82_vm1, %v2632_v59  ;;  %v2508_v60 = vld [vmem:[%s4120_s0 + $0x518] sm:$0xff] }
  0xfa   :  { %v2637_v61 = vld [vmem:[%s4120_s0 + $0x718] sm:$0xff] }
  0xfb   :  { %v2159_v3 = vmax.f32 %v2095_v1, 0.0  ;;  %2310 = vmatmul.msk.f32.gmra.mxu0 %vm82_vm1, %v48_v63  ;;  %2439 = vmatmul.msk.f32.gmra.mxu1 %vm82_vm1, %v2374_v0  ;;  %v53_v1 = vld [vmem:[%s4120_s0 + $0x118] sm:$0xff] }
  0xfc   :  { %v1334_v4 = vpop.f32.mrf.mxu2  ;;  %v1864_v5 = vpop.f32.mrf.mxu3 }
  0xfd   :  { %2224 = vst.msk [vmem:[%s4122_s3 + $0x68] sm:$0xff] %vm2210_vm2, %v2159_v3  ;;  %v1498_v6 = vmax.f32 %v968_v2, %v1334_v4  ;;  %v2379_v2 = vld [vmem:[%s4120_s0 + $0x318] sm:$0xff] }
  0xff   :  { %v2028_v9 = vmax.f32 %v1498_v6, %v1864_v5 }
 0x100   :  { %v341_v10 = vpop.f32.mrf.mxu0  ;;  %v807_v11 = vpop.f32.mrf.mxu1 }
 0x101   :  { %v2096_v15 = vadd.f32 %v3040_v14, %v2028_v9  ;;  %2569 = vmatmul.msk.f32.gmra.mxu2 %vm82_vm1, %v2504_v7  ;;  %v969_v16 = vmax.f32 %v341_v10, %v807_v11  ;;  %2698 = vmatmul.msk.f32.gmra.mxu3 %vm82_vm1, %v2633_v8  ;;  %v2509_v9 = vld [vmem:[%s4120_s0 + $0x520] sm:$0xff] }
 0x102   :  { %v2638_v10 = vld [vmem:[%s4120_s0 + $0x720] sm:$0xff] }
 0x103   :  { %v2160_v17 = vmax.f32 %v2096_v15, 0.0  ;;  %2311 = vmatmul.msk.f32.gmra.mxu0 %vm82_vm1, %v49_v12  ;;  %2440 = vmatmul.msk.f32.gmra.mxu1 %vm82_vm1, %v2375_v13  ;;  %v54_v15 = vld [vmem:[%s4120_s0 + $0x120] sm:$0xff] }
 0x104   :  { %v1337_v18 = vpop.f32.mrf.mxu2  ;;  %v1867_v19 = vpop.f32.mrf.mxu3 }
 0x105   :  { %2225 = vst.msk [vmem:[%s4122_s3 + $0x70] sm:$0xff] %vm2210_vm2, %v2160_v17  ;;  %v1499_v20 = vmax.f32 %v969_v16, %v1337_v18  ;;  %v2380_v16 = vld [vmem:[%s4120_s0 + $0x320] sm:$0xff] }
 0x107   :  { %v2029_v23 = vmax.f32 %v1499_v20, %v1867_v19 }
 0x108   :  { %v344_v24 = vpop.f32.mrf.mxu0  ;;  %v810_v25 = vpop.f32.mrf.mxu1 }
 0x109   :  { %v2097_v28 = vadd.f32 %v3040_v14, %v2029_v23  ;;  %2570 = vmatmul.msk.f32.gmra.mxu2 %vm82_vm1, %v2505_v21  ;;  %v970_v29 = vmax.f32 %v344_v24, %v810_v25  ;;  %2699 = vmatmul.msk.f32.gmra.mxu3 %vm82_vm1, %v2634_v22  ;;  %v2510_v23 = vld [vmem:[%s4120_s0 + $0x528] sm:$0xff] }
 0x10a   :  { %v2639_v24 = vld [vmem:[%s4120_s0 + $0x728] sm:$0xff] }
 0x10b   :  { %v2161_v30 = vmax.f32 %v2097_v28, 0.0  ;;  %2312 = vmatmul.msk.f32.gmra.mxu0 %vm82_vm1, %v50_v26  ;;  %2441 = vmatmul.msk.f32.gmra.mxu1 %vm82_vm1, %v2376_v27  ;;  %v55_v28 = vld [vmem:[%s4120_s0 + $0x128] sm:$0xff] }
 0x10c   :  { %v1340_v31 = vpop.f32.mrf.mxu2  ;;  %v1870_v32 = vpop.f32.mrf.mxu3 }
 0x10d   :  { %2226 = vst.msk [vmem:[%s4122_s3 + $0x78] sm:$0xff] %vm2210_vm2, %v2161_v30  ;;  %v1500_v33 = vmax.f32 %v970_v29, %v1340_v31  ;;  %v2381_v29 = vld [vmem:[%s4120_s0 + $0x328] sm:$0xff] }
 0x10f   :  { %v2030_v36 = vmax.f32 %v1500_v33, %v1870_v32 }
 0x110   :  { %v347_v37 = vpop.f32.mrf.mxu0  ;;  %v813_v38 = vpop.f32.mrf.mxu1 }
 0x111   :  { %v2098_v41 = vadd.f32 %v3040_v14, %v2030_v36  ;;  %2571 = vmatmul.msk.f32.gmra.mxu2 %vm82_vm1, %v2506_v34  ;;  %v971_v42 = vmax.f32 %v347_v37, %v813_v38  ;;  %2700 = vmatmul.msk.f32.gmra.mxu3 %vm82_vm1, %v2635_v35  ;;  %v2511_v36 = vld [vmem:[%s4120_s0 + $0x530] sm:$0xff] }
 0x112   :  { %v2640_v37 = vld [vmem:[%s4120_s0 + $0x730] sm:$0xff] }
 0x113   :  { %v2162_v43 = vmax.f32 %v2098_v41, 0.0  ;;  %2313 = vmatmul.msk.f32.gmra.mxu0 %vm82_vm1, %v51_v39  ;;  %2442 = vmatmul.msk.f32.gmra.mxu1 %vm82_vm1, %v2377_v40  ;;  %v56_v41 = vld [vmem:[%s4120_s0 + $0x130] sm:$0xff] }
 0x114   :  { %v1343_v44 = vpop.f32.mrf.mxu2  ;;  %v1873_v45 = vpop.f32.mrf.mxu3 }
 0x115   :  { %2227 = vst.msk [vmem:[%s4122_s3 + $0x80] sm:$0xff] %vm2210_vm2, %v2162_v43  ;;  %v1501_v46 = vmax.f32 %v971_v42, %v1343_v44  ;;  %v2382_v42 = vld [vmem:[%s4120_s0 + $0x330] sm:$0xff] }
 0x117   :  { %v2031_v49 = vmax.f32 %v1501_v46, %v1873_v45 }
 0x118   :  { %v350_v50 = vpop.f32.mrf.mxu0  ;;  %v816_v51 = vpop.f32.mrf.mxu1 }
 0x119   :  { %v2099_v54 = vadd.f32 %v3040_v14, %v2031_v49  ;;  %2572 = vmatmul.msk.f32.gmra.mxu2 %vm82_vm1, %v2507_v47  ;;  %v972_v55 = vmax.f32 %v350_v50, %v816_v51  ;;  %2701 = vmatmul.msk.f32.gmra.mxu3 %vm82_vm1, %v2636_v48  ;;  %v2512_v49 = vld [vmem:[%s4120_s0 + $0x538] sm:$0xff] }
 0x11a   :  { %v2641_v50 = vld [vmem:[%s4120_s0 + $0x738] sm:$0xff] }
 0x11b   :  { %v2163_v56 = vmax.f32 %v2099_v54, 0.0  ;;  %2314 = vmatmul.msk.f32.gmra.mxu0 %vm82_vm1, %v52_v52  ;;  %2443 = vmatmul.msk.f32.gmra.mxu1 %vm82_vm1, %v2378_v53  ;;  %v57_v54 = vld [vmem:[%s4120_s0 + $0x138] sm:$0xff] }
 0x11c   :  { %v1346_v57 = vpop.f32.mrf.mxu2  ;;  %v1876_v58 = vpop.f32.mrf.mxu3 }
 0x11d   :  { %2228 = vst.msk [vmem:[%s4122_s3 + $0x88] sm:$0xff] %vm2210_vm2, %v2163_v56  ;;  %v1502_v59 = vmax.f32 %v972_v55, %v1346_v57  ;;  %v2383_v55 = vld [vmem:[%s4120_s0 + $0x338] sm:$0xff] }
 0x11f   :  { %v2032_v62 = vmax.f32 %v1502_v59, %v1876_v58 }
 0x120   :  { %v353_v63 = vpop.f32.mrf.mxu0  ;;  %v819_v0 = vpop.f32.mrf.mxu1 }
 0x121   :  { %v2100_v3 = vadd.f32 %v3040_v14, %v2032_v62  ;;  %2573 = vmatmul.msk.f32.gmra.mxu2 %vm82_vm1, %v2508_v60  ;;  %v973_v4 = vmax.f32 %v353_v63, %v819_v0  ;;  %2702 = vmatmul.msk.f32.gmra.mxu3 %vm82_vm1, %v2637_v61  ;;  %v2513_v62 = vld [vmem:[%s4120_s0 + $0x540] sm:$0xff] }
 0x122   :  { %v2642_v63 = vld [vmem:[%s4120_s0 + $0x740] sm:$0xff] }
 0x123   :  { %v2164_v5 = vmax.f32 %v2100_v3, 0.0  ;;  %2315 = vmatmul.msk.f32.gmra.mxu0 %vm82_vm1, %v53_v1  ;;  %2444 = vmatmul.msk.f32.gmra.mxu1 %vm82_vm1, %v2379_v2  ;;  %v58_v3 = vld [vmem:[%s4120_s0 + $0x140] sm:$0xff] }
 0x124   :  { %v1349_v6 = vpop.f32.mrf.mxu2  ;;  %v1879_v7 = vpop.f32.mrf.mxu3 }
 0x125   :  { %2229 = vst.msk [vmem:[%s4122_s3 + $0x90] sm:$0xff] %vm2210_vm2, %v2164_v5  ;;  %v1503_v8 = vmax.f32 %v973_v4, %v1349_v6  ;;  %v2384_v4 = vld [vmem:[%s4120_s0 + $0x340] sm:$0xff] }
 0x127   :  { %v2033_v11 = vmax.f32 %v1503_v8, %v1879_v7 }
 0x128   :  { %v356_v12 = vpop.f32.mrf.mxu0  ;;  %v822_v13 = vpop.f32.mrf.mxu1 }
 0x129   :  { %v2101_v17 = vadd.f32 %v3040_v14, %v2033_v11  ;;  %2574 = vmatmul.msk.f32.gmra.mxu2 %vm82_vm1, %v2509_v9  ;;  %v974_v18 = vmax.f32 %v356_v12, %v822_v13  ;;  %2703 = vmatmul.msk.f32.gmra.mxu3 %vm82_vm1, %v2638_v10  ;;  %v2514_v11 = vld [vmem:[%s4120_s0 + $0x548] sm:$0xff] }
 0x12a   :  { %v2643_v12 = vld [vmem:[%s4120_s0 + $0x748] sm:$0xff] }
 0x12b   :  { %v2165_v19 = vmax.f32 %v2101_v17, 0.0  ;;  %2316 = vmatmul.msk.f32.gmra.mxu0 %vm82_vm1, %v54_v15  ;;  %2445 = vmatmul.msk.f32.gmra.mxu1 %vm82_vm1, %v2380_v16  ;;  %v59_v17 = vld [vmem:[%s4120_s0 + $0x148] sm:$0xff] }
 0x12c   :  { %v1352_v20 = vpop.f32.mrf.mxu2  ;;  %v1882_v21 = vpop.f32.mrf.mxu3 }
 0x12d   :  { %2230 = vst.msk [vmem:[%s4122_s3 + $0x98] sm:$0xff] %vm2210_vm2, %v2165_v19  ;;  %v1504_v22 = vmax.f32 %v974_v18, %v1352_v20  ;;  %v2385_v18 = vld [vmem:[%s4120_s0 + $0x348] sm:$0xff] }
 0x12f   :  { %v2034_v25 = vmax.f32 %v1504_v22, %v1882_v21 }
 0x130   :  { %v359_v26 = vpop.f32.mrf.mxu0  ;;  %v825_v27 = vpop.f32.mrf.mxu1 }
 0x131   :  { %v2102_v30 = vadd.f32 %v3040_v14, %v2034_v25  ;;  %2575 = vmatmul.msk.f32.gmra.mxu2 %vm82_vm1, %v2510_v23  ;;  %v975_v31 = vmax.f32 %v359_v26, %v825_v27  ;;  %2704 = vmatmul.msk.f32.gmra.mxu3 %vm82_vm1, %v2639_v24  ;;  %v2515_v25 = vld [vmem:[%s4120_s0 + $0x550] sm:$0xff] }
 0x132   :  { %v2644_v26 = vld [vmem:[%s4120_s0 + $0x750] sm:$0xff] }
 0x133   :  { %v2166_v32 = vmax.f32 %v2102_v30, 0.0  ;;  %2317 = vmatmul.msk.f32.gmra.mxu0 %vm82_vm1, %v55_v28  ;;  %2446 = vmatmul.msk.f32.gmra.mxu1 %vm82_vm1, %v2381_v29  ;;  %v60_v30 = vld [vmem:[%s4120_s0 + $0x150] sm:$0xff] }
 0x134   :  { %v1355_v33 = vpop.f32.mrf.mxu2  ;;  %v1885_v34 = vpop.f32.mrf.mxu3 }
 0x135   :  { %2231 = vst.msk [vmem:[%s4122_s3 + $0xa0] sm:$0xff] %vm2210_vm2, %v2166_v32  ;;  %v1505_v35 = vmax.f32 %v975_v31, %v1355_v33  ;;  %v2386_v31 = vld [vmem:[%s4120_s0 + $0x350] sm:$0xff] }
 0x137   :  { %v2035_v38 = vmax.f32 %v1505_v35, %v1885_v34 }
 0x138   :  { %v362_v39 = vpop.f32.mrf.mxu0  ;;  %v828_v40 = vpop.f32.mrf.mxu1 }
 0x139   :  { %v2103_v43 = vadd.f32 %v3040_v14, %v2035_v38  ;;  %2576 = vmatmul.msk.f32.gmra.mxu2 %vm82_vm1, %v2511_v36  ;;  %v976_v44 = vmax.f32 %v362_v39, %v828_v40  ;;  %2705 = vmatmul.msk.f32.gmra.mxu3 %vm82_vm1, %v2640_v37  ;;  %v2516_v38 = vld [vmem:[%s4120_s0 + $0x558] sm:$0xff] }
 0x13a   :  { %v2645_v39 = vld [vmem:[%s4120_s0 + $0x758] sm:$0xff] }
 0x13b   :  { %v2167_v45 = vmax.f32 %v2103_v43, 0.0  ;;  %2318 = vmatmul.msk.f32.gmra.mxu0 %vm82_vm1, %v56_v41  ;;  %2447 = vmatmul.msk.f32.gmra.mxu1 %vm82_vm1, %v2382_v42  ;;  %v61_v43 = vld [vmem:[%s4120_s0 + $0x158] sm:$0xff] }
 0x13c   :  { %v1358_v46 = vpop.f32.mrf.mxu2  ;;  %v1888_v47 = vpop.f32.mrf.mxu3 }
 0x13d   :  { %2232 = vst.msk [vmem:[%s4122_s3 + $0xa8] sm:$0xff] %vm2210_vm2, %v2167_v45  ;;  %v1506_v48 = vmax.f32 %v976_v44, %v1358_v46  ;;  %v2387_v44 = vld [vmem:[%s4120_s0 + $0x358] sm:$0xff] }
 0x13f   :  { %v2036_v51 = vmax.f32 %v1506_v48, %v1888_v47 }
 0x140   :  { %v365_v52 = vpop.f32.mrf.mxu0  ;;  %v831_v53 = vpop.f32.mrf.mxu1 }
 0x141   :  { %v2104_v56 = vadd.f32 %v3040_v14, %v2036_v51  ;;  %2577 = vmatmul.msk.f32.gmra.mxu2 %vm82_vm1, %v2512_v49  ;;  %v977_v57 = vmax.f32 %v365_v52, %v831_v53  ;;  %2706 = vmatmul.msk.f32.gmra.mxu3 %vm82_vm1, %v2641_v50  ;;  %v2517_v51 = vld [vmem:[%s4120_s0 + $0x560] sm:$0xff] }
 0x142   :  { %v2646_v52 = vld [vmem:[%s4120_s0 + $0x760] sm:$0xff] }
 0x143   :  { %v2168_v58 = vmax.f32 %v2104_v56, 0.0  ;;  %2319 = vmatmul.msk.f32.gmra.mxu0 %vm82_vm1, %v57_v54  ;;  %2448 = vmatmul.msk.f32.gmra.mxu1 %vm82_vm1, %v2383_v55  ;;  %v62_v56 = vld [vmem:[%s4120_s0 + $0x160] sm:$0xff] }
 0x144   :  { %v1361_v59 = vpop.f32.mrf.mxu2  ;;  %v1891_v60 = vpop.f32.mrf.mxu3 }
 0x145   :  { %2233 = vst.msk [vmem:[%s4122_s3 + $0xb0] sm:$0xff] %vm2210_vm2, %v2168_v58  ;;  %v1507_v61 = vmax.f32 %v977_v57, %v1361_v59  ;;  %v2388_v57 = vld [vmem:[%s4120_s0 + $0x360] sm:$0xff] }
 0x147   :  { %v2037_v0 = vmax.f32 %v1507_v61, %v1891_v60 }
 0x148   :  { %v368_v1 = vpop.f32.mrf.mxu0  ;;  %v834_v2 = vpop.f32.mrf.mxu1 }
 0x149   :  { %v2105_v5 = vadd.f32 %v3040_v14, %v2037_v0  ;;  %2578 = vmatmul.msk.f32.gmra.mxu2 %vm82_vm1, %v2513_v62  ;;  %v978_v6 = vmax.f32 %v368_v1, %v834_v2  ;;  %2707 = vmatmul.msk.f32.gmra.mxu3 %vm82_vm1, %v2642_v63  ;;  %v2647_v0 = vld [vmem:[%s4120_s0 + $0x768] sm:$0xff] }
 0x14b   :  { %v2169_v7 = vmax.f32 %v2105_v5, 0.0  ;;  %2320 = vmatmul.msk.f32.gmra.mxu0 %vm82_vm1, %v58_v3  ;;  %2449 = vmatmul.msk.f32.gmra.mxu1 %vm82_vm1, %v2384_v4  ;;  %v63_v4 = vld [vmem:[%s4120_s0 + $0x168] sm:$0xff] }
 0x14c   :  { %v1364_v8 = vpop.f32.mrf.mxu2  ;;  %v1894_v9 = vpop.f32.mrf.mxu3  ;;  %v2389_v5 = vld [vmem:[%s4120_s0 + $0x368] sm:$0xff] }
 0x14d   :  { %2234 = vst.msk [vmem:[%s4122_s3 + $0xb8] sm:$0xff] %vm2210_vm2, %v2169_v7  ;;  %v1508_v10 = vmax.f32 %v978_v6, %v1364_v8  ;;  %v3645_v6 = vld [vmem:[%s4121_s2] ss:$0 sm:$0xff] }
 0x14f   :  { %v2038_v13 = vmax.f32 %v1508_v10, %v1894_v9 }
 0x150   :  { %v371_v15 = vpop.f32.mrf.mxu0  ;;  %v837_v16 = vpop.f32.mrf.mxu1 }
 0x151   :  { %v2106_v19 = vadd.f32 %v3040_v14, %v2038_v13  ;;  %2579 = vmatmul.msk.f32.gmra.mxu2 %vm82_vm1, %v2514_v11  ;;  %v979_v20 = vmax.f32 %v371_v15, %v837_v16  ;;  %2708 = vmatmul.msk.f32.gmra.mxu3 %vm82_vm1, %v2643_v12  ;;  %v2519_v13 = vld [vmem:[%s4120_s0 + $0x570] sm:$0xff] }
 0x152   :  { %v2648_v15 = vld [vmem:[%s4120_s0 + $0x770] sm:$0xff] }
 0x153   :  { %v2170_v21 = vmax.f32 %v2106_v19, 0.0  ;;  %2321 = vmatmul.msk.f32.gmra.mxu0 %vm82_vm1, %v59_v17  ;;  %2450 = vmatmul.msk.f32.gmra.mxu1 %vm82_vm1, %v2385_v18  ;;  %v64_v19 = vld [vmem:[%s4120_s0 + $0x170] sm:$0xff] }
 0x154   :  { %v1367_v22 = vpop.f32.mrf.mxu2  ;;  %v1897_v23 = vpop.f32.mrf.mxu3 }
 0x155   :  { %2235 = vst.msk [vmem:[%s4122_s3 + $0xc0] sm:$0xff] %vm2210_vm2, %v2170_v21  ;;  %v1509_v24 = vmax.f32 %v979_v20, %v1367_v22  ;;  %v2390_v20 = vld [vmem:[%s4120_s0 + $0x370] sm:$0xff] }
 0x157   :  { %v2039_v27 = vmax.f32 %v1509_v24, %v1897_v23 }
 0x158   :  { %v374_v28 = vpop.f32.mrf.mxu0  ;;  %v840_v29 = vpop.f32.mrf.mxu1 }
 0x159   :  { %v2107_v32 = vadd.f32 %v3040_v14, %v2039_v27  ;;  %2580 = vmatmul.msk.f32.gmra.mxu2 %vm82_vm1, %v2515_v25  ;;  %v980_v33 = vmax.f32 %v374_v28, %v840_v29  ;;  %2709 = vmatmul.msk.f32.gmra.mxu3 %vm82_vm1, %v2644_v26  ;;  %v2520_v27 = vld [vmem:[%s4120_s0 + $0x578] sm:$0xff] }
 0x15a   :  { %v2649_v28 = vld [vmem:[%s4120_s0 + $0x778] sm:$0xff] }
 0x15b   :  { %v2171_v34 = vmax.f32 %v2107_v32, 0.0  ;;  %2322 = vmatmul.msk.f32.gmra.mxu0 %vm82_vm1, %v60_v30  ;;  %2451 = vmatmul.msk.f32.gmra.mxu1 %vm82_vm1, %v2386_v31  ;;  %v65_v32 = vld [vmem:[%s4120_s0 + $0x178] sm:$0xff] }
 0x15c   :  { %v1370_v35 = vpop.f32.mrf.mxu2  ;;  %v1900_v36 = vpop.f32.mrf.mxu3 }
 0x15d   :  { %2236 = vst.msk [vmem:[%s4122_s3 + $0xc8] sm:$0xff] %vm2210_vm2, %v2171_v34  ;;  %v1510_v37 = vmax.f32 %v980_v33, %v1370_v35  ;;  %v2391_v33 = vld [vmem:[%s4120_s0 + $0x378] sm:$0xff] }
 0x15f   :  { %v2040_v40 = vmax.f32 %v1510_v37, %v1900_v36 }
 0x160   :  { %v377_v41 = vpop.f32.mrf.mxu0  ;;  %v843_v42 = vpop.f32.mrf.mxu1 }
 0x161   :  { %v2108_v45 = vadd.f32 %v3040_v14, %v2040_v40  ;;  %2581 = vmatmul.msk.f32.gmra.mxu2 %vm82_vm1, %v2516_v38  ;;  %v981_v46 = vmax.f32 %v377_v41, %v843_v42  ;;  %2710 = vmatmul.msk.f32.gmra.mxu3 %vm82_vm1, %v2645_v39  ;;  %v2521_v40 = vld [vmem:[%s4120_s0 + $0x580] sm:$0xff] }
 0x162   :  { %v2650_v41 = vld [vmem:[%s4120_s0 + $0x780] sm:$0xff] }
 0x163   :  { %v2172_v47 = vmax.f32 %v2108_v45, 0.0  ;;  %2323 = vmatmul.msk.f32.gmra.mxu0 %vm82_vm1, %v61_v43  ;;  %2452 = vmatmul.msk.f32.gmra.mxu1 %vm82_vm1, %v2387_v44  ;;  %v66_v45 = vld [vmem:[%s4120_s0 + $0x180] sm:$0xff] }
 0x164   :  { %v1373_v48 = vpop.f32.mrf.mxu2  ;;  %v1903_v49 = vpop.f32.mrf.mxu3 }
 0x165   :  { %2237 = vst.msk [vmem:[%s4122_s3 + $0xd0] sm:$0xff] %vm2210_vm2, %v2172_v47  ;;  %v1511_v50 = vmax.f32 %v981_v46, %v1373_v48  ;;  %v2392_v46 = vld [vmem:[%s4120_s0 + $0x380] sm:$0xff] }
 0x167   :  { %v2041_v53 = vmax.f32 %v1511_v50, %v1903_v49 }
 0x168   :  { %v380_v54 = vpop.f32.mrf.mxu0  ;;  %v846_v55 = vpop.f32.mrf.mxu1 }
 0x169   :  { %v2109_v58 = vadd.f32 %v3040_v14, %v2041_v53  ;;  %2582 = vmatmul.msk.f32.gmra.mxu2 %vm82_vm1, %v2517_v51  ;;  %v982_v59 = vmax.f32 %v380_v54, %v846_v55  ;;  %2711 = vmatmul.msk.f32.gmra.mxu3 %vm82_vm1, %v2646_v52  ;;  %v2518_v14 = vld [vmem:[%s4120_s0 + $0x568] sm:$0xff] }
 0x16a   :  { %v2522_v53 = vld [vmem:[%s4120_s0 + $0x588] sm:$0xff] }
 0x16b   :  { %v2173_v60 = vmax.f32 %v2109_v58, 0.0  ;;  %2324 = vmatmul.msk.f32.gmra.mxu0 %vm82_vm1, %v62_v56  ;;  %2453 = vmatmul.msk.f32.gmra.mxu1 %vm82_vm1, %v2388_v57  ;;  %v2651_v54 = vld [vmem:[%s4120_s0 + $0x788] sm:$0xff] }
 0x16c   :  { %v1376_v61 = vpop.f32.mrf.mxu2  ;;  %v1906_v62 = vpop.f32.mrf.mxu3  ;;  %v67_v58 = vld [vmem:[%s4120_s0 + $0x188] sm:$0xff] }
 0x16d   :  { %2238 = vst.msk [vmem:[%s4122_s3 + $0xd8] sm:$0xff] %vm2210_vm2, %v2173_v60  ;;  %v1512_v63 = vmax.f32 %v982_v59, %v1376_v61  ;;  %v2393_v59 = vld [vmem:[%s4120_s0 + $0x388] sm:$0xff] }
 0x16f   :  { %v2042_v1 = vmax.f32 %v1512_v63, %v1906_v62 }
 0x170   :  { %v383_v2 = vpop.f32.mrf.mxu0  ;;  %v849_v3 = vpop.f32.mrf.mxu1 }
 0x171   :  { %v2110_v7 = vadd.f32 %v3645_v6, %v2042_v1  ;;  %2583 = vmatmul.msk.f32.gmra.mxu2 %vm82_vm1, %v2518_v14  ;;  %v983_v8 = vmax.f32 %v383_v2, %v849_v3  ;;  %2712 = vmatmul.msk.f32.gmra.mxu3 %vm82_vm1, %v2647_v0  ;;  %v2523_v1 = vld [vmem:[%s4120_s0 + $0x590] sm:$0xff] }
 0x172   :  { %v2652_v2 = vld [vmem:[%s4120_s0 + $0x790] sm:$0xff] }
 0x173   :  { %v2174_v9 = vmax.f32 %v2110_v7, 0.0  ;;  %2325 = vmatmul.msk.f32.gmra.mxu0 %vm82_vm1, %v63_v4  ;;  %2454 = vmatmul.msk.f32.gmra.mxu1 %vm82_vm1, %v2389_v5  ;;  %v68_v7 = vld [vmem:[%s4120_s0 + $0x190] sm:$0xff] }
 0x174   :  { %v1379_v10 = vpop.f32.mrf.mxu2  ;;  %v1909_v11 = vpop.f32.mrf.mxu3 }
 0x175   :  { %2239 = vst.msk [vmem:[%s4122_s3 + $0xe0] sm:$0xff] %vm2210_vm2, %v2174_v9  ;;  %v1513_v12 = vmax.f32 %v983_v8, %v1379_v10  ;;  %v2394_v8 = vld [vmem:[%s4120_s0 + $0x390] sm:$0xff] }
 0x177   :  { %v2043_v16 = vmax.f32 %v1513_v12, %v1909_v11 }
 0x178   :  { %v386_v17 = vpop.f32.mrf.mxu0  ;;  %v852_v18 = vpop.f32.mrf.mxu1 }
 0x179   :  { %v2111_v21 = vadd.f32 %v3645_v6, %v2043_v16  ;;  %2584 = vmatmul.msk.f32.gmra.mxu2 %vm82_vm1, %v2519_v13  ;;  %v984_v22 = vmax.f32 %v386_v17, %v852_v18  ;;  %2713 = vmatmul.msk.f32.gmra.mxu3 %vm82_vm1, %v2648_v15  ;;  %v2524_v16 = vld [vmem:[%s4120_s0 + $0x598] sm:$0xff] }
 0x17a   :  { %v2653_v17 = vld [vmem:[%s4120_s0 + $0x798] sm:$0xff] }
 0x17b   :  { %v2175_v23 = vmax.f32 %v2111_v21, 0.0  ;;  %2326 = vmatmul.msk.f32.gmra.mxu0 %vm82_vm1, %v64_v19  ;;  %2455 = vmatmul.msk.f32.gmra.mxu1 %vm82_vm1, %v2390_v20  ;;  %v69_v21 = vld [vmem:[%s4120_s0 + $0x198] sm:$0xff] }
 0x17c   :  { %v1382_v24 = vpop.f32.mrf.mxu2  ;;  %v1912_v25 = vpop.f32.mrf.mxu3 }
 0x17d   :  { %2240 = vst.msk [vmem:[%s4122_s3 + $0xe8] sm:$0xff] %vm2210_vm2, %v2175_v23  ;;  %v1514_v26 = vmax.f32 %v984_v22, %v1382_v24  ;;  %v2395_v22 = vld [vmem:[%s4120_s0 + $0x398] sm:$0xff] }
 0x17f   :  { %v2044_v29 = vmax.f32 %v1514_v26, %v1912_v25 }
 0x180   :  { %v389_v30 = vpop.f32.mrf.mxu0  ;;  %v855_v31 = vpop.f32.mrf.mxu1 }
 0x181   :  { %v2112_v34 = vadd.f32 %v3645_v6, %v2044_v29  ;;  %2585 = vmatmul.msk.f32.gmra.mxu2 %vm82_vm1, %v2520_v27  ;;  %v985_v35 = vmax.f32 %v389_v30, %v855_v31  ;;  %2714 = vmatmul.msk.f32.gmra.mxu3 %vm82_vm1, %v2649_v28  ;;  %v2525_v29 = vld [vmem:[%s4120_s0 + $0x5a0] sm:$0xff] }
 0x182   :  { %v2654_v30 = vld [vmem:[%s4120_s0 + $0x7a0] sm:$0xff] }
 0x183   :  { %v2176_v36 = vmax.f32 %v2112_v34, 0.0  ;;  %2327 = vmatmul.msk.f32.gmra.mxu0 %vm82_vm1, %v65_v32  ;;  %2456 = vmatmul.msk.f32.gmra.mxu1 %vm82_vm1, %v2391_v33  ;;  %v70_v34 = vld [vmem:[%s4120_s0 + $0x1a0] sm:$0xff] }
 0x184   :  { %v1385_v37 = vpop.f32.mrf.mxu2  ;;  %v1915_v38 = vpop.f32.mrf.mxu3 }
 0x185   :  { %2241 = vst.msk [vmem:[%s4122_s3 + $0xf0] sm:$0xff] %vm2210_vm2, %v2176_v36  ;;  %v1515_v39 = vmax.f32 %v985_v35, %v1385_v37  ;;  %v2396_v35 = vld [vmem:[%s4120_s0 + $0x3a0] sm:$0xff] }
 0x187   :  { %v2045_v42 = vmax.f32 %v1515_v39, %v1915_v38 }
 0x188   :  { %v392_v43 = vpop.f32.mrf.mxu0  ;;  %v858_v44 = vpop.f32.mrf.mxu1 }
 0x189   :  { %v2113_v47 = vadd.f32 %v3645_v6, %v2045_v42  ;;  %2586 = vmatmul.msk.f32.gmra.mxu2 %vm82_vm1, %v2521_v40  ;;  %v986_v48 = vmax.f32 %v392_v43, %v858_v44  ;;  %2715 = vmatmul.msk.f32.gmra.mxu3 %vm82_vm1, %v2650_v41  ;;  %v2526_v42 = vld [vmem:[%s4120_s0 + $0x5a8] sm:$0xff] }
 0x18a   :  { %v2655_v43 = vld [vmem:[%s4120_s0 + $0x7a8] sm:$0xff] }
 0x18b   :  { %v2177_v49 = vmax.f32 %v2113_v47, 0.0  ;;  %2328 = vmatmul.msk.f32.gmra.mxu0 %vm82_vm1, %v66_v45  ;;  %2457 = vmatmul.msk.f32.gmra.mxu1 %vm82_vm1, %v2392_v46  ;;  %v71_v47 = vld [vmem:[%s4120_s0 + $0x1a8] sm:$0xff] }
 0x18c   :  { %v1388_v50 = vpop.f32.mrf.mxu2  ;;  %v1918_v51 = vpop.f32.mrf.mxu3 }
 0x18d   :  { %2242 = vst.msk [vmem:[%s4122_s3 + $0xf8] sm:$0xff] %vm2210_vm2, %v2177_v49  ;;  %v1516_v52 = vmax.f32 %v986_v48, %v1388_v50  ;;  %v2397_v48 = vld [vmem:[%s4120_s0 + $0x3a8] sm:$0xff] }
 0x18f   :  { %v2046_v55 = vmax.f32 %v1516_v52, %v1918_v51 }
 0x190   :  { %v395_v56 = vpop.f32.mrf.mxu0  ;;  %v861_v57 = vpop.f32.mrf.mxu1 }
 0x191   :  { %v2114_v60 = vadd.f32 %v3645_v6, %v2046_v55  ;;  %2587 = vmatmul.msk.f32.gmra.mxu2 %vm82_vm1, %v2522_v53  ;;  %v987_v61 = vmax.f32 %v395_v56, %v861_v57  ;;  %2716 = vmatmul.msk.f32.gmra.mxu3 %vm82_vm1, %v2651_v54  ;;  %v2527_v55 = vld [vmem:[%s4120_s0 + $0x5b0] sm:$0xff] }
 0x192   :  { %v2656_v56 = vld [vmem:[%s4120_s0 + $0x7b0] sm:$0xff] }
 0x193   :  { %v2178_v62 = vmax.f32 %v2114_v60, 0.0  ;;  %2329 = vmatmul.msk.f32.gmra.mxu0 %vm82_vm1, %v67_v58  ;;  %2458 = vmatmul.msk.f32.gmra.mxu1 %vm82_vm1, %v2393_v59  ;;  %v72_v60 = vld [vmem:[%s4120_s0 + $0x1b0] sm:$0xff] }
 0x194   :  { %v1391_v63 = vpop.f32.mrf.mxu2  ;;  %v1921_v14 = vpop.f32.mrf.mxu3 }
 0x195   :  { %2243 = vst.msk [vmem:[%s4122_s3 + $0x100] sm:$0xff] %vm2210_vm2, %v2178_v62  ;;  %v1517_v0 = vmax.f32 %v987_v61, %v1391_v63  ;;  %v2398_v61 = vld [vmem:[%s4120_s0 + $0x3b0] sm:$0xff] }
 0x197   :  { %v2047_v3 = vmax.f32 %v1517_v0, %v1921_v14 }
 0x198   :  { %v398_v4 = vpop.f32.mrf.mxu0  ;;  %v864_v5 = vpop.f32.mrf.mxu1 }
 0x199   :  { %v2115_v9 = vadd.f32 %v3645_v6, %v2047_v3  ;;  %2588 = vmatmul.msk.f32.gmra.mxu2 %vm82_vm1, %v2523_v1  ;;  %v988_v10 = vmax.f32 %v398_v4, %v864_v5  ;;  %2717 = vmatmul.msk.f32.gmra.mxu3 %vm82_vm1, %v2652_v2  ;;  %v2528_v3 = vld [vmem:[%s4120_s0 + $0x5b8] sm:$0xff] }
 0x19a   :  { %v2657_v4 = vld [vmem:[%s4120_s0 + $0x7b8] sm:$0xff] }
 0x19b   :  { %v2179_v11 = vmax.f32 %v2115_v9, 0.0  ;;  %2330 = vmatmul.msk.f32.gmra.mxu0 %vm82_vm1, %v68_v7  ;;  %2459 = vmatmul.msk.f32.gmra.mxu1 %vm82_vm1, %v2394_v8  ;;  %v73_v9 = vld [vmem:[%s4120_s0 + $0x1b8] sm:$0xff] }
 0x19c   :  { %v1394_v12 = vpop.f32.mrf.mxu2  ;;  %v1924_v13 = vpop.f32.mrf.mxu3 }
 0x19d   :  { %2244 = vst.msk [vmem:[%s4122_s3 + $0x108] sm:$0xff] %vm2210_vm2, %v2179_v11  ;;  %v1518_v15 = vmax.f32 %v988_v10, %v1394_v12  ;;  %v2399_v10 = vld [vmem:[%s4120_s0 + $0x3b8] sm:$0xff] }
 0x19f   :  { %v2048_v18 = vmax.f32 %v1518_v15, %v1924_v13 }
 0x1a0   :  { %v401_v19 = vpop.f32.mrf.mxu0  ;;  %v867_v20 = vpop.f32.mrf.mxu1 }
 0x1a1   :  { %v2116_v23 = vadd.f32 %v3645_v6, %v2048_v18  ;;  %2589 = vmatmul.msk.f32.gmra.mxu2 %vm82_vm1, %v2524_v16  ;;  %v989_v24 = vmax.f32 %v401_v19, %v867_v20  ;;  %2718 = vmatmul.msk.f32.gmra.mxu3 %vm82_vm1, %v2653_v17  ;;  %v2529_v18 = vld [vmem:[%s4120_s0 + $0x5c0] sm:$0xff] }
 0x1a2   :  { %v2658_v19 = vld [vmem:[%s4120_s0 + $0x7c0] sm:$0xff] }
 0x1a3   :  { %v2180_v25 = vmax.f32 %v2116_v23, 0.0  ;;  %2331 = vmatmul.msk.f32.gmra.mxu0 %vm82_vm1, %v69_v21  ;;  %2460 = vmatmul.msk.f32.gmra.mxu1 %vm82_vm1, %v2395_v22  ;;  %v74_v23 = vld [vmem:[%s4120_s0 + $0x1c0] sm:$0xff] }
 0x1a4   :  { %v1397_v26 = vpop.f32.mrf.mxu2  ;;  %v1927_v27 = vpop.f32.mrf.mxu3 }
 0x1a5   :  { %2245 = vst.msk [vmem:[%s4122_s3 + $0x110] sm:$0xff] %vm2210_vm2, %v2180_v25  ;;  %v1519_v28 = vmax.f32 %v989_v24, %v1397_v26  ;;  %v2400_v24 = vld [vmem:[%s4120_s0 + $0x3c0] sm:$0xff] }
 0x1a7   :  { %v2049_v31 = vmax.f32 %v1519_v28, %v1927_v27 }
 0x1a8   :  { %v404_v32 = vpop.f32.mrf.mxu0  ;;  %v870_v33 = vpop.f32.mrf.mxu1 }
 0x1a9   :  { %v2117_v36 = vadd.f32 %v3645_v6, %v2049_v31  ;;  %2590 = vmatmul.msk.f32.gmra.mxu2 %vm82_vm1, %v2525_v29  ;;  %v990_v37 = vmax.f32 %v404_v32, %v870_v33  ;;  %2719 = vmatmul.msk.f32.gmra.mxu3 %vm82_vm1, %v2654_v30  ;;  %v2530_v31 = vld [vmem:[%s4120_s0 + $0x5c8] sm:$0xff] }
 0x1aa   :  { %v2659_v32 = vld [vmem:[%s4120_s0 + $0x7c8] sm:$0xff] }
 0x1ab   :  { %v2181_v38 = vmax.f32 %v2117_v36, 0.0  ;;  %2332 = vmatmul.msk.f32.gmra.mxu0 %vm82_vm1, %v70_v34  ;;  %2461 = vmatmul.msk.f32.gmra.mxu1 %vm82_vm1, %v2396_v35  ;;  %v75_v36 = vld [vmem:[%s4120_s0 + $0x1c8] sm:$0xff] }
 0x1ac   :  { %v1400_v39 = vpop.f32.mrf.mxu2  ;;  %v1930_v40 = vpop.f32.mrf.mxu3 }
 0x1ad   :  { %2246 = vst.msk [vmem:[%s4122_s3 + $0x118] sm:$0xff] %vm2210_vm2, %v2181_v38  ;;  %v1520_v41 = vmax.f32 %v990_v37, %v1400_v39  ;;  %v2401_v37 = vld [vmem:[%s4120_s0 + $0x3c8] sm:$0xff] }
 0x1af   :  { %v2050_v44 = vmax.f32 %v1520_v41, %v1930_v40 }
 0x1b0   :  { %v407_v45 = vpop.f32.mrf.mxu0  ;;  %v873_v46 = vpop.f32.mrf.mxu1 }
 0x1b1   :  { %v2118_v49 = vadd.f32 %v3645_v6, %v2050_v44  ;;  %2591 = vmatmul.msk.f32.gmra.mxu2 %vm82_vm1, %v2526_v42  ;;  %v991_v50 = vmax.f32 %v407_v45, %v873_v46  ;;  %2720 = vmatmul.msk.f32.gmra.mxu3 %vm82_vm1, %v2655_v43  ;;  %v2531_v44 = vld [vmem:[%s4120_s0 + $0x5d0] sm:$0xff] }
 0x1b2   :  { %v2660_v45 = vld [vmem:[%s4120_s0 + $0x7d0] sm:$0xff] }
 0x1b3   :  { %v2182_v51 = vmax.f32 %v2118_v49, 0.0  ;;  %2333 = vmatmul.msk.f32.gmra.mxu0 %vm82_vm1, %v71_v47  ;;  %2462 = vmatmul.msk.f32.gmra.mxu1 %vm82_vm1, %v2397_v48  ;;  %v76_v49 = vld [vmem:[%s4120_s0 + $0x1d0] sm:$0xff] }
 0x1b4   :  { %v1403_v52 = vpop.f32.mrf.mxu2  ;;  %v1933_v53 = vpop.f32.mrf.mxu3 }
 0x1b5   :  { %2247 = vst.msk [vmem:[%s4122_s3 + $0x120] sm:$0xff] %vm2210_vm2, %v2182_v51  ;;  %v1521_v54 = vmax.f32 %v991_v50, %v1403_v52  ;;  %v2402_v50 = vld [vmem:[%s4120_s0 + $0x3d0] sm:$0xff] }
 0x1b7   :  { %v2051_v57 = vmax.f32 %v1521_v54, %v1933_v53 }
 0x1b8   :  { %v410_v58 = vpop.f32.mrf.mxu0  ;;  %v876_v59 = vpop.f32.mrf.mxu1 }
 0x1b9   :  { %v2119_v62 = vadd.f32 %v3645_v6, %v2051_v57  ;;  %2592 = vmatmul.msk.f32.gmra.mxu2 %vm82_vm1, %v2527_v55  ;;  %v992_v63 = vmax.f32 %v410_v58, %v876_v59  ;;  %2721 = vmatmul.msk.f32.gmra.mxu3 %vm82_vm1, %v2656_v56  ;;  %v2532_v57 = vld [vmem:[%s4120_s0 + $0x5d8] sm:$0xff] }
 0x1ba   :  { %v2661_v58 = vld [vmem:[%s4120_s0 + $0x7d8] sm:$0xff] }
 0x1bb   :  { %v2183_v14 = vmax.f32 %v2119_v62, 0.0  ;;  %2334 = vmatmul.msk.f32.gmra.mxu0 %vm82_vm1, %v72_v60  ;;  %2463 = vmatmul.msk.f32.gmra.mxu1 %vm82_vm1, %v2398_v61  ;;  %v77_v62 = vld [vmem:[%s4120_s0 + $0x1d8] sm:$0xff] }
 0x1bc   :  { %v1406_v0 = vpop.f32.mrf.mxu2  ;;  %v1936_v1 = vpop.f32.mrf.mxu3 }
 0x1bd   :  { %2248 = vst.msk [vmem:[%s4122_s3 + $0x128] sm:$0xff] %vm2210_vm2, %v2183_v14  ;;  %v1522_v2 = vmax.f32 %v992_v63, %v1406_v0  ;;  %v2403_v63 = vld [vmem:[%s4120_s0 + $0x3d8] sm:$0xff] }
 0x1bf   :  { %v2052_v5 = vmax.f32 %v1522_v2, %v1936_v1 }
 0x1c0   :  { %v413_v7 = vpop.f32.mrf.mxu0  ;;  %v879_v8 = vpop.f32.mrf.mxu1 }
 0x1c1   :  { %v2120_v11 = vadd.f32 %v3645_v6, %v2052_v5  ;;  %2593 = vmatmul.msk.f32.gmra.mxu2 %vm82_vm1, %v2528_v3  ;;  %v993_v12 = vmax.f32 %v413_v7, %v879_v8  ;;  %2722 = vmatmul.msk.f32.gmra.mxu3 %vm82_vm1, %v2657_v4  ;;  %v2533_v5 = vld [vmem:[%s4120_s0 + $0x5e0] sm:$0xff] }
 0x1c2   :  { %v2662_v7 = vld [vmem:[%s4120_s0 + $0x7e0] sm:$0xff] }
 0x1c3   :  { %v2184_v13 = vmax.f32 %v2120_v11, 0.0  ;;  %2335 = vmatmul.msk.f32.gmra.mxu0 %vm82_vm1, %v73_v9  ;;  %2464 = vmatmul.msk.f32.gmra.mxu1 %vm82_vm1, %v2399_v10  ;;  %v78_v11 = vld [vmem:[%s4120_s0 + $0x1e0] sm:$0xff] }
 0x1c4   :  { %v1409_v15 = vpop.f32.mrf.mxu2  ;;  %v1939_v16 = vpop.f32.mrf.mxu3 }
 0x1c5   :  { %2249 = vst.msk [vmem:[%s4122_s3 + $0x130] sm:$0xff] %vm2210_vm2, %v2184_v13  ;;  %v1523_v17 = vmax.f32 %v993_v12, %v1409_v15  ;;  %v2404_v12 = vld [vmem:[%s4120_s0 + $0x3e0] sm:$0xff] }
 0x1c7   :  { %v2053_v20 = vmax.f32 %v1523_v17, %v1939_v16 }
 0x1c8   :  { %v416_v21 = vpop.f32.mrf.mxu0  ;;  %v882_v22 = vpop.f32.mrf.mxu1 }
 0x1c9   :  { %v2121_v25 = vadd.f32 %v3645_v6, %v2053_v20  ;;  %2594 = vmatmul.msk.f32.gmra.mxu2 %vm82_vm1, %v2529_v18  ;;  %v994_v26 = vmax.f32 %v416_v21, %v882_v22  ;;  %2723 = vmatmul.msk.f32.gmra.mxu3 %vm82_vm1, %v2658_v19  ;;  %v2534_v20 = vld [vmem:[%s4120_s0 + $0x5e8] sm:$0xff] }
 0x1ca   :  { %v2663_v21 = vld [vmem:[%s4120_s0 + $0x7e8] sm:$0xff] }
 0x1cb   :  { %v2185_v27 = vmax.f32 %v2121_v25, 0.0  ;;  %2336 = vmatmul.msk.f32.gmra.mxu0 %vm82_vm1, %v74_v23  ;;  %2465 = vmatmul.msk.f32.gmra.mxu1 %vm82_vm1, %v2400_v24  ;;  %v79_v25 = vld [vmem:[%s4120_s0 + $0x1e8] sm:$0xff] }
 0x1cc   :  { %v1412_v28 = vpop.f32.mrf.mxu2  ;;  %v1942_v29 = vpop.f32.mrf.mxu3 }
 0x1cd   :  { %2250 = vst.msk [vmem:[%s4122_s3 + $0x138] sm:$0xff] %vm2210_vm2, %v2185_v27  ;;  %v1524_v30 = vmax.f32 %v994_v26, %v1412_v28  ;;  %v2405_v26 = vld [vmem:[%s4120_s0 + $0x3e8] sm:$0xff] }
 0x1cf   :  { %v2054_v33 = vmax.f32 %v1524_v30, %v1942_v29 }
 0x1d0   :  { %v419_v34 = vpop.f32.mrf.mxu0  ;;  %v885_v35 = vpop.f32.mrf.mxu1 }
 0x1d1   :  { %v2122_v38 = vadd.f32 %v3645_v6, %v2054_v33  ;;  %2595 = vmatmul.msk.f32.gmra.mxu2 %vm82_vm1, %v2530_v31  ;;  %v995_v39 = vmax.f32 %v419_v34, %v885_v35  ;;  %2724 = vmatmul.msk.f32.gmra.mxu3 %vm82_vm1, %v2659_v32  ;;  %v2535_v33 = vld [vmem:[%s4120_s0 + $0x5f0] sm:$0xff] }
 0x1d2   :  { %v2664_v34 = vld [vmem:[%s4120_s0 + $0x7f0] sm:$0xff] }
 0x1d3   :  { %v2186_v40 = vmax.f32 %v2122_v38, 0.0  ;;  %2337 = vmatmul.msk.f32.gmra.mxu0 %vm82_vm1, %v75_v36  ;;  %2466 = vmatmul.msk.f32.gmra.mxu1 %vm82_vm1, %v2401_v37  ;;  %v80_v38 = vld [vmem:[%s4120_s0 + $0x1f0] sm:$0xff] }
 0x1d4   :  { %v1415_v41 = vpop.f32.mrf.mxu2  ;;  %v1945_v42 = vpop.f32.mrf.mxu3 }
 0x1d5   :  { %2251 = vst.msk [vmem:[%s4122_s3 + $0x140] sm:$0xff] %vm2210_vm2, %v2186_v40  ;;  %v1525_v43 = vmax.f32 %v995_v39, %v1415_v41  ;;  %v2406_v39 = vld [vmem:[%s4120_s0 + $0x3f0] sm:$0xff] }
 0x1d7   :  { %v2055_v46 = vmax.f32 %v1525_v43, %v1945_v42 }
 0x1d8   :  { %v422_v47 = vpop.f32.mrf.mxu0  ;;  %v888_v48 = vpop.f32.mrf.mxu1 }
 0x1d9   :  { %v2123_v51 = vadd.f32 %v3645_v6, %v2055_v46  ;;  %2596 = vmatmul.msk.f32.gmra.mxu2 %vm82_vm1, %v2531_v44  ;;  %v996_v52 = vmax.f32 %v422_v47, %v888_v48  ;;  %2725 = vmatmul.msk.f32.gmra.mxu3 %vm82_vm1, %v2660_v45  ;;  %v2536_v46 = vld [vmem:[%s4120_s0 + $0x5f8] sm:$0xff] }
 0x1da   :  { %v2665_v47 = vld [vmem:[%s4120_s0 + $0x7f8] sm:$0xff] }
 0x1db   :  { %v2187_v53 = vmax.f32 %v2123_v51, 0.0  ;;  %2338 = vmatmul.msk.f32.gmra.mxu0 %vm82_vm1, %v76_v49  ;;  %2467 = vmatmul.msk.f32.gmra.mxu1 %vm82_vm1, %v2402_v50  ;;  %v81_v51 = vld [vmem:[%s4120_s0 + $0x1f8] sm:$0xff] }
 0x1dc   :  { %v1418_v54 = vpop.f32.mrf.mxu2  ;;  %v1948_v55 = vpop.f32.mrf.mxu3 }
 0x1dd   :  { %2252 = vst.msk [vmem:[%s4122_s3 + $0x148] sm:$0xff] %vm2210_vm2, %v2187_v53  ;;  %v1526_v56 = vmax.f32 %v996_v52, %v1418_v54  ;;  %v2407_v52 = vld [vmem:[%s4120_s0 + $0x3f8] sm:$0xff] }
 0x1df   :  { %v2056_v59 = vmax.f32 %v1526_v56, %v1948_v55 }
 0x1e0   :  { %v425_v60 = vpop.f32.mrf.mxu0  ;;  %v891_v61 = vpop.f32.mrf.mxu1 }
 0x1e1   :  { %v2124_v14 = vadd.f32 %v3645_v6, %v2056_v59  ;;  %2597 = vmatmul.msk.f32.gmra.mxu2 %vm82_vm1, %v2532_v57  ;;  %v997_v0 = vmax.f32 %v425_v60, %v891_v61  ;;  %2726 = vmatmul.msk.f32.gmra.mxu3 %vm82_vm1, %v2661_v58 }
 0x1e3   :  { %v2188_v1 = vmax.f32 %v2124_v14, 0.0  ;;  %2339 = vmatmul.msk.f32.gmra.mxu0 %vm82_vm1, %v77_v62  ;;  %2468 = vmatmul.msk.f32.gmra.mxu1 %vm82_vm1, %v2403_v63 }
 0x1e4   :  { %v1421_v2 = vpop.f32.mrf.mxu2  ;;  %v1951_v3 = vpop.f32.mrf.mxu3 }
 0x1e5   :  { %2253 = vst.msk [vmem:[%s4122_s3 + $0x150] sm:$0xff] %vm2210_vm2, %v2188_v1  ;;  %v1527_v4 = vmax.f32 %v997_v0, %v1421_v2 }
 0x1e7   :  { %v2057_v8 = vmax.f32 %v1527_v4, %v1951_v3 }
 0x1e8   :  { %v428_v9 = vpop.f32.mrf.mxu0  ;;  %v894_v10 = vpop.f32.mrf.mxu1 }
 0x1e9   :  { %v2125_v13 = vadd.f32 %v3645_v6, %v2057_v8  ;;  %2598 = vmatmul.msk.f32.gmra.mxu2 %vm82_vm1, %v2533_v5  ;;  %v998_v15 = vmax.f32 %v428_v9, %v894_v10  ;;  %2727 = vmatmul.msk.f32.gmra.mxu3 %vm82_vm1, %v2662_v7 }
 0x1eb   :  { %v2189_v16 = vmax.f32 %v2125_v13, 0.0  ;;  %2340 = vmatmul.msk.f32.gmra.mxu0 %vm82_vm1, %v78_v11  ;;  %2469 = vmatmul.msk.f32.gmra.mxu1 %vm82_vm1, %v2404_v12 }
 0x1ec   :  { %v1424_v17 = vpop.f32.mrf.mxu2  ;;  %v1954_v18 = vpop.f32.mrf.mxu3 }
 0x1ed   :  { %2254 = vst.msk [vmem:[%s4122_s3 + $0x158] sm:$0xff] %vm2210_vm2, %v2189_v16  ;;  %v1528_v19 = vmax.f32 %v998_v15, %v1424_v17 }
 0x1ef   :  { %v2058_v22 = vmax.f32 %v1528_v19, %v1954_v18 }
 0x1f0   :  { %v431_v23 = vpop.f32.mrf.mxu0  ;;  %v897_v24 = vpop.f32.mrf.mxu1 }
 0x1f1   :  { %v2126_v27 = vadd.f32 %v3645_v6, %v2058_v22  ;;  %2599 = vmatmul.msk.f32.gmra.mxu2 %vm82_vm1, %v2534_v20  ;;  %v999_v28 = vmax.f32 %v431_v23, %v897_v24  ;;  %2728 = vmatmul.msk.f32.gmra.mxu3 %vm82_vm1, %v2663_v21 }
 0x1f3   :  { %v2190_v29 = vmax.f32 %v2126_v27, 0.0  ;;  %2341 = vmatmul.msk.f32.gmra.mxu0 %vm82_vm1, %v79_v25  ;;  %2470 = vmatmul.msk.f32.gmra.mxu1 %vm82_vm1, %v2405_v26 }
 0x1f4   :  { %v1427_v30 = vpop.f32.mrf.mxu2  ;;  %v1957_v31 = vpop.f32.mrf.mxu3 }
 0x1f5   :  { %2255 = vst.msk [vmem:[%s4122_s3 + $0x160] sm:$0xff] %vm2210_vm2, %v2190_v29  ;;  %v1529_v32 = vmax.f32 %v999_v28, %v1427_v30 }
 0x1f7   :  { %v2059_v35 = vmax.f32 %v1529_v32, %v1957_v31 }
 0x1f8   :  { %v434_v36 = vpop.f32.mrf.mxu0  ;;  %v900_v37 = vpop.f32.mrf.mxu1 }
 0x1f9   :  { %v2127_v40 = vadd.f32 %v3645_v6, %v2059_v35  ;;  %2600 = vmatmul.msk.f32.gmra.mxu2 %vm82_vm1, %v2535_v33  ;;  %v1000_v41 = vmax.f32 %v434_v36, %v900_v37  ;;  %2729 = vmatmul.msk.f32.gmra.mxu3 %vm82_vm1, %v2664_v34 }
 0x1fb   :  { %v2191_v42 = vmax.f32 %v2127_v40, 0.0  ;;  %2342 = vmatmul.msk.f32.gmra.mxu0 %vm82_vm1, %v80_v38  ;;  %2471 = vmatmul.msk.f32.gmra.mxu1 %vm82_vm1, %v2406_v39 }
 0x1fc   :  { %v1430_v43 = vpop.f32.mrf.mxu2  ;;  %v1960_v44 = vpop.f32.mrf.mxu3 }
 0x1fd   :  { %2256 = vst.msk [vmem:[%s4122_s3 + $0x168] sm:$0xff] %vm2210_vm2, %v2191_v42  ;;  %v1530_v45 = vmax.f32 %v1000_v41, %v1430_v43 }
 0x1ff   :  { %v2060_v48 = vmax.f32 %v1530_v45, %v1960_v44 }
 0x200   :  { %v437_v49 = vpop.f32.mrf.mxu0  ;;  %v903_v50 = vpop.f32.mrf.mxu1 }
 0x201   :  { %v2128_v53 = vadd.f32 %v3645_v6, %v2060_v48  ;;  %2601 = vmatmul.msk.f32.gmra.mxu2 %vm82_vm1, %v2536_v46  ;;  %v1001_v54 = vmax.f32 %v437_v49, %v903_v50  ;;  %2730 = vmatmul.msk.f32.gmra.mxu3 %vm82_vm1, %v2665_v47 }
 0x203   :  { %v2192_v55 = vmax.f32 %v2128_v53, 0.0  ;;  %2343 = vmatmul.msk.f32.gmra.mxu0 %vm82_vm1, %v81_v51  ;;  %2472 = vmatmul.msk.f32.gmra.mxu1 %vm82_vm1, %v2407_v52 }
 0x204   :  { %v1433_v56 = vpop.f32.mrf.mxu2  ;;  %v1963_v57 = vpop.f32.mrf.mxu3 }
 0x205   :  { %2257 = vst.msk [vmem:[%s4122_s3 + $0x170] sm:$0xff] %vm2210_vm2, %v2192_v55  ;;  %v1531_v58 = vmax.f32 %v1001_v54, %v1433_v56 }
 0x207   :  { %v2061_v59 = vmax.f32 %v1531_v58, %v1963_v57 }
 0x208   :  { %v440_v60 = vpop.f32.mrf.mxu0  ;;  %v906_v61 = vpop.f32.mrf.mxu1 }
 0x209   :  { %v2129_v62 = vadd.f32 %v3645_v6, %v2061_v59  ;;  %v1002_v63 = vmax.f32 %v440_v60, %v906_v61 }
 0x20b   :  { %v2193_v14 = vmax.f32 %v2129_v62, 0.0 }
 0x20c   :  { %v1436_v0 = vpop.f32.mrf.mxu2  ;;  %v1966_v1 = vpop.f32.mrf.mxu3 }
 0x20d   :  { %2258 = vst.msk [vmem:[%s4122_s3 + $0x178] sm:$0xff] %vm2210_vm2, %v2193_v14  ;;  %v1532_v2 = vmax.f32 %v1002_v63, %v1436_v0 }
 0x20f   :  { %v2062_v3 = vmax.f32 %v1532_v2, %v1966_v1 }
 0x210   :  { %v443_v4 = vpop.f32.mrf.mxu0  ;;  %v909_v5 = vpop.f32.mrf.mxu1 }
 0x211   :  { %v2130_v7 = vadd.f32 %v3645_v6, %v2062_v3  ;;  %v1003_v8 = vmax.f32 %v443_v4, %v909_v5 }
 0x213   :  { %v2194_v9 = vmax.f32 %v2130_v7, 0.0 }
 0x214   :  { %v1439_v10 = vpop.f32.mrf.mxu2  ;;  %v1969_v11 = vpop.f32.mrf.mxu3 }
 0x215   :  { %2259 = vst.msk [vmem:[%s4122_s3 + $0x180] sm:$0xff] %vm2210_vm2, %v2194_v9  ;;  %v1533_v12 = vmax.f32 %v1003_v8, %v1439_v10 }
 0x217   :  { %v2063_v13 = vmax.f32 %v1533_v12, %v1969_v11 }
 0x218   :  { %v446_v15 = vpop.f32.mrf.mxu0  ;;  %v912_v16 = vpop.f32.mrf.mxu1 }
 0x219   :  { %v2131_v17 = vadd.f32 %v3645_v6, %v2063_v13  ;;  %v1004_v18 = vmax.f32 %v446_v15, %v912_v16 }
 0x21b   :  { %v2195_v19 = vmax.f32 %v2131_v17, 0.0 }
 0x21c   :  { %v1442_v20 = vpop.f32.mrf.mxu2  ;;  %v1972_v21 = vpop.f32.mrf.mxu3 }
 0x21d   :  { %2260 = vst.msk [vmem:[%s4122_s3 + $0x188] sm:$0xff] %vm2210_vm2, %v2195_v19  ;;  %v1534_v22 = vmax.f32 %v1004_v18, %v1442_v20 }
 0x21f   :  { %v2064_v23 = vmax.f32 %v1534_v22, %v1972_v21 }
 0x220   :  { %v449_v24 = vpop.f32.mrf.mxu0  ;;  %v915_v25 = vpop.f32.mrf.mxu1 }
 0x221   :  { %v2132_v26 = vadd.f32 %v3645_v6, %v2064_v23  ;;  %v1005_v27 = vmax.f32 %v449_v24, %v915_v25 }
 0x223   :  { %v2196_v28 = vmax.f32 %v2132_v26, 0.0 }
 0x224   :  { %v1445_v29 = vpop.f32.mrf.mxu2  ;;  %v1975_v30 = vpop.f32.mrf.mxu3 }
 0x225   :  { %2261 = vst.msk [vmem:[%s4122_s3 + $0x190] sm:$0xff] %vm2210_vm2, %v2196_v28  ;;  %v1535_v31 = vmax.f32 %v1005_v27, %v1445_v29 }
 0x227   :  { %v2065_v32 = vmax.f32 %v1535_v31, %v1975_v30 }
 0x228   :  { %v452_v33 = vpop.f32.mrf.mxu0  ;;  %v918_v34 = vpop.f32.mrf.mxu1 }
 0x229   :  { %v2133_v35 = vadd.f32 %v3645_v6, %v2065_v32  ;;  %v1006_v36 = vmax.f32 %v452_v33, %v918_v34 }
 0x22b   :  { %v2197_v37 = vmax.f32 %v2133_v35, 0.0 }
 0x22c   :  { %v1448_v38 = vpop.f32.mrf.mxu2  ;;  %v1978_v39 = vpop.f32.mrf.mxu3 }
 0x22d   :  { %2262 = vst.msk [vmem:[%s4122_s3 + $0x198] sm:$0xff] %vm2210_vm2, %v2197_v37  ;;  %v1536_v40 = vmax.f32 %v1006_v36, %v1448_v38 }
 0x22f   :  { %v2066_v41 = vmax.f32 %v1536_v40, %v1978_v39 }
 0x230   :  { %v455_v42 = vpop.f32.mrf.mxu0  ;;  %v921_v43 = vpop.f32.mrf.mxu1 }
 0x231   :  { %v2134_v44 = vadd.f32 %v3645_v6, %v2066_v41  ;;  %v1007_v45 = vmax.f32 %v455_v42, %v921_v43 }
 0x233   :  { %v2198_v46 = vmax.f32 %v2134_v44, 0.0 }
 0x234   :  { %v1451_v47 = vpop.f32.mrf.mxu2  ;;  %v1981_v48 = vpop.f32.mrf.mxu3 }
 0x235   :  { %2263 = vst.msk [vmem:[%s4122_s3 + $0x1a0] sm:$0xff] %vm2210_vm2, %v2198_v46  ;;  %v1537_v49 = vmax.f32 %v1007_v45, %v1451_v47 }
 0x237   :  { %v2067_v50 = vmax.f32 %v1537_v49, %v1981_v48 }
 0x238   :  { %v458_v51 = vpop.f32.mrf.mxu0  ;;  %v924_v52 = vpop.f32.mrf.mxu1 }
 0x239   :  { %v2135_v53 = vadd.f32 %v3645_v6, %v2067_v50  ;;  %v1008_v54 = vmax.f32 %v458_v51, %v924_v52 }
 0x23b   :  { %v2199_v55 = vmax.f32 %v2135_v53, 0.0 }
 0x23c   :  { %v1454_v56 = vpop.f32.mrf.mxu2  ;;  %v1984_v57 = vpop.f32.mrf.mxu3 }
 0x23d   :  { %2264 = vst.msk [vmem:[%s4122_s3 + $0x1a8] sm:$0xff] %vm2210_vm2, %v2199_v55  ;;  %v1538_v58 = vmax.f32 %v1008_v54, %v1454_v56 }
 0x23f   :  { %v2068_v59 = vmax.f32 %v1538_v58, %v1984_v57 }
 0x240   :  { %v461_v60 = vpop.f32.mrf.mxu0  ;;  %v927_v61 = vpop.f32.mrf.mxu1 }
 0x241   :  { %v2136_v62 = vadd.f32 %v3645_v6, %v2068_v59  ;;  %v1009_v63 = vmax.f32 %v461_v60, %v927_v61 }
 0x243   :  { %v2200_v14 = vmax.f32 %v2136_v62, 0.0 }
 0x244   :  { %v1457_v0 = vpop.f32.mrf.mxu2  ;;  %v1987_v1 = vpop.f32.mrf.mxu3 }
 0x245   :  { %2265 = vst.msk [vmem:[%s4122_s3 + $0x1b0] sm:$0xff] %vm2210_vm2, %v2200_v14  ;;  %v1539_v2 = vmax.f32 %v1009_v63, %v1457_v0 }
 0x247   :  { %v2069_v3 = vmax.f32 %v1539_v2, %v1987_v1 }
 0x248   :  { %v464_v4 = vpop.f32.mrf.mxu0  ;;  %v930_v5 = vpop.f32.mrf.mxu1 }
 0x249   :  { %v2137_v7 = vadd.f32 %v3645_v6, %v2069_v3  ;;  %v1010_v8 = vmax.f32 %v464_v4, %v930_v5 }
 0x24b   :  { %v2201_v9 = vmax.f32 %v2137_v7, 0.0 }
 0x24c   :  { %v1460_v10 = vpop.f32.mrf.mxu2  ;;  %v1990_v11 = vpop.f32.mrf.mxu3 }
 0x24d   :  { %2266 = vst.msk [vmem:[%s4122_s3 + $0x1b8] sm:$0xff] %vm2210_vm2, %v2201_v9  ;;  %v1540_v12 = vmax.f32 %v1010_v8, %v1460_v10 }
 0x24f   :  { %v2070_v13 = vmax.f32 %v1540_v12, %v1990_v11 }
 0x250   :  { %v467_v15 = vpop.f32.mrf.mxu0  ;;  %v933_v16 = vpop.f32.mrf.mxu1 }
 0x251   :  { %v2138_v17 = vadd.f32 %v3645_v6, %v2070_v13  ;;  %v1011_v18 = vmax.f32 %v467_v15, %v933_v16 }
 0x253   :  { %v2202_v19 = vmax.f32 %v2138_v17, 0.0 }
 0x254   :  { %v1463_v20 = vpop.f32.mrf.mxu2  ;;  %v1993_v21 = vpop.f32.mrf.mxu3 }
 0x255   :  { %2267 = vst.msk [vmem:[%s4122_s3 + $0x1c0] sm:$0xff] %vm2210_vm2, %v2202_v19  ;;  %v1541_v22 = vmax.f32 %v1011_v18, %v1463_v20 }
 0x257   :  { %v2071_v23 = vmax.f32 %v1541_v22, %v1993_v21 }
 0x258   :  { %v470_v24 = vpop.f32.mrf.mxu0  ;;  %v936_v25 = vpop.f32.mrf.mxu1 }
 0x259   :  { %v2139_v26 = vadd.f32 %v3645_v6, %v2071_v23  ;;  %v1012_v27 = vmax.f32 %v470_v24, %v936_v25 }
 0x25b   :  { %v2203_v28 = vmax.f32 %v2139_v26, 0.0 }
 0x25c   :  { %v1466_v29 = vpop.f32.mrf.mxu2  ;;  %v1996_v30 = vpop.f32.mrf.mxu3 }
 0x25d   :  { %2268 = vst.msk [vmem:[%s4122_s3 + $0x1c8] sm:$0xff] %vm2210_vm2, %v2203_v28  ;;  %v1542_v31 = vmax.f32 %v1012_v27, %v1466_v29 }
 0x25f   :  { %v2072_v32 = vmax.f32 %v1542_v31, %v1996_v30 }
 0x260   :  { %v473_v33 = vpop.f32.mrf.mxu0  ;;  %v939_v34 = vpop.f32.mrf.mxu1 }
 0x261   :  { %v2140_v35 = vadd.f32 %v3645_v6, %v2072_v32  ;;  %v1013_v36 = vmax.f32 %v473_v33, %v939_v34 }
 0x263   :  { %v2204_v37 = vmax.f32 %v2140_v35, 0.0 }
 0x264   :  { %v1469_v38 = vpop.f32.mrf.mxu2  ;;  %v1999_v39 = vpop.f32.mrf.mxu3 }
 0x265   :  { %2269 = vst.msk [vmem:[%s4122_s3 + $0x1d0] sm:$0xff] %vm2210_vm2, %v2204_v37  ;;  %v1543_v40 = vmax.f32 %v1013_v36, %v1469_v38 }
 0x267   :  { %v2073_v41 = vmax.f32 %v1543_v40, %v1999_v39 }
 0x268   :  { %v476_v42 = vpop.f32.mrf.mxu0  ;;  %v942_v43 = vpop.f32.mrf.mxu1 }
 0x269   :  { %v2141_v44 = vadd.f32 %v3645_v6, %v2073_v41  ;;  %v1014_v45 = vmax.f32 %v476_v42, %v942_v43 }
 0x26b   :  { %v2205_v46 = vmax.f32 %v2141_v44, 0.0 }
 0x26c   :  { %v1472_v47 = vpop.f32.mrf.mxu2  ;;  %v2002_v48 = vpop.f32.mrf.mxu3 }
 0x26d   :  { %2270 = vst.msk [vmem:[%s4122_s3 + $0x1d8] sm:$0xff] %vm2210_vm2, %v2205_v46  ;;  %v1544_v49 = vmax.f32 %v1014_v45, %v1472_v47 }
 0x26f   :  { %v2074_v50 = vmax.f32 %v1544_v49, %v2002_v48 }
 0x270   :  { %v479_v51 = vpop.f32.mrf.mxu0  ;;  %v945_v52 = vpop.f32.mrf.mxu1 }
 0x271   :  { %v2142_v53 = vadd.f32 %v3645_v6, %v2074_v50  ;;  %v1015_v54 = vmax.f32 %v479_v51, %v945_v52 }
 0x273   :  { %v2206_v55 = vmax.f32 %v2142_v53, 0.0 }
 0x274   :  { %v1475_v56 = vpop.f32.mrf.mxu2  ;;  %v2005_v57 = vpop.f32.mrf.mxu3 }
 0x275   :  { %2271 = vst.msk [vmem:[%s4122_s3 + $0x1e0] sm:$0xff] %vm2210_vm2, %v2206_v55  ;;  %v1545_v58 = vmax.f32 %v1015_v54, %v1475_v56 }
 0x277   :  { %v2075_v59 = vmax.f32 %v1545_v58, %v2005_v57 }
 0x278   :  { %v482_v60 = vpop.f32.mrf.mxu0  ;;  %v948_v61 = vpop.f32.mrf.mxu1 }
 0x279   :  { %v2143_v62 = vadd.f32 %v3645_v6, %v2075_v59  ;;  %v1016_v63 = vmax.f32 %v482_v60, %v948_v61 }
 0x27b   :  { %v2207_v14 = vmax.f32 %v2143_v62, 0.0 }
 0x27c   :  { %v1478_v0 = vpop.f32.mrf.mxu2  ;;  %v2008_v1 = vpop.f32.mrf.mxu3 }
 0x27d   :  { %2272 = vst.msk [vmem:[%s4122_s3 + $0x1e8] sm:$0xff] %vm2210_vm2, %v2207_v14  ;;  %v1546_v2 = vmax.f32 %v1016_v63, %v1478_v0 }
 0x27f   :  { %v2076_v3 = vmax.f32 %v1546_v2, %v2008_v1 }
 0x280   :  { %v485_v4 = vpop.f32.mrf.mxu0  ;;  %v951_v5 = vpop.f32.mrf.mxu1 }
 0x281   :  { %v2144_v7 = vadd.f32 %v3645_v6, %v2076_v3  ;;  %v1017_v8 = vmax.f32 %v485_v4, %v951_v5 }
 0x283   :  { %v2208_v9 = vmax.f32 %v2144_v7, 0.0 }
 0x284   :  { %v1481_v10 = vpop.f32.mrf.mxu2  ;;  %v2011_v11 = vpop.f32.mrf.mxu3 }
 0x285   :  { %2273 = vst.msk [vmem:[%s4122_s3 + $0x1f0] sm:$0xff] %vm2210_vm2, %v2208_v9  ;;  %v1547_v12 = vmax.f32 %v1017_v8, %v1481_v10 }
 0x287   :  { %v2077_v13 = vmax.f32 %v1547_v12, %v2011_v11 }
 0x289   :  { %v2145_v15 = vadd.f32 %v3645_v6, %v2077_v13 }
 0x28b   :  { %v2209_v16 = vmax.f32 %v2145_v15, 0.0 }
 0x28d   :  { %2274 = vst.msk [vmem:[%s4122_s3 + $0x1f8] sm:$0xff] %vm2210_vm2, %v2209_v16 }

// kernel: vgg_adversarial_forward.11
= control target key start
LH: loop header
LB: loop body
LE: loop exit
PB: predicated region body
PF: predicated region fallthrough
CT: control target
= control target key end

     0   :  { %vm39_vm0 = vcmask 588800   ;;  %vm627_vm1 = vcmask 130048   ;;  %s1149_s1 = inlined_call_operand.vmem [shape: f32[72,16], index: 1, kind: input, shape index: {}]   ;;  %s1150_s0 = inlined_call_operand.vmem [shape: f32[4,128,72], index: 0, kind: input, shape index: {}]   ;;  %s1151_s2 = inlined_call_operand.vmem [shape: f32[1,16], index: 2, kind: input, shape index: {}]   ;;  %s1152_s3 = inlined_call_operand.vmem [shape: f32[128,16], index: 3, kind: output, shape index: {}]  }
   0x1   :  { %v22_v0 = vld [vmem:[%s1149_s1 + $0x40] sm:$0xff]  ;;  %v21_v1 = vld [vmem:[%s1149_s1 + $0x38] sm:$0xff]  ;;  %v20_v2 = vld [vmem:[%s1149_s1 + $0x30] sm:$0xff] }
   0x2   :  { %371 = vmatpush.msra.mxu2 %v22_v0  ;;  %517 = vmatpush.msra.mxu3 %v22_v0  ;;  %v19_v3 = vld [vmem:[%s1149_s1 + $0x28] sm:$0xff]  ;;  %v18_v4 = vld [vmem:[%s1149_s1 + $0x20] sm:$0xff]  ;;  %v17_v5 = vld [vmem:[%s1149_s1 + $0x18] sm:$0xff] }
   0x3   :  { %95 = vmatpush.msra.mxu0 %v22_v0  ;;  %225 = vmatpush.msra.mxu1 %v22_v0  ;;  %v16_v6 = vld [vmem:[%s1149_s1 + $0x10] sm:$0xff]  ;;  %v15_v7 = vld [vmem:[%s1149_s1 + $0x8] sm:$0xff]  ;;  %v14_v8 = vld [vmem:[%s1149_s1] sm:$0xff] }
   0x4   :  { %372 = vmatpush.msra.mxu2 %v21_v1  ;;  %518 = vmatpush.msra.mxu3 %v21_v1  ;;  %v696_v9 = vld [vmem:[%s1150_s0 + $0x100] sm:$0xff]  ;;  %v697_v13 = vld [vmem:[%s1150_s0 + $0x108] sm:$0xff]  ;;  %v698_v17 = vld [vmem:[%s1150_s0 + $0x110] sm:$0xff] }
   0x5   :  { %96 = vmatpush.msra.mxu0 %v21_v1  ;;  %226 = vmatpush.msra.mxu1 %v21_v1  ;;  %v728_v10 = vld [vmem:[%s1150_s0 + $0x180] sm:$0xff]  ;;  %v729_v14 = vld [vmem:[%s1150_s0 + $0x188] sm:$0xff]  ;;  %v730_v18 = vld [vmem:[%s1150_s0 + $0x190] sm:$0xff] }
   0x6   :  { %373 = vmatpush.msra.mxu2 %v20_v2  ;;  %519 = vmatpush.msra.mxu3 %v20_v2  ;;  %v23_v11 = vld [vmem:[%s1150_s0] sm:$0xff]  ;;  %v24_v15 = vld [vmem:[%s1150_s0 + $0x8] sm:$0xff]  ;;  %v25_v19 = vld [vmem:[%s1150_s0 + $0x10] sm:$0xff] }
   0x7   :  { %97 = vmatpush.msra.mxu0 %v20_v2  ;;  %227 = vmatpush.msra.mxu1 %v20_v2  ;;  %v664_v12 = vld [vmem:[%s1150_s0 + $0x80] sm:$0xff]  ;;  %v665_v16 = vld [vmem:[%s1150_s0 + $0x88] sm:$0xff]  ;;  %v666_v20 = vld [vmem:[%s1150_s0 + $0x90] sm:$0xff] }
   0x8   :  { %374 = vmatpush.msra.mxu2 %v19_v3  ;;  %520 = vmatpush.msra.mxu3 %v19_v3  ;;  %v699_v21 = vld [vmem:[%s1150_s0 + $0x118] sm:$0xff]  ;;  %v700_v25 = vld [vmem:[%s1150_s0 + $0x120] sm:$0xff]  ;;  %v701_v29 = vld [vmem:[%s1150_s0 + $0x128] sm:$0xff] }
   0x9   :  { %98 = vmatpush.msra.mxu0 %v19_v3  ;;  %228 = vmatpush.msra.mxu1 %v19_v3  ;;  %v731_v22 = vld [vmem:[%s1150_s0 + $0x198] sm:$0xff]  ;;  %v732_v26 = vld [vmem:[%s1150_s0 + $0x1a0] sm:$0xff]  ;;  %v733_v30 = vld [vmem:[%s1150_s0 + $0x1a8] sm:$0xff] }
   0xa   :  { %375 = vmatpush.msra.mxu2 %v18_v4  ;;  %521 = vmatpush.msra.mxu3 %v18_v4  ;;  %v26_v23 = vld [vmem:[%s1150_s0 + $0x18] sm:$0xff]  ;;  %v27_v27 = vld [vmem:[%s1150_s0 + $0x20] sm:$0xff]  ;;  %v28_v31 = vld [vmem:[%s1150_s0 + $0x28] sm:$0xff] }
   0xb   :  { %99 = vmatpush.msra.mxu0 %v18_v4  ;;  %229 = vmatpush.msra.mxu1 %v18_v4  ;;  %v667_v24 = vld [vmem:[%s1150_s0 + $0x98] sm:$0xff]  ;;  %v668_v28 = vld [vmem:[%s1150_s0 + $0xa0] sm:$0xff]  ;;  %v669_v32 = vld [vmem:[%s1150_s0 + $0xa8] sm:$0xff] }
   0xc   :  { %376 = vmatpush.msra.mxu2 %v17_v5  ;;  %522 = vmatpush.msra.mxu3 %v17_v5  ;;  %v702_v33 = vld [vmem:[%s1150_s0 + $0x130] sm:$0xff]  ;;  %v703_v37 = vld [vmem:[%s1150_s0 + $0x138] sm:$0xff]  ;;  %v704_v41 = vld [vmem:[%s1150_s0 + $0x140] sm:$0xff] }
   0xd   :  { %100 = vmatpush.msra.mxu0 %v17_v5  ;;  %230 = vmatpush.msra.mxu1 %v17_v5  ;;  %v734_v34 = vld [vmem:[%s1150_s0 + $0x1b0] sm:$0xff]  ;;  %v735_v38 = vld [vmem:[%s1150_s0 + $0x1b8] sm:$0xff]  ;;  %v736_v42 = vld [vmem:[%s1150_s0 + $0x1c0] sm:$0xff] }
   0xe   :  { %377 = vmatpush.msra.mxu2 %v16_v6  ;;  %523 = vmatpush.msra.mxu3 %v16_v6  ;;  %v29_v35 = vld [vmem:[%s1150_s0 + $0x30] sm:$0xff]  ;;  %v30_v39 = vld [vmem:[%s1150_s0 + $0x38] sm:$0xff]  ;;  %v31_v43 = vld [vmem:[%s1150_s0 + $0x40] sm:$0xff] }
   0xf   :  { %101 = vmatpush.msra.mxu0 %v16_v6  ;;  %231 = vmatpush.msra.mxu1 %v16_v6  ;;  %v670_v36 = vld [vmem:[%s1150_s0 + $0xb0] sm:$0xff]  ;;  %v671_v40 = vld [vmem:[%s1150_s0 + $0xb8] sm:$0xff]  ;;  %v672_v44 = vld [vmem:[%s1150_s0 + $0xc0] sm:$0xff] }
  0x10   :  { %378 = vmatpush.msra.mxu2 %v15_v7  ;;  %524 = vmatpush.msra.mxu3 %v15_v7  ;;  %v705_v45 = vld [vmem:[%s1150_s0 + $0x148] sm:$0xff]  ;;  %v706_v49 = vld [vmem:[%s1150_s0 + $0x150] sm:$0xff]  ;;  %v707_v53 = vld [vmem:[%s1150_s0 + $0x158] sm:$0xff] }
  0x11   :  { %102 = vmatpush.msra.mxu0 %v15_v7  ;;  %232 = vmatpush.msra.mxu1 %v15_v7  ;;  %v737_v46 = vld [vmem:[%s1150_s0 + $0x1c8] sm:$0xff]  ;;  %v738_v50 = vld [vmem:[%s1150_s0 + $0x1d0] sm:$0xff]  ;;  %v739_v54 = vld [vmem:[%s1150_s0 + $0x1d8] sm:$0xff] }
  0x12   :  { %379 = vmatpush.msra.mxu2 %v14_v8  ;;  %525 = vmatpush.msra.mxu3 %v14_v8  ;;  %v32_v47 = vld [vmem:[%s1150_s0 + $0x48] sm:$0xff]  ;;  %v33_v51 = vld [vmem:[%s1150_s0 + $0x50] sm:$0xff]  ;;  %v34_v55 = vld [vmem:[%s1150_s0 + $0x58] sm:$0xff] }
  0x13   :  { %712 = vmatmul.msk.f32.vlgmr.msra.gmra.mxu2 %vm39_vm0, %v696_v9  ;;  %744 = vmatmul.msk.f32.vlgmr.msra.gmra.mxu3 %vm39_vm0, %v728_v10  ;;  %v673_v48 = vld [vmem:[%s1150_s0 + $0xc8] sm:$0xff]  ;;  %v674_v52 = vld [vmem:[%s1150_s0 + $0xd0] sm:$0xff]  ;;  %v675_v56 = vld [vmem:[%s1150_s0 + $0xd8] sm:$0xff] }
  0x14   :  { %103 = vmatpush.msra.mxu0 %v14_v8  ;;  %233 = vmatpush.msra.mxu1 %v14_v8  ;;  %v708_v57 = vld [vmem:[%s1150_s0 + $0x160] sm:$0xff]  ;;  %v709_v61 = vld [vmem:[%s1150_s0 + $0x168] sm:$0xff]  ;;  %v710_v1 = vld [vmem:[%s1150_s0 + $0x170] sm:$0xff] }
  0x15   :  { %648 = vmatmul.msk.f32.vlgmr.msra.gmra.mxu0 %vm39_vm0, %v23_v11  ;;  %680 = vmatmul.msk.f32.vlgmr.msra.gmra.mxu1 %vm39_vm0, %v664_v12  ;;  %v740_v58 = vld [vmem:[%s1150_s0 + $0x1e0] sm:$0xff]  ;;  %v741_v62 = vld [vmem:[%s1150_s0 + $0x1e8] sm:$0xff]  ;;  %v742_v2 = vld [vmem:[%s1150_s0 + $0x1f0] sm:$0xff] }
  0x16   :  { %v35_v59 = vld [vmem:[%s1150_s0 + $0x60] sm:$0xff]  ;;  %v36_v63 = vld [vmem:[%s1150_s0 + $0x68] sm:$0xff]  ;;  %v37_v3 = vld [vmem:[%s1150_s0 + $0x70] sm:$0xff] }
  0x17   :  { %v676_v60 = vld [vmem:[%s1150_s0 + $0xe0] sm:$0xff]  ;;  %v677_v0 = vld [vmem:[%s1150_s0 + $0xe8] sm:$0xff]  ;;  %v678_v4 = vld [vmem:[%s1150_s0 + $0xf0] sm:$0xff] }
  0x18   :  { %v711_v5 = vld [vmem:[%s1150_s0 + $0x178] sm:$0xff] }
  0x19   :  { %v743_v6 = vld [vmem:[%s1150_s0 + $0x1f8] sm:$0xff] }
  0x1a   :  { %v38_v7 = vld [vmem:[%s1150_s0 + $0x78] sm:$0xff] }
  0x1b   :  { %713 = vmatmul.msk.f32.gmra.mxu2 %vm39_vm0, %v697_v13  ;;  %745 = vmatmul.msk.f32.gmra.mxu3 %vm39_vm0, %v729_v14  ;;  %v679_v8 = vld [vmem:[%s1150_s0 + $0xf8] sm:$0xff] }
  0x1d   :  { %649 = vmatmul.msk.f32.gmra.mxu0 %vm39_vm0, %v24_v15  ;;  %681 = vmatmul.msk.f32.gmra.mxu1 %vm39_vm0, %v665_v16  ;;  %v1067_v15 = vld [vmem:[%s1151_s2] ss:$0 sm:$0xff] }
  0x23   :  { %714 = vmatmul.msk.f32.gmra.mxu2 %vm39_vm0, %v698_v17  ;;  %746 = vmatmul.msk.f32.gmra.mxu3 %vm39_vm0, %v730_v18 }
  0x25   :  { %650 = vmatmul.msk.f32.gmra.mxu0 %vm39_vm0, %v25_v19  ;;  %682 = vmatmul.msk.f32.gmra.mxu1 %vm39_vm0, %v666_v20 }
  0x2b   :  { %715 = vmatmul.msk.f32.gmra.mxu2 %vm39_vm0, %v699_v21  ;;  %747 = vmatmul.msk.f32.gmra.mxu3 %vm39_vm0, %v731_v22 }
  0x2d   :  { %651 = vmatmul.msk.f32.gmra.mxu0 %vm39_vm0, %v26_v23  ;;  %683 = vmatmul.msk.f32.gmra.mxu1 %vm39_vm0, %v667_v24 }
  0x33   :  { %716 = vmatmul.msk.f32.gmra.mxu2 %vm39_vm0, %v700_v25  ;;  %748 = vmatmul.msk.f32.gmra.mxu3 %vm39_vm0, %v732_v26 }
  0x35   :  { %652 = vmatmul.msk.f32.gmra.mxu0 %vm39_vm0, %v27_v27  ;;  %684 = vmatmul.msk.f32.gmra.mxu1 %vm39_vm0, %v668_v28 }
  0x3b   :  { %717 = vmatmul.msk.f32.gmra.mxu2 %vm39_vm0, %v701_v29  ;;  %749 = vmatmul.msk.f32.gmra.mxu3 %vm39_vm0, %v733_v30 }
  0x3d   :  { %653 = vmatmul.msk.f32.gmra.mxu0 %vm39_vm0, %v28_v31  ;;  %685 = vmatmul.msk.f32.gmra.mxu1 %vm39_vm0, %v669_v32 }
  0x43   :  { %718 = vmatmul.msk.f32.gmra.mxu2 %vm39_vm0, %v702_v33  ;;  %750 = vmatmul.msk.f32.gmra.mxu3 %vm39_vm0, %v734_v34 }
  0x45   :  { %654 = vmatmul.msk.f32.gmra.mxu0 %vm39_vm0, %v29_v35  ;;  %686 = vmatmul.msk.f32.gmra.mxu1 %vm39_vm0, %v670_v36 }
  0x4b   :  { %719 = vmatmul.msk.f32.gmra.mxu2 %vm39_vm0, %v703_v37  ;;  %751 = vmatmul.msk.f32.gmra.mxu3 %vm39_vm0, %v735_v38 }
  0x4d   :  { %655 = vmatmul.msk.f32.gmra.mxu0 %vm39_vm0, %v30_v39  ;;  %687 = vmatmul.msk.f32.gmra.mxu1 %vm39_vm0, %v671_v40 }
  0x53   :  { %720 = vmatmul.msk.f32.gmra.mxu2 %vm39_vm0, %v704_v41  ;;  %752 = vmatmul.msk.f32.gmra.mxu3 %vm39_vm0, %v736_v42 }
  0x55   :  { %656 = vmatmul.msk.f32.gmra.mxu0 %vm39_vm0, %v31_v43  ;;  %688 = vmatmul.msk.f32.gmra.mxu1 %vm39_vm0, %v672_v44 }
  0x5b   :  { %721 = vmatmul.msk.f32.gmra.mxu2 %vm39_vm0, %v705_v45  ;;  %753 = vmatmul.msk.f32.gmra.mxu3 %vm39_vm0, %v737_v46 }
  0x5d   :  { %657 = vmatmul.msk.f32.gmra.mxu0 %vm39_vm0, %v32_v47  ;;  %689 = vmatmul.msk.f32.gmra.mxu1 %vm39_vm0, %v673_v48 }
  0x63   :  { %722 = vmatmul.msk.f32.gmra.mxu2 %vm39_vm0, %v706_v49  ;;  %754 = vmatmul.msk.f32.gmra.mxu3 %vm39_vm0, %v738_v50 }
  0x65   :  { %658 = vmatmul.msk.f32.gmra.mxu0 %vm39_vm0, %v33_v51  ;;  %690 = vmatmul.msk.f32.gmra.mxu1 %vm39_vm0, %v674_v52 }
  0x6b   :  { %723 = vmatmul.msk.f32.gmra.mxu2 %vm39_vm0, %v707_v53  ;;  %755 = vmatmul.msk.f32.gmra.mxu3 %vm39_vm0, %v739_v54 }
  0x6d   :  { %659 = vmatmul.msk.f32.gmra.mxu0 %vm39_vm0, %v34_v55  ;;  %691 = vmatmul.msk.f32.gmra.mxu1 %vm39_vm0, %v675_v56 }
  0x73   :  { %724 = vmatmul.msk.f32.gmra.mxu2 %vm39_vm0, %v708_v57  ;;  %756 = vmatmul.msk.f32.gmra.mxu3 %vm39_vm0, %v740_v58 }
  0x75   :  { %660 = vmatmul.msk.f32.gmra.mxu0 %vm39_vm0, %v35_v59  ;;  %692 = vmatmul.msk.f32.gmra.mxu1 %vm39_vm0, %v676_v60 }
  0x7b   :  { %725 = vmatmul.msk.f32.gmra.mxu2 %vm39_vm0, %v709_v61  ;;  %757 = vmatmul.msk.f32.gmra.mxu3 %vm39_vm0, %v741_v62 }
  0x7d   :  { %661 = vmatmul.msk.f32.gmra.mxu0 %vm39_vm0, %v36_v63  ;;  %693 = vmatmul.msk.f32.gmra.mxu1 %vm39_vm0, %v677_v0 }
  0x83   :  { %726 = vmatmul.msk.f32.gmra.mxu2 %vm39_vm0, %v710_v1  ;;  %758 = vmatmul.msk.f32.gmra.mxu3 %vm39_vm0, %v742_v2 }
  0x85   :  { %662 = vmatmul.msk.f32.gmra.mxu0 %vm39_vm0, %v37_v3  ;;  %694 = vmatmul.msk.f32.gmra.mxu1 %vm39_vm0, %v678_v4 }
  0x8b   :  { %727 = vmatmul.msk.f32.gmra.mxu2 %vm39_vm0, %v711_v5  ;;  %759 = vmatmul.msk.f32.gmra.mxu3 %vm39_vm0, %v743_v6 }
  0x8d   :  { %663 = vmatmul.msk.f32.gmra.mxu0 %vm39_vm0, %v38_v7  ;;  %695 = vmatmul.msk.f32.gmra.mxu1 %vm39_vm0, %v679_v8 }
  0x92   :  { %v105_v9 = vpop.f32.mrf.mxu0  ;;  %v235_v10 = vpop.f32.mrf.mxu1 }
  0x93   :  { %v283_v11 = vmax.f32 %v105_v9, %v235_v10 }
  0x96   :  { %v381_v12 = vpop.f32.mrf.mxu2  ;;  %v527_v13 = vpop.f32.mrf.mxu3 }
  0x97   :  { %v429_v14 = vmax.f32 %v283_v11, %v381_v12 }
  0x99   :  { %v575_v16 = vmax.f32 %v429_v14, %v527_v13 }
  0x9a   :  { %v108_v17 = vpop.f32.mrf.mxu0  ;;  %v238_v18 = vpop.f32.mrf.mxu1 }
  0x9b   :  { %v595_v19 = vadd.f32 %v1067_v15, %v575_v16  ;;  %v284_v20 = vmax.f32 %v108_v17, %v238_v18 }
  0x9d   :  { %v611_v21 = vmax.f32 %v595_v19, 0.0 }
  0x9e   :  { %v384_v22 = vpop.f32.mrf.mxu2  ;;  %v530_v23 = vpop.f32.mrf.mxu3 }
  0x9f   :  { %628 = vst.msk [vmem:[%s1152_s3] sm:$0xff] %vm627_vm1, %v611_v21  ;;  %v430_v24 = vmax.f32 %v284_v20, %v384_v22 }
  0xa1   :  { %v576_v25 = vmax.f32 %v430_v24, %v530_v23 }
  0xa2   :  { %v111_v26 = vpop.f32.mrf.mxu0  ;;  %v241_v27 = vpop.f32.mrf.mxu1 }
  0xa3   :  { %v596_v28 = vadd.f32 %v1067_v15, %v576_v25  ;;  %v285_v29 = vmax.f32 %v111_v26, %v241_v27 }
  0xa5   :  { %v612_v30 = vmax.f32 %v596_v28, 0.0 }
  0xa6   :  { %v387_v31 = vpop.f32.mrf.mxu2  ;;  %v533_v32 = vpop.f32.mrf.mxu3 }
  0xa7   :  { %629 = vst.msk [vmem:[%s1152_s3 + $0x8] sm:$0xff] %vm627_vm1, %v612_v30  ;;  %v431_v33 = vmax.f32 %v285_v29, %v387_v31 }
  0xa9   :  { %v577_v34 = vmax.f32 %v431_v33, %v533_v32 }
  0xaa   :  { %v114_v35 = vpop.f32.mrf.mxu0  ;;  %v244_v36 = vpop.f32.mrf.mxu1 }
  0xab   :  { %v597_v37 = vadd.f32 %v1067_v15, %v577_v34  ;;  %v286_v38 = vmax.f32 %v114_v35, %v244_v36 }
  0xad   :  { %v613_v39 = vmax.f32 %v597_v37, 0.0 }
  0xae   :  { %v390_v40 = vpop.f32.mrf.mxu2  ;;  %v536_v41 = vpop.f32.mrf.mxu3 }
  0xaf   :  { %630 = vst.msk [vmem:[%s1152_s3 + $0x10] sm:$0xff] %vm627_vm1, %v613_v39  ;;  %v432_v42 = vmax.f32 %v286_v38, %v390_v40 }
  0xb1   :  { %v578_v43 = vmax.f32 %v432_v42, %v536_v41 }
  0xb2   :  { %v117_v44 = vpop.f32.mrf.mxu0  ;;  %v247_v45 = vpop.f32.mrf.mxu1 }
  0xb3   :  { %v598_v46 = vadd.f32 %v1067_v15, %v578_v43  ;;  %v287_v47 = vmax.f32 %v117_v44, %v247_v45 }
  0xb5   :  { %v614_v48 = vmax.f32 %v598_v46, 0.0 }
  0xb6   :  { %v393_v49 = vpop.f32.mrf.mxu2  ;;  %v539_v50 = vpop.f32.mrf.mxu3 }
  0xb7   :  { %631 = vst.msk [vmem:[%s1152_s3 + $0x18] sm:$0xff] %vm627_vm1, %v614_v48  ;;  %v433_v51 = vmax.f32 %v287_v47, %v393_v49 }
  0xb9   :  { %v579_v52 = vmax.f32 %v433_v51, %v539_v50 }
  0xba   :  { %v120_v53 = vpop.f32.mrf.mxu0  ;;  %v250_v54 = vpop.f32.mrf.mxu1 }
  0xbb   :  { %v599_v55 = vadd.f32 %v1067_v15, %v579_v52  ;;  %v288_v56 = vmax.f32 %v120_v53, %v250_v54 }
  0xbd   :  { %v615_v57 = vmax.f32 %v599_v55, 0.0 }
  0xbe   :  { %v396_v58 = vpop.f32.mrf.mxu2  ;;  %v542_v59 = vpop.f32.mrf.mxu3 }
  0xbf   :  { %632 = vst.msk [vmem:[%s1152_s3 + $0x20] sm:$0xff] %vm627_vm1, %v615_v57  ;;  %v434_v60 = vmax.f32 %v288_v56, %v396_v58 }
  0xc1   :  { %v580_v61 = vmax.f32 %v434_v60, %v542_v59 }
  0xc2   :  { %v123_v62 = vpop.f32.mrf.mxu0  ;;  %v253_v63 = vpop.f32.mrf.mxu1 }
  0xc3   :  { %v600_v0 = vadd.f32 %v1067_v15, %v580_v61  ;;  %v289_v1 = vmax.f32 %v123_v62, %v253_v63 }
  0xc5   :  { %v616_v2 = vmax.f32 %v600_v0, 0.0 }
  0xc6   :  { %v399_v3 = vpop.f32.mrf.mxu2  ;;  %v545_v4 = vpop.f32.mrf.mxu3 }
  0xc7   :  { %633 = vst.msk [vmem:[%s1152_s3 + $0x28] sm:$0xff] %vm627_vm1, %v616_v2  ;;  %v435_v5 = vmax.f32 %v289_v1, %v399_v3 }
  0xc9   :  { %v581_v6 = vmax.f32 %v435_v5, %v545_v4 }
  0xca   :  { %v126_v7 = vpop.f32.mrf.mxu0  ;;  %v256_v8 = vpop.f32.mrf.mxu1 }
  0xcb   :  { %v601_v9 = vadd.f32 %v1067_v15, %v581_v6  ;;  %v290_v10 = vmax.f32 %v126_v7, %v256_v8 }
  0xcd   :  { %v617_v11 = vmax.f32 %v601_v9, 0.0 }
  0xce   :  { %v402_v12 = vpop.f32.mrf.mxu2  ;;  %v548_v13 = vpop.f32.mrf.mxu3 }
  0xcf   :  { %634 = vst.msk [vmem:[%s1152_s3 + $0x30] sm:$0xff] %vm627_vm1, %v617_v11  ;;  %v436_v14 = vmax.f32 %v290_v10, %v402_v12 }
  0xd1   :  { %v582_v16 = vmax.f32 %v436_v14, %v548_v13 }
  0xd2   :  { %v129_v17 = vpop.f32.mrf.mxu0  ;;  %v259_v18 = vpop.f32.mrf.mxu1 }
  0xd3   :  { %v602_v19 = vadd.f32 %v1067_v15, %v582_v16  ;;  %v291_v20 = vmax.f32 %v129_v17, %v259_v18 }
  0xd5   :  { %v618_v21 = vmax.f32 %v602_v19, 0.0 }
  0xd6   :  { %v405_v22 = vpop.f32.mrf.mxu2  ;;  %v551_v23 = vpop.f32.mrf.mxu3 }
  0xd7   :  { %635 = vst.msk [vmem:[%s1152_s3 + $0x38] sm:$0xff] %vm627_vm1, %v618_v21  ;;  %v437_v24 = vmax.f32 %v291_v20, %v405_v22 }
  0xd9   :  { %v583_v25 = vmax.f32 %v437_v24, %v551_v23 }
  0xda   :  { %v132_v26 = vpop.f32.mrf.mxu0  ;;  %v262_v27 = vpop.f32.mrf.mxu1 }
  0xdb   :  { %v603_v28 = vadd.f32 %v1067_v15, %v583_v25  ;;  %v292_v29 = vmax.f32 %v132_v26, %v262_v27 }
  0xdd   :  { %v619_v30 = vmax.f32 %v603_v28, 0.0 }
  0xde   :  { %v408_v31 = vpop.f32.mrf.mxu2  ;;  %v554_v32 = vpop.f32.mrf.mxu3 }
  0xdf   :  { %636 = vst.msk [vmem:[%s1152_s3 + $0x40] sm:$0xff] %vm627_vm1, %v619_v30  ;;  %v438_v33 = vmax.f32 %v292_v29, %v408_v31 }
  0xe1   :  { %v584_v34 = vmax.f32 %v438_v33, %v554_v32 }
  0xe2   :  { %v135_v35 = vpop.f32.mrf.mxu0  ;;  %v265_v36 = vpop.f32.mrf.mxu1 }
  0xe3   :  { %v604_v37 = vadd.f32 %v1067_v15, %v584_v34  ;;  %v293_v38 = vmax.f32 %v135_v35, %v265_v36 }
  0xe5   :  { %v620_v39 = vmax.f32 %v604_v37, 0.0 }
  0xe6   :  { %v411_v40 = vpop.f32.mrf.mxu2  ;;  %v557_v41 = vpop.f32.mrf.mxu3 }
  0xe7   :  { %637 = vst.msk [vmem:[%s1152_s3 + $0x48] sm:$0xff] %vm627_vm1, %v620_v39  ;;  %v439_v42 = vmax.f32 %v293_v38, %v411_v40 }
  0xe9   :  { %v585_v43 = vmax.f32 %v439_v42, %v557_v41 }
  0xea   :  { %v138_v44 = vpop.f32.mrf.mxu0  ;;  %v268_v45 = vpop.f32.mrf.mxu1 }
  0xeb   :  { %v605_v46 = vadd.f32 %v1067_v15, %v585_v43  ;;  %v294_v47 = vmax.f32 %v138_v44, %v268_v45 }
  0xed   :  { %v621_v48 = vmax.f32 %v605_v46, 0.0 }
  0xee   :  { %v414_v49 = vpop.f32.mrf.mxu2  ;;  %v560_v50 = vpop.f32.mrf.mxu3 }
  0xef   :  { %638 = vst.msk [vmem:[%s1152_s3 + $0x50] sm:$0xff] %vm627_vm1, %v621_v48  ;;  %v440_v51 = vmax.f32 %v294_v47, %v414_v49 }
  0xf1   :  { %v586_v52 = vmax.f32 %v440_v51, %v560_v50 }
  0xf2   :  { %v141_v53 = vpop.f32.mrf.mxu0  ;;  %v271_v54 = vpop.f32.mrf.mxu1 }
  0xf3   :  { %v606_v55 = vadd.f32 %v1067_v15, %v586_v52  ;;  %v295_v56 = vmax.f32 %v141_v53, %v271_v54 }
  0xf5   :  { %v622_v57 = vmax.f32 %v606_v55, 0.0 }
  0xf6   :  { %v417_v58 = vpop.f32.mrf.mxu2  ;;  %v563_v59 = vpop.f32.mrf.mxu3 }
  0xf7   :  { %639 = vst.msk [vmem:[%s1152_s3 + $0x58] sm:$0xff] %vm627_vm1, %v622_v57  ;;  %v441_v60 = vmax.f32 %v295_v56, %v417_v58 }
  0xf9   :  { %v587_v61 = vmax.f32 %v441_v60, %v563_v59 }
  0xfa   :  { %v144_v62 = vpop.f32.mrf.mxu0  ;;  %v274_v63 = vpop.f32.mrf.mxu1 }
  0xfb   :  { %v607_v0 = vadd.f32 %v1067_v15, %v587_v61  ;;  %v296_v1 = vmax.f32 %v144_v62, %v274_v63 }
  0xfd   :  { %v623_v2 = vmax.f32 %v607_v0, 0.0 }
  0xfe   :  { %v420_v3 = vpop.f32.mrf.mxu2  ;;  %v566_v4 = vpop.f32.mrf.mxu3 }
  0xff   :  { %640 = vst.msk [vmem:[%s1152_s3 + $0x60] sm:$0xff] %vm627_vm1, %v623_v2  ;;  %v442_v5 = vmax.f32 %v296_v1, %v420_v3 }
 0x101   :  { %v588_v6 = vmax.f32 %v442_v5, %v566_v4 }
 0x102   :  { %v147_v7 = vpop.f32.mrf.mxu0  ;;  %v277_v8 = vpop.f32.mrf.mxu1 }
 0x103   :  { %v608_v9 = vadd.f32 %v1067_v15, %v588_v6  ;;  %v297_v10 = vmax.f32 %v147_v7, %v277_v8 }
 0x105   :  { %v624_v11 = vmax.f32 %v608_v9, 0.0 }
 0x106   :  { %v423_v12 = vpop.f32.mrf.mxu2  ;;  %v569_v13 = vpop.f32.mrf.mxu3 }
 0x107   :  { %641 = vst.msk [vmem:[%s1152_s3 + $0x68] sm:$0xff] %vm627_vm1, %v624_v11  ;;  %v443_v14 = vmax.f32 %v297_v10, %v423_v12 }
 0x109   :  { %v589_v16 = vmax.f32 %v443_v14, %v569_v13 }
 0x10a   :  { %v150_v17 = vpop.f32.mrf.mxu0  ;;  %v280_v18 = vpop.f32.mrf.mxu1 }
 0x10b   :  { %v609_v19 = vadd.f32 %v1067_v15, %v589_v16  ;;  %v298_v20 = vmax.f32 %v150_v17, %v280_v18 }
 0x10d   :  { %v625_v21 = vmax.f32 %v609_v19, 0.0 }
 0x10e   :  { %v426_v22 = vpop.f32.mrf.mxu2  ;;  %v572_v23 = vpop.f32.mrf.mxu3 }
 0x10f   :  { %642 = vst.msk [vmem:[%s1152_s3 + $0x70] sm:$0xff] %vm627_vm1, %v625_v21  ;;  %v444_v24 = vmax.f32 %v298_v20, %v426_v22 }
 0x111   :  { %v590_v25 = vmax.f32 %v444_v24, %v572_v23 }
 0x113   :  { %v610_v26 = vadd.f32 %v1067_v15, %v590_v25 }
 0x115   :  { %v626_v27 = vmax.f32 %v610_v26, 0.0 }
 0x117   :  { %643 = vst.msk [vmem:[%s1152_s3 + $0x78] sm:$0xff] %vm627_vm1, %v626_v27 }

// kernel: vgg_adversarial_forward.12
= control target key start
LH: loop header
LB: loop body
LE: loop exit
PB: predicated region body
PF: predicated region fallthrough
CT: control target
= control target key end

     0   :  { %vm68_vm0 = vcmask 130048   ;;  %vm263_vm1 = vcmask 261120   ;;  %s617_s1 = inlined_call_operand.vmem [shape: f32[144,32], index: 1, kind: input, shape index: {}]   ;;  %s618_s0 = inlined_call_operand.vmem [shape: f32[1,128,144], index: 0, kind: input, shape index: {}]   ;;  %s619_s2 = inlined_call_operand.vmem [shape: f32[1,32], index: 2, kind: input, shape index: {}]   ;;  %s620_s3 = inlined_call_operand.vmem [shape: f32[128,32], index: 3, kind: output, shape index: {}]  }
   0x1   :  { %v29_v0 = vld [vmem:[%s617_s1 + $0x78] sm:$0xff]  ;;  %v361_v1 = vld [vmem:[%s617_s1 + $0x88] sm:$0xff]  ;;  %v28_v2 = vld [vmem:[%s617_s1 + $0x70] sm:$0xff] }
   0x2   :  { %117 = vmatpush.msra.mxu0 %v29_v0  ;;  %300 = vmatpush.msra.mxu2 %v29_v0  ;;  %v369_v3 = vld [vmem:[%s617_s1 + $0x80] sm:$0xff]  ;;  %v33_v4 = vld [vmem:[%s618_s0 + $0x8] sm:$0xff]  ;;  %v25_v7 = vld [vmem:[%s617_s1 + $0x58] sm:$0xff] }
   0x3   :  { %301 = vmatpush.msra.mxu3 %v29_v0  ;;  %196 = vmatpush.msra.mxu1 %v361_v1  ;;  %v27_v5 = vld [vmem:[%s617_s1 + $0x68] sm:$0xff]  ;;  %v26_v6 = vld [vmem:[%s617_s1 + $0x60] sm:$0xff]  ;;  %v24_v8 = vld [vmem:[%s617_s1 + $0x50] sm:$0xff] }
   0x4   :  { %118 = vmatpush.msra.mxu0 %v28_v2  ;;  %302 = vmatpush.msra.mxu2 %v28_v2  ;;  %v35_v9 = vld [vmem:[%s618_s0 + $0x18] sm:$0xff]  ;;  %v23_v10 = vld [vmem:[%s617_s1 + $0x48] sm:$0xff]  ;;  %v22_v11 = vld [vmem:[%s617_s1 + $0x40] sm:$0xff] }
   0x5   :  { %303 = vmatpush.msra.mxu3 %v28_v2  ;;  %197 = vmatpush.msra.mxu1 %v369_v3  ;;  %v21_v12 = vld [vmem:[%s617_s1 + $0x38] sm:$0xff]  ;;  %v20_v13 = vld [vmem:[%s617_s1 + $0x30] sm:$0xff]  ;;  %v37_v14 = vld [vmem:[%s618_s0 + $0x28] sm:$0xff] }
   0x6   :  { %284 = vmatmul.msk.f32.vlgmr.msra.gmra.mxu1 %vm68_vm0, %v33_v4  ;;  %119 = vmatpush.msra.mxu0 %v27_v5  ;;  %v19_v15 = vld [vmem:[%s617_s1 + $0x28] sm:$0xff]  ;;  %v18_v16 = vld [vmem:[%s617_s1 + $0x20] sm:$0xff]  ;;  %v17_v17 = vld [vmem:[%s617_s1 + $0x18] sm:$0xff] }
   0x7   :  { %304 = vmatpush.msra.mxu2 %v27_v5  ;;  %305 = vmatpush.msra.mxu3 %v27_v5  ;;  %v16_v18 = vld [vmem:[%s617_s1 + $0x10] sm:$0xff]  ;;  %v39_v19 = vld [vmem:[%s618_s0 + $0x38] sm:$0xff]  ;;  %v15_v20 = vld [vmem:[%s617_s1 + $0x8] sm:$0xff] }
   0x8   :  { %120 = vmatpush.msra.mxu0 %v26_v6  ;;  %v14_v21 = vld [vmem:[%s617_s1] sm:$0xff]  ;;  %v46_v23 = vld [vmem:[%s618_s0 + $0x70] sm:$0xff]  ;;  %v41_v25 = vld [vmem:[%s618_s0 + $0x48] sm:$0xff] }
   0x9   :  { %306 = vmatpush.msra.mxu2 %v26_v6  ;;  %307 = vmatpush.msra.mxu3 %v26_v6  ;;  %v32_v22 = vld [vmem:[%s618_s0] sm:$0xff]  ;;  %v62_v24 = vld [vmem:[%s618_s0 + $0xf0] sm:$0xff]  ;;  %v53_v28 = vld [vmem:[%s618_s0 + $0xa8] sm:$0xff] }
   0xa   :  { %121 = vmatpush.msra.mxu0 %v25_v7  ;;  %v34_v26 = vld [vmem:[%s618_s0 + $0x10] sm:$0xff]  ;;  %v48_v27 = vld [vmem:[%s618_s0 + $0x80] sm:$0xff]  ;;  %v43_v29 = vld [vmem:[%s618_s0 + $0x58] sm:$0xff] }
   0xb   :  { %308 = vmatpush.msra.mxu2 %v25_v7  ;;  %309 = vmatpush.msra.mxu3 %v25_v7  ;;  %v36_v30 = vld [vmem:[%s618_s0 + $0x20] sm:$0xff]  ;;  %v50_v31 = vld [vmem:[%s618_s0 + $0x90] sm:$0xff]  ;;  %v55_v32 = vld [vmem:[%s618_s0 + $0xb8] sm:$0xff] }
   0xc   :  { %122 = vmatpush.msra.mxu0 %v24_v8  ;;  %v45_v33 = vld [vmem:[%s618_s0 + $0x68] sm:$0xff]  ;;  %v38_v34 = vld [vmem:[%s618_s0 + $0x30] sm:$0xff]  ;;  %v52_v35 = vld [vmem:[%s618_s0 + $0xa0] sm:$0xff] }
   0xd   :  { %310 = vmatpush.msra.mxu2 %v24_v8  ;;  %311 = vmatpush.msra.mxu3 %v24_v8  ;;  %v57_v36 = vld [vmem:[%s618_s0 + $0xc8] sm:$0xff]  ;;  %v47_v37 = vld [vmem:[%s618_s0 + $0x78] sm:$0xff]  ;;  %v40_v38 = vld [vmem:[%s618_s0 + $0x40] sm:$0xff] }
   0xe   :  { %285 = vmatmul.msk.f32.gmra.mxu1 %vm68_vm0, %v35_v9  ;;  %123 = vmatpush.msra.mxu0 %v23_v10  ;;  %v54_v39 = vld [vmem:[%s618_s0 + $0xb0] sm:$0xff]  ;;  %v59_v40 = vld [vmem:[%s618_s0 + $0xd8] sm:$0xff]  ;;  %v49_v41 = vld [vmem:[%s618_s0 + $0x88] sm:$0xff] }
   0xf   :  { %312 = vmatpush.msra.mxu2 %v23_v10  ;;  %313 = vmatpush.msra.mxu3 %v23_v10  ;;  %v42_v42 = vld [vmem:[%s618_s0 + $0x50] sm:$0xff]  ;;  %v56_v43 = vld [vmem:[%s618_s0 + $0xc0] sm:$0xff]  ;;  %v61_v44 = vld [vmem:[%s618_s0 + $0xe8] sm:$0xff] }
  0x10   :  { %124 = vmatpush.msra.mxu0 %v22_v11  ;;  %v51_v45 = vld [vmem:[%s618_s0 + $0x98] sm:$0xff]  ;;  %v44_v46 = vld [vmem:[%s618_s0 + $0x60] sm:$0xff]  ;;  %v58_v47 = vld [vmem:[%s618_s0 + $0xd0] sm:$0xff] }
  0x11   :  { %314 = vmatpush.msra.mxu2 %v22_v11  ;;  %315 = vmatpush.msra.mxu3 %v22_v11  ;;  %v63_v48 = vld [vmem:[%s618_s0 + $0xf8] sm:$0xff]  ;;  %v60_v49 = vld [vmem:[%s618_s0 + $0xe0] sm:$0xff] }
  0x12   :  { %125 = vmatpush.msra.mxu0 %v21_v12  ;;  %v532_v54 = vld [vmem:[%s619_s2] ss:$0 sm:$0xff] }
  0x13   :  { %316 = vmatpush.msra.mxu2 %v21_v12  ;;  %317 = vmatpush.msra.mxu3 %v21_v12 }
  0x14   :  { %126 = vmatpush.msra.mxu0 %v20_v13 }
  0x15   :  { %318 = vmatpush.msra.mxu2 %v20_v13  ;;  %319 = vmatpush.msra.mxu3 %v20_v13 }
  0x16   :  { %286 = vmatmul.msk.f32.gmra.mxu1 %vm68_vm0, %v37_v14  ;;  %127 = vmatpush.msra.mxu0 %v19_v15 }
  0x17   :  { %320 = vmatpush.msra.mxu2 %v19_v15  ;;  %321 = vmatpush.msra.mxu3 %v19_v15 }
  0x18   :  { %128 = vmatpush.msra.mxu0 %v18_v16 }
  0x19   :  { %322 = vmatpush.msra.mxu2 %v18_v16  ;;  %323 = vmatpush.msra.mxu3 %v18_v16 }
  0x1a   :  { %129 = vmatpush.msra.mxu0 %v17_v17 }
  0x1b   :  { %324 = vmatpush.msra.mxu2 %v17_v17  ;;  %325 = vmatpush.msra.mxu3 %v17_v17 }
  0x1c   :  { %130 = vmatpush.msra.mxu0 %v16_v18 }
  0x1d   :  { %326 = vmatpush.msra.mxu2 %v16_v18  ;;  %327 = vmatpush.msra.mxu3 %v16_v18 }
  0x1e   :  { %287 = vmatmul.msk.f32.gmra.mxu1 %vm68_vm0, %v39_v19  ;;  %131 = vmatpush.msra.mxu0 %v15_v20 }
  0x1f   :  { %328 = vmatpush.msra.mxu2 %v15_v20  ;;  %329 = vmatpush.msra.mxu3 %v15_v20 }
  0x20   :  { %132 = vmatpush.msra.mxu0 %v14_v21 }
  0x21   :  { %330 = vmatpush.msra.mxu2 %v14_v21  ;;  %331 = vmatpush.msra.mxu3 %v14_v21 }
  0x22   :  { %133 = vmatmul.f32.vlgmr.msra.gmra.mxu0 %v32_v22  ;;  %154 = vmatmul.f32.vlgmr.msra.gmra.mxu2 %v46_v23 }
  0x23   :  { %178 = vmatmul.f32.vlgmr.msra.gmra.mxu3 %v62_v24 }
  0x24   :  { %332 = vmatpush.msrb.mxu3 %v361_v1 }
  0x26   :  { %288 = vmatmul.msk.f32.gmra.mxu1 %vm68_vm0, %v41_v25  ;;  %333 = vmatpush.msrb.mxu3 %v369_v3 }
  0x2a   :  { %136 = vmatmul.f32.gmra.mxu0 %v34_v26  ;;  %157 = vmatmul.f32.gmra.mxu2 %v48_v27 }
  0x2b   :  { %294 = vmatmul.msk.f32.vlgmr.msrb.gmra.mxu3 %vm68_vm0, %v53_v28 }
  0x2e   :  { %289 = vmatmul.msk.f32.gmra.mxu1 %vm68_vm0, %v43_v29 }
  0x32   :  { %139 = vmatmul.f32.gmra.mxu0 %v36_v30  ;;  %160 = vmatmul.f32.gmra.mxu2 %v50_v31 }
  0x33   :  { %295 = vmatmul.msk.f32.gmra.mxu3 %vm68_vm0, %v55_v32 }
  0x36   :  { %290 = vmatmul.msk.f32.gmra.mxu1 %vm68_vm0, %v45_v33 }
  0x3a   :  { %142 = vmatmul.f32.gmra.mxu0 %v38_v34  ;;  %163 = vmatmul.f32.gmra.mxu2 %v52_v35 }
  0x3b   :  { %296 = vmatmul.msk.f32.gmra.mxu3 %vm68_vm0, %v57_v36 }
  0x3e   :  { %291 = vmatmul.msk.f32.gmra.mxu1 %vm68_vm0, %v47_v37 }
  0x42   :  { %145 = vmatmul.f32.gmra.mxu0 %v40_v38  ;;  %166 = vmatmul.f32.gmra.mxu2 %v54_v39 }
  0x43   :  { %297 = vmatmul.msk.f32.gmra.mxu3 %vm68_vm0, %v59_v40 }
  0x46   :  { %292 = vmatmul.msk.f32.gmra.mxu1 %vm68_vm0, %v49_v41 }
  0x4a   :  { %148 = vmatmul.f32.gmra.mxu0 %v42_v42  ;;  %169 = vmatmul.f32.gmra.mxu2 %v56_v43 }
  0x4b   :  { %298 = vmatmul.msk.f32.gmra.mxu3 %vm68_vm0, %v61_v44 }
  0x4e   :  { %293 = vmatmul.msk.f32.gmra.mxu1 %vm68_vm0, %v51_v45 }
  0x52   :  { %151 = vmatmul.f32.gmra.mxu0 %v44_v46  ;;  %172 = vmatmul.f32.gmra.mxu2 %v58_v47 }
  0x53   :  { %299 = vmatmul.msk.f32.gmra.mxu3 %vm68_vm0, %v63_v48 }
  0x5a   :  { %175 = vmatmul.f32.gmra.mxu2 %v60_v49 }
  0x83   :  { %v199_v50 = vpop.f32.mrf.mxu1 }
  0x8b   :  { %v202_v51 = vpop.f32.mrf.mxu1 }
  0x93   :  { %v205_v52 = vpop.f32.mrf.mxu1 }
  0x9b   :  { %v208_v53 = vpop.f32.mrf.mxu1 }
  0x9f   :  { %v134_v55 = vpop.f32.mrf.mxu0 }
  0xa0   :  { %v135_v56 = vadd.f32 %v532_v54, %v134_v55 }
  0xa2   :  { %v200_v57 = vadd.f32 %v199_v50, %v135_v56 }
  0xa3   :  { %v211_v58 = vpop.f32.mrf.mxu1 }
  0xa4   :  { %v247_v59 = vmax.f32 %v200_v57, 0.0 }
  0xa5   :  { %v155_v60 = vpop.f32.mrf.mxu2 }
  0xa6   :  { %264 = vst.msk [vmem:[%s620_s3] sm:$0xff] %vm263_vm1, %v247_v59  ;;  %v539_v61 = vpop.f32.mrf.mxu3  ;;  %v156_v14 = vadd.f32 %v532_v54, %v155_v60 }
  0xa7   :  { %v137_v62 = vpop.f32.mrf.mxu0  ;;  %v180_v56 = vadd.f32 %v532_v54, %v539_v61 }
  0xa8   :  { %v138_v63 = vadd.f32 %v532_v54, %v137_v62 }
  0xaa   :  { %v203_v0 = vadd.f32 %v202_v51, %v138_v63 }
  0xab   :  { %v214_v1 = vpop.f32.mrf.mxu1 }
  0xac   :  { %v248_v2 = vmax.f32 %v203_v0, 0.0 }
  0xad   :  { %v158_v3 = vpop.f32.mrf.mxu2 }
  0xae   :  { %265 = vst.msk [vmem:[%s620_s3 + $0x8] sm:$0xff] %vm263_vm1, %v248_v2  ;;  %v229_v4 = vpop.f32.mrf.mxu3  ;;  %v159_v26 = vadd.f32 %v532_v54, %v158_v3 }
  0xaf   :  { %v140_v5 = vpop.f32.mrf.mxu0 }
  0xb0   :  { %v141_v6 = vadd.f32 %v532_v54, %v140_v5 }
  0xb2   :  { %v206_v7 = vadd.f32 %v205_v52, %v141_v6 }
  0xb3   :  { %v217_v8 = vpop.f32.mrf.mxu1 }
  0xb4   :  { %v249_v9 = vmax.f32 %v206_v7, 0.0 }
  0xb5   :  { %v161_v10 = vpop.f32.mrf.mxu2 }
  0xb6   :  { %266 = vst.msk [vmem:[%s620_s3 + $0x10] sm:$0xff] %vm263_vm1, %v249_v9  ;;  %v232_v11 = vpop.f32.mrf.mxu3  ;;  %v162_v39 = vadd.f32 %v532_v54, %v161_v10 }
  0xb7   :  { %v143_v12 = vpop.f32.mrf.mxu0 }
  0xb8   :  { %v144_v13 = vadd.f32 %v532_v54, %v143_v12 }
  0xba   :  { %v209_v15 = vadd.f32 %v208_v53, %v144_v13 }
  0xbb   :  { %v220_v16 = vpop.f32.mrf.mxu1 }
  0xbc   :  { %v250_v17 = vmax.f32 %v209_v15, 0.0  ;;  %v221_v18 = vadd.f32 %v220_v16, %v156_v14 }
  0xbd   :  { %v164_v19 = vpop.f32.mrf.mxu2 }
  0xbe   :  { %267 = vst.msk [vmem:[%s620_s3 + $0x18] sm:$0xff] %vm263_vm1, %v250_v17  ;;  %v254_v20 = vmax.f32 %v221_v18, 0.0  ;;  %v165_v21 = vadd.f32 %v532_v54, %v164_v19  ;;  %v235_v22 = vpop.f32.mrf.mxu3 }
  0xbf   :  { %v146_v23 = vpop.f32.mrf.mxu0 }
  0xc0   :  { %271 = vst.msk [vmem:[%s620_s3 + $0x38] sm:$0xff] %vm263_vm1, %v254_v20  ;;  %v230_v24 = vadd.f32 %v229_v4, %v165_v21  ;;  %v147_v25 = vadd.f32 %v532_v54, %v146_v23 }
  0xc2   :  { %v257_v27 = vmax.f32 %v230_v24, 0.0  ;;  %v212_v28 = vadd.f32 %v211_v58, %v147_v25 }
  0xc3   :  { %v223_v29 = vpop.f32.mrf.mxu1 }
  0xc4   :  { %274 = vst.msk [vmem:[%s620_s3 + $0x50] sm:$0xff] %vm263_vm1, %v257_v27  ;;  %v251_v30 = vmax.f32 %v212_v28, 0.0  ;;  %v224_v31 = vadd.f32 %v223_v29, %v159_v26 }
  0xc5   :  { %v167_v32 = vpop.f32.mrf.mxu2 }
  0xc6   :  { %268 = vst.msk [vmem:[%s620_s3 + $0x20] sm:$0xff] %vm263_vm1, %v251_v30  ;;  %v255_v33 = vmax.f32 %v224_v31, 0.0  ;;  %v168_v34 = vadd.f32 %v532_v54, %v167_v32  ;;  %v238_v35 = vpop.f32.mrf.mxu3 }
  0xc7   :  { %v149_v36 = vpop.f32.mrf.mxu0 }
  0xc8   :  { %272 = vst.msk [vmem:[%s620_s3 + $0x40] sm:$0xff] %vm263_vm1, %v255_v33  ;;  %v233_v37 = vadd.f32 %v232_v11, %v168_v34  ;;  %v150_v38 = vadd.f32 %v532_v54, %v149_v36 }
  0xca   :  { %v258_v40 = vmax.f32 %v233_v37, 0.0  ;;  %v215_v41 = vadd.f32 %v214_v1, %v150_v38 }
  0xcb   :  { %v226_v42 = vpop.f32.mrf.mxu1 }
  0xcc   :  { %275 = vst.msk [vmem:[%s620_s3 + $0x58] sm:$0xff] %vm263_vm1, %v258_v40  ;;  %v252_v43 = vmax.f32 %v215_v41, 0.0  ;;  %v227_v44 = vadd.f32 %v226_v42, %v162_v39 }
  0xcd   :  { %v170_v45 = vpop.f32.mrf.mxu2 }
  0xce   :  { %269 = vst.msk [vmem:[%s620_s3 + $0x28] sm:$0xff] %vm263_vm1, %v252_v43  ;;  %v256_v46 = vmax.f32 %v227_v44, 0.0  ;;  %v171_v47 = vadd.f32 %v532_v54, %v170_v45  ;;  %v241_v48 = vpop.f32.mrf.mxu3 }
  0xcf   :  { %v152_v49 = vpop.f32.mrf.mxu0 }
  0xd0   :  { %273 = vst.msk [vmem:[%s620_s3 + $0x48] sm:$0xff] %vm263_vm1, %v256_v46  ;;  %v236_v50 = vadd.f32 %v235_v22, %v171_v47  ;;  %v153_v51 = vadd.f32 %v532_v54, %v152_v49 }
  0xd2   :  { %v259_v52 = vmax.f32 %v236_v50, 0.0  ;;  %v218_v53 = vadd.f32 %v217_v8, %v153_v51 }
  0xd4   :  { %276 = vst.msk [vmem:[%s620_s3 + $0x60] sm:$0xff] %vm263_vm1, %v259_v52  ;;  %v253_v55 = vmax.f32 %v218_v53, 0.0 }
  0xd5   :  { %v173_v57 = vpop.f32.mrf.mxu2 }
  0xd6   :  { %270 = vst.msk [vmem:[%s620_s3 + $0x30] sm:$0xff] %vm263_vm1, %v253_v55  ;;  %v174_v58 = vadd.f32 %v532_v54, %v173_v57  ;;  %v244_v59 = vpop.f32.mrf.mxu3 }
  0xd7   :  { %v245_v60 = vadd.f32 %v244_v59, %v180_v56 }
  0xd8   :  { %v239_v62 = vadd.f32 %v238_v35, %v174_v58 }
  0xd9   :  { %v262_v63 = vmax.f32 %v245_v60, 0.0 }
  0xda   :  { %v260_v0 = vmax.f32 %v239_v62, 0.0 }
  0xdb   :  { %279 = vst.msk [vmem:[%s620_s3 + $0x78] sm:$0xff] %vm263_vm1, %v262_v63 }
  0xdc   :  { %277 = vst.msk [vmem:[%s620_s3 + $0x68] sm:$0xff] %vm263_vm1, %v260_v0 }
  0xdd   :  { %v176_v61 = vpop.f32.mrf.mxu2 }
  0xde   :  { %v177_v1 = vadd.f32 %v532_v54, %v176_v61 }
  0xe0   :  { %v242_v2 = vadd.f32 %v241_v48, %v177_v1 }
  0xe2   :  { %v261_v3 = vmax.f32 %v242_v2, 0.0 }
  0xe4   :  { %278 = vst.msk [vmem:[%s620_s3 + $0x70] sm:$0xff] %vm263_vm1, %v261_v3 }

// kernel: vgg_adversarial_forward.13
= control target key start
LH: loop header
LB: loop body
LE: loop exit
PB: predicated region body
PF: predicated region fallthrough
CT: control target
= control target key end

     0   :  { %vm62_vm0 = vcmask 261120   ;;  %s1121_s1 = inlined_call_operand.vmem [shape: f32[288,32], index: 1, kind: input, shape index: {}]   ;;  %s1122_s0 = inlined_call_operand.vmem [shape: f32[4,32,288], index: 0, kind: input, shape index: {}]   ;;  %s1123_s2 = inlined_call_operand.vmem [shape: f32[1,32], index: 2, kind: input, shape index: {}]   ;;  %s1124_s3 = inlined_call_operand.vmem [shape: f32[32,32], index: 3, kind: output, shape index: {}]  }
   0x1   :  { %v606_v0 = vld [vmem:[%s1121_s1 + $0x78] sm:$0xff]  ;;  %v616_v2 = vld [vmem:[%s1121_s1 + $0x70] sm:$0xff]  ;;  %v635_v5 = vld [vmem:[%s1121_s1 + $0x68] sm:$0xff] }
   0x2   :  { %v611_v1 = vld [vmem:[%s1121_s1 + $0x118] sm:$0xff]  ;;  %75 = vmatpush.msra.mxu0 %v606_v0  ;;  %v628_v4 = vld [vmem:[%s1121_s1 + $0x110] sm:$0xff]  ;;  %187 = vmatpush.msra.mxu3 %v606_v0  ;;  %v645_v7 = vld [vmem:[%s1121_s1 + $0x108] sm:$0xff] }
   0x3   :  { %145 = vmatpush.msra.mxu2 %v611_v1  ;;  %v623_v3 = vld [vmem:[%s1121_s1 + $0xf8] sm:$0xff]  ;;  %v640_v6 = vld [vmem:[%s1121_s1 + $0xf0] sm:$0xff]  ;;  %v652_v8 = vld [vmem:[%s1121_s1 + $0xe8] sm:$0xff] }
   0x4   :  { %104 = vmatpush.msra.mxu1 %v623_v3  ;;  %76 = vmatpush.msra.mxu0 %v616_v2  ;;  %v659_v9 = vld [vmem:[%s1121_s1 + $0x60] sm:$0xff]  ;;  %v52_v11 = vld [vmem:[%s1122_s0 + $0x10] sm:$0xff]  ;;  %v676_v12 = vld [vmem:[%s1121_s1 + $0x58] sm:$0xff] }
   0x5   :  { %146 = vmatpush.msra.mxu2 %v628_v4  ;;  %188 = vmatpush.msra.mxu3 %v616_v2  ;;  %v664_v10 = vld [vmem:[%s1121_s1 + $0x100] sm:$0xff]  ;;  %v690_v14 = vld [vmem:[%s1121_s1 + $0x50] sm:$0xff]  ;;  %v695_v15 = vld [vmem:[%s1121_s1 + $0xd8] sm:$0xff] }
   0x6   :  { %105 = vmatpush.msra.mxu1 %v640_v6  ;;  %77 = vmatpush.msra.mxu0 %v635_v5  ;;  %v681_v13 = vld [vmem:[%s1121_s1 + $0xe0] sm:$0xff]  ;;  %v704_v16 = vld [vmem:[%s1121_s1 + $0x48] sm:$0xff]  ;;  %v709_v17 = vld [vmem:[%s1121_s1 + $0xd0] sm:$0xff] }
   0x7   :  { %147 = vmatpush.msra.mxu2 %v645_v7  ;;  %189 = vmatpush.msra.mxu3 %v635_v5  ;;  %v718_v18 = vld [vmem:[%s1121_s1 + $0x40] sm:$0xff]  ;;  %v723_v19 = vld [vmem:[%s1121_s1 + $0xc8] sm:$0xff]  ;;  %v735_v21 = vld [vmem:[%s1121_s1 + $0x38] sm:$0xff] }
   0x8   :  { %106 = vmatpush.msra.mxu1 %v652_v8  ;;  %78 = vmatpush.msra.mxu0 %v659_v9  ;;  %v55_v20 = vld [vmem:[%s1122_s0 + $0x28] sm:$0xff]  ;;  %v742_v22 = vld [vmem:[%s1121_s1 + $0xc0] sm:$0xff]  ;;  %v749_v23 = vld [vmem:[%s1121_s1 + $0x30] sm:$0xff] }
   0x9   :  { %148 = vmatpush.msra.mxu2 %v664_v10  ;;  %190 = vmatpush.msra.mxu3 %v659_v9  ;;  %v756_v24 = vld [vmem:[%s1121_s1 + $0xb8] sm:$0xff]  ;;  %v763_v25 = vld [vmem:[%s1121_s1 + $0x28] sm:$0xff]  ;;  %v770_v26 = vld [vmem:[%s1121_s1 + $0xb0] sm:$0xff] }
   0xa   :  { %530 = vmatmul.msk.f32.vlgmr.msra.gmra.mxu2 %vm62_vm0, %v52_v11  ;;  %79 = vmatpush.msra.mxu0 %v676_v12  ;;  %v777_v27 = vld [vmem:[%s1121_s1 + $0x20] sm:$0xff]  ;;  %v784_v28 = vld [vmem:[%s1121_s1 + $0xa8] sm:$0xff]  ;;  %v791_v29 = vld [vmem:[%s1121_s1 + $0x18] sm:$0xff] }
   0xb   :  { %107 = vmatpush.msra.mxu1 %v681_v13  ;;  %191 = vmatpush.msra.mxu3 %v676_v12  ;;  %v58_v30 = vld [vmem:[%s1122_s0 + $0x40] sm:$0xff]  ;;  %v810_v32 = vld [vmem:[%s1121_s1 + $0x10] sm:$0xff]  ;;  %v815_v33 = vld [vmem:[%s1121_s1 + $0x98] sm:$0xff] }
   0xc   :  { %216 = vmatpush.msrb.mxu2 %v623_v3  ;;  %80 = vmatpush.msra.mxu0 %v690_v14  ;;  %v801_v31 = vld [vmem:[%s1121_s1 + $0xa0] sm:$0xff]  ;;  %v824_v34 = vld [vmem:[%s1121_s1 + $0x8] sm:$0xff]  ;;  %v829_v35 = vld [vmem:[%s1121_s1 + $0x90] sm:$0xff] }
   0xd   :  { %108 = vmatpush.msra.mxu1 %v695_v15  ;;  %192 = vmatpush.msra.mxu3 %v690_v14  ;;  %v838_v36 = vld [vmem:[%s1121_s1] sm:$0xff]  ;;  %v843_v37 = vld [vmem:[%s1121_s1 + $0x88] sm:$0xff]  ;;  %v61_v39 = vld [vmem:[%s1122_s0 + $0x58] sm:$0xff] }
   0xe   :  { %217 = vmatpush.msrb.mxu2 %v640_v6  ;;  %81 = vmatpush.msra.mxu0 %v704_v16  ;;  %v50_v38 = vld [vmem:[%s1122_s0] sm:$0xff]  ;;  %v51_v42 = vld [vmem:[%s1122_s0 + $0x8] sm:$0xff]  ;;  %v53_v43 = vld [vmem:[%s1122_s0 + $0x18] sm:$0xff] }
   0xf   :  { %109 = vmatpush.msra.mxu1 %v709_v17  ;;  %193 = vmatpush.msra.mxu3 %v704_v16  ;;  %v534_v40 = vld [vmem:[%s1122_s0 + $0x60] sm:$0xff]  ;;  %v537_v44 = vld [vmem:[%s1122_s0 + $0x78] sm:$0xff]  ;;  %v535_v45 = vld [vmem:[%s1122_s0 + $0x68] sm:$0xff] }
  0x10   :  { %218 = vmatpush.msrb.mxu2 %v652_v8  ;;  %82 = vmatpush.msra.mxu0 %v718_v18  ;;  %v863_v41 = vld [vmem:[%s1121_s1 + $0x80] sm:$0xff]  ;;  %v56_v47 = vld [vmem:[%s1122_s0 + $0x30] sm:$0xff]  ;;  %v57_v50 = vld [vmem:[%s1122_s0 + $0x38] sm:$0xff] }
  0x11   :  { %110 = vmatpush.msra.mxu1 %v723_v19  ;;  %194 = vmatpush.msra.mxu3 %v718_v18  ;;  %v54_v46 = vld [vmem:[%s1122_s0 + $0x20] sm:$0xff]  ;;  %v540_v48 = vld [vmem:[%s1122_s0 + $0x90] sm:$0xff]  ;;  %v59_v51 = vld [vmem:[%s1122_s0 + $0x48] sm:$0xff] }
  0x12   :  { %219 = vmatpush.msrb.mxu2 %v681_v13  ;;  %83 = vmatpush.msra.mxu0 %v735_v21  ;;  %v538_v49 = vld [vmem:[%s1122_s0 + $0x80] sm:$0xff]  ;;  %v543_v52 = vld [vmem:[%s1122_s0 + $0xa8] sm:$0xff]  ;;  %v541_v53 = vld [vmem:[%s1122_s0 + $0x98] sm:$0xff] }
  0x13   :  { %531 = vmatmul.msk.f32.gmra.mxu2 %vm62_vm0, %v55_v20  ;;  %111 = vmatpush.msra.mxu1 %v742_v22  ;;  %v60_v54 = vld [vmem:[%s1122_s0 + $0x50] sm:$0xff]  ;;  %v551_v57 = vld [vmem:[%s1122_s0 + $0xc8] sm:$0xff]  ;;  %v550_v58 = vld [vmem:[%s1122_s0 + $0xc0] sm:$0xff] }
  0x14   :  { %195 = vmatpush.msra.mxu3 %v735_v21  ;;  %220 = vmatpush.msrb.mxu2 %v695_v15  ;;  %v536_v55 = vld [vmem:[%s1122_s0 + $0x70] sm:$0xff]  ;;  %v539_v59 = vld [vmem:[%s1122_s0 + $0x88] sm:$0xff]  ;;  %v554_v61 = vld [vmem:[%s1122_s0 + $0xe0] sm:$0xff] }
  0x15   :  { %84 = vmatpush.msra.mxu0 %v749_v23  ;;  %112 = vmatpush.msra.mxu1 %v756_v24  ;;  %v544_v56 = vld [vmem:[%s1122_s0 + $0xb0] sm:$0xff]  ;;  %v553_v62 = vld [vmem:[%s1122_s0 + $0xd8] sm:$0xff]  ;;  %v542_v63 = vld [vmem:[%s1122_s0 + $0xa0] sm:$0xff] }
  0x16   :  { %196 = vmatpush.msra.mxu3 %v749_v23  ;;  %221 = vmatpush.msrb.mxu2 %v709_v17  ;;  %v552_v60 = vld [vmem:[%s1122_s0 + $0xd0] sm:$0xff]  ;;  %v569_v11 = vld [vmem:[%s1122_s0 + $0x138] sm:$0xff] }
  0x17   :  { %85 = vmatpush.msra.mxu0 %v763_v25  ;;  %113 = vmatpush.msra.mxu1 %v770_v26 }
  0x18   :  { %197 = vmatpush.msra.mxu3 %v763_v25  ;;  %222 = vmatpush.msrb.mxu2 %v723_v19 }
  0x19   :  { %86 = vmatpush.msra.mxu0 %v777_v27  ;;  %114 = vmatpush.msra.mxu1 %v784_v28 }
  0x1a   :  { %198 = vmatpush.msra.mxu3 %v777_v27  ;;  %223 = vmatpush.msrb.mxu2 %v742_v22 }
  0x1b   :  { %87 = vmatpush.msra.mxu0 %v791_v29  ;;  %532 = vmatmul.msk.f32.gmra.mxu2 %vm62_vm0, %v58_v30 }
  0x1c   :  { %115 = vmatpush.msra.mxu1 %v801_v31  ;;  %199 = vmatpush.msra.mxu3 %v791_v29 }
  0x1d   :  { %224 = vmatpush.msrb.mxu2 %v756_v24  ;;  %88 = vmatpush.msra.mxu0 %v810_v32 }
  0x1e   :  { %116 = vmatpush.msra.mxu1 %v815_v33  ;;  %200 = vmatpush.msra.mxu3 %v810_v32 }
  0x1f   :  { %225 = vmatpush.msrb.mxu2 %v770_v26  ;;  %89 = vmatpush.msra.mxu0 %v824_v34 }
  0x20   :  { %117 = vmatpush.msra.mxu1 %v829_v35  ;;  %201 = vmatpush.msra.mxu3 %v824_v34 }
  0x21   :  { %226 = vmatpush.msrb.mxu2 %v784_v28  ;;  %90 = vmatpush.msra.mxu0 %v838_v36 }
  0x22   :  { %118 = vmatpush.msra.mxu1 %v843_v37  ;;  %202 = vmatpush.msra.mxu3 %v838_v36 }
  0x23   :  { %227 = vmatpush.msrb.mxu2 %v801_v31  ;;  %91 = vmatmul.f32.vlgmr.msra.gmra.mxu0 %v50_v38 }
  0x24   :  { %533 = vmatmul.msk.f32.gmra.mxu2 %vm62_vm0, %v61_v39  ;;  %203 = vmatmul.f32.vlgmr.msra.gmra.mxu3 %v534_v40 }
  0x25   :  { %119 = vmatpush.msra.mxu1 %v863_v41  ;;  %332 = vmatpush.msrb.mxu3 %v623_v3 }
  0x26   :  { %228 = vmatpush.msrb.mxu2 %v815_v33  ;;  %120 = vmatmul.f32.vlgmr.msra.gmra.mxu1 %v51_v42 }
  0x27   :  { %257 = vmatpush.msrb.mxu0 %v611_v1  ;;  %333 = vmatpush.msrb.mxu3 %v640_v6 }
  0x28   :  { %229 = vmatpush.msrb.mxu2 %v829_v35  ;;  %303 = vmatpush.msrb.mxu1 %v606_v0 }
  0x29   :  { %258 = vmatpush.msrb.mxu0 %v628_v4  ;;  %334 = vmatpush.msrb.mxu3 %v652_v8 }
  0x2a   :  { %230 = vmatpush.msrb.mxu2 %v843_v37  ;;  %304 = vmatpush.msrb.mxu1 %v616_v2 }
  0x2b   :  { %259 = vmatpush.msrb.mxu0 %v645_v7  ;;  %335 = vmatpush.msrb.mxu3 %v681_v13 }
  0x2c   :  { %231 = vmatpush.msrb.mxu2 %v863_v41  ;;  %94 = vmatmul.f32.gmra.mxu0 %v53_v43 }
  0x2d   :  { %206 = vmatmul.f32.gmra.mxu3 %v537_v44  ;;  %232 = vmatmul.f32.vlgmr.msrb.gmra.mxu2 %v535_v45 }
  0x2e   :  { %305 = vmatpush.msrb.mxu1 %v635_v5  ;;  %336 = vmatpush.msrb.mxu3 %v695_v15 }
  0x2f   :  { %123 = vmatmul.f32.gmra.mxu1 %v54_v46  ;;  %260 = vmatpush.msrb.mxu0 %v664_v10 }
  0x30   :  { %306 = vmatpush.msrb.mxu1 %v659_v9  ;;  %337 = vmatpush.msrb.mxu3 %v709_v17 }
  0x31   :  { %373 = vmatpush.msra.mxu2 %v611_v1  ;;  %419 = vmatpush.msra.mxu0 %v606_v0  ;;  %v555_v0 = vld [vmem:[%s1122_s0 + $0xe8] sm:$0xff] }
  0x32   :  { %307 = vmatpush.msrb.mxu1 %v676_v12  ;;  %338 = vmatpush.msrb.mxu3 %v723_v19 }
  0x33   :  { %374 = vmatpush.msra.mxu2 %v628_v4  ;;  %420 = vmatpush.msra.mxu0 %v616_v2  ;;  %v556_v2 = vld [vmem:[%s1122_s0 + $0xf0] sm:$0xff] }
  0x34   :  { %308 = vmatpush.msrb.mxu1 %v690_v14  ;;  %339 = vmatpush.msrb.mxu3 %v742_v22 }
  0x35   :  { %97 = vmatmul.f32.gmra.mxu0 %v56_v47  ;;  %209 = vmatmul.f32.gmra.mxu3 %v540_v48 }
  0x36   :  { %235 = vmatmul.f32.gmra.mxu2 %v538_v49  ;;  %309 = vmatpush.msrb.mxu1 %v704_v16 }
  0x37   :  { %340 = vmatpush.msrb.mxu3 %v756_v24  ;;  %126 = vmatmul.f32.gmra.mxu1 %v57_v50 }
  0x38   :  { %375 = vmatpush.msra.mxu2 %v645_v7  ;;  %310 = vmatpush.msrb.mxu1 %v718_v18 }
  0x39   :  { %341 = vmatpush.msrb.mxu3 %v770_v26  ;;  %421 = vmatpush.msra.mxu0 %v635_v5  ;;  %v560_v5 = vld [vmem:[%s1122_s0 + $0x110] sm:$0xff] }
  0x3a   :  { %376 = vmatpush.msra.mxu2 %v664_v10  ;;  %311 = vmatpush.msrb.mxu1 %v735_v21 }
  0x3b   :  { %342 = vmatpush.msrb.mxu3 %v784_v28  ;;  %422 = vmatpush.msra.mxu0 %v659_v9  ;;  %v568_v9 = vld [vmem:[%s1122_s0 + $0x130] sm:$0xff] }
  0x3c   :  { %312 = vmatpush.msrb.mxu1 %v749_v23 }
  0x3d   :  { %343 = vmatpush.msrb.mxu3 %v801_v31  ;;  %100 = vmatmul.f32.gmra.mxu0 %v59_v51 }
  0x3e   :  { %212 = vmatmul.f32.gmra.mxu3 %v543_v52  ;;  %238 = vmatmul.f32.gmra.mxu2 %v541_v53 }
  0x3f   :  { %313 = vmatpush.msrb.mxu1 %v763_v25  ;;  %344 = vmatpush.msrb.mxu3 %v815_v33 }
  0x40   :  { %129 = vmatmul.f32.gmra.mxu1 %v60_v54  ;;  %423 = vmatpush.msra.mxu0 %v676_v12  ;;  %v571_v12 = vld [vmem:[%s1122_s0 + $0x148] sm:$0xff] }
  0x41   :  { %314 = vmatpush.msrb.mxu1 %v777_v27  ;;  %345 = vmatpush.msrb.mxu3 %v829_v35 }
  0x42   :  { %424 = vmatpush.msra.mxu0 %v690_v14  ;;  %v572_v14 = vld [vmem:[%s1122_s0 + $0x150] sm:$0xff] }
  0x43   :  { %315 = vmatpush.msrb.mxu1 %v791_v29  ;;  %346 = vmatpush.msrb.mxu3 %v843_v37 }
  0x44   :  { %425 = vmatpush.msra.mxu0 %v704_v16  ;;  %v573_v16 = vld [vmem:[%s1122_s0 + $0x158] sm:$0xff] }
  0x45   :  { %316 = vmatpush.msrb.mxu1 %v810_v32  ;;  %347 = vmatpush.msrb.mxu3 %v863_v41 }
  0x46   :  { %546 = vmatmul.msk.f32.vlgmr.msrb.gmra.mxu0 %vm62_vm0, %v536_v55  ;;  %241 = vmatmul.f32.gmra.mxu2 %v544_v56 }
  0x47   :  { %317 = vmatpush.msrb.mxu1 %v824_v34  ;;  %348 = vmatmul.f32.vlgmr.msrb.gmra.mxu3 %v551_v57 }
  0x48   :  { %426 = vmatpush.msra.mxu0 %v718_v18  ;;  %489 = vmatpush.msra.mxu3 %v611_v1  ;;  %v557_v1 = vld [vmem:[%s1122_s0 + $0xf8] sm:$0xff] }
  0x49   :  { %318 = vmatpush.msrb.mxu1 %v838_v36  ;;  %v577_v18 = vld [vmem:[%s1122_s0 + $0x178] sm:$0xff] }
  0x4a   :  { %319 = vmatmul.f32.vlgmr.msrb.gmra.mxu1 %v550_v58  ;;  %427 = vmatpush.msra.mxu0 %v735_v21 }
  0x4b   :  { %448 = vmatpush.msra.mxu1 %v623_v3  ;;  %490 = vmatpush.msra.mxu3 %v628_v4  ;;  %v545_v3 = vld [vmem:[%s1122_s0 + $0xb8] sm:$0xff]  ;;  %v558_v4 = vld [vmem:[%s1122_s0 + $0x100] sm:$0xff] }
  0x4c   :  { %428 = vmatpush.msra.mxu0 %v749_v23 }
  0x4d   :  { %449 = vmatpush.msra.mxu1 %v640_v6  ;;  %491 = vmatpush.msra.mxu3 %v645_v7  ;;  %v559_v6 = vld [vmem:[%s1122_s0 + $0x108] sm:$0xff]  ;;  %v566_v7 = vld [vmem:[%s1122_s0 + $0x120] sm:$0xff] }
  0x4e   :  { %547 = vmatmul.msk.f32.gmra.mxu0 %vm62_vm0, %v539_v59  ;;  %562 = vmatmul.msk.f32.vlgmr.msra.gmra.mxu2 %vm62_vm0, %v552_v60 }
  0x4f   :  { %450 = vmatpush.msra.mxu1 %v652_v8  ;;  %351 = vmatmul.f32.gmra.mxu3 %v554_v61  ;;  %v561_v8 = vld [vmem:[%s1122_s0 + $0x118] sm:$0xff] }
  0x50   :  { %429 = vmatpush.msra.mxu0 %v763_v25  ;;  %492 = vmatpush.msra.mxu3 %v664_v10  ;;  %v567_v10 = vld [vmem:[%s1122_s0 + $0x128] sm:$0xff] }
  0x51   :  { %451 = vmatpush.msra.mxu1 %v681_v13  ;;  %v570_v13 = vld [vmem:[%s1122_s0 + $0x140] sm:$0xff] }
  0x52   :  { %322 = vmatmul.f32.gmra.mxu1 %v553_v62  ;;  %430 = vmatpush.msra.mxu0 %v777_v27 }
  0x53   :  { %452 = vmatpush.msra.mxu1 %v695_v15  ;;  %v574_v15 = vld [vmem:[%s1122_s0 + $0x160] sm:$0xff] }
  0x54   :  { %431 = vmatpush.msra.mxu0 %v791_v29 }
  0x55   :  { %453 = vmatpush.msra.mxu1 %v709_v17  ;;  %v575_v17 = vld [vmem:[%s1122_s0 + $0x168] sm:$0xff] }
  0x56   :  { %548 = vmatmul.msk.f32.gmra.mxu0 %vm62_vm0, %v542_v63  ;;  %563 = vmatmul.msk.f32.gmra.mxu2 %vm62_vm0, %v555_v0 }
  0x57   :  { %454 = vmatpush.msra.mxu1 %v723_v19  ;;  %354 = vmatmul.f32.gmra.mxu3 %v557_v1  ;;  %v576_v19 = vld [vmem:[%s1122_s0 + $0x170] sm:$0xff] }
  0x58   :  { %432 = vmatpush.msra.mxu0 %v810_v32 }
  0x59   :  { %455 = vmatpush.msra.mxu1 %v742_v22 }
  0x5a   :  { %325 = vmatmul.f32.gmra.mxu1 %v556_v2  ;;  %433 = vmatpush.msra.mxu0 %v824_v34 }
  0x5b   :  { %456 = vmatpush.msra.mxu1 %v756_v24 }
  0x5c   :  { %434 = vmatpush.msra.mxu0 %v838_v36 }
  0x5d   :  { %457 = vmatpush.msra.mxu1 %v770_v26 }
  0x5e   :  { %549 = vmatmul.msk.f32.gmra.mxu0 %vm62_vm0, %v545_v3  ;;  %564 = vmatmul.msk.f32.gmra.mxu2 %vm62_vm0, %v558_v4 }
  0x5f   :  { %458 = vmatpush.msra.mxu1 %v784_v28  ;;  %357 = vmatmul.f32.gmra.mxu3 %v560_v5 }
  0x61   :  { %459 = vmatpush.msra.mxu1 %v801_v31 }
  0x62   :  { %328 = vmatmul.f32.gmra.mxu1 %v559_v6  ;;  %v582_v6 = vld [vmem:[%s1123_s2] ss:$0 sm:$0xff] }
  0x63   :  { %460 = vmatpush.msra.mxu1 %v815_v33 }
  0x65   :  { %461 = vmatpush.msra.mxu1 %v829_v35 }
  0x66   :  { %435 = vmatmul.f32.vlgmr.msra.gmra.mxu0 %v566_v7  ;;  %565 = vmatmul.msk.f32.gmra.mxu2 %vm62_vm0, %v561_v8 }
  0x67   :  { %462 = vmatpush.msra.mxu1 %v843_v37  ;;  %578 = vmatmul.msk.f32.vlgmr.msra.gmra.mxu3 %vm62_vm0, %v568_v9 }
  0x69   :  { %463 = vmatpush.msra.mxu1 %v863_v41 }
  0x6a   :  { %464 = vmatmul.f32.vlgmr.msra.gmra.mxu1 %v567_v10 }
  0x6e   :  { %438 = vmatmul.f32.gmra.mxu0 %v569_v11 }
  0x6f   :  { %579 = vmatmul.msk.f32.gmra.mxu3 %vm62_vm0, %v571_v12 }
  0x72   :  { %467 = vmatmul.f32.gmra.mxu1 %v570_v13 }
  0x76   :  { %441 = vmatmul.f32.gmra.mxu0 %v572_v14 }
  0x77   :  { %580 = vmatmul.msk.f32.gmra.mxu3 %vm62_vm0, %v574_v15 }
  0x7a   :  { %470 = vmatmul.f32.gmra.mxu1 %v573_v16 }
  0x7e   :  { %444 = vmatmul.f32.gmra.mxu0 %v575_v17 }
  0x7f   :  { %581 = vmatmul.msk.f32.gmra.mxu3 %vm62_vm0, %v577_v18 }
  0x82   :  { %473 = vmatmul.f32.gmra.mxu1 %v576_v19 }
  0x8d   :  { %v150_v20 = vpop.f32.mrf.mxu2 }
  0x96   :  { %v153_v21 = vpop.f32.mrf.mxu2 }
  0x9e   :  { %v1087_v23 = vpop.f32.mrf.mxu2 }
  0xa0   :  { %v92_v22 = vpop.f32.mrf.mxu0 }
  0xa3   :  { %v121_v24 = vpop.f32.mrf.mxu1 }
  0xa4   :  { %v122_v54 = vadd.f32 %v121_v24, %v92_v22 }
  0xa6   :  { %v151_v59 = vadd.f32 %v150_v20, %v122_v54 }
  0xa7   :  { %v204_v25 = vpop.f32.mrf.mxu3  ;;  %v1089_v27 = vpop.f32.mrf.mxu2 }
  0xa9   :  { %v95_v26 = vpop.f32.mrf.mxu0 }
  0xac   :  { %v124_v28 = vpop.f32.mrf.mxu1 }
  0xad   :  { %v125_v2 = vadd.f32 %v124_v28, %v95_v26 }
  0xaf   :  { %v154_v11 = vadd.f32 %v153_v21, %v125_v2 }
  0xb0   :  { %v207_v29 = vpop.f32.mrf.mxu3  ;;  %v233_v32 = vpop.f32.mrf.mxu2 }
  0xb1   :  { %v234_v55 = vadd.f32 %v233_v32, %v204_v25 }
  0xb2   :  { %v98_v30 = vpop.f32.mrf.mxu0 }
  0xb4   :  { %v127_v31 = vpop.f32.mrf.mxu1 }
  0xb5   :  { %v128_v20 = vadd.f32 %v127_v31, %v98_v30 }
  0xb7   :  { %v157_v32 = vadd.f32 %v1087_v23, %v128_v20 }
  0xb8   :  { %v210_v33 = vpop.f32.mrf.mxu3 }
  0xb9   :  { %v236_v36 = vpop.f32.mrf.mxu2 }
  0xba   :  { %v1091_v34 = vpop.f32.mrf.mxu0  ;;  %v237_v3 = vadd.f32 %v236_v36, %v207_v29 }
  0xbd   :  { %v1093_v35 = vpop.f32.mrf.mxu1 }
  0xbe   :  { %v131_v31 = vadd.f32 %v1093_v35, %v1091_v34 }
  0xc1   :  { %v1095_v37 = vpop.f32.mrf.mxu3  ;;  %v239_v40 = vpop.f32.mrf.mxu2 }
  0xc2   :  { %v240_v22 = vadd.f32 %v239_v40, %v210_v33 }
  0xc3   :  { %v262_v38 = vpop.f32.mrf.mxu0 }
  0xc4   :  { %v263_v56 = vadd.f32 %v262_v38, %v234_v55 }
  0xc6   :  { %v274_v63 = vmax.f32 %v151_v59, %v263_v56 }
  0xc7   :  { %v320_v39 = vpop.f32.mrf.mxu1 }
  0xc9   :  { %v242_v46 = vpop.f32.mrf.mxu2 }
  0xca   :  { %v349_v41 = vpop.f32.mrf.mxu3  ;;  %v243_v33 = vadd.f32 %v242_v46, %v1095_v37 }
  0xcb   :  { %v265_v42 = vpop.f32.mrf.mxu0  ;;  %v350_v57 = vadd.f32 %v349_v41, %v320_v39 }
  0xcc   :  { %v266_v7 = vadd.f32 %v265_v42, %v237_v3 }
  0xce   :  { %v275_v15 = vmax.f32 %v154_v11, %v266_v7 }
  0xcf   :  { %v323_v43 = vpop.f32.mrf.mxu1 }
  0xd1   :  { %v378_v50 = vpop.f32.mrf.mxu2 }
  0xd2   :  { %v352_v44 = vpop.f32.mrf.mxu3  ;;  %v379_v60 = vadd.f32 %v378_v50, %v350_v57 }
  0xd3   :  { %v268_v45 = vpop.f32.mrf.mxu0  ;;  %v353_v8 = vadd.f32 %v352_v44, %v323_v43 }
  0xd4   :  { %v390_v4 = vmax.f32 %v274_v63, %v379_v60  ;;  %v269_v26 = vadd.f32 %v268_v45, %v240_v22 }
  0xd6   :  { %v276_v41 = vmax.f32 %v157_v32, %v269_v26 }
  0xd7   :  { %v326_v47 = vpop.f32.mrf.mxu1 }
  0xd9   :  { %v381_v61 = vpop.f32.mrf.mxu2 }
  0xda   :  { %v355_v48 = vpop.f32.mrf.mxu3  ;;  %v382_v12 = vadd.f32 %v381_v61, %v353_v8 }
  0xdb   :  { %v271_v49 = vpop.f32.mrf.mxu0  ;;  %v356_v28 = vadd.f32 %v355_v48, %v326_v47 }
  0xdc   :  { %v391_v24 = vmax.f32 %v275_v15, %v382_v12  ;;  %v272_v45 = vadd.f32 %v271_v49, %v243_v33 }
  0xdf   :  { %v329_v51 = vpop.f32.mrf.mxu1 }
  0xe1   :  { %v384_v16 = vpop.f32.mrf.mxu2 }
  0xe2   :  { %v358_v52 = vpop.f32.mrf.mxu3  ;;  %v385_v36 = vadd.f32 %v384_v16, %v356_v28 }
  0xe3   :  { %v436_v53 = vpop.f32.mrf.mxu0  ;;  %v359_v47 = vadd.f32 %v358_v52, %v329_v51 }
  0xe4   :  { %v392_v40 = vmax.f32 %v276_v41, %v385_v36 }
  0xe7   :  { %v465_v58 = vpop.f32.mrf.mxu1 }
  0xe8   :  { %v466_v62 = vadd.f32 %v465_v58, %v436_v53  ;;  %v160_v53 = vadd.f32 %v1089_v27, %v131_v31 }
  0xe9   :  { %v387_v44 = vpop.f32.mrf.mxu2 }
  0xea   :  { %v494_v0 = vpop.f32.mrf.mxu3  ;;  %v388_v54 = vadd.f32 %v387_v44, %v359_v47  ;;  %v277_v35 = vmax.f32 %v160_v53, %v272_v45 }
  0xeb   :  { %v439_v1 = vpop.f32.mrf.mxu0  ;;  %v495_v5 = vadd.f32 %v494_v0, %v466_v62 }
  0xec   :  { %v393_v56 = vmax.f32 %v277_v35, %v388_v54 }
  0xed   :  { %v506_v9 = vmax.f32 %v390_v4, %v495_v5 }
  0xef   :  { %v468_v10 = vpop.f32.mrf.mxu1  ;;  %v514_v13 = vadd.f32 %v582_v6, %v506_v9 }
  0xf0   :  { %v469_v14 = vadd.f32 %v468_v10, %v439_v1 }
  0xf1   :  { %v518_v17 = vmax.f32 %v514_v13, 0.0 }
  0xf2   :  { %v497_v18 = vpop.f32.mrf.mxu3 }
  0xf3   :  { %v442_v19 = vpop.f32.mrf.mxu0  ;;  %522 = vst.msk [vmem:[%s1124_s3] sm:$0xff] %vm62_vm0, %v518_v17  ;;  %v498_v25 = vadd.f32 %v497_v18, %v469_v14 }
  0xf5   :  { %v507_v21 = vmax.f32 %v391_v24, %v498_v25 }
  0xf7   :  { %v471_v29 = vpop.f32.mrf.mxu1  ;;  %v515_v38 = vadd.f32 %v582_v6, %v507_v21 }
  0xf8   :  { %v472_v39 = vadd.f32 %v471_v29, %v442_v19 }
  0xf9   :  { %v519_v42 = vmax.f32 %v515_v38, 0.0 }
  0xfa   :  { %v500_v30 = vpop.f32.mrf.mxu3 }
  0xfb   :  { %523 = vst.msk [vmem:[%s1124_s3 + $0x8] sm:$0xff] %vm62_vm0, %v519_v42  ;;  %v501_v43 = vadd.f32 %v500_v30, %v472_v39  ;;  %v445_v23 = vpop.f32.mrf.mxu0 }
  0xfd   :  { %v508_v48 = vmax.f32 %v392_v40, %v501_v43 }
  0xff   :  { %v474_v50 = vpop.f32.mrf.mxu1  ;;  %v516_v55 = vadd.f32 %v582_v6, %v508_v48 }
 0x100   :  { %v475_v34 = vadd.f32 %v474_v50, %v445_v23 }
 0x101   :  { %v520_v37 = vmax.f32 %v516_v55, 0.0 }
 0x102   :  { %v503_v46 = vpop.f32.mrf.mxu3 }
 0x103   :  { %524 = vst.msk [vmem:[%s1124_s3 + $0x10] sm:$0xff] %vm62_vm0, %v520_v37  ;;  %v504_v57 = vadd.f32 %v503_v46, %v475_v34 }
 0x105   :  { %v509_v58 = vmax.f32 %v393_v56, %v504_v57 }
 0x107   :  { %v517_v49 = vadd.f32 %v582_v6, %v509_v58 }
 0x109   :  { %v521_v51 = vmax.f32 %v517_v49, 0.0 }
 0x10b   :  { %525 = vst.msk [vmem:[%s1124_s3 + $0x18] sm:$0xff] %vm62_vm0, %v521_v51 }

// kernel: vgg_adversarial_forward.14
= control target key start
LH: loop header
LB: loop body
LE: loop exit
PB: predicated region body
PF: predicated region fallthrough
CT: control target
= control target key end

     0   :  { %vm66_vm0 = vcmask 261120   ;;  %vm170_vm1 = vcmask 523264   ;;  %s387_s1 = inlined_call_operand.vmem [shape: f32[288,64], index: 1, kind: input, shape index: {}]   ;;  %s388_s0 = inlined_call_operand.vmem [shape: f32[1,32,288], index: 0, kind: input, shape index: {}]   ;;  %s389_s2 = inlined_call_operand.vmem [shape: f32[1,64], index: 2, kind: input, shape index: {}]   ;;  %s390_s3 = inlined_call_operand.vmem [shape: f32[32,64], index: 3, kind: output, shape index: {}]  }
   0x1   :  { %v29_v0 = vld [vmem:[%s387_s1 + $0x78] sm:$0xff]  ;;  %v28_v2 = vld [vmem:[%s387_s1 + $0x70] sm:$0xff]  ;;  %v27_v4 = vld [vmem:[%s387_s1 + $0x68] sm:$0xff] }
   0x2   :  { %v45_v1 = vld [vmem:[%s387_s1 + $0xf8] sm:$0xff]  ;;  %79 = vmatpush.msra.mxu0 %v29_v0  ;;  %183 = vmatpush.msra.mxu3 %v29_v0  ;;  %v44_v3 = vld [vmem:[%s387_s1 + $0xf0] sm:$0xff]  ;;  %v43_v5 = vld [vmem:[%s387_s1 + $0xe8] sm:$0xff] }
   0x3   :  { %108 = vmatpush.msra.mxu1 %v45_v1  ;;  %v26_v6 = vld [vmem:[%s387_s1 + $0x60] sm:$0xff]  ;;  %v25_v8 = vld [vmem:[%s387_s1 + $0x58] sm:$0xff]  ;;  %v24_v11 = vld [vmem:[%s387_s1 + $0x50] sm:$0xff] }
   0x4   :  { %80 = vmatpush.msra.mxu0 %v28_v2  ;;  %184 = vmatpush.msra.mxu3 %v28_v2  ;;  %v42_v7 = vld [vmem:[%s387_s1 + $0xe0] sm:$0xff]  ;;  %v41_v9 = vld [vmem:[%s387_s1 + $0xd8] sm:$0xff]  ;;  %v48_v12 = vld [vmem:[%s387_s1 + $0x110] sm:$0xff] }
   0x5   :  { %109 = vmatpush.msra.mxu1 %v44_v3  ;;  %v49_v10 = vld [vmem:[%s387_s1 + $0x118] sm:$0xff]  ;;  %v40_v13 = vld [vmem:[%s387_s1 + $0xd0] sm:$0xff]  ;;  %v47_v14 = vld [vmem:[%s387_s1 + $0x108] sm:$0xff] }
   0x6   :  { %81 = vmatpush.msra.mxu0 %v27_v4  ;;  %185 = vmatpush.msra.mxu3 %v27_v4  ;;  %v23_v15 = vld [vmem:[%s387_s1 + $0x48] sm:$0xff]  ;;  %v46_v17 = vld [vmem:[%s387_s1 + $0x100] sm:$0xff]  ;;  %v52_v20 = vld [vmem:[%s388_s0 + $0x10] sm:$0xff] }
   0x7   :  { %110 = vmatpush.msra.mxu1 %v43_v5  ;;  %149 = vmatpush.msra.mxu2 %v49_v10  ;;  %v39_v16 = vld [vmem:[%s387_s1 + $0xc8] sm:$0xff]  ;;  %v22_v18 = vld [vmem:[%s387_s1 + $0x40] sm:$0xff]  ;;  %v21_v21 = vld [vmem:[%s387_s1 + $0x38] sm:$0xff] }
   0x8   :  { %82 = vmatpush.msra.mxu0 %v26_v6  ;;  %186 = vmatpush.msra.mxu3 %v26_v6  ;;  %v38_v19 = vld [vmem:[%s387_s1 + $0xc0] sm:$0xff]  ;;  %v37_v22 = vld [vmem:[%s387_s1 + $0xb8] sm:$0xff]  ;;  %v20_v23 = vld [vmem:[%s387_s1 + $0x30] sm:$0xff] }
   0x9   :  { %111 = vmatpush.msra.mxu1 %v42_v7  ;;  %150 = vmatpush.msra.mxu2 %v48_v12  ;;  %v36_v24 = vld [vmem:[%s387_s1 + $0xb0] sm:$0xff]  ;;  %v19_v25 = vld [vmem:[%s387_s1 + $0x28] sm:$0xff]  ;;  %v18_v27 = vld [vmem:[%s387_s1 + $0x20] sm:$0xff] }
   0xa   :  { %83 = vmatpush.msra.mxu0 %v25_v8  ;;  %187 = vmatpush.msra.mxu3 %v25_v8  ;;  %v35_v26 = vld [vmem:[%s387_s1 + $0xa8] sm:$0xff]  ;;  %v34_v28 = vld [vmem:[%s387_s1 + $0xa0] sm:$0xff]  ;;  %v17_v30 = vld [vmem:[%s387_s1 + $0x18] sm:$0xff] }
   0xb   :  { %112 = vmatpush.msra.mxu1 %v41_v9  ;;  %151 = vmatpush.msra.mxu2 %v47_v14  ;;  %v55_v29 = vld [vmem:[%s388_s0 + $0x28] sm:$0xff]  ;;  %v33_v31 = vld [vmem:[%s387_s1 + $0x98] sm:$0xff]  ;;  %v16_v32 = vld [vmem:[%s387_s1 + $0x10] sm:$0xff] }
   0xc   :  { %84 = vmatpush.msra.mxu0 %v24_v11  ;;  %188 = vmatpush.msra.mxu3 %v24_v11  ;;  %v32_v33 = vld [vmem:[%s387_s1 + $0x90] sm:$0xff]  ;;  %v15_v34 = vld [vmem:[%s387_s1 + $0x8] sm:$0xff]  ;;  %v14_v36 = vld [vmem:[%s387_s1] sm:$0xff] }
   0xd   :  { %113 = vmatpush.msra.mxu1 %v40_v13  ;;  %152 = vmatpush.msra.mxu2 %v46_v17  ;;  %v31_v35 = vld [vmem:[%s387_s1 + $0x88] sm:$0xff]  ;;  %v30_v37 = vld [vmem:[%s387_s1 + $0x80] sm:$0xff]  ;;  %v53_v39 = vld [vmem:[%s388_s0 + $0x18] sm:$0xff] }
   0xe   :  { %85 = vmatpush.msra.mxu0 %v23_v15  ;;  %189 = vmatpush.msra.mxu3 %v23_v15  ;;  %v50_v38 = vld [vmem:[%s388_s0] sm:$0xff]  ;;  %v51_v40 = vld [vmem:[%s388_s0 + $0x8] sm:$0xff]  ;;  %v56_v42 = vld [vmem:[%s388_s0 + $0x30] sm:$0xff] }
   0xf   :  { %114 = vmatpush.msra.mxu1 %v39_v16  ;;  %179 = vmatmul.msk.f32.vlgmr.msra.gmra.mxu2 %vm66_vm0, %v52_v20  ;;  %v58_v41 = vld [vmem:[%s388_s0 + $0x40] sm:$0xff]  ;;  %v61_v44 = vld [vmem:[%s388_s0 + $0x58] sm:$0xff]  ;;  %v59_v45 = vld [vmem:[%s388_s0 + $0x48] sm:$0xff] }
  0x10   :  { %86 = vmatpush.msra.mxu0 %v22_v18  ;;  %190 = vmatpush.msra.mxu3 %v22_v18  ;;  %v54_v43 = vld [vmem:[%s388_s0 + $0x20] sm:$0xff]  ;;  %v57_v46 = vld [vmem:[%s388_s0 + $0x38] sm:$0xff]  ;;  %v60_v47 = vld [vmem:[%s388_s0 + $0x50] sm:$0xff] }
  0x11   :  { %115 = vmatpush.msra.mxu1 %v38_v19  ;;  %v199_v49 = vld [vmem:[%s389_s2] ss:$0 sm:$0xff] }
  0x12   :  { %87 = vmatpush.msra.mxu0 %v21_v21  ;;  %191 = vmatpush.msra.mxu3 %v21_v21 }
  0x13   :  { %116 = vmatpush.msra.mxu1 %v37_v22 }
  0x14   :  { %88 = vmatpush.msra.mxu0 %v20_v23  ;;  %192 = vmatpush.msra.mxu3 %v20_v23 }
  0x15   :  { %117 = vmatpush.msra.mxu1 %v36_v24 }
  0x16   :  { %89 = vmatpush.msra.mxu0 %v19_v25  ;;  %193 = vmatpush.msra.mxu3 %v19_v25 }
  0x17   :  { %118 = vmatpush.msra.mxu1 %v35_v26  ;;  %180 = vmatmul.msk.f32.gmra.mxu2 %vm66_vm0, %v55_v29 }
  0x18   :  { %90 = vmatpush.msra.mxu0 %v18_v27  ;;  %194 = vmatpush.msra.mxu3 %v18_v27 }
  0x19   :  { %119 = vmatpush.msra.mxu1 %v34_v28 }
  0x1a   :  { %91 = vmatpush.msra.mxu0 %v17_v30  ;;  %195 = vmatpush.msra.mxu3 %v17_v30 }
  0x1b   :  { %120 = vmatpush.msra.mxu1 %v33_v31 }
  0x1c   :  { %92 = vmatpush.msra.mxu0 %v16_v32  ;;  %196 = vmatpush.msra.mxu3 %v16_v32 }
  0x1d   :  { %121 = vmatpush.msra.mxu1 %v32_v33 }
  0x1e   :  { %93 = vmatpush.msra.mxu0 %v15_v34  ;;  %197 = vmatpush.msra.mxu3 %v15_v34 }
  0x1f   :  { %122 = vmatpush.msra.mxu1 %v31_v35  ;;  %181 = vmatmul.msk.f32.gmra.mxu2 %vm66_vm0, %v58_v41 }
  0x20   :  { %94 = vmatpush.msra.mxu0 %v14_v36  ;;  %198 = vmatpush.msra.mxu3 %v14_v36 }
  0x21   :  { %123 = vmatpush.msra.mxu1 %v30_v37  ;;  %95 = vmatmul.f32.vlgmr.msra.gmra.mxu0 %v50_v38 }
  0x22   :  { %98 = vmatmul.f32.vlgmr.msra.gmra.mxu3 %v53_v39  ;;  %124 = vmatmul.f32.vlgmr.msra.gmra.mxu1 %v51_v40 }
  0x27   :  { %182 = vmatmul.msk.f32.gmra.mxu2 %vm66_vm0, %v61_v44 }
  0x2a   :  { %101 = vmatmul.f32.gmra.mxu3 %v56_v42  ;;  %127 = vmatmul.f32.gmra.mxu1 %v54_v43 }
  0x32   :  { %104 = vmatmul.f32.gmra.mxu3 %v59_v45  ;;  %130 = vmatmul.f32.gmra.mxu1 %v57_v46 }
  0x3a   :  { %133 = vmatmul.f32.gmra.mxu1 %v60_v47 }
  0x92   :  { %v154_v48 = vpop.f32.mrf.mxu2 }
  0x9a   :  { %v157_v55 = vpop.f32.mrf.mxu2 }
  0x9e   :  { %v96_v50 = vpop.f32.mrf.mxu0 }
  0x9f   :  { %v97_v51 = vadd.f32 %v199_v49, %v96_v50  ;;  %v125_v52 = vpop.f32.mrf.mxu1 }
  0xa1   :  { %v126_v53 = vadd.f32 %v125_v52, %v97_v51 }
  0xa2   :  { %v160_v0 = vpop.f32.mrf.mxu2 }
  0xa3   :  { %v155_v54 = vadd.f32 %v154_v48, %v126_v53 }
  0xa5   :  { %v166_v56 = vmax.f32 %v155_v54, 0.0  ;;  %v99_v57 = vpop.f32.mrf.mxu3 }
  0xa6   :  { %v100_v58 = vadd.f32 %v199_v49, %v99_v57 }
  0xa7   :  { %171 = vst.msk [vmem:[%s390_s3] sm:$0xff] %vm170_vm1, %v166_v56  ;;  %v128_v59 = vpop.f32.mrf.mxu1 }
  0xa8   :  { %v129_v60 = vadd.f32 %v128_v59, %v100_v58 }
  0xaa   :  { %v158_v61 = vadd.f32 %v157_v55, %v129_v60  ;;  %v163_v9 = vpop.f32.mrf.mxu2 }
  0xac   :  { %v167_v62 = vmax.f32 %v158_v61, 0.0 }
  0xad   :  { %v102_v63 = vpop.f32.mrf.mxu3 }
  0xae   :  { %172 = vst.msk [vmem:[%s390_s3 + $0x8] sm:$0xff] %vm170_vm1, %v167_v62  ;;  %v103_v1 = vadd.f32 %v199_v49, %v102_v63 }
  0xaf   :  { %v131_v2 = vpop.f32.mrf.mxu1 }
  0xb0   :  { %v132_v3 = vadd.f32 %v131_v2, %v103_v1 }
  0xb2   :  { %v161_v4 = vadd.f32 %v160_v0, %v132_v3 }
  0xb4   :  { %v168_v5 = vmax.f32 %v161_v4, 0.0 }
  0xb5   :  { %v105_v6 = vpop.f32.mrf.mxu3 }
  0xb6   :  { %173 = vst.msk [vmem:[%s390_s3 + $0x10] sm:$0xff] %vm170_vm1, %v168_v5  ;;  %v106_v7 = vadd.f32 %v199_v49, %v105_v6 }
  0xb7   :  { %v134_v8 = vpop.f32.mrf.mxu1 }
  0xb8   :  { %v135_v10 = vadd.f32 %v134_v8, %v106_v7 }
  0xba   :  { %v164_v11 = vadd.f32 %v163_v9, %v135_v10 }
  0xbc   :  { %v169_v12 = vmax.f32 %v164_v11, 0.0 }
  0xbe   :  { %174 = vst.msk [vmem:[%s390_s3 + $0x18] sm:$0xff] %vm170_vm1, %v169_v12 }

// kernel: vgg_adversarial_forward.15
= control target key start
LH: loop header
LB: loop body
LE: loop exit
PB: predicated region body
PF: predicated region fallthrough
CT: control target
= control target key end

     0   :  { %vm91_vm0 = vcmask 523264   ;;  %s1295_s1 = inlined_call_operand.vmem [shape: f32[576,64], index: 1, kind: input, shape index: {}]   ;;  %s1296_s0 = inlined_call_operand.vmem [shape: f32[4,8,576], index: 0, kind: input, shape index: {}]   ;;  %s1297_s2 = inlined_call_operand.vmem [shape: f32[1,64], index: 2, kind: input, shape index: {}]   ;;  %s1298_s3 = inlined_call_operand.vmem [shape: f32[8,64], index: 3, kind: output, shape index: {}]  }
   0x1   :  { %v579_v0 = vld [vmem:[%s1295_s1 + $0x78] sm:$0xff]  ;;  %v589_v2 = vld [vmem:[%s1295_s1 + $0x70] sm:$0xff]  ;;  %v613_v6 = vld [vmem:[%s1295_s1 + $0x68] sm:$0xff] }
   0x2   :  { %v584_v1 = vld [vmem:[%s1295_s1 + $0x178] sm:$0xff]  ;;  %95 = vmatpush.msra.mxu0 %v579_v0  ;;  %v601_v4 = vld [vmem:[%s1295_s1 + $0x170] sm:$0xff]  ;;  %v623_v8 = vld [vmem:[%s1295_s1 + $0x168] sm:$0xff] }
   0x3   :  { %1331 = vst [vmem:[#allocation2_spill] sm:$0xff] %v584_v1  ;;  %135 = vmatpush.msra.mxu2 %v584_v1  ;;  %v596_v3 = vld [vmem:[%s1295_s1 + $0xf8] sm:$0xff]  ;;  %v618_v7 = vld [vmem:[%s1295_s1 + $0xf0] sm:$0xff]  ;;  %v635_v10 = vld [vmem:[%s1295_s1 + $0xe8] sm:$0xff] }
   0x4   :  { %1332 = vst [vmem:[#allocation3_spill] sm:$0xff] %v596_v3  ;;  %v606_v5 = vld [vmem:[%s1295_s1 + $0x1f8] sm:$0xff]  ;;  %115 = vmatpush.msra.mxu1 %v596_v3  ;;  %96 = vmatpush.msra.mxu0 %v589_v2  ;;  %v630_v9 = vld [vmem:[%s1295_s1 + $0x1f0] sm:$0xff]  ;;  %v642_v11 = vld [vmem:[%s1295_s1 + $0x60] sm:$0xff] }
   0x5   :  { %1333 = vst [vmem:[#allocation4_spill] sm:$0xff] %v601_v4  ;;  %155 = vmatpush.msra.mxu3 %v606_v5  ;;  %136 = vmatpush.msra.mxu2 %v601_v4  ;;  %v647_v12 = vld [vmem:[%s1295_s1 + $0x160] sm:$0xff]  ;;  %v652_v13 = vld [vmem:[%s1295_s1 + $0x1e8] sm:$0xff]  ;;  %v671_v16 = vld [vmem:[%s1295_s1 + $0x58] sm:$0xff] }
   0x6   :  { %1334 = vst [vmem:[#allocation5_spill] sm:$0xff] %v618_v7  ;;  %116 = vmatpush.msra.mxu1 %v618_v7  ;;  %97 = vmatpush.msra.mxu0 %v613_v6  ;;  %v659_v14 = vld [vmem:[%s1295_s1 + $0xe0] sm:$0xff]  ;;  %v676_v17 = vld [vmem:[%s1295_s1 + $0x158] sm:$0xff]  ;;  %v695_v20 = vld [vmem:[%s1295_s1 + $0x50] sm:$0xff] }
   0x7   :  { %1335 = vst [vmem:[#allocation6_spill] sm:$0xff] %v623_v8  ;;  %156 = vmatpush.msra.mxu3 %v630_v9  ;;  %137 = vmatpush.msra.mxu2 %v623_v8  ;;  %v664_v15 = vld [vmem:[%s1295_s1 + $0x1e0] sm:$0xff]  ;;  %v683_v18 = vld [vmem:[%s1295_s1 + $0xd8] sm:$0xff]  ;;  %v700_v21 = vld [vmem:[%s1295_s1 + $0x150] sm:$0xff] }
   0x8   :  { %1336 = vst [vmem:[#allocation7_spill] sm:$0xff] %v635_v10  ;;  %117 = vmatpush.msra.mxu1 %v635_v10  ;;  %98 = vmatpush.msra.mxu0 %v642_v11  ;;  %v688_v19 = vld [vmem:[%s1295_s1 + $0x1d8] sm:$0xff]  ;;  %v707_v22 = vld [vmem:[%s1295_s1 + $0xd0] sm:$0xff]  ;;  %v719_v24 = vld [vmem:[%s1295_s1 + $0x48] sm:$0xff] }
   0x9   :  { %1337 = vst [vmem:[#allocation8_spill] sm:$0xff] %v647_v12  ;;  %157 = vmatpush.msra.mxu3 %v652_v13  ;;  %138 = vmatpush.msra.mxu2 %v647_v12  ;;  %v712_v23 = vld [vmem:[%s1295_s1 + $0x1d0] sm:$0xff]  ;;  %v724_v25 = vld [vmem:[%s1295_s1 + $0x148] sm:$0xff]  ;;  %v743_v28 = vld [vmem:[%s1295_s1 + $0x40] sm:$0xff] }
   0xa   :  { %1338 = vst [vmem:[#allocation9_spill] sm:$0xff] %v659_v14  ;;  %118 = vmatpush.msra.mxu1 %v659_v14  ;;  %99 = vmatpush.msra.mxu0 %v671_v16  ;;  %v731_v26 = vld [vmem:[%s1295_s1 + $0xc8] sm:$0xff]  ;;  %v748_v29 = vld [vmem:[%s1295_s1 + $0x140] sm:$0xff]  ;;  %v767_v32 = vld [vmem:[%s1295_s1 + $0x38] sm:$0xff] }
   0xb   :  { %1339 = vst [vmem:[#allocation10_spill] sm:$0xff] %v676_v17  ;;  %158 = vmatpush.msra.mxu3 %v664_v15  ;;  %139 = vmatpush.msra.mxu2 %v676_v17  ;;  %v736_v27 = vld [vmem:[%s1295_s1 + $0x1c8] sm:$0xff]  ;;  %v755_v30 = vld [vmem:[%s1295_s1 + $0xc0] sm:$0xff]  ;;  %v772_v33 = vld [vmem:[%s1295_s1 + $0x138] sm:$0xff] }
   0xc   :  { %1340 = vst [vmem:[#allocation11_spill] sm:$0xff] %v683_v18  ;;  %119 = vmatpush.msra.mxu1 %v683_v18  ;;  %100 = vmatpush.msra.mxu0 %v695_v20  ;;  %v760_v31 = vld [vmem:[%s1295_s1 + $0x1c0] sm:$0xff]  ;;  %v779_v34 = vld [vmem:[%s1295_s1 + $0xb8] sm:$0xff]  ;;  %v791_v36 = vld [vmem:[%s1295_s1 + $0x30] sm:$0xff] }
   0xd   :  { %1341 = vst [vmem:[#allocation12_spill] sm:$0xff] %v700_v21  ;;  %159 = vmatpush.msra.mxu3 %v688_v19  ;;  %140 = vmatpush.msra.mxu2 %v700_v21  ;;  %v784_v35 = vld [vmem:[%s1295_s1 + $0x1b8] sm:$0xff]  ;;  %v796_v37 = vld [vmem:[%s1295_s1 + $0x130] sm:$0xff]  ;;  %v815_v40 = vld [vmem:[%s1295_s1 + $0x28] sm:$0xff] }
   0xe   :  { %1342 = vst [vmem:[#allocation13_spill] sm:$0xff] %v707_v22  ;;  %120 = vmatpush.msra.mxu1 %v707_v22  ;;  %101 = vmatpush.msra.mxu0 %v719_v24  ;;  %v803_v38 = vld [vmem:[%s1295_s1 + $0xb0] sm:$0xff]  ;;  %v820_v41 = vld [vmem:[%s1295_s1 + $0x128] sm:$0xff]  ;;  %v839_v44 = vld [vmem:[%s1295_s1 + $0x20] sm:$0xff] }
   0xf   :  { %1343 = vst [vmem:[#allocation14_spill] sm:$0xff] %v731_v26  ;;  %160 = vmatpush.msra.mxu3 %v712_v23  ;;  %141 = vmatpush.msra.mxu2 %v724_v25  ;;  %v808_v39 = vld [vmem:[%s1295_s1 + $0x1b0] sm:$0xff]  ;;  %v827_v42 = vld [vmem:[%s1295_s1 + $0xa8] sm:$0xff]  ;;  %v844_v45 = vld [vmem:[%s1295_s1 + $0x120] sm:$0xff] }
  0x10   :  { %121 = vmatpush.msra.mxu1 %v731_v26  ;;  %102 = vmatpush.msra.mxu0 %v743_v28  ;;  %1344 = vst [vmem:[#allocation15_spill] sm:$0xff] %v779_v34  ;;  %v832_v43 = vld [vmem:[%s1295_s1 + $0x1a8] sm:$0xff]  ;;  %v851_v46 = vld [vmem:[%s1295_s1 + $0xa0] sm:$0xff]  ;;  %v863_v48 = vld [vmem:[%s1295_s1 + $0x18] sm:$0xff] }
  0x11   :  { %161 = vmatpush.msra.mxu3 %v736_v27  ;;  %142 = vmatpush.msra.mxu2 %v748_v29  ;;  %v856_v47 = vld [vmem:[%s1295_s1 + $0x1a0] sm:$0xff]  ;;  %v868_v49 = vld [vmem:[%s1295_s1 + $0x118] sm:$0xff]  ;;  %v887_v52 = vld [vmem:[%s1295_s1 + $0x10] sm:$0xff] }
  0x12   :  { %122 = vmatpush.msra.mxu1 %v755_v30  ;;  %103 = vmatpush.msra.mxu0 %v767_v32  ;;  %1345 = vst [vmem:[#allocation16_spill] sm:$0xff] %v856_v47  ;;  %v875_v50 = vld [vmem:[%s1295_s1 + $0x98] sm:$0xff]  ;;  %v892_v53 = vld [vmem:[%s1295_s1 + $0x110] sm:$0xff]  ;;  %v911_v56 = vld [vmem:[%s1295_s1 + $0x8] sm:$0xff] }
  0x13   :  { %162 = vmatpush.msra.mxu3 %v760_v31  ;;  %143 = vmatpush.msra.mxu2 %v772_v33  ;;  %v880_v51 = vld [vmem:[%s1295_s1 + $0x198] sm:$0xff]  ;;  %v899_v54 = vld [vmem:[%s1295_s1 + $0x90] sm:$0xff]  ;;  %v916_v57 = vld [vmem:[%s1295_s1 + $0x108] sm:$0xff] }
  0x14   :  { %123 = vmatpush.msra.mxu1 %v779_v34  ;;  %104 = vmatpush.msra.mxu0 %v791_v36  ;;  %1346 = vst [vmem:[#allocation17_spill] sm:$0xff] %v880_v51  ;;  %v904_v55 = vld [vmem:[%s1295_s1 + $0x190] sm:$0xff]  ;;  %v923_v58 = vld [vmem:[%s1295_s1 + $0x88] sm:$0xff]  ;;  %v935_v60 = vld [vmem:[%s1295_s1] sm:$0xff] }
  0x15   :  { %163 = vmatpush.msra.mxu3 %v784_v35  ;;  %144 = vmatpush.msra.mxu2 %v796_v37  ;;  %1347 = vst [vmem:[#allocation18_spill] sm:$0xff] %v904_v55  ;;  %v928_v59 = vld [vmem:[%s1295_s1 + $0x188] sm:$0xff]  ;;  %v940_v61 = vld [vmem:[%s1295_s1 + $0x100] sm:$0xff]  ;;  %v947_v62 = vld [vmem:[%s1295_s1 + $0x238] sm:$0xff] }
  0x16   :  { %124 = vmatpush.msra.mxu1 %v803_v38  ;;  %105 = vmatpush.msra.mxu0 %v815_v40  ;;  %1348 = vst [vmem:[#allocation19_spill] sm:$0xff] %v928_v59  ;;  %v954_v63 = vld [vmem:[%s1295_s1 + $0x80] sm:$0xff] }
  0x17   :  { %164 = vmatpush.msra.mxu3 %v808_v39  ;;  %145 = vmatpush.msra.mxu2 %v820_v41  ;;  %1349 = vst [vmem:[#allocation20_spill] sm:$0xff] %v954_v63 }
  0x18   :  { %125 = vmatpush.msra.mxu1 %v827_v42  ;;  %106 = vmatpush.msra.mxu0 %v839_v44 }
  0x19   :  { %165 = vmatpush.msra.mxu3 %v832_v43  ;;  %146 = vmatpush.msra.mxu2 %v844_v45 }
  0x1a   :  { %126 = vmatpush.msra.mxu1 %v851_v46  ;;  %107 = vmatpush.msra.mxu0 %v863_v48 }
  0x1b   :  { %166 = vmatpush.msra.mxu3 %v856_v47  ;;  %147 = vmatpush.msra.mxu2 %v868_v49  ;;  %v984_v47 = vld [vmem:[%s1295_s1 + $0x220] sm:$0xff] }
  0x1c   :  { %127 = vmatpush.msra.mxu1 %v875_v50  ;;  %108 = vmatpush.msra.mxu0 %v887_v52 }
  0x1d   :  { %167 = vmatpush.msra.mxu3 %v880_v51  ;;  %148 = vmatpush.msra.mxu2 %v892_v53  ;;  %v966_v51 = vld [vmem:[%s1295_s1 + $0x230] sm:$0xff] }
  0x1e   :  { %128 = vmatpush.msra.mxu1 %v899_v54  ;;  %109 = vmatpush.msra.mxu0 %v911_v56 }
  0x1f   :  { %168 = vmatpush.msra.mxu3 %v904_v55  ;;  %149 = vmatpush.msra.mxu2 %v916_v57  ;;  %v959_v55 = vld [vmem:[%s1295_s1 + $0x180] sm:$0xff] }
  0x20   :  { %129 = vmatpush.msra.mxu1 %v923_v58  ;;  %1350 = vst [vmem:[#allocation21_spill] sm:$0xff] %v959_v55  ;;  %110 = vmatpush.msra.mxu0 %v935_v60 }
  0x21   :  { %169 = vmatpush.msra.mxu3 %v928_v59  ;;  %150 = vmatpush.msra.mxu2 %v940_v61  ;;  %v975_v59 = vld [vmem:[%s1295_s1 + $0x228] sm:$0xff] }
  0x22   :  { %183 = vmatpush.msrb.mxu0 %v947_v62  ;;  %130 = vmatpush.msra.mxu1 %v954_v63 }
  0x23   :  { %224 = vmatpush.msrb.mxu2 %v596_v3  ;;  %170 = vmatpush.msra.mxu3 %v959_v55  ;;  %v993_v55 = vld [vmem:[%s1295_s1 + $0x218] sm:$0xff] }
  0x24   :  { %184 = vmatpush.msrb.mxu0 %v966_v51  ;;  %204 = vmatpush.msrb.mxu1 %v579_v0 }
  0x25   :  { %225 = vmatpush.msrb.mxu2 %v618_v7  ;;  %244 = vmatpush.msrb.mxu3 %v584_v1  ;;  %v1002_v1 = vld [vmem:[%s1295_s1 + $0x210] sm:$0xff] }
  0x26   :  { %185 = vmatpush.msrb.mxu0 %v975_v59  ;;  %205 = vmatpush.msrb.mxu1 %v589_v2 }
  0x27   :  { %226 = vmatpush.msrb.mxu2 %v635_v10  ;;  %245 = vmatpush.msrb.mxu3 %v601_v4  ;;  %v1011_v4 = vld [vmem:[%s1295_s1 + $0x208] sm:$0xff] }
  0x28   :  { %186 = vmatpush.msrb.mxu0 %v984_v47  ;;  %206 = vmatpush.msrb.mxu1 %v613_v6 }
  0x29   :  { %227 = vmatpush.msrb.mxu2 %v659_v14  ;;  %246 = vmatpush.msrb.mxu3 %v623_v8  ;;  %v88_v8 = vld [vmem:[%s1296_s0 + $0x10] sm:$0xff] }
  0x2a   :  { %187 = vmatpush.msrb.mxu0 %v993_v55  ;;  %207 = vmatpush.msrb.mxu1 %v642_v11 }
  0x2b   :  { %228 = vmatpush.msrb.mxu2 %v683_v18  ;;  %247 = vmatpush.msrb.mxu3 %v647_v12  ;;  %v1023_v12 = vld [vmem:[%s1295_s1 + $0x200] sm:$0xff] }
  0x2c   :  { %188 = vmatpush.msrb.mxu0 %v1002_v1  ;;  %208 = vmatpush.msrb.mxu1 %v671_v16 }
  0x2d   :  { %229 = vmatpush.msrb.mxu2 %v707_v22  ;;  %248 = vmatpush.msrb.mxu3 %v676_v17  ;;  %v86_v17 = vld [vmem:[%s1296_s0] sm:$0xff]  ;;  %v89_v22 = vld [vmem:[%s1296_s0 + $0x18] sm:$0xff] }
  0x2e   :  { %189 = vmatpush.msrb.mxu0 %v1011_v4  ;;  %209 = vmatpush.msrb.mxu1 %v695_v20 }
  0x2f   :  { %230 = vmatpush.msrb.mxu2 %v731_v26  ;;  %249 = vmatpush.msrb.mxu3 %v700_v21  ;;  %v87_v21 = vld [vmem:[%s1296_s0 + $0x8] sm:$0xff] }
  0x30   :  { %151 = vmatmul.f32.vlgmr.msra.gmra.mxu2 %v88_v8  ;;  %190 = vmatpush.msrb.mxu0 %v1023_v12  ;;  %v90_v8 = vld [vmem:[%s1296_s0 + $0x20] sm:$0xff] }
  0x31   :  { %210 = vmatpush.msrb.mxu1 %v719_v24  ;;  %231 = vmatpush.msrb.mxu2 %v755_v30 }
  0x32   :  { %250 = vmatpush.msrb.mxu3 %v724_v25  ;;  %111 = vmatmul.f32.vlgmr.msra.gmra.mxu0 %v86_v17  ;;  %v538_v17 = vld [vmem:[%s1296_s0 + $0x30] sm:$0xff] }
  0x33   :  { %171 = vmatmul.f32.vlgmr.msra.gmra.mxu3 %v89_v22  ;;  %264 = vmatpush.msra.mxu0 %v606_v5  ;;  %v1351_v22 = vld [vmem:[#allocation16_spill] sm:$0xff] }
  0x34   :  { %211 = vmatpush.msrb.mxu1 %v743_v28  ;;  %232 = vmatpush.msrb.mxu2 %v779_v34 }
  0x35   :  { %251 = vmatpush.msrb.mxu3 %v748_v29  ;;  %131 = vmatmul.f32.vlgmr.msra.gmra.mxu1 %v87_v21  ;;  %v539_v21 = vld [vmem:[%s1296_s0 + $0x38] sm:$0xff] }
  0x36   :  { %265 = vmatpush.msra.mxu0 %v630_v9  ;;  %212 = vmatpush.msrb.mxu1 %v767_v32 }
  0x37   :  { %233 = vmatpush.msrb.mxu2 %v803_v38  ;;  %252 = vmatpush.msrb.mxu3 %v772_v33 }
  0x38   :  { %266 = vmatpush.msra.mxu0 %v652_v13  ;;  %213 = vmatpush.msrb.mxu1 %v791_v36 }
  0x39   :  { %234 = vmatpush.msrb.mxu2 %v827_v42  ;;  %253 = vmatpush.msrb.mxu3 %v796_v37 }
  0x3a   :  { %267 = vmatpush.msra.mxu0 %v664_v15  ;;  %214 = vmatpush.msrb.mxu1 %v815_v40 }
  0x3b   :  { %235 = vmatpush.msrb.mxu2 %v851_v46  ;;  %254 = vmatpush.msrb.mxu3 %v820_v41 }
  0x3c   :  { %536 = vmatmul.msk.f32.vlgmr.msrb.gmra.mxu0 %vm91_vm0, %v90_v8  ;;  %215 = vmatpush.msrb.mxu1 %v839_v44  ;;  %v537_v8 = vld [vmem:[%s1296_s0 + $0x28] sm:$0xff] }
  0x3d   :  { %268 = vmatpush.msra.mxu0 %v688_v19  ;;  %236 = vmatpush.msrb.mxu2 %v875_v50 }
  0x3e   :  { %255 = vmatpush.msrb.mxu3 %v844_v45  ;;  %216 = vmatpush.msrb.mxu1 %v863_v48 }
  0x3f   :  { %269 = vmatpush.msra.mxu0 %v712_v23  ;;  %237 = vmatpush.msrb.mxu2 %v899_v54 }
  0x40   :  { %256 = vmatpush.msrb.mxu3 %v868_v49  ;;  %217 = vmatpush.msrb.mxu1 %v887_v52 }
  0x41   :  { %270 = vmatpush.msra.mxu0 %v736_v27  ;;  %238 = vmatpush.msrb.mxu2 %v923_v58 }
  0x42   :  { %257 = vmatpush.msrb.mxu3 %v892_v53  ;;  %218 = vmatpush.msrb.mxu1 %v911_v56 }
  0x43   :  { %271 = vmatpush.msra.mxu0 %v760_v31  ;;  %239 = vmatpush.msrb.mxu2 %v954_v63 }
  0x44   :  { %258 = vmatpush.msrb.mxu3 %v916_v57  ;;  %219 = vmatpush.msrb.mxu1 %v935_v60 }
  0x45   :  { %314 = vmatpush.msra.mxu2 %v579_v0  ;;  %272 = vmatpush.msra.mxu0 %v784_v35 }
  0x46   :  { %259 = vmatpush.msrb.mxu3 %v940_v61  ;;  %292 = vmatpush.msra.mxu1 %v947_v62 }
  0x47   :  { %273 = vmatpush.msra.mxu0 %v808_v39  ;;  %315 = vmatpush.msra.mxu2 %v589_v2 }
  0x48   :  { %334 = vmatpush.msra.mxu3 %v596_v3  ;;  %293 = vmatpush.msra.mxu1 %v966_v51  ;;  %v1352_v3 = vld [vmem:[#allocation17_spill] sm:$0xff] }
  0x49   :  { %274 = vmatpush.msra.mxu0 %v832_v43  ;;  %316 = vmatpush.msra.mxu2 %v613_v6 }
  0x4a   :  { %335 = vmatpush.msra.mxu3 %v618_v7  ;;  %240 = vmatmul.f32.vlgmr.msrb.gmra.mxu2 %v538_v17  ;;  %v1353_v17 = vld [vmem:[#allocation18_spill] sm:$0xff]  ;;  %v1358_v7 = vld [vmem:[#allocation4_spill] sm:$0xff] }
  0x4b   :  { %275 = vmatpush.msra.mxu0 %v1351_v22  ;;  %294 = vmatpush.msra.mxu1 %v975_v59 }
  0x4c   :  { %317 = vmatpush.msra.mxu2 %v642_v11  ;;  %336 = vmatpush.msra.mxu3 %v635_v10  ;;  %v1354_v10 = vld [vmem:[#allocation19_spill] sm:$0xff] }
  0x4d   :  { %260 = vmatmul.f32.vlgmr.msrb.gmra.mxu3 %v539_v21  ;;  %276 = vmatpush.msra.mxu0 %v1352_v3  ;;  %v1355_v21 = vld [vmem:[#allocation13_spill] sm:$0xff] }
  0x4e   :  { %295 = vmatpush.msra.mxu1 %v984_v47  ;;  %318 = vmatpush.msra.mxu2 %v671_v16 }
  0x4f   :  { %337 = vmatpush.msra.mxu3 %v659_v14  ;;  %220 = vmatmul.f32.vlgmr.msrb.gmra.mxu1 %v537_v8  ;;  %v540_v8 = vld [vmem:[%s1296_s0 + $0x40] sm:$0xff]  ;;  %v1356_v14 = vld [vmem:[#allocation21_spill] sm:$0xff] }
  0x50   :  { %277 = vmatpush.msra.mxu0 %v1353_v17  ;;  %296 = vmatpush.msra.mxu1 %v993_v55 }
  0x51   :  { %319 = vmatpush.msra.mxu2 %v695_v20  ;;  %338 = vmatpush.msra.mxu3 %v683_v18  ;;  %v541_v18 = vld [vmem:[%s1296_s0 + $0x48] sm:$0xff] }
  0x52   :  { %278 = vmatpush.msra.mxu0 %v1354_v10  ;;  %297 = vmatpush.msra.mxu1 %v1002_v1 }
  0x53   :  { %320 = vmatpush.msra.mxu2 %v719_v24  ;;  %339 = vmatpush.msra.mxu3 %v1355_v21  ;;  %v1357_v21 = vld [vmem:[#allocation2_spill] sm:$0xff] }
  0x54   :  { %279 = vmatpush.msra.mxu0 %v1356_v14  ;;  %298 = vmatpush.msra.mxu1 %v1011_v4 }
  0x55   :  { %321 = vmatpush.msra.mxu2 %v743_v28  ;;  %340 = vmatpush.msra.mxu3 %v731_v26  ;;  %v1359_v26 = vld [vmem:[#allocation6_spill] sm:$0xff] }
  0x56   :  { %280 = vmatmul.f32.vlgmr.msra.gmra.mxu0 %v540_v8  ;;  %299 = vmatpush.msra.mxu1 %v1023_v12  ;;  %v1360_v8 = vld [vmem:[#allocation8_spill] sm:$0xff] }
  0x57   :  { %354 = vmatpush.msrb.mxu0 %v1357_v21  ;;  %322 = vmatpush.msra.mxu2 %v767_v32 }
  0x58   :  { %341 = vmatpush.msra.mxu3 %v755_v30  ;;  %542 = vmatmul.msk.f32.vlgmr.msra.gmra.mxu1 %vm91_vm0, %v541_v18  ;;  %v1361_v18 = vld [vmem:[#allocation10_spill] sm:$0xff] }
  0x59   :  { %355 = vmatpush.msrb.mxu0 %v1358_v7  ;;  %374 = vmatpush.msrb.mxu1 %v606_v5 }
  0x5a   :  { %323 = vmatpush.msra.mxu2 %v791_v36  ;;  %342 = vmatpush.msra.mxu3 %v779_v34  ;;  %v1362_v34 = vld [vmem:[#allocation12_spill] sm:$0xff] }
  0x5b   :  { %356 = vmatpush.msrb.mxu0 %v1359_v26  ;;  %375 = vmatpush.msrb.mxu1 %v630_v9 }
  0x5c   :  { %324 = vmatpush.msra.mxu2 %v815_v40  ;;  %343 = vmatpush.msra.mxu3 %v803_v38 }
  0x5d   :  { %357 = vmatpush.msrb.mxu0 %v1360_v8  ;;  %376 = vmatpush.msrb.mxu1 %v652_v13 }
  0x5e   :  { %325 = vmatpush.msra.mxu2 %v839_v44  ;;  %344 = vmatpush.msra.mxu3 %v827_v42 }
  0x5f   :  { %358 = vmatpush.msrb.mxu0 %v1361_v18  ;;  %377 = vmatpush.msrb.mxu1 %v664_v15 }
  0x60   :  { %326 = vmatpush.msra.mxu2 %v863_v48  ;;  %345 = vmatpush.msra.mxu3 %v851_v46 }
  0x61   :  { %359 = vmatpush.msrb.mxu0 %v1362_v34  ;;  %378 = vmatpush.msrb.mxu1 %v688_v19 }
  0x62   :  { %327 = vmatpush.msra.mxu2 %v887_v52  ;;  %346 = vmatpush.msra.mxu3 %v875_v50 }
  0x63   :  { %360 = vmatpush.msrb.mxu0 %v724_v25  ;;  %379 = vmatpush.msrb.mxu1 %v712_v23 }
  0x64   :  { %328 = vmatpush.msra.mxu2 %v911_v56  ;;  %347 = vmatpush.msra.mxu3 %v899_v54 }
  0x65   :  { %361 = vmatpush.msrb.mxu0 %v748_v29  ;;  %380 = vmatpush.msrb.mxu1 %v736_v27 }
  0x66   :  { %329 = vmatpush.msra.mxu2 %v935_v60  ;;  %348 = vmatpush.msra.mxu3 %v923_v58 }
  0x67   :  { %362 = vmatpush.msrb.mxu0 %v772_v33  ;;  %381 = vmatpush.msrb.mxu1 %v760_v31 }
  0x68   :  { %402 = vmatpush.msrb.mxu2 %v947_v62  ;;  %349 = vmatpush.msra.mxu3 %v954_v63  ;;  %v543_v63 = vld [vmem:[%s1296_s0 + $0x50] sm:$0xff] }
  0x69   :  { %363 = vmatpush.msrb.mxu0 %v796_v37  ;;  %382 = vmatpush.msrb.mxu1 %v784_v35 }
  0x6a   :  { %403 = vmatpush.msrb.mxu2 %v966_v51  ;;  %424 = vmatpush.msrb.mxu3 %v579_v0  ;;  %v544_v0 = vld [vmem:[%s1296_s0 + $0x58] sm:$0xff] }
  0x6b   :  { %364 = vmatpush.msrb.mxu0 %v820_v41  ;;  %383 = vmatpush.msrb.mxu1 %v808_v39 }
  0x6c   :  { %404 = vmatpush.msrb.mxu2 %v975_v59  ;;  %425 = vmatpush.msrb.mxu3 %v589_v2  ;;  %v547_v2 = vld [vmem:[%s1296_s0 + $0x70] sm:$0xff] }
  0x6d   :  { %365 = vmatpush.msrb.mxu0 %v844_v45  ;;  %384 = vmatpush.msrb.mxu1 %v832_v43 }
  0x6e   :  { %405 = vmatpush.msrb.mxu2 %v984_v47  ;;  %426 = vmatpush.msrb.mxu3 %v613_v6  ;;  %v545_v6 = vld [vmem:[%s1296_s0 + $0x60] sm:$0xff] }
  0x6f   :  { %330 = vmatmul.f32.vlgmr.msra.gmra.mxu2 %v543_v63  ;;  %366 = vmatpush.msrb.mxu0 %v868_v49 }
  0x70   :  { %385 = vmatpush.msrb.mxu1 %v1351_v22  ;;  %406 = vmatpush.msrb.mxu2 %v993_v55 }
  0x71   :  { %427 = vmatpush.msrb.mxu3 %v642_v11  ;;  %367 = vmatpush.msrb.mxu0 %v892_v53  ;;  %v1363_v11 = vld [vmem:[#allocation3_spill] sm:$0xff] }
  0x72   :  { %350 = vmatmul.f32.vlgmr.msra.gmra.mxu3 %v544_v0  ;;  %386 = vmatpush.msrb.mxu1 %v1352_v3 }
  0x73   :  { %407 = vmatpush.msrb.mxu2 %v1002_v1  ;;  %428 = vmatpush.msrb.mxu3 %v671_v16  ;;  %v546_v16 = vld [vmem:[%s1296_s0 + $0x68] sm:$0xff] }
  0x74   :  { %368 = vmatpush.msrb.mxu0 %v916_v57  ;;  %387 = vmatpush.msrb.mxu1 %v1353_v17 }
  0x75   :  { %408 = vmatpush.msrb.mxu2 %v1011_v4  ;;  %429 = vmatpush.msrb.mxu3 %v695_v20  ;;  %v1364_v20 = vld [vmem:[#allocation5_spill] sm:$0xff] }
  0x76   :  { %369 = vmatpush.msrb.mxu0 %v940_v61  ;;  %388 = vmatpush.msrb.mxu1 %v1354_v10 }
  0x77   :  { %409 = vmatpush.msrb.mxu2 %v1023_v12  ;;  %430 = vmatpush.msrb.mxu3 %v719_v24  ;;  %v1365_v24 = vld [vmem:[#allocation7_spill] sm:$0xff] }
  0x78   :  { %548 = vmatmul.msk.f32.vlgmr.msrb.gmra.mxu2 %vm91_vm0, %v547_v2  ;;  %444 = vmatpush.msra.mxu0 %v1363_v11 }
  0x79   :  { %484 = vmatpush.msra.mxu2 %v606_v5  ;;  %389 = vmatpush.msrb.mxu1 %v1356_v14  ;;  %v1366_v5 = vld [vmem:[#allocation9_spill] sm:$0xff] }
  0x7a   :  { %431 = vmatpush.msrb.mxu3 %v743_v28  ;;  %370 = vmatmul.f32.vlgmr.msrb.gmra.mxu0 %v545_v6 }
  0x7b   :  { %445 = vmatpush.msra.mxu0 %v1364_v20  ;;  %464 = vmatpush.msra.mxu1 %v1357_v21 }
  0x7c   :  { %485 = vmatpush.msra.mxu2 %v630_v9  ;;  %432 = vmatpush.msrb.mxu3 %v767_v32  ;;  %v1367_v9 = vld [vmem:[#allocation11_spill] sm:$0xff] }
  0x7d   :  { %390 = vmatmul.f32.vlgmr.msrb.gmra.mxu1 %v546_v16  ;;  %446 = vmatpush.msra.mxu0 %v1365_v24 }
  0x7e   :  { %465 = vmatpush.msra.mxu1 %v1358_v7  ;;  %486 = vmatpush.msra.mxu2 %v652_v13  ;;  %v1368_v7 = vld [vmem:[#allocation13_spill] sm:$0xff]  ;;  %v1369_v13 = vld [vmem:[#allocation14_spill] sm:$0xff] }
  0x7f   :  { %433 = vmatpush.msrb.mxu3 %v791_v36  ;;  %447 = vmatpush.msra.mxu0 %v1366_v5 }
  0x80   :  { %466 = vmatpush.msra.mxu1 %v1359_v26  ;;  %487 = vmatpush.msra.mxu2 %v664_v15  ;;  %v1370_v15 = vld [vmem:[#allocation15_spill] sm:$0xff] }
  0x81   :  { %434 = vmatpush.msrb.mxu3 %v815_v40  ;;  %448 = vmatpush.msra.mxu0 %v1367_v9 }
  0x82   :  { %467 = vmatpush.msra.mxu1 %v1360_v8  ;;  %488 = vmatpush.msra.mxu2 %v688_v19  ;;  %v549_v19 = vld [vmem:[%s1296_s0 + $0x78] sm:$0xff] }
  0x83   :  { %435 = vmatpush.msrb.mxu3 %v839_v44  ;;  %449 = vmatpush.msra.mxu0 %v1368_v7 }
  0x84   :  { %468 = vmatpush.msra.mxu1 %v1361_v18  ;;  %489 = vmatpush.msra.mxu2 %v712_v23  ;;  %v552_v23 = vld [vmem:[%s1296_s0 + $0x90] sm:$0xff] }
  0x85   :  { %436 = vmatpush.msrb.mxu3 %v863_v48  ;;  %450 = vmatpush.msra.mxu0 %v1369_v13 }
  0x86   :  { %469 = vmatpush.msra.mxu1 %v1362_v34  ;;  %490 = vmatpush.msra.mxu2 %v736_v27 }
  0x87   :  { %437 = vmatpush.msrb.mxu3 %v887_v52  ;;  %451 = vmatpush.msra.mxu0 %v755_v30 }
  0x88   :  { %470 = vmatpush.msra.mxu1 %v724_v25  ;;  %491 = vmatpush.msra.mxu2 %v760_v31  ;;  %v1371_v25 = vld [vmem:[#allocation20_spill] sm:$0xff] }
  0x89   :  { %438 = vmatpush.msrb.mxu3 %v911_v56  ;;  %452 = vmatpush.msra.mxu0 %v1370_v15 }
  0x8a   :  { %471 = vmatpush.msra.mxu1 %v748_v29  ;;  %492 = vmatpush.msra.mxu2 %v784_v35 }
  0x8b   :  { %439 = vmatpush.msrb.mxu3 %v935_v60  ;;  %453 = vmatpush.msra.mxu0 %v803_v38 }
  0x8c   :  { %472 = vmatpush.msra.mxu1 %v772_v33  ;;  %493 = vmatpush.msra.mxu2 %v808_v39 }
  0x8d   :  { %512 = vmatpush.msra.mxu3 %v947_v62  ;;  %454 = vmatpush.msra.mxu0 %v827_v42 }
  0x8e   :  { %473 = vmatpush.msra.mxu1 %v796_v37  ;;  %494 = vmatpush.msra.mxu2 %v832_v43 }
  0x8f   :  { %513 = vmatpush.msra.mxu3 %v966_v51  ;;  %455 = vmatpush.msra.mxu0 %v851_v46 }
  0x90   :  { %474 = vmatpush.msra.mxu1 %v820_v41  ;;  %495 = vmatpush.msra.mxu2 %v1351_v22 }
  0x91   :  { %514 = vmatpush.msra.mxu3 %v975_v59  ;;  %456 = vmatpush.msra.mxu0 %v875_v50 }
  0x92   :  { %475 = vmatpush.msra.mxu1 %v844_v45  ;;  %496 = vmatpush.msra.mxu2 %v1352_v3  ;;  %v550_v3 = vld [vmem:[%s1296_s0 + $0x80] sm:$0xff] }
  0x93   :  { %515 = vmatpush.msra.mxu3 %v984_v47  ;;  %457 = vmatpush.msra.mxu0 %v899_v54 }
  0x94   :  { %440 = vmatmul.f32.vlgmr.msrb.gmra.mxu3 %v549_v19  ;;  %476 = vmatpush.msra.mxu1 %v868_v49 }
  0x95   :  { %497 = vmatpush.msra.mxu2 %v1353_v17  ;;  %516 = vmatpush.msra.mxu3 %v993_v55 }
  0x96   :  { %458 = vmatpush.msra.mxu0 %v923_v58  ;;  %477 = vmatpush.msra.mxu1 %v892_v53 }
  0x97   :  { %498 = vmatpush.msra.mxu2 %v1354_v10  ;;  %517 = vmatpush.msra.mxu3 %v1002_v1  ;;  %v551_v1 = vld [vmem:[%s1296_s0 + $0x88] sm:$0xff]  ;;  %v553_v10 = vld [vmem:[%s1296_s0 + $0x98] sm:$0xff] }
  0x98   :  { %459 = vmatpush.msra.mxu0 %v1371_v25  ;;  %478 = vmatpush.msra.mxu1 %v916_v57 }
  0x99   :  { %499 = vmatpush.msra.mxu2 %v1356_v14  ;;  %518 = vmatpush.msra.mxu3 %v1011_v4 }
  0x9a   :  { %460 = vmatmul.f32.vlgmr.msra.gmra.mxu0 %v550_v3  ;;  %500 = vmatmul.f32.vlgmr.msra.gmra.mxu2 %v552_v23 }
  0x9b   :  { %479 = vmatpush.msra.mxu1 %v940_v61  ;;  %519 = vmatpush.msra.mxu3 %v1023_v12  ;;  %v555_v61 = vld [vmem:[%s1297_s2] ss:$0 sm:$0xff] }
  0x9c   :  { %480 = vmatmul.f32.vlgmr.msra.gmra.mxu1 %v551_v1  ;;  %554 = vmatmul.msk.f32.vlgmr.msra.gmra.mxu3 %vm91_vm0, %v553_v10 }
  0xaf   :  { %v112_v14 = vpop.f32.mrf.mxu0 }
  0xb2   :  { %v132_v26 = vpop.f32.mrf.mxu1 }
  0xb3   :  { %v152_v4 = vpop.f32.mrf.mxu2  ;;  %v133_v38 = vadd.f32 %v132_v26, %v112_v14 }
  0xb5   :  { %v153_v41 = vadd.f32 %v152_v4, %v133_v38 }
  0xb6   :  { %v172_v27 = vpop.f32.mrf.mxu3 }
  0xb7   :  { %v173_v47 = vadd.f32 %v172_v27, %v153_v41 }
  0xb9   :  { %v192_v28 = vpop.f32.mrf.mxu0 }
  0xba   :  { %v193_v52 = vadd.f32 %v192_v28, %v173_v47 }
  0xcc   :  { %v221_v29 = vpop.f32.mrf.mxu1 }
  0xcd   :  { %v241_v30 = vpop.f32.mrf.mxu2 }
  0xce   :  { %v242_v36 = vadd.f32 %v241_v30, %v221_v29 }
  0xd0   :  { %v261_v31 = vpop.f32.mrf.mxu3 }
  0xd1   :  { %v262_v40 = vadd.f32 %v261_v31, %v242_v36 }
  0xd3   :  { %v281_v32 = vpop.f32.mrf.mxu0 }
  0xd4   :  { %v282_v44 = vadd.f32 %v281_v32, %v262_v40 }
  0xd5   :  { %v301_v33 = vpop.f32.mrf.mxu1 }
  0xd6   :  { %v302_v51 = vadd.f32 %v301_v33, %v282_v44 }
  0xd8   :  { %v304_v56 = vmax.f32 %v193_v52, %v302_v51 }
  0xf2   :  { %v331_v34 = vpop.f32.mrf.mxu2 }
  0xf5   :  { %v351_v35 = vpop.f32.mrf.mxu3 }
  0xf6   :  { %v352_v39 = vadd.f32 %v351_v35, %v331_v34 }
  0xf7   :  { %v371_v37 = vpop.f32.mrf.mxu0 }
  0xf8   :  { %v372_v42 = vadd.f32 %v371_v37, %v352_v39 }
  0xfa   :  { %v391_v12 = vpop.f32.mrf.mxu1 }
  0xfb   :  { %v411_v43 = vpop.f32.mrf.mxu2  ;;  %v392_v48 = vadd.f32 %v391_v12, %v372_v42 }
  0xfd   :  { %v412_v53 = vadd.f32 %v411_v43, %v392_v48 }
  0xff   :  { %v414_v59 = vmax.f32 %v304_v56, %v412_v53 }
 0x117   :  { %v441_v45 = vpop.f32.mrf.mxu3  ;;  %v461_v46 = vpop.f32.mrf.mxu0 }
 0x118   :  { %v462_v49 = vadd.f32 %v461_v46, %v441_v45 }
 0x119   :  { %v481_v50 = vpop.f32.mrf.mxu1 }
 0x11a   :  { %v482_v54 = vadd.f32 %v481_v50, %v462_v49 }
 0x11d   :  { %v501_v55 = vpop.f32.mrf.mxu2 }
 0x11e   :  { %v502_v57 = vadd.f32 %v501_v55, %v482_v54 }
 0x11f   :  { %v521_v58 = vpop.f32.mrf.mxu3 }
 0x120   :  { %v522_v60 = vadd.f32 %v521_v58, %v502_v57 }
 0x122   :  { %v524_v62 = vmax.f32 %v414_v59, %v522_v60 }
 0x124   :  { %v529_v63 = vadd.f32 %v555_v61, %v524_v62 }
 0x126   :  { %v530_v22 = vmax.f32 %v529_v63, 0.0 }
 0x128   :  { %531 = vst.msk [vmem:[%s1298_s3] sm:$0xff] %vm91_vm0, %v530_v22 }

// kernel: vgg_adversarial_forward.16
= control target key start
LH: loop header
LB: loop body
LE: loop exit
PB: predicated region body
PF: predicated region fallthrough
CT: control target
= control target key end

     0   :  { %vm95_vm0 = vcmask 523264   ;;  %s466_s1 = inlined_call_operand.vmem [shape: f32[576,64], index: 1, kind: input, shape index: {}]   ;;  %s467_s2 = inlined_call_operand.vmem [shape: f32[1,64], index: 2, kind: input, shape index: {}]   ;;  %s468_s0 = inlined_call_operand.vmem [shape: f32[1,8,576], index: 0, kind: input, shape index: {}]   ;;  %s469_s3 = inlined_call_operand.vmem [shape: f32[8,64], index: 3, kind: output, shape index: {}]  }
   0x1   :  { %v29_v0 = vld [vmem:[%s466_s1 + $0x78] sm:$0xff]  ;;  %v28_v1 = vld [vmem:[%s466_s1 + $0x70] sm:$0xff]  ;;  %v27_v4 = vld [vmem:[%s466_s1 + $0x68] sm:$0xff] }
   0x2   :  { %99 = vmatpush.msra.mxu0 %v29_v0  ;;  %v61_v2 = vld [vmem:[%s466_s1 + $0x178] sm:$0xff]  ;;  %v60_v3 = vld [vmem:[%s466_s1 + $0x170] sm:$0xff]  ;;  %v59_v7 = vld [vmem:[%s466_s1 + $0x168] sm:$0xff] }
   0x3   :  { %139 = vmatpush.msra.mxu2 %v61_v2  ;;  %v77_v5 = vld [vmem:[%s466_s1 + $0x1f8] sm:$0xff]  ;;  %v76_v8 = vld [vmem:[%s466_s1 + $0x1f0] sm:$0xff]  ;;  %v26_v9 = vld [vmem:[%s466_s1 + $0x60] sm:$0xff] }
   0x4   :  { %v45_v6 = vld [vmem:[%s466_s1 + $0xf8] sm:$0xff]  ;;  %100 = vmatpush.msra.mxu0 %v28_v1  ;;  %159 = vmatpush.msra.mxu3 %v77_v5  ;;  %v44_v10 = vld [vmem:[%s466_s1 + $0xf0] sm:$0xff]  ;;  %v75_v11 = vld [vmem:[%s466_s1 + $0x1e8] sm:$0xff] }
   0x5   :  { %140 = vmatpush.msra.mxu2 %v60_v3  ;;  %119 = vmatpush.msra.mxu1 %v45_v6  ;;  %v58_v12 = vld [vmem:[%s466_s1 + $0x160] sm:$0xff]  ;;  %v43_v13 = vld [vmem:[%s466_s1 + $0xe8] sm:$0xff]  ;;  %v25_v14 = vld [vmem:[%s466_s1 + $0x58] sm:$0xff] }
   0x6   :  { %101 = vmatpush.msra.mxu0 %v27_v4  ;;  %160 = vmatpush.msra.mxu3 %v76_v8  ;;  %v74_v15 = vld [vmem:[%s466_s1 + $0x1e0] sm:$0xff]  ;;  %v57_v16 = vld [vmem:[%s466_s1 + $0x158] sm:$0xff]  ;;  %v24_v18 = vld [vmem:[%s466_s1 + $0x50] sm:$0xff] }
   0x7   :  { %141 = vmatpush.msra.mxu2 %v59_v7  ;;  %120 = vmatpush.msra.mxu1 %v44_v10  ;;  %v42_v17 = vld [vmem:[%s466_s1 + $0xe0] sm:$0xff]  ;;  %v73_v19 = vld [vmem:[%s466_s1 + $0x1d8] sm:$0xff]  ;;  %v56_v20 = vld [vmem:[%s466_s1 + $0x150] sm:$0xff] }
   0x8   :  { %102 = vmatpush.msra.mxu0 %v26_v9  ;;  %161 = vmatpush.msra.mxu3 %v75_v11  ;;  %v41_v21 = vld [vmem:[%s466_s1 + $0xd8] sm:$0xff]  ;;  %v23_v22 = vld [vmem:[%s466_s1 + $0x48] sm:$0xff]  ;;  %v72_v23 = vld [vmem:[%s466_s1 + $0x1d0] sm:$0xff] }
   0x9   :  { %142 = vmatpush.msra.mxu2 %v58_v12  ;;  %121 = vmatpush.msra.mxu1 %v43_v13  ;;  %v55_v24 = vld [vmem:[%s466_s1 + $0x148] sm:$0xff]  ;;  %v40_v25 = vld [vmem:[%s466_s1 + $0xd0] sm:$0xff]  ;;  %v22_v26 = vld [vmem:[%s466_s1 + $0x40] sm:$0xff] }
   0xa   :  { %103 = vmatpush.msra.mxu0 %v25_v14  ;;  %162 = vmatpush.msra.mxu3 %v74_v15  ;;  %v71_v27 = vld [vmem:[%s466_s1 + $0x1c8] sm:$0xff]  ;;  %v54_v28 = vld [vmem:[%s466_s1 + $0x140] sm:$0xff]  ;;  %v21_v30 = vld [vmem:[%s466_s1 + $0x38] sm:$0xff] }
   0xb   :  { %143 = vmatpush.msra.mxu2 %v57_v16  ;;  %122 = vmatpush.msra.mxu1 %v42_v17  ;;  %v39_v29 = vld [vmem:[%s466_s1 + $0xc8] sm:$0xff]  ;;  %v70_v31 = vld [vmem:[%s466_s1 + $0x1c0] sm:$0xff]  ;;  %v53_v32 = vld [vmem:[%s466_s1 + $0x138] sm:$0xff] }
   0xc   :  { %104 = vmatpush.msra.mxu0 %v24_v18  ;;  %163 = vmatpush.msra.mxu3 %v73_v19  ;;  %v38_v33 = vld [vmem:[%s466_s1 + $0xc0] sm:$0xff]  ;;  %v20_v34 = vld [vmem:[%s466_s1 + $0x30] sm:$0xff]  ;;  %v69_v35 = vld [vmem:[%s466_s1 + $0x1b8] sm:$0xff] }
   0xd   :  { %144 = vmatpush.msra.mxu2 %v56_v20  ;;  %123 = vmatpush.msra.mxu1 %v41_v21  ;;  %v52_v36 = vld [vmem:[%s466_s1 + $0x130] sm:$0xff]  ;;  %v37_v37 = vld [vmem:[%s466_s1 + $0xb8] sm:$0xff]  ;;  %v19_v38 = vld [vmem:[%s466_s1 + $0x28] sm:$0xff] }
   0xe   :  { %105 = vmatpush.msra.mxu0 %v23_v22  ;;  %164 = vmatpush.msra.mxu3 %v72_v23  ;;  %v68_v39 = vld [vmem:[%s466_s1 + $0x1b0] sm:$0xff]  ;;  %v51_v40 = vld [vmem:[%s466_s1 + $0x128] sm:$0xff]  ;;  %v18_v42 = vld [vmem:[%s466_s1 + $0x20] sm:$0xff] }
   0xf   :  { %145 = vmatpush.msra.mxu2 %v55_v24  ;;  %124 = vmatpush.msra.mxu1 %v40_v25  ;;  %v36_v41 = vld [vmem:[%s466_s1 + $0xb0] sm:$0xff]  ;;  %v67_v43 = vld [vmem:[%s466_s1 + $0x1a8] sm:$0xff]  ;;  %v50_v44 = vld [vmem:[%s466_s1 + $0x120] sm:$0xff] }
  0x10   :  { %106 = vmatpush.msra.mxu0 %v22_v26  ;;  %165 = vmatpush.msra.mxu3 %v71_v27  ;;  %v35_v45 = vld [vmem:[%s466_s1 + $0xa8] sm:$0xff]  ;;  %v17_v46 = vld [vmem:[%s466_s1 + $0x18] sm:$0xff]  ;;  %v66_v47 = vld [vmem:[%s466_s1 + $0x1a0] sm:$0xff] }
  0x11   :  { %146 = vmatpush.msra.mxu2 %v54_v28  ;;  %125 = vmatpush.msra.mxu1 %v39_v29  ;;  %v49_v48 = vld [vmem:[%s466_s1 + $0x118] sm:$0xff]  ;;  %v34_v49 = vld [vmem:[%s466_s1 + $0xa0] sm:$0xff]  ;;  %v16_v50 = vld [vmem:[%s466_s1 + $0x10] sm:$0xff] }
  0x12   :  { %107 = vmatpush.msra.mxu0 %v21_v30  ;;  %166 = vmatpush.msra.mxu3 %v70_v31  ;;  %v65_v51 = vld [vmem:[%s466_s1 + $0x198] sm:$0xff]  ;;  %v48_v52 = vld [vmem:[%s466_s1 + $0x110] sm:$0xff]  ;;  %v15_v54 = vld [vmem:[%s466_s1 + $0x8] sm:$0xff] }
  0x13   :  { %147 = vmatpush.msra.mxu2 %v53_v32  ;;  %126 = vmatpush.msra.mxu1 %v38_v33  ;;  %v33_v53 = vld [vmem:[%s466_s1 + $0x98] sm:$0xff]  ;;  %v64_v55 = vld [vmem:[%s466_s1 + $0x190] sm:$0xff]  ;;  %v47_v56 = vld [vmem:[%s466_s1 + $0x108] sm:$0xff] }
  0x14   :  { %108 = vmatpush.msra.mxu0 %v20_v34  ;;  %167 = vmatpush.msra.mxu3 %v69_v35  ;;  %v32_v57 = vld [vmem:[%s466_s1 + $0x90] sm:$0xff]  ;;  %v14_v58 = vld [vmem:[%s466_s1] sm:$0xff]  ;;  %v63_v59 = vld [vmem:[%s466_s1 + $0x188] sm:$0xff] }
  0x15   :  { %148 = vmatpush.msra.mxu2 %v52_v36  ;;  %127 = vmatpush.msra.mxu1 %v37_v37  ;;  %v85_v60 = vld [vmem:[%s466_s1 + $0x238] sm:$0xff]  ;;  %v46_v61 = vld [vmem:[%s466_s1 + $0x100] sm:$0xff]  ;;  %v88_v62 = vld [vmem:[%s468_s0 + $0x10] sm:$0xff] }
  0x16   :  { %109 = vmatpush.msra.mxu0 %v19_v38  ;;  %168 = vmatpush.msra.mxu3 %v68_v39  ;;  %v31_v63 = vld [vmem:[%s466_s1 + $0x88] sm:$0xff]  ;;  %v84_v0 = vld [vmem:[%s466_s1 + $0x230] sm:$0xff]  ;;  %v62_v1 = vld [vmem:[%s466_s1 + $0x180] sm:$0xff] }
  0x17   :  { %149 = vmatpush.msra.mxu2 %v51_v40  ;;  %128 = vmatpush.msra.mxu1 %v36_v41  ;;  %v86_v2 = vld [vmem:[%s468_s0] sm:$0xff]  ;;  %v89_v3 = vld [vmem:[%s468_s0 + $0x18] sm:$0xff]  ;;  %v83_v4 = vld [vmem:[%s466_s1 + $0x228] sm:$0xff] }
  0x18   :  { %110 = vmatpush.msra.mxu0 %v18_v42  ;;  %169 = vmatpush.msra.mxu3 %v67_v43  ;;  %v30_v5 = vld [vmem:[%s466_s1 + $0x80] sm:$0xff]  ;;  %v87_v6 = vld [vmem:[%s468_s0 + $0x8] sm:$0xff]  ;;  %v81_v8 = vld [vmem:[%s466_s1 + $0x218] sm:$0xff] }
  0x19   :  { %150 = vmatpush.msra.mxu2 %v50_v44  ;;  %129 = vmatpush.msra.mxu1 %v35_v45  ;;  %v82_v7 = vld [vmem:[%s466_s1 + $0x220] sm:$0xff]  ;;  %v80_v9 = vld [vmem:[%s466_s1 + $0x210] sm:$0xff]  ;;  %v79_v10 = vld [vmem:[%s466_s1 + $0x208] sm:$0xff] }
  0x1a   :  { %111 = vmatpush.msra.mxu0 %v17_v46  ;;  %170 = vmatpush.msra.mxu3 %v66_v47  ;;  %v78_v11 = vld [vmem:[%s466_s1 + $0x200] sm:$0xff] }
  0x1b   :  { %151 = vmatpush.msra.mxu2 %v49_v48  ;;  %130 = vmatpush.msra.mxu1 %v34_v49  ;;  %v90_v12 = vld [vmem:[%s468_s0 + $0x20] sm:$0xff] }
  0x1c   :  { %112 = vmatpush.msra.mxu0 %v16_v50  ;;  %171 = vmatpush.msra.mxu3 %v65_v51  ;;  %v206_v13 = vld [vmem:[%s467_s2] ss:$0 sm:$0xff] }
  0x1d   :  { %152 = vmatpush.msra.mxu2 %v48_v52  ;;  %131 = vmatpush.msra.mxu1 %v33_v53 }
  0x1e   :  { %113 = vmatpush.msra.mxu0 %v15_v54  ;;  %172 = vmatpush.msra.mxu3 %v64_v55 }
  0x1f   :  { %153 = vmatpush.msra.mxu2 %v47_v56  ;;  %132 = vmatpush.msra.mxu1 %v32_v57 }
  0x20   :  { %114 = vmatpush.msra.mxu0 %v14_v58  ;;  %173 = vmatpush.msra.mxu3 %v63_v59 }
  0x21   :  { %154 = vmatpush.msra.mxu2 %v46_v61  ;;  %133 = vmatpush.msra.mxu1 %v31_v63 }
  0x22   :  { %187 = vmatpush.msrb.mxu0 %v85_v60  ;;  %155 = vmatmul.f32.vlgmr.msra.gmra.mxu2 %v88_v62 }
  0x23   :  { %174 = vmatpush.msra.mxu3 %v62_v1  ;;  %115 = vmatmul.f32.vlgmr.msra.gmra.mxu0 %v86_v2 }
  0x24   :  { %188 = vmatpush.msrb.mxu0 %v84_v0  ;;  %175 = vmatmul.f32.vlgmr.msra.gmra.mxu3 %v89_v3 }
  0x25   :  { %134 = vmatpush.msra.mxu1 %v30_v5 }
  0x26   :  { %189 = vmatpush.msrb.mxu0 %v83_v4  ;;  %135 = vmatmul.f32.vlgmr.msra.gmra.mxu1 %v87_v6 }
  0x28   :  { %190 = vmatpush.msrb.mxu0 %v82_v7 }
  0x2a   :  { %191 = vmatpush.msrb.mxu0 %v81_v8 }
  0x2c   :  { %192 = vmatpush.msrb.mxu0 %v80_v9 }
  0x2e   :  { %193 = vmatpush.msrb.mxu0 %v79_v10 }
  0x30   :  { %194 = vmatpush.msrb.mxu0 %v78_v11 }
  0x31   :  { %205 = vmatmul.msk.f32.vlgmr.msrb.gmra.mxu0 %vm95_vm0, %v90_v12 }
  0xa0   :  { %v116_v14 = vpop.f32.mrf.mxu0 }
  0xa1   :  { %v117_v15 = vadd.f32 %v206_v13, %v116_v14 }
  0xa3   :  { %v136_v16 = vpop.f32.mrf.mxu1 }
  0xa4   :  { %v137_v17 = vadd.f32 %v136_v16, %v117_v15 }
  0xa5   :  { %v156_v18 = vpop.f32.mrf.mxu2 }
  0xa6   :  { %v157_v19 = vadd.f32 %v156_v18, %v137_v17 }
  0xa7   :  { %v176_v20 = vpop.f32.mrf.mxu3 }
  0xa8   :  { %v177_v21 = vadd.f32 %v176_v20, %v157_v19 }
  0xae   :  { %v196_v22 = vpop.f32.mrf.mxu0 }
  0xaf   :  { %v197_v23 = vadd.f32 %v196_v22, %v177_v21 }
  0xb1   :  { %v199_v24 = vmax.f32 %v197_v23, 0.0 }
  0xb3   :  { %200 = vst.msk [vmem:[%s469_s3] sm:$0xff] %vm95_vm0, %v199_v24 }

// kernel: vgg_adversarial_forward.17
= control target key start
LH: loop header
LB: loop body
LE: loop exit
PB: predicated region body
PF: predicated region fallthrough
CT: control target
= control target key end

     0   :  { %vm102_vm0 = vcmask 523264   ;;  %vm571_vm1 = vcmask 517120   ;;  %s1305_s1 = inlined_call_operand.vmem [shape: f32[576,64], index: 1, kind: input, shape index: {}]   ;;  %s1306_s0 = inlined_call_operand.vmem [shape: f32[4,2,576], index: 0, kind: input, shape index: {}]   ;;  %s1307_s2 = inlined_call_operand.vmem [shape: f32[1,64], index: 2, kind: input, shape index: {}]   ;;  %s1308_s3 = inlined_call_operand.vmem [shape: f32[2,64], index: 3, kind: output, shape index: {}]  }
   0x1   :  { %v611_v0 = vld [vmem:[%s1305_s1 + $0x78] sm:$0xff]  ;;  %v621_v2 = vld [vmem:[%s1305_s1 + $0x70] sm:$0xff]  ;;  %v645_v6 = vld [vmem:[%s1305_s1 + $0x68] sm:$0xff] }
   0x2   :  { %v616_v1 = vld [vmem:[%s1305_s1 + $0x178] sm:$0xff]  ;;  %105 = vmatpush.msra.mxu0 %v611_v0  ;;  %v633_v4 = vld [vmem:[%s1305_s1 + $0x170] sm:$0xff]  ;;  %v655_v8 = vld [vmem:[%s1305_s1 + $0x168] sm:$0xff] }
   0x3   :  { %145 = vmatpush.msra.mxu2 %v616_v1  ;;  %v628_v3 = vld [vmem:[%s1305_s1 + $0xf8] sm:$0xff]  ;;  %1358 = vst [vmem:[#allocation2_spill] sm:$0xff] %v633_v4  ;;  %v650_v7 = vld [vmem:[%s1305_s1 + $0xf0] sm:$0xff]  ;;  %v667_v10 = vld [vmem:[%s1305_s1 + $0xe8] sm:$0xff] }
   0x4   :  { %v638_v5 = vld [vmem:[%s1305_s1 + $0x1f8] sm:$0xff]  ;;  %125 = vmatpush.msra.mxu1 %v628_v3  ;;  %1359 = vst [vmem:[#allocation3_spill] sm:$0xff] %v650_v7  ;;  %106 = vmatpush.msra.mxu0 %v621_v2  ;;  %v662_v9 = vld [vmem:[%s1305_s1 + $0x1f0] sm:$0xff]  ;;  %v674_v11 = vld [vmem:[%s1305_s1 + $0x60] sm:$0xff] }
   0x5   :  { %165 = vmatpush.msra.mxu3 %v638_v5  ;;  %1360 = vst [vmem:[#allocation4_spill] sm:$0xff] %v655_v8  ;;  %146 = vmatpush.msra.mxu2 %v633_v4  ;;  %v679_v12 = vld [vmem:[%s1305_s1 + $0x160] sm:$0xff]  ;;  %v684_v13 = vld [vmem:[%s1305_s1 + $0x1e8] sm:$0xff]  ;;  %v703_v16 = vld [vmem:[%s1305_s1 + $0x58] sm:$0xff] }
   0x6   :  { %126 = vmatpush.msra.mxu1 %v650_v7  ;;  %1361 = vst [vmem:[#allocation5_spill] sm:$0xff] %v679_v12  ;;  %107 = vmatpush.msra.mxu0 %v645_v6  ;;  %v691_v14 = vld [vmem:[%s1305_s1 + $0xe0] sm:$0xff]  ;;  %v708_v17 = vld [vmem:[%s1305_s1 + $0x158] sm:$0xff]  ;;  %v727_v20 = vld [vmem:[%s1305_s1 + $0x50] sm:$0xff] }
   0x7   :  { %166 = vmatpush.msra.mxu3 %v662_v9  ;;  %147 = vmatpush.msra.mxu2 %v655_v8  ;;  %1362 = vst [vmem:[#allocation6_spill] sm:$0xff] %v691_v14  ;;  %v696_v15 = vld [vmem:[%s1305_s1 + $0x1e0] sm:$0xff]  ;;  %v715_v18 = vld [vmem:[%s1305_s1 + $0xd8] sm:$0xff]  ;;  %v732_v21 = vld [vmem:[%s1305_s1 + $0x150] sm:$0xff] }
   0x8   :  { %127 = vmatpush.msra.mxu1 %v667_v10  ;;  %1363 = vst [vmem:[#allocation7_spill] sm:$0xff] %v708_v17  ;;  %108 = vmatpush.msra.mxu0 %v674_v11  ;;  %v720_v19 = vld [vmem:[%s1305_s1 + $0x1d8] sm:$0xff]  ;;  %v739_v22 = vld [vmem:[%s1305_s1 + $0xd0] sm:$0xff]  ;;  %v751_v24 = vld [vmem:[%s1305_s1 + $0x48] sm:$0xff] }
   0x9   :  { %167 = vmatpush.msra.mxu3 %v684_v13  ;;  %148 = vmatpush.msra.mxu2 %v679_v12  ;;  %1364 = vst [vmem:[#allocation8_spill] sm:$0xff] %v715_v18  ;;  %v744_v23 = vld [vmem:[%s1305_s1 + $0x1d0] sm:$0xff]  ;;  %v756_v25 = vld [vmem:[%s1305_s1 + $0x148] sm:$0xff]  ;;  %v775_v28 = vld [vmem:[%s1305_s1 + $0x40] sm:$0xff] }
   0xa   :  { %128 = vmatpush.msra.mxu1 %v691_v14  ;;  %1365 = vst [vmem:[#allocation9_spill] sm:$0xff] %v732_v21  ;;  %109 = vmatpush.msra.mxu0 %v703_v16  ;;  %v763_v26 = vld [vmem:[%s1305_s1 + $0xc8] sm:$0xff]  ;;  %v780_v29 = vld [vmem:[%s1305_s1 + $0x140] sm:$0xff]  ;;  %v799_v32 = vld [vmem:[%s1305_s1 + $0x38] sm:$0xff] }
   0xb   :  { %168 = vmatpush.msra.mxu3 %v696_v15  ;;  %149 = vmatpush.msra.mxu2 %v708_v17  ;;  %1366 = vst [vmem:[#allocation10_spill] sm:$0xff] %v739_v22  ;;  %v768_v27 = vld [vmem:[%s1305_s1 + $0x1c8] sm:$0xff]  ;;  %v787_v30 = vld [vmem:[%s1305_s1 + $0xc0] sm:$0xff]  ;;  %v804_v33 = vld [vmem:[%s1305_s1 + $0x138] sm:$0xff] }
   0xc   :  { %129 = vmatpush.msra.mxu1 %v715_v18  ;;  %110 = vmatpush.msra.mxu0 %v727_v20  ;;  %1367 = vst [vmem:[#allocation11_spill] sm:$0xff] %v763_v26  ;;  %v792_v31 = vld [vmem:[%s1305_s1 + $0x1c0] sm:$0xff]  ;;  %v811_v34 = vld [vmem:[%s1305_s1 + $0xb8] sm:$0xff]  ;;  %v823_v36 = vld [vmem:[%s1305_s1 + $0x30] sm:$0xff] }
   0xd   :  { %169 = vmatpush.msra.mxu3 %v720_v19  ;;  %150 = vmatpush.msra.mxu2 %v732_v21  ;;  %1368 = vst [vmem:[#allocation12_spill] sm:$0xff] %v787_v30  ;;  %v816_v35 = vld [vmem:[%s1305_s1 + $0x1b8] sm:$0xff]  ;;  %v828_v37 = vld [vmem:[%s1305_s1 + $0x130] sm:$0xff]  ;;  %v847_v40 = vld [vmem:[%s1305_s1 + $0x28] sm:$0xff] }
   0xe   :  { %130 = vmatpush.msra.mxu1 %v739_v22  ;;  %111 = vmatpush.msra.mxu0 %v751_v24  ;;  %1369 = vst [vmem:[#allocation13_spill] sm:$0xff] %v792_v31  ;;  %v835_v38 = vld [vmem:[%s1305_s1 + $0xb0] sm:$0xff]  ;;  %v852_v41 = vld [vmem:[%s1305_s1 + $0x128] sm:$0xff]  ;;  %v871_v44 = vld [vmem:[%s1305_s1 + $0x20] sm:$0xff] }
   0xf   :  { %170 = vmatpush.msra.mxu3 %v744_v23  ;;  %151 = vmatpush.msra.mxu2 %v756_v25  ;;  %1370 = vst [vmem:[#allocation14_spill] sm:$0xff] %v811_v34  ;;  %v840_v39 = vld [vmem:[%s1305_s1 + $0x1b0] sm:$0xff]  ;;  %v859_v42 = vld [vmem:[%s1305_s1 + $0xa8] sm:$0xff]  ;;  %v876_v45 = vld [vmem:[%s1305_s1 + $0x120] sm:$0xff] }
  0x10   :  { %131 = vmatpush.msra.mxu1 %v763_v26  ;;  %112 = vmatpush.msra.mxu0 %v775_v28  ;;  %1371 = vst [vmem:[#allocation15_spill] sm:$0xff] %v816_v35  ;;  %v864_v43 = vld [vmem:[%s1305_s1 + $0x1a8] sm:$0xff]  ;;  %v883_v46 = vld [vmem:[%s1305_s1 + $0xa0] sm:$0xff]  ;;  %v895_v48 = vld [vmem:[%s1305_s1 + $0x18] sm:$0xff] }
  0x11   :  { %171 = vmatpush.msra.mxu3 %v768_v27  ;;  %152 = vmatpush.msra.mxu2 %v780_v29  ;;  %1372 = vst [vmem:[#allocation16_spill] sm:$0xff] %v835_v38  ;;  %v888_v47 = vld [vmem:[%s1305_s1 + $0x1a0] sm:$0xff]  ;;  %v900_v49 = vld [vmem:[%s1305_s1 + $0x118] sm:$0xff]  ;;  %v922_v53 = vld [vmem:[%s1305_s1 + $0x10] sm:$0xff] }
  0x12   :  { %132 = vmatpush.msra.mxu1 %v787_v30  ;;  %113 = vmatpush.msra.mxu0 %v799_v32  ;;  %1373 = vst [vmem:[#allocation17_spill] sm:$0xff] %v840_v39  ;;  %v907_v50 = vld [vmem:[%s1305_s1 + $0x98] sm:$0xff]  ;;  %v86_v52 = vld [vmem:[%s1306_s0] sm:$0xff]  ;;  %v927_v54 = vld [vmem:[%s1305_s1 + $0x110] sm:$0xff] }
  0x13   :  { %172 = vmatpush.msra.mxu3 %v792_v31  ;;  %153 = vmatpush.msra.mxu2 %v804_v33  ;;  %1374 = vst [vmem:[#allocation18_spill] sm:$0xff] %v864_v43  ;;  %v912_v51 = vld [vmem:[%s1305_s1 + $0x198] sm:$0xff]  ;;  %v934_v55 = vld [vmem:[%s1305_s1 + $0x90] sm:$0xff]  ;;  %v87_v57 = vld [vmem:[%s1306_s0 + $0x8] sm:$0x3] }
  0x14   :  { %133 = vmatpush.msra.mxu1 %v811_v34  ;;  %114 = vmatpush.msra.mxu0 %v823_v36  ;;  %1375 = vst [vmem:[#allocation19_spill] sm:$0xff] %v876_v45  ;;  %v939_v56 = vld [vmem:[%s1305_s1 + $0x190] sm:$0xff]  ;;  %v949_v58 = vld [vmem:[%s1305_s1 + $0x8] sm:$0xff]  ;;  %v973_v62 = vld [vmem:[%s1305_s1] sm:$0xff] }
  0x15   :  { %173 = vmatpush.msra.mxu3 %v816_v35  ;;  %154 = vmatpush.msra.mxu2 %v828_v37  ;;  %1376 = vst [vmem:[#allocation20_spill] sm:$0xff] %v888_v47  ;;  %v954_v59 = vld [vmem:[%s1305_s1 + $0x108] sm:$0xff]  ;;  %v978_v63 = vld [vmem:[%s1305_s1 + $0x100] sm:$0xff] }
  0x16   :  { %134 = vmatpush.msra.mxu1 %v835_v38  ;;  %115 = vmatpush.msra.mxu0 %v847_v40  ;;  %1377 = vst [vmem:[#allocation21_spill] sm:$0xff] %v900_v49  ;;  %v961_v60 = vld [vmem:[%s1305_s1 + $0x88] sm:$0xff] }
  0x17   :  { %174 = vmatpush.msra.mxu3 %v840_v39  ;;  %155 = vmatpush.msra.mxu2 %v852_v41  ;;  %1378 = vst [vmem:[#allocation22_spill] sm:$0xff] %v912_v51  ;;  %v966_v61 = vld [vmem:[%s1305_s1 + $0x188] sm:$0xff] }
  0x18   :  { %135 = vmatpush.msra.mxu1 %v859_v42  ;;  %116 = vmatpush.msra.mxu0 %v871_v44  ;;  %1379 = vst [vmem:[#allocation23_spill] sm:$0xff] %v927_v54  ;;  %v1019_v31 = vld [vmem:[%s1305_s1 + $0x228] sm:$0xff] }
  0x19   :  { %175 = vmatpush.msra.mxu3 %v864_v43  ;;  %156 = vmatpush.msra.mxu2 %v876_v45  ;;  %90 = vst [vmem:[#allocation1] ss:$4 sm:$0xff] %v86_v52  ;;  %v985_v52 = vld [vmem:[%s1305_s1 + $0x238] sm:$0xff]  ;;  %v579_v43 = vld [vmem:[%s1306_s0 + $0x12] sm:$0x3] }
  0x1a   :  { %136 = vmatpush.msra.mxu1 %v883_v46  ;;  %117 = vmatpush.msra.mxu0 %v895_v48  ;;  %1380 = vst [vmem:[#allocation24_spill] sm:$0xff] %v939_v56 }
  0x1b   :  { %176 = vmatpush.msra.mxu3 %v888_v47  ;;  %157 = vmatpush.msra.mxu2 %v900_v49  ;;  %1381 = vst [vmem:[#allocation25_spill] sm:$0xff] %v954_v59  ;;  %v578_v47 = vld [vmem:[%s1306_s0 + $0xa] sm:$0xff] }
  0x1c   :  { %137 = vmatpush.msra.mxu1 %v907_v50  ;;  %92 = vst [vmem:[#allocation1 + $0x20] ss:$4 sm:$0xff] %v87_v57  ;;  %118 = vmatpush.msra.mxu0 %v922_v53  ;;  %v990_v57 = vld [vmem:[%s1305_s1 + $0x80] sm:$0xff] }
  0x1d   :  { %177 = vmatpush.msra.mxu3 %v912_v51  ;;  %158 = vmatpush.msra.mxu2 %v927_v54  ;;  %1382 = vst [vmem:[#allocation26_spill] sm:$0xff] %v966_v61  ;;  %v1002_v51 = vld [vmem:[%s1305_s1 + $0x230] sm:$0xff] }
  0x1e   :  { %138 = vmatpush.msra.mxu1 %v934_v55  ;;  %1383 = vst [vmem:[#allocation27_spill] sm:$0xff] %v973_v62  ;;  %119 = vmatpush.msra.mxu0 %v949_v58 }
  0x1f   :  { %178 = vmatpush.msra.mxu3 %v939_v56  ;;  %1384 = vst [vmem:[#allocation28_spill] sm:$0xff] %v978_v63  ;;  %159 = vmatpush.msra.mxu2 %v954_v59  ;;  %v995_v56 = vld [vmem:[%s1305_s1 + $0x180] sm:$0xff] }
  0x20   :  { %1385 = vst [vmem:[#allocation29_spill] sm:$0xff] %v990_v57  ;;  %139 = vmatpush.msra.mxu1 %v961_v60  ;;  %120 = vmatpush.msra.mxu0 %v973_v62  ;;  %v95_v39 = vld.sshfl [vmem:[#allocation1 + $0x10] sm:$0xff pattern:$0x73625140] }
  0x21   :  { %1386 = vst [vmem:[#allocation30_spill] sm:$0xff] %v995_v56  ;;  %179 = vmatpush.msra.mxu3 %v966_v61  ;;  %160 = vmatpush.msra.mxu2 %v978_v63  ;;  %v93_v35 = vld.sshfl [vmem:[#allocation1] sm:$0xff pattern:$0x73625140] }
  0x22   :  { %193 = vmatpush.msrb.mxu0 %v985_v52  ;;  %v96_v61 = vld.sshfl [vmem:[#allocation1 + $0x18] sm:$0xff pattern:$0x73625140]  ;;  %v94_v59 = vld.sshfl [vmem:[#allocation1 + $0x8] sm:$0xff pattern:$0x73625140]  ;;  %140 = vmatpush.msra.mxu1 %v990_v57 }
  0x23   :  { %244 = vmatpush.msrb.mxu2 %v628_v3  ;;  %180 = vmatpush.msra.mxu3 %v995_v56  ;;  %210 = vst [vmem:[#allocation1] ss:$4 sm:$0xff] %v578_v47  ;;  %v1021_v62 = vld.sshfl [vmem:[#allocation1 + $0x20] sm:$0xff pattern:$0x73625140]  ;;  %v1048_v47 = vld [vmem:[%s1305_s1 + $0x210] sm:$0xff] }
  0x24   :  { %194 = vmatpush.msrb.mxu0 %v1002_v51  ;;  %224 = vmatpush.msrb.mxu1 %v611_v0  ;;  %212 = vst [vmem:[#allocation1 + $0x20] ss:$4 sm:$0xff] %v579_v43  ;;  %v1030_v56 = vld [vmem:[%s1305_s1 + $0x220] sm:$0xff]  ;;  %v1039_v43 = vld [vmem:[%s1305_s1 + $0x218] sm:$0xff] }
  0x25   :  { %245 = vmatpush.msrb.mxu2 %v650_v7  ;;  %264 = vmatpush.msrb.mxu3 %v616_v1 }
  0x26   :  { %195 = vmatpush.msrb.mxu0 %v1019_v31  ;;  %225 = vmatpush.msrb.mxu1 %v621_v2 }
  0x27   :  { %246 = vmatpush.msrb.mxu2 %v667_v10  ;;  %265 = vmatpush.msrb.mxu3 %v633_v4  ;;  %v1057_v4 = vld [vmem:[%s1305_s1 + $0x208] sm:$0xff] }
  0x28   :  { %196 = vmatpush.msrb.mxu0 %v1030_v56  ;;  %226 = vmatpush.msrb.mxu1 %v645_v6 }
  0x29   :  { %247 = vmatpush.msrb.mxu2 %v691_v14  ;;  %266 = vmatpush.msrb.mxu3 %v655_v8  ;;  %v1066_v8 = vld [vmem:[%s1305_s1 + $0x200] sm:$0xff] }
  0x2a   :  { %197 = vmatpush.msrb.mxu0 %v1039_v43  ;;  %227 = vmatpush.msrb.mxu1 %v674_v11 }
  0x2b   :  { %248 = vmatpush.msrb.mxu2 %v715_v18  ;;  %267 = vmatpush.msrb.mxu3 %v679_v12  ;;  %v1082_v12 = vld.sshfl [vmem:[#allocation1 + $0x18] sm:$0xff pattern:$0x73625140] }
  0x2c   :  { %198 = vmatpush.msrb.mxu0 %v1048_v47  ;;  %228 = vmatpush.msrb.mxu1 %v703_v16 }
  0x2d   :  { %249 = vmatpush.msrb.mxu2 %v739_v22  ;;  %268 = vmatpush.msrb.mxu3 %v708_v17  ;;  %v214_v17 = vld.sshfl [vmem:[#allocation1 + $0x8] sm:$0xff pattern:$0x73625140] }
  0x2e   :  { %199 = vmatpush.msrb.mxu0 %v1057_v4  ;;  %229 = vmatpush.msrb.mxu1 %v727_v20 }
  0x2f   :  { %250 = vmatpush.msrb.mxu2 %v763_v26  ;;  %269 = vmatpush.msrb.mxu3 %v732_v21  ;;  %v213_v21 = vld.sshfl [vmem:[#allocation1] sm:$0xff pattern:$0x73625140] }
  0x30   :  { %161 = vmatmul.f32.vlgmr.msra.gmra.mxu2 %v95_v39  ;;  %200 = vmatpush.msrb.mxu0 %v1066_v8  ;;  %v215_v39 = vld.sshfl [vmem:[#allocation1 + $0x10] sm:$0xff pattern:$0x73625140] }
  0x31   :  { %230 = vmatpush.msrb.mxu1 %v751_v24  ;;  %251 = vmatpush.msrb.mxu2 %v787_v30 }
  0x32   :  { %270 = vmatpush.msrb.mxu3 %v756_v25  ;;  %121 = vmatmul.f32.vlgmr.msra.gmra.mxu0 %v93_v35  ;;  %v581_v35 = vld [vmem:[%s1306_s0 + $0x14] sm:$0xff] }
  0x33   :  { %181 = vmatmul.f32.vlgmr.msra.gmra.mxu3 %v96_v61  ;;  %284 = vmatpush.msra.mxu0 %v638_v5  ;;  %330 = vst [vmem:[#allocation1] ss:$4 sm:$0xff] %v581_v35  ;;  %v582_v61 = vld [vmem:[%s1306_s0 + $0x1c] sm:$0x3]  ;;  %v1388_v35 = vld [vmem:[#allocation25_spill] sm:$0xff] }
  0x34   :  { %231 = vmatpush.msrb.mxu1 %v775_v28  ;;  %252 = vmatpush.msrb.mxu2 %v811_v34 }
  0x35   :  { %271 = vmatpush.msrb.mxu3 %v780_v29  ;;  %141 = vmatmul.f32.vlgmr.msra.gmra.mxu1 %v94_v59  ;;  %v1091_v59 = vld.sshfl [vmem:[#allocation1 + $0x20] sm:$0xff pattern:$0x73625140] }
  0x36   :  { %285 = vmatpush.msra.mxu0 %v662_v9  ;;  %232 = vmatpush.msrb.mxu1 %v799_v32  ;;  %332 = vst [vmem:[#allocation1 + $0x20] ss:$4 sm:$0xff] %v582_v61  ;;  %v1389_v61 = vld [vmem:[#allocation15_spill] sm:$0xff] }
  0x37   :  { %253 = vmatpush.msrb.mxu2 %v835_v38  ;;  %272 = vmatpush.msrb.mxu3 %v804_v33 }
  0x38   :  { %286 = vmatpush.msra.mxu0 %v684_v13  ;;  %233 = vmatpush.msrb.mxu1 %v823_v36 }
  0x39   :  { %254 = vmatpush.msrb.mxu2 %v859_v42  ;;  %273 = vmatpush.msrb.mxu3 %v828_v37 }
  0x3a   :  { %287 = vmatpush.msra.mxu0 %v696_v15  ;;  %234 = vmatpush.msrb.mxu1 %v847_v40 }
  0x3b   :  { %255 = vmatpush.msrb.mxu2 %v883_v46  ;;  %274 = vmatpush.msrb.mxu3 %v852_v41 }
  0x3c   :  { %577 = vmatmul.msk.f32.vlgmr.msrb.gmra.mxu0 %vm102_vm0, %v1021_v62  ;;  %235 = vmatpush.msrb.mxu1 %v871_v44  ;;  %v1387_v62 = vld [vmem:[#allocation13_spill] sm:$0xff] }
  0x3d   :  { %288 = vmatpush.msra.mxu0 %v720_v19  ;;  %256 = vmatpush.msrb.mxu2 %v907_v50 }
  0x3e   :  { %275 = vmatpush.msrb.mxu3 %v876_v45  ;;  %236 = vmatpush.msrb.mxu1 %v895_v48  ;;  %v1391_v45 = vld [vmem:[#allocation17_spill] sm:$0xff] }
  0x3f   :  { %289 = vmatpush.msra.mxu0 %v744_v23  ;;  %257 = vmatpush.msrb.mxu2 %v934_v55 }
  0x40   :  { %276 = vmatpush.msrb.mxu3 %v900_v49  ;;  %237 = vmatpush.msrb.mxu1 %v922_v53  ;;  %v1390_v49 = vld [vmem:[#allocation27_spill] sm:$0xff] }
  0x41   :  { %290 = vmatpush.msra.mxu0 %v768_v27  ;;  %258 = vmatpush.msrb.mxu2 %v961_v60 }
  0x42   :  { %277 = vmatpush.msrb.mxu3 %v927_v54  ;;  %238 = vmatpush.msrb.mxu1 %v949_v58  ;;  %v1392_v54 = vld [vmem:[#allocation18_spill] sm:$0xff] }
  0x43   :  { %291 = vmatpush.msra.mxu0 %v1387_v62  ;;  %259 = vmatpush.msrb.mxu2 %v990_v57 }
  0x44   :  { %278 = vmatpush.msrb.mxu3 %v1388_v35  ;;  %239 = vmatpush.msrb.mxu1 %v1390_v49  ;;  %v1393_v35 = vld [vmem:[#allocation20_spill] sm:$0xff] }
  0x45   :  { %344 = vmatpush.msra.mxu2 %v611_v0  ;;  %292 = vmatpush.msra.mxu0 %v1389_v61 }
  0x46   :  { %279 = vmatpush.msrb.mxu3 %v978_v63  ;;  %312 = vmatpush.msra.mxu1 %v985_v52  ;;  %v1394_v63 = vld [vmem:[#allocation22_spill] sm:$0xff] }
  0x47   :  { %293 = vmatpush.msra.mxu0 %v1391_v45  ;;  %345 = vmatpush.msra.mxu2 %v621_v2 }
  0x48   :  { %364 = vmatpush.msra.mxu3 %v628_v3  ;;  %313 = vmatpush.msra.mxu1 %v1002_v51 }
  0x49   :  { %294 = vmatpush.msra.mxu0 %v1392_v54  ;;  %346 = vmatpush.msra.mxu2 %v645_v6 }
  0x4a   :  { %365 = vmatpush.msra.mxu3 %v650_v7  ;;  %260 = vmatmul.f32.vlgmr.msrb.gmra.mxu2 %v214_v17  ;;  %v1395_v7 = vld [vmem:[#allocation24_spill] sm:$0xff]  ;;  %v1396_v17 = vld [vmem:[#allocation26_spill] sm:$0xff] }
  0x4b   :  { %295 = vmatpush.msra.mxu0 %v1393_v35  ;;  %314 = vmatpush.msra.mxu1 %v1019_v31 }
  0x4c   :  { %347 = vmatpush.msra.mxu2 %v674_v11  ;;  %366 = vmatpush.msra.mxu3 %v667_v10 }
  0x4d   :  { %280 = vmatmul.f32.vlgmr.msrb.gmra.mxu3 %v215_v39  ;;  %296 = vmatpush.msra.mxu0 %v1394_v63  ;;  %v1397_v39 = vld [vmem:[#allocation30_spill] sm:$0xff] }
  0x4e   :  { %315 = vmatpush.msra.mxu1 %v1030_v56  ;;  %348 = vmatpush.msra.mxu2 %v703_v16 }
  0x4f   :  { %367 = vmatpush.msra.mxu3 %v691_v14  ;;  %240 = vmatmul.f32.vlgmr.msrb.gmra.mxu1 %v213_v21  ;;  %v1159_v21 = vld.sshfl [vmem:[#allocation1 + $0x20] sm:$0xff pattern:$0x73625140]  ;;  %v335_v14 = vld.sshfl [vmem:[#allocation1 + $0x10] sm:$0xff pattern:$0x73625140] }
  0x50   :  { %297 = vmatpush.msra.mxu0 %v1395_v7  ;;  %316 = vmatpush.msra.mxu1 %v1039_v43 }
  0x51   :  { %349 = vmatpush.msra.mxu2 %v727_v20  ;;  %368 = vmatpush.msra.mxu3 %v715_v18  ;;  %v334_v18 = vld.sshfl [vmem:[#allocation1 + $0x8] sm:$0xff pattern:$0x73625140] }
  0x52   :  { %298 = vmatpush.msra.mxu0 %v1396_v17  ;;  %317 = vmatpush.msra.mxu1 %v1048_v47 }
  0x53   :  { %350 = vmatpush.msra.mxu2 %v751_v24  ;;  %369 = vmatpush.msra.mxu3 %v739_v22  ;;  %v585_v22 = vld [vmem:[%s1306_s0 + $0x26] sm:$0x3] }
  0x54   :  { %299 = vmatpush.msra.mxu0 %v1397_v39  ;;  %318 = vmatpush.msra.mxu1 %v1057_v4  ;;  %452 = vst [vmem:[#allocation1 + $0x20] ss:$4 sm:$0xff] %v585_v22  ;;  %v1175_v22 = vld.sshfl [vmem:[#allocation1 + $0x18] sm:$0xff pattern:$0x73625140] }
  0x55   :  { %351 = vmatpush.msra.mxu2 %v775_v28  ;;  %370 = vmatpush.msra.mxu3 %v763_v26  ;;  %v1398_v26 = vld [vmem:[#allocation2_spill] sm:$0xff] }
  0x56   :  { %300 = vmatmul.f32.vlgmr.msra.gmra.mxu0 %v1082_v12  ;;  %319 = vmatpush.msra.mxu1 %v1066_v8  ;;  %v584_v12 = vld [vmem:[%s1306_s0 + $0x1e] sm:$0xff] }
  0x57   :  { %384 = vmatpush.msrb.mxu0 %v616_v1  ;;  %352 = vmatpush.msra.mxu2 %v799_v32 }
  0x58   :  { %371 = vmatpush.msra.mxu3 %v787_v30  ;;  %580 = vmatmul.msk.f32.vlgmr.msra.gmra.mxu1 %vm102_vm0, %v1091_v59  ;;  %v1399_v59 = vld [vmem:[#allocation4_spill] sm:$0xff]  ;;  %v333_v30 = vld.sshfl [vmem:[#allocation1] sm:$0xff pattern:$0x73625140] }
  0x59   :  { %385 = vmatpush.msrb.mxu0 %v1398_v26  ;;  %404 = vmatpush.msrb.mxu1 %v638_v5  ;;  %v1400_v26 = vld [vmem:[#allocation5_spill] sm:$0xff]  ;;  %450 = vst [vmem:[#allocation1] ss:$4 sm:$0xff] %v584_v12  ;;  %v1403_v12 = vld [vmem:[#allocation19_spill] sm:$0xff] }
  0x5a   :  { %353 = vmatpush.msra.mxu2 %v823_v36  ;;  %372 = vmatpush.msra.mxu3 %v811_v34  ;;  %v1401_v34 = vld [vmem:[#allocation7_spill] sm:$0xff] }
  0x5b   :  { %386 = vmatpush.msrb.mxu0 %v1399_v59  ;;  %405 = vmatpush.msrb.mxu1 %v662_v9 }
  0x5c   :  { %354 = vmatpush.msra.mxu2 %v847_v40  ;;  %373 = vmatpush.msra.mxu3 %v835_v38  ;;  %v1402_v38 = vld [vmem:[#allocation9_spill] sm:$0xff] }
  0x5d   :  { %387 = vmatpush.msrb.mxu0 %v1400_v26  ;;  %406 = vmatpush.msrb.mxu1 %v684_v13 }
  0x5e   :  { %355 = vmatpush.msra.mxu2 %v871_v44  ;;  %374 = vmatpush.msra.mxu3 %v859_v42 }
  0x5f   :  { %388 = vmatpush.msrb.mxu0 %v1401_v34  ;;  %407 = vmatpush.msrb.mxu1 %v696_v15 }
  0x60   :  { %356 = vmatpush.msra.mxu2 %v895_v48  ;;  %375 = vmatpush.msra.mxu3 %v883_v46 }
  0x61   :  { %389 = vmatpush.msrb.mxu0 %v1402_v38  ;;  %408 = vmatpush.msrb.mxu1 %v720_v19 }
  0x62   :  { %357 = vmatpush.msra.mxu2 %v922_v53  ;;  %376 = vmatpush.msra.mxu3 %v907_v50 }
  0x63   :  { %390 = vmatpush.msrb.mxu0 %v756_v25  ;;  %409 = vmatpush.msrb.mxu1 %v744_v23 }
  0x64   :  { %358 = vmatpush.msra.mxu2 %v949_v58  ;;  %377 = vmatpush.msra.mxu3 %v934_v55 }
  0x65   :  { %391 = vmatpush.msrb.mxu0 %v780_v29  ;;  %410 = vmatpush.msrb.mxu1 %v768_v27 }
  0x66   :  { %359 = vmatpush.msra.mxu2 %v1390_v49  ;;  %378 = vmatpush.msra.mxu3 %v961_v60 }
  0x67   :  { %392 = vmatpush.msrb.mxu0 %v804_v33  ;;  %411 = vmatpush.msrb.mxu1 %v1387_v62 }
  0x68   :  { %432 = vmatpush.msrb.mxu2 %v985_v52  ;;  %379 = vmatpush.msra.mxu3 %v990_v57  ;;  %v1404_v57 = vld [vmem:[#allocation21_spill] sm:$0xff] }
  0x69   :  { %393 = vmatpush.msrb.mxu0 %v828_v37  ;;  %412 = vmatpush.msrb.mxu1 %v1389_v61 }
  0x6a   :  { %433 = vmatpush.msrb.mxu2 %v1002_v51  ;;  %464 = vmatpush.msrb.mxu3 %v611_v0  ;;  %v1405_v0 = vld [vmem:[#allocation23_spill] sm:$0xff] }
  0x6b   :  { %394 = vmatpush.msrb.mxu0 %v852_v41  ;;  %413 = vmatpush.msrb.mxu1 %v1391_v45 }
  0x6c   :  { %434 = vmatpush.msrb.mxu2 %v1019_v31  ;;  %465 = vmatpush.msrb.mxu3 %v621_v2  ;;  %v1406_v2 = vld [vmem:[#allocation25_spill] sm:$0xff] }
  0x6d   :  { %395 = vmatpush.msrb.mxu0 %v1403_v12  ;;  %414 = vmatpush.msrb.mxu1 %v1392_v54 }
  0x6e   :  { %435 = vmatpush.msrb.mxu2 %v1030_v56  ;;  %466 = vmatpush.msrb.mxu3 %v645_v6  ;;  %v1407_v6 = vld [vmem:[#allocation28_spill] sm:$0xff] }
  0x6f   :  { %360 = vmatmul.f32.vlgmr.msra.gmra.mxu2 %v333_v30  ;;  %396 = vmatpush.msrb.mxu0 %v1404_v57 }
  0x70   :  { %415 = vmatpush.msrb.mxu1 %v1393_v35  ;;  %436 = vmatpush.msrb.mxu2 %v1039_v43 }
  0x71   :  { %467 = vmatpush.msrb.mxu3 %v674_v11  ;;  %397 = vmatpush.msrb.mxu0 %v1405_v0  ;;  %v1408_v11 = vld [vmem:[#allocation3_spill] sm:$0xff] }
  0x72   :  { %380 = vmatmul.f32.vlgmr.msra.gmra.mxu3 %v334_v18  ;;  %416 = vmatpush.msrb.mxu1 %v1394_v63  ;;  %v454_v18 = vld.sshfl [vmem:[#allocation1 + $0x8] sm:$0xff pattern:$0x73625140] }
  0x73   :  { %437 = vmatpush.msrb.mxu2 %v1048_v47  ;;  %468 = vmatpush.msrb.mxu3 %v703_v16  ;;  %v453_v16 = vld.sshfl [vmem:[#allocation1] sm:$0xff pattern:$0x73625140] }
  0x74   :  { %398 = vmatpush.msrb.mxu0 %v1406_v2  ;;  %417 = vmatpush.msrb.mxu1 %v1395_v7 }
  0x75   :  { %438 = vmatpush.msrb.mxu2 %v1057_v4  ;;  %469 = vmatpush.msrb.mxu3 %v727_v20  ;;  %v1417_v20 = vld [vmem:[#allocation29_spill] sm:$0xff] }
  0x76   :  { %399 = vmatpush.msrb.mxu0 %v1407_v6  ;;  %418 = vmatpush.msrb.mxu1 %v1396_v17 }
  0x77   :  { %439 = vmatpush.msrb.mxu2 %v1066_v8  ;;  %470 = vmatpush.msrb.mxu3 %v751_v24 }
  0x78   :  { %583 = vmatmul.msk.f32.vlgmr.msrb.gmra.mxu2 %vm102_vm0, %v1159_v21  ;;  %484 = vmatpush.msra.mxu0 %v628_v3  ;;  %v1409_v3 = vld [vmem:[#allocation2_spill] sm:$0xff] }
  0x79   :  { %524 = vmatpush.msra.mxu2 %v638_v5  ;;  %419 = vmatpush.msrb.mxu1 %v1397_v39  ;;  %v1410_v5 = vld [vmem:[#allocation6_spill] sm:$0xff] }
  0x7a   :  { %471 = vmatpush.msrb.mxu3 %v775_v28  ;;  %400 = vmatmul.f32.vlgmr.msrb.gmra.mxu0 %v335_v14  ;;  %v1415_v14 = vld [vmem:[#allocation14_spill] sm:$0xff] }
  0x7b   :  { %485 = vmatpush.msra.mxu0 %v1408_v11  ;;  %504 = vmatpush.msra.mxu1 %v616_v1  ;;  %v1411_v1 = vld [vmem:[#allocation8_spill] sm:$0xff] }
  0x7c   :  { %525 = vmatpush.msra.mxu2 %v662_v9  ;;  %472 = vmatpush.msrb.mxu3 %v799_v32  ;;  %v1412_v9 = vld [vmem:[#allocation10_spill] sm:$0xff] }
  0x7d   :  { %420 = vmatmul.f32.vlgmr.msrb.gmra.mxu1 %v1175_v22  ;;  %486 = vmatpush.msra.mxu0 %v667_v10  ;;  %v1413_v10 = vld [vmem:[#allocation11_spill] sm:$0xff] }
  0x7e   :  { %505 = vmatpush.msra.mxu1 %v1409_v3  ;;  %526 = vmatpush.msra.mxu2 %v684_v13  ;;  %v1414_v13 = vld [vmem:[#allocation12_spill] sm:$0xff] }
  0x7f   :  { %473 = vmatpush.msrb.mxu3 %v823_v36  ;;  %487 = vmatpush.msra.mxu0 %v1410_v5 }
  0x80   :  { %506 = vmatpush.msra.mxu1 %v1399_v59  ;;  %527 = vmatpush.msra.mxu2 %v696_v15  ;;  %v1416_v15 = vld [vmem:[#allocation16_spill] sm:$0xff] }
  0x81   :  { %474 = vmatpush.msrb.mxu3 %v847_v40  ;;  %488 = vmatpush.msra.mxu0 %v1411_v1 }
  0x82   :  { %507 = vmatpush.msra.mxu1 %v1400_v26  ;;  %528 = vmatpush.msra.mxu2 %v720_v19  ;;  %v456_v19 = vld.sshfl [vmem:[#allocation1 + $0x18] sm:$0xff pattern:$0x73625140] }
  0x83   :  { %475 = vmatpush.msrb.mxu3 %v871_v44  ;;  %489 = vmatpush.msra.mxu0 %v1412_v9 }
  0x84   :  { %508 = vmatpush.msra.mxu1 %v1401_v34  ;;  %529 = vmatpush.msra.mxu2 %v744_v23  ;;  %v457_v23 = vld.sshfl [vmem:[#allocation1 + $0x20] sm:$0xff pattern:$0x73625140] }
  0x85   :  { %476 = vmatpush.msrb.mxu3 %v895_v48  ;;  %490 = vmatpush.msra.mxu0 %v1413_v10 }
  0x86   :  { %509 = vmatpush.msra.mxu1 %v1402_v38  ;;  %530 = vmatpush.msra.mxu2 %v768_v27 }
  0x87   :  { %477 = vmatpush.msrb.mxu3 %v922_v53  ;;  %491 = vmatpush.msra.mxu0 %v1414_v13 }
  0x88   :  { %510 = vmatpush.msra.mxu1 %v756_v25  ;;  %531 = vmatpush.msra.mxu2 %v1387_v62 }
  0x89   :  { %478 = vmatpush.msrb.mxu3 %v949_v58  ;;  %492 = vmatpush.msra.mxu0 %v1415_v14 }
  0x8a   :  { %511 = vmatpush.msra.mxu1 %v780_v29  ;;  %532 = vmatpush.msra.mxu2 %v1389_v61 }
  0x8b   :  { %479 = vmatpush.msrb.mxu3 %v1390_v49  ;;  %493 = vmatpush.msra.mxu0 %v1416_v15 }
  0x8c   :  { %512 = vmatpush.msra.mxu1 %v804_v33  ;;  %533 = vmatpush.msra.mxu2 %v1391_v45 }
  0x8d   :  { %552 = vmatpush.msra.mxu3 %v985_v52  ;;  %494 = vmatpush.msra.mxu0 %v859_v42 }
  0x8e   :  { %513 = vmatpush.msra.mxu1 %v828_v37  ;;  %534 = vmatpush.msra.mxu2 %v1392_v54 }
  0x8f   :  { %553 = vmatpush.msra.mxu3 %v1002_v51  ;;  %495 = vmatpush.msra.mxu0 %v883_v46 }
  0x90   :  { %514 = vmatpush.msra.mxu1 %v852_v41  ;;  %535 = vmatpush.msra.mxu2 %v1393_v35  ;;  %v587_v35 = vld [vmem:[%s1307_s2] ss:$0 sm:$0xff] }
  0x91   :  { %554 = vmatpush.msra.mxu3 %v1019_v31  ;;  %496 = vmatpush.msra.mxu0 %v907_v50 }
  0x92   :  { %515 = vmatpush.msra.mxu1 %v1403_v12  ;;  %536 = vmatpush.msra.mxu2 %v1394_v63 }
  0x93   :  { %555 = vmatpush.msra.mxu3 %v1030_v56  ;;  %497 = vmatpush.msra.mxu0 %v934_v55 }
  0x94   :  { %480 = vmatmul.f32.vlgmr.msrb.gmra.mxu3 %v453_v16  ;;  %516 = vmatpush.msra.mxu1 %v1404_v57 }
  0x95   :  { %537 = vmatpush.msra.mxu2 %v1395_v7  ;;  %556 = vmatpush.msra.mxu3 %v1039_v43  ;;  %v455_v7 = vld.sshfl [vmem:[#allocation1 + $0x10] sm:$0xff pattern:$0x73625140] }
  0x96   :  { %498 = vmatpush.msra.mxu0 %v961_v60  ;;  %517 = vmatpush.msra.mxu1 %v1405_v0 }
  0x97   :  { %538 = vmatpush.msra.mxu2 %v1396_v17  ;;  %557 = vmatpush.msra.mxu3 %v1048_v47 }
  0x98   :  { %499 = vmatpush.msra.mxu0 %v1417_v20  ;;  %518 = vmatpush.msra.mxu1 %v1406_v2 }
  0x99   :  { %539 = vmatpush.msra.mxu2 %v1397_v39  ;;  %558 = vmatpush.msra.mxu3 %v1057_v4 }
  0x9a   :  { %500 = vmatmul.f32.vlgmr.msra.gmra.mxu0 %v454_v18  ;;  %540 = vmatmul.f32.vlgmr.msra.gmra.mxu2 %v456_v19 }
  0x9b   :  { %519 = vmatpush.msra.mxu1 %v1407_v6  ;;  %559 = vmatpush.msra.mxu3 %v1066_v8 }
  0x9c   :  { %520 = vmatmul.f32.vlgmr.msra.gmra.mxu1 %v455_v7  ;;  %586 = vmatmul.msk.f32.vlgmr.msra.gmra.mxu3 %vm102_vm0, %v457_v23 }
  0xaf   :  { %v122_v24 = vpop.f32.mrf.mxu0 }
  0xb2   :  { %v142_v25 = vpop.f32.mrf.mxu1 }
  0xb3   :  { %v162_v26 = vpop.f32.mrf.mxu2  ;;  %v143_v38 = vadd.f32 %v142_v25, %v122_v24 }
  0xb5   :  { %v163_v42 = vadd.f32 %v162_v26, %v143_v38 }
  0xb6   :  { %v182_v27 = vpop.f32.mrf.mxu3 }
  0xb7   :  { %v183_v50 = vadd.f32 %v182_v27, %v163_v42 }
  0xb9   :  { %v202_v28 = vpop.f32.mrf.mxu0 }
  0xba   :  { %v203_v56 = vadd.f32 %v202_v28, %v183_v50 }
  0xcc   :  { %v241_v29 = vpop.f32.mrf.mxu1 }
  0xcd   :  { %v261_v30 = vpop.f32.mrf.mxu2 }
  0xce   :  { %v262_v36 = vadd.f32 %v261_v30, %v241_v29 }
  0xd0   :  { %v281_v31 = vpop.f32.mrf.mxu3 }
  0xd1   :  { %v282_v41 = vadd.f32 %v281_v31, %v262_v36 }
  0xd3   :  { %v301_v4 = vpop.f32.mrf.mxu0 }
  0xd4   :  { %v302_v46 = vadd.f32 %v301_v4, %v282_v41 }
  0xd5   :  { %v321_v32 = vpop.f32.mrf.mxu1 }
  0xd6   :  { %v322_v55 = vadd.f32 %v321_v32, %v302_v46 }
  0xd8   :  { %v324_v52 = vmax.f32 %v203_v56, %v322_v55 }
  0xf2   :  { %v361_v33 = vpop.f32.mrf.mxu2 }
  0xf5   :  { %v381_v34 = vpop.f32.mrf.mxu3 }
  0xf6   :  { %v382_v40 = vadd.f32 %v381_v34, %v361_v33 }
  0xf7   :  { %v401_v37 = vpop.f32.mrf.mxu0 }
  0xf8   :  { %v402_v44 = vadd.f32 %v401_v37, %v382_v40 }
  0xfa   :  { %v421_v8 = vpop.f32.mrf.mxu1 }
  0xfb   :  { %v441_v45 = vpop.f32.mrf.mxu2  ;;  %v422_v51 = vadd.f32 %v421_v8, %v402_v44 }
  0xfd   :  { %v442_v58 = vadd.f32 %v441_v45, %v422_v51 }
  0xff   :  { %v444_v47 = vmax.f32 %v324_v52, %v442_v58 }
 0x117   :  { %v481_v48 = vpop.f32.mrf.mxu3  ;;  %v501_v49 = vpop.f32.mrf.mxu0 }
 0x118   :  { %v502_v53 = vadd.f32 %v501_v49, %v481_v48 }
 0x119   :  { %v521_v54 = vpop.f32.mrf.mxu1 }
 0x11a   :  { %v522_v60 = vadd.f32 %v521_v54, %v502_v53 }
 0x11d   :  { %v541_v63 = vpop.f32.mrf.mxu2 }
 0x11e   :  { %v542_v57 = vadd.f32 %v541_v63, %v522_v60 }
 0x11f   :  { %v561_v43 = vpop.f32.mrf.mxu3 }
 0x120   :  { %v562_v62 = vadd.f32 %v561_v43, %v542_v57 }
 0x122   :  { %v564_v61 = vmax.f32 %v444_v47, %v562_v62 }
 0x124   :  { %v569_v17 = vadd.f32 %v587_v35, %v564_v61 }
 0x126   :  { %v570_v39 = vmax.f32 %v569_v17, 0.0 }
 0x128   :  { %572 = vst.msk [vmem:[%s1308_s3] sm:$0x3] %vm571_vm1, %v570_v39 }

// kernel: vgg_adversarial_forward.18
= control target key start
LH: loop header
LB: loop body
LE: loop exit
PB: predicated region body
PF: predicated region fallthrough
CT: control target
= control target key end

     0   :  { %s371_s0 = inlined_call_operand.vmem [shape: f32[2,64], index: 0, kind: input, shape index: {}]   ;;  %s372_s1 = inlined_call_operand.vmem [shape: f32[64,128], index: 1, kind: input, shape index: {}]   ;;  %s373_s2 = inlined_call_operand.vmem [shape: f32[1,128], index: 2, kind: input, shape index: {}]   ;;  %s374_s3 = inlined_call_operand.vmem [shape: f32[128,128], index: 3, kind: input, shape index: {}]   ;;  %s375_s4 = inlined_call_operand.vmem [shape: f32[1,128], index: 4, kind: input, shape index: {}]   ;;  %s376_s5 = inlined_call_operand.vmem [shape: f32[128,10], index: 5, kind: input, shape index: {}]   ;;  %s377_s6 = inlined_call_operand.vmem [shape: f32[1,10], index: 6, kind: input, shape index: {}]   ;;  %s378_s7 = inlined_call_operand.hbm [shape: f32[2,10], index: 7, kind: output, shape index: {}]  }
   0x1   :  { %v35_v0 = vld [vmem:[%s372_s1 + $0x38] sm:$0xff]  ;;  %v34_v1 = vld [vmem:[%s372_s1 + $0x30] sm:$0xff]  ;;  %v33_v2 = vld [vmem:[%s372_s1 + $0x28] sm:$0xff] }
   0x2   :  { %52 = vmatpush.msra.mxu0 %v35_v0  ;;  %v80_v3 = vld [vmem:[%s374_s3 + $0x78] sm:$0xff]  ;;  %v79_v4 = vld [vmem:[%s374_s3 + $0x70] sm:$0xff]  ;;  %v32_v5 = vld [vmem:[%s372_s1 + $0x20] sm:$0xff] }
   0x3   :  { %85 = vmatpush.msra.mxu1 %v80_v3  ;;  %v78_v6 = vld [vmem:[%s374_s3 + $0x68] sm:$0xff]  ;;  %v31_v7 = vld [vmem:[%s372_s1 + $0x18] sm:$0xff]  ;;  %v30_v8 = vld [vmem:[%s372_s1 + $0x10] sm:$0xff] }
   0x4   :  { %53 = vmatpush.msra.mxu0 %v34_v1  ;;  %v77_v9 = vld [vmem:[%s374_s3 + $0x60] sm:$0xff] }
   0x5   :  { %86 = vmatpush.msra.mxu1 %v79_v4 }
   0x6   :  { %54 = vmatpush.msra.mxu0 %v33_v2 }
   0x7   :  { %87 = vmatpush.msra.mxu1 %v78_v6 }
   0x8   :  { %55 = vmatpush.msra.mxu0 %v32_v5 }
   0x9   :  { %12 = vsyncpa [#allocation3], 0  ;;  %v76_v10 = vld [vmem:[%s374_s3 + $0x58] sm:$0xff]  ;;  %v29_v11 = vld [vmem:[%s372_s1 + $0x8] sm:$0xff]  ;;  %88 = vmatpush.msra.mxu1 %v77_v9  ;;  %vm40_vm0 = vcmask 523264   ;;  %s195_s12 = smov [#allocation2]  }
   0xa   :  { %56 = vmatpush.msra.mxu0 %v31_v7  ;;  %v75_v12 = vld [vmem:[%s374_s3 + $0x50] sm:$0xff]  ;;  %v28_v13 = vld [vmem:[%s372_s1] sm:$0xff]  ;;  %v74_v15 = vld [vmem:[%s374_s3 + $0x48] sm:$0xff]  ;;  %s153_s13 = sshll.u32 %s195_s12, 4  ;;  %s155_s15 = sshll.u32 %s378_s7, 4  ;;  %vm146_vm1 = vcmask 74752   ;;  %s154_s13 = int_to_ptr.vmem [resolvable:$true] %s153_s13  ;;  %s156_s15 = int_to_ptr.hbm [resolvable:$true] %s155_s15 }
   0xb   :  { %89 = vmatpush.msra.mxu1 %v76_v10  ;;  %v27_v14 = vld [vmem:[%s371_s0] sm:$0x3]  ;;  %v72_v17 = vld [vmem:[%s374_s3 + $0x38] sm:$0xff]  ;;  %v71_v18 = vld [vmem:[%s374_s3 + $0x30] sm:$0xff] }
   0xc   :  { %57 = vmatpush.msra.mxu0 %v30_v8  ;;  %v73_v16 = vld [vmem:[%s374_s3 + $0x40] sm:$0xff]  ;;  %v70_v19 = vld [vmem:[%s374_s3 + $0x28] sm:$0xff]  ;;  %v68_v21 = vld [vmem:[%s374_s3 + $0x18] sm:$0xff] }
   0xd   :  { %90 = vmatpush.msra.mxu1 %v75_v12  ;;  %v69_v20 = vld [vmem:[%s374_s3 + $0x20] sm:$0xff]  ;;  %v67_v22 = vld [vmem:[%s374_s3 + $0x10] sm:$0xff]  ;;  %v66_v23 = vld [vmem:[%s374_s3 + $0x8] sm:$0xff] }
   0xe   :  { %58 = vmatpush.msra.mxu0 %v29_v11  ;;  %v65_v24 = vld [vmem:[%s374_s3] sm:$0xff]  ;;  %v121_v25 = vld [vmem:[%s376_s5 + $0x78] sm:$0xff]  ;;  %v120_v26 = vld [vmem:[%s376_s5 + $0x70] sm:$0xff] }
   0xf   :  { %91 = vmatpush.msra.mxu1 %v74_v15  ;;  %126 = vmatpush.msra.mxu2 %v121_v25  ;;  %v119_v27 = vld [vmem:[%s376_s5 + $0x68] sm:$0xff]  ;;  %v118_v28 = vld [vmem:[%s376_s5 + $0x60] sm:$0xff]  ;;  %v117_v29 = vld [vmem:[%s376_s5 + $0x58] sm:$0xff] }
  0x10   :  { %59 = vmatpush.msra.mxu0 %v28_v13  ;;  %v116_v30 = vld [vmem:[%s376_s5 + $0x50] sm:$0xff]  ;;  %v115_v31 = vld [vmem:[%s376_s5 + $0x48] sm:$0xff]  ;;  %v114_v32 = vld [vmem:[%s376_s5 + $0x40] sm:$0xff] }
  0x11   :  { %164 = vmatmul.msk.f32.vlgmr.msra.gmra.mxu0 %vm40_vm0, %v27_v14  ;;  %92 = vmatpush.msra.mxu1 %v73_v16  ;;  %v113_v33 = vld [vmem:[%s376_s5 + $0x38] sm:$0xff]  ;;  %v112_v34 = vld [vmem:[%s376_s5 + $0x30] sm:$0xff]  ;;  %v111_v35 = vld [vmem:[%s376_s5 + $0x28] sm:$0xff] }
  0x12   :  { %127 = vmatpush.msra.mxu2 %v120_v26  ;;  %v110_v36 = vld [vmem:[%s376_s5 + $0x20] sm:$0xff]  ;;  %v109_v37 = vld [vmem:[%s376_s5 + $0x18] sm:$0xff]  ;;  %v108_v42 = vld [vmem:[%s376_s5 + $0x10] sm:$0xff] }
  0x13   :  { %93 = vmatpush.msra.mxu1 %v72_v17  ;;  %v166_v38 = vld [vmem:[%s373_s2] ss:$0 sm:$0xff]  ;;  %v107_v43 = vld [vmem:[%s376_s5 + $0x8] sm:$0xff] }
  0x14   :  { %128 = vmatpush.msra.mxu2 %v119_v27  ;;  %v106_v44 = vld [vmem:[%s376_s5] sm:$0xff] }
  0x15   :  { %94 = vmatpush.msra.mxu1 %v71_v18  ;;  %v167_v45 = vld [vmem:[%s375_s4] ss:$0 sm:$0xff] }
  0x16   :  { %129 = vmatpush.msra.mxu2 %v118_v28  ;;  %v168_v49 = vld [vmem:[%s377_s6] ss:$0 sm:$0xff] }
  0x17   :  { %95 = vmatpush.msra.mxu1 %v70_v19 }
  0x18   :  { %130 = vmatpush.msra.mxu2 %v117_v29 }
  0x19   :  { %96 = vmatpush.msra.mxu1 %v69_v20 }
  0x1a   :  { %131 = vmatpush.msra.mxu2 %v116_v30 }
  0x1b   :  { %97 = vmatpush.msra.mxu1 %v68_v21 }
  0x1c   :  { %132 = vmatpush.msra.mxu2 %v115_v31 }
  0x1d   :  { %98 = vmatpush.msra.mxu1 %v67_v22 }
  0x1e   :  { %133 = vmatpush.msra.mxu2 %v114_v32 }
  0x1f   :  { %99 = vmatpush.msra.mxu1 %v66_v23 }
  0x20   :  { %134 = vmatpush.msra.mxu2 %v113_v33 }
  0x21   :  { %100 = vmatpush.msra.mxu1 %v65_v24 }
  0x22   :  { %135 = vmatpush.msra.mxu2 %v112_v34 }
  0x24   :  { %136 = vmatpush.msra.mxu2 %v111_v35 }
  0x26   :  { %137 = vmatpush.msra.mxu2 %v110_v36 }
  0x28   :  { %138 = vmatpush.msra.mxu2 %v109_v37 }
  0x2a   :  { %139 = vmatpush.msra.mxu2 %v108_v42 }
  0x2c   :  { %140 = vmatpush.msra.mxu2 %v107_v43 }
  0x2e   :  { %141 = vmatpush.msra.mxu2 %v106_v44 }
  0x8e   :  { %v61_v39 = vpop.f32.mrf.mxu0 }
  0x8f   :  { %v62_v40 = vadd.f32 %v166_v38, %v61_v39 }
  0x91   :  { %v64_v41 = vmax.f32 %v62_v40, 0.0 }
  0x93   :  { %101 = vmatmul.f32.vlgmr.msra.gmra.mxu1 %v64_v41 }
 0x110   :  { %v102_v46 = vpop.f32.mrf.mxu1 }
 0x111   :  { %v103_v47 = vadd.f32 %v167_v45, %v102_v46 }
 0x113   :  { %v105_v48 = vmax.f32 %v103_v47, 0.0 }
 0x115   :  { %142 = vmatmul.f32.vlgmr.msra.gmra.mxu2 %v105_v48 }
 0x198   :  { %v143_v50 = vpop.f32.mrf.mxu2 }
 0x199   :  { %v144_v51 = vadd.f32 %v168_v49, %v143_v50 }
 0x19b   :  { %147 = vst.msk [vmem:[#allocation2] sm:$0x3] %vm146_vm1, %v144_v51 }
 0x19c   :  { %158 = dma.vmem_to_hbm [thread:$0]  %s154_s13, 32, %s156_s15, [#allocation3]  }
 0x19d   :  { %193 = dma.done.wait [#allocation3], 32  }
 0x19e   :  { %194 = vsyncadd [#allocation3], 4294967264 }
 0x19f   :  { %163 = vsyncpa [#allocation3], 1 }

// kernel: vgg_adversarial_forward.19
= control target key start
LH: loop header
LB: loop body
LE: loop exit
PB: predicated region body
PF: predicated region fallthrough
CT: control target
= control target key end

     0   :  { %s906_s0 = inlined_call_operand.vmem [shape: f32[32,32], index: 0, kind: input, shape index: {}]   ;;  %s907_s1 = inlined_call_operand.vmem [shape: f32[2,32], index: 1, kind: input, shape index: {}]   ;;  %s908_s2 = inlined_call_operand.vmem [shape: f32[32,64], index: 2, kind: input, shape index: {}]   ;;  %s909_s3 = inlined_call_operand.vmem [shape: f32[1,64], index: 3, kind: input, shape index: {}]   ;;  %s910_s4 = inlined_call_operand.vmem [shape: f32[64,64], index: 4, kind: input, shape index: {}]   ;;  %s911_s5 = inlined_call_operand.vmem [shape: f32[1,64], index: 5, kind: input, shape index: {}]   ;;  %s912_s6 = inlined_call_operand.vmem [shape: f32[64,64], index: 6, kind: input, shape index: {}]   ;;  %s913_s7 = inlined_call_operand.vmem [shape: f32[1,64], index: 7, kind: input, shape index: {}]   ;;  %s914_s8 = inlined_call_operand.vmem [shape: f32[64,64], index: 8, kind: input, shape index: {}]   ;;  %s915_s9 = inlined_call_operand.vmem [shape: f32[1,64], index: 9, kind: input, shape index: {}]   ;;  %s916_s10 = inlined_call_operand.vmem [shape: f32[64,128], index: 10, kind: input, shape index: {}]   ;;  %s917_s11 = inlined_call_operand.vmem [shape: f32[1,128], index: 11, kind: input, shape index: {}]   ;;  %s918_s12 = inlined_call_operand.vmem [shape: f32[128,128], index: 12, kind: input, shape index: {}]   ;;  %s919_s13 = inlined_call_operand.vmem [shape: f32[1,128], index: 13, kind: input, shape index: {}]   ;;  %s920_s14 = inlined_call_operand.vmem [shape: f32[128,10], index: 14, kind: input, shape index: {}]   ;;  %s921_s15 = inlined_call_operand.vmem [shape: f32[1,10], index: 15, kind: input, shape index: {}]   ;;  %s922_s16 = inlined_call_operand.hbm [shape: f32[2,10], index: 16, kind: output, shape index: {}]  }
   0x1   :  { %924 = sst [smem:[#allocation5_spill]] %s906_s0 }
   0x2   :  { %v61_v0 = vld [vmem:[%s908_s2 + $0x18] sm:$0xff]  ;;  %v60_v1 = vld [vmem:[%s908_s2 + $0x10] sm:$0xff]  ;;  %v59_v2 = vld [vmem:[%s908_s2 + $0x8] sm:$0xff]  ;;  %s925_s18 = sld [smem:[#allocation5_spill]]  ;;  %vm66_vm0 = vcmask 261120  }
   0x3   :  { %91 = vmatpush.msra.mxu0 %v61_v0  ;;  %v119_v3 = vld [vmem:[%s910_s4 + $0x38] sm:$0xff]  ;;  %v58_v4 = vld [vmem:[%s908_s2] sm:$0xff]  ;;  %v118_v6 = vld [vmem:[%s910_s4 + $0x30] sm:$0xff] }
   0x4   :  { %145 = vmatpush.msra.mxu1 %v119_v3  ;;  %v117_v7 = vld [vmem:[%s910_s4 + $0x28] sm:$0xff]  ;;  %v116_v8 = vld [vmem:[%s910_s4 + $0x20] sm:$0xff] }
   0x5   :  { %92 = vmatpush.msra.mxu0 %v60_v1 }
   0x6   :  { %146 = vmatpush.msra.mxu1 %v118_v6 }
   0x7   :  { %93 = vmatpush.msra.mxu0 %v59_v2 }
   0x8   :  { %v54_v5 = vld [vmem:[%s925_s18] sm:$0xff]  ;;  %147 = vmatpush.msra.mxu1 %v117_v7 }
   0x9   :  { %94 = vmatpush.msra.mxu0 %v58_v4 }
   0xa   :  { %21 = vsyncpa [#allocation3], 0  ;;  %485 = vmatmul.msk.f32.vlgmr.msra.gmra.mxu0 %vm66_vm0, %v54_v5  ;;  %v115_v9 = vld [vmem:[%s910_s4 + $0x18] sm:$0xff]  ;;  %148 = vmatpush.msra.mxu1 %v116_v8  ;;  %v55_v10 = vld [vmem:[%s925_s18 + $0x8] sm:$0xff]  ;;  %vm124_vm1 = vcmask 523264   ;;  %vm467_vm2 = vcmask 74752  }
   0xb   :  { %v56_v11 = vld [vmem:[%s925_s18 + $0x10] sm:$0xff]  ;;  %v57_v12 = vld [vmem:[%s925_s18 + $0x18] sm:$0xff]  ;;  %v113_v14 = vld [vmem:[%s910_s4 + $0x8] sm:$0xff] }
   0xc   :  { %149 = vmatpush.msra.mxu1 %v115_v9  ;;  %v114_v13 = vld [vmem:[%s910_s4 + $0x10] sm:$0xff]  ;;  %v112_v15 = vld [vmem:[%s910_s4] sm:$0xff]  ;;  %v177_v17 = vld [vmem:[%s912_s6 + $0x38] sm:$0xff] }
   0xd   :  { %v523_v16 = vld [vmem:[%s909_s3] ss:$0 sm:$0xff]  ;;  %v176_v18 = vld [vmem:[%s912_s6 + $0x30] sm:$0xff]  ;;  %202 = vmatpush.msra.mxu2 %v177_v17  ;;  %v175_v19 = vld [vmem:[%s912_s6 + $0x28] sm:$0xff] }
   0xe   :  { %150 = vmatpush.msra.mxu1 %v114_v13  ;;  %v174_v22 = vld [vmem:[%s912_s6 + $0x20] sm:$0xff]  ;;  %v173_v24 = vld [vmem:[%s912_s6 + $0x18] sm:$0xff]  ;;  %v172_v34 = vld [vmem:[%s912_s6 + $0x10] sm:$0xff] }
   0xf   :  { %203 = vmatpush.msra.mxu2 %v176_v18  ;;  %v171_v35 = vld [vmem:[%s912_s6 + $0x8] sm:$0xff]  ;;  %v170_v36 = vld [vmem:[%s912_s6] sm:$0xff]  ;;  %v234_v38 = vld [vmem:[%s914_s8 + $0x38] sm:$0xff] }
  0x10   :  { %151 = vmatpush.msra.mxu1 %v113_v14  ;;  %v524_v37 = vld [vmem:[%s911_s5] ss:$0 sm:$0xff]  ;;  %v233_v39 = vld [vmem:[%s914_s8 + $0x30] sm:$0xff]  ;;  %259 = vmatpush.msra.mxu3 %v234_v38  ;;  %v232_v40 = vld [vmem:[%s914_s8 + $0x28] sm:$0xff]  ;;  %s556_s5 = smov [#allocation2]  }
  0x11   :  { %204 = vmatpush.msra.mxu2 %v175_v19  ;;  %v231_v43 = vld [vmem:[%s914_s8 + $0x20] sm:$0xff]  ;;  %v230_v45 = vld [vmem:[%s914_s8 + $0x18] sm:$0xff]  ;;  %v229_v55 = vld [vmem:[%s914_s8 + $0x10] sm:$0xff]  ;;  %s474_s30 = sshll.u32 %s556_s5, 4  ;;  %s475_s30 = int_to_ptr.vmem [resolvable:$true] %s474_s30 }
  0x12   :  { %486 = vmatmul.msk.f32.gmra.mxu0 %vm66_vm0, %v55_v10  ;;  %152 = vmatpush.msra.mxu1 %v112_v15  ;;  %v228_v56 = vld [vmem:[%s914_s8 + $0x8] sm:$0xff]  ;;  %v227_v57 = vld [vmem:[%s914_s8] sm:$0xff]  ;;  %v291_v59 = vld [vmem:[%s916_s10 + $0x38] sm:$0xff] }
  0x13   :  { %205 = vmatpush.msra.mxu2 %v174_v22  ;;  %260 = vmatpush.msra.mxu3 %v233_v39  ;;  %v525_v58 = vld [vmem:[%s913_s7] ss:$0 sm:$0xff]  ;;  %v290_v60 = vld [vmem:[%s916_s10 + $0x30] sm:$0xff]  ;;  %v289_v61 = vld [vmem:[%s916_s10 + $0x28] sm:$0xff] }
  0x14   :  { %316 = vmatpush.msrb.mxu0 %v291_v59  ;;  %v288_v0 = vld [vmem:[%s916_s10 + $0x20] sm:$0xff]  ;;  %v287_v2 = vld [vmem:[%s916_s10 + $0x18] sm:$0xff]  ;;  %v286_v3 = vld [vmem:[%s916_s10 + $0x10] sm:$0xff] }
  0x15   :  { %206 = vmatpush.msra.mxu2 %v173_v24  ;;  %261 = vmatpush.msra.mxu3 %v232_v40  ;;  %v285_v4 = vld [vmem:[%s916_s10 + $0x8] sm:$0xff]  ;;  %v284_v14 = vld [vmem:[%s916_s10] sm:$0xff]  ;;  %v355_v17 = vld [vmem:[%s918_s12 + $0x70] sm:$0xff] }
  0x16   :  { %317 = vmatpush.msrb.mxu0 %v290_v60  ;;  %v526_v15 = vld [vmem:[%s915_s9] ss:$0 sm:$0xff]  ;;  %v354_v18 = vld [vmem:[%s918_s12 + $0x68] sm:$0xff]  ;;  %v351_v24 = vld [vmem:[%s918_s12 + $0x50] sm:$0xff] }
  0x17   :  { %207 = vmatpush.msra.mxu2 %v172_v34  ;;  %262 = vmatpush.msra.mxu3 %v231_v43  ;;  %v341_v43 = vld [vmem:[%s918_s12] sm:$0xff]  ;;  %v401_v59 = vld [vmem:[%s920_s14 + $0x38] sm:$0xff]  ;;  %v400_v60 = vld [vmem:[%s920_s14 + $0x30] sm:$0xff] }
  0x18   :  { %318 = vmatpush.msrb.mxu0 %v289_v61  ;;  %v399_v61 = vld [vmem:[%s920_s14 + $0x28] sm:$0xff] }
  0x19   :  { %208 = vmatpush.msra.mxu2 %v171_v35  ;;  %263 = vmatpush.msra.mxu3 %v230_v45  ;;  %v345_v35 = vld [vmem:[%s918_s12 + $0x20] sm:$0xff]  ;;  %v409_v45 = vld [vmem:[%s920_s14 + $0x78] sm:$0xff] }
  0x1a   :  { %487 = vmatmul.msk.f32.gmra.mxu0 %vm66_vm0, %v56_v11 }
  0x1b   :  { %209 = vmatpush.msra.mxu2 %v170_v36  ;;  %264 = vmatpush.msra.mxu3 %v229_v55 }
  0x1c   :  { %319 = vmatpush.msrb.mxu0 %v288_v0  ;;  %v398_v0 = vld [vmem:[%s920_s14 + $0x20] sm:$0xff] }
  0x1d   :  { %265 = vmatpush.msra.mxu3 %v228_v56  ;;  %414 = vmatpush.msrb.mxu2 %v409_v45 }
  0x1e   :  { %320 = vmatpush.msrb.mxu0 %v287_v2  ;;  %v397_v2 = vld [vmem:[%s920_s14 + $0x18] sm:$0xff] }
  0x1f   :  { %266 = vmatpush.msra.mxu3 %v227_v57  ;;  %v402_v57 = vld [vmem:[%s920_s14 + $0x40] sm:$0xff] }
  0x20   :  { %321 = vmatpush.msrb.mxu0 %v286_v3 }
  0x22   :  { %488 = vmatmul.msk.f32.gmra.mxu0 %vm66_vm0, %v57_v12 }
  0x23   :  { %322 = vmatpush.msrb.mxu0 %v285_v4 }
  0x25   :  { %323 = vmatpush.msrb.mxu0 %v284_v14 }
  0x87   :  { %v96_v20 = vpop.f32.mrf.mxu0 }
  0x88   :  { %v97_v21 = vadd.f32 %v523_v16, %v96_v20 }
  0x8a   :  { %v108_v23 = vmax.f32 %v97_v21, 0.0  ;;  %v353_v21 = vld [vmem:[%s918_s12 + $0x60] sm:$0xff] }
  0x8c   :  { %489 = vmatmul.msk.f32.vlgmr.msra.gmra.mxu1 %vm124_vm1, %v108_v23  ;;  %v352_v23 = vld [vmem:[%s918_s12 + $0x58] sm:$0xff] }
  0x8f   :  { %v99_v25 = vpop.f32.mrf.mxu0 }
  0x90   :  { %v100_v26 = vadd.f32 %v523_v16, %v99_v25  ;;  %v350_v25 = vld [vmem:[%s918_s12 + $0x48] sm:$0xff] }
  0x92   :  { %v109_v27 = vmax.f32 %v100_v26, 0.0 }
  0x94   :  { %490 = vmatmul.msk.f32.gmra.mxu1 %vm124_vm1, %v109_v27 }
  0x97   :  { %v102_v28 = vpop.f32.mrf.mxu0 }
  0x98   :  { %v103_v29 = vadd.f32 %v523_v16, %v102_v28  ;;  %v349_v28 = vld [vmem:[%s918_s12 + $0x40] sm:$0xff] }
  0x9a   :  { %v110_v30 = vmax.f32 %v103_v29, 0.0 }
  0x9c   :  { %491 = vmatmul.msk.f32.gmra.mxu1 %vm124_vm1, %v110_v30  ;;  %v348_v30 = vld [vmem:[%s918_s12 + $0x38] sm:$0xff] }
  0x9f   :  { %v105_v31 = vpop.f32.mrf.mxu0 }
  0xa0   :  { %v106_v32 = vadd.f32 %v523_v16, %v105_v31  ;;  %v356_v16 = vld [vmem:[%s918_s12 + $0x78] sm:$0xff]  ;;  %v347_v31 = vld [vmem:[%s918_s12 + $0x30] sm:$0xff] }
  0xa1   :  { %361 = vmatpush.msrb.mxu1 %v356_v16  ;;  %506 = vmatpush.msrb.mxu3 %v356_v16 }
  0xa2   :  { %v111_v33 = vmax.f32 %v106_v32, 0.0  ;;  %v346_v32 = vld [vmem:[%s918_s12 + $0x28] sm:$0xff] }
  0xa3   :  { %362 = vmatpush.msrb.mxu1 %v355_v17  ;;  %507 = vmatpush.msrb.mxu3 %v355_v17 }
  0xa4   :  { %492 = vmatmul.msk.f32.gmra.mxu1 %vm124_vm1, %v111_v33 }
  0xa5   :  { %363 = vmatpush.msrb.mxu1 %v354_v18  ;;  %508 = vmatpush.msrb.mxu3 %v354_v18 }
  0xa7   :  { %364 = vmatpush.msrb.mxu1 %v353_v21  ;;  %509 = vmatpush.msrb.mxu3 %v353_v21 }
  0xa9   :  { %365 = vmatpush.msrb.mxu1 %v352_v23  ;;  %510 = vmatpush.msrb.mxu3 %v352_v23 }
  0xab   :  { %366 = vmatpush.msrb.mxu1 %v351_v24  ;;  %511 = vmatpush.msrb.mxu3 %v351_v24 }
  0xad   :  { %367 = vmatpush.msrb.mxu1 %v350_v25  ;;  %512 = vmatpush.msrb.mxu3 %v350_v25  ;;  %v529_v25 = vld [vmem:[%s921_s15] ss:$0 sm:$0xff]  ;;  %s476_s15 = sshll.u32 %s922_s16, 4  ;;  %s477_s15 = int_to_ptr.hbm [resolvable:$true] %s476_s15 }
  0xaf   :  { %368 = vmatpush.msrb.mxu1 %v349_v28  ;;  %513 = vmatpush.msrb.mxu3 %v349_v28 }
  0xb1   :  { %369 = vmatpush.msrb.mxu1 %v348_v30  ;;  %514 = vmatpush.msrb.mxu3 %v348_v30 }
  0xb3   :  { %370 = vmatpush.msrb.mxu1 %v347_v31  ;;  %515 = vmatpush.msrb.mxu3 %v347_v31  ;;  %v443_v31 = vld [vmem:[%s907_s1] sm:$0x3] }
  0xb5   :  { %371 = vmatpush.msrb.mxu1 %v346_v32  ;;  %516 = vmatpush.msrb.mxu3 %v346_v32 }
  0xb7   :  { %372 = vmatpush.msrb.mxu1 %v345_v35  ;;  %517 = vmatpush.msrb.mxu3 %v345_v35 }
 0x109   :  { %v154_v41 = vpop.f32.mrf.mxu1 }
 0x10a   :  { %v155_v42 = vadd.f32 %v524_v37, %v154_v41  ;;  %v343_v41 = vld [vmem:[%s918_s12 + $0x10] sm:$0xff] }
 0x10c   :  { %v166_v44 = vmax.f32 %v155_v42, 0.0  ;;  %v342_v42 = vld [vmem:[%s918_s12 + $0x8] sm:$0xff] }
 0x10e   :  { %493 = vmatmul.msk.f32.vlgmr.msra.gmra.mxu2 %vm124_vm1, %v166_v44  ;;  %v527_v44 = vld [vmem:[%s917_s11] ss:$0 sm:$0xff] }
 0x111   :  { %v157_v46 = vpop.f32.mrf.mxu1 }
 0x112   :  { %v158_v47 = vadd.f32 %v524_v37, %v157_v46  ;;  %v408_v46 = vld [vmem:[%s920_s14 + $0x70] sm:$0xff] }
 0x113   :  { %415 = vmatpush.msrb.mxu2 %v408_v46 }
 0x114   :  { %v167_v48 = vmax.f32 %v158_v47, 0.0  ;;  %v407_v47 = vld [vmem:[%s920_s14 + $0x68] sm:$0xff] }
 0x115   :  { %416 = vmatpush.msrb.mxu2 %v407_v47 }
 0x116   :  { %494 = vmatmul.msk.f32.gmra.mxu2 %vm124_vm1, %v167_v48 }
 0x119   :  { %v160_v49 = vpop.f32.mrf.mxu1 }
 0x11a   :  { %v161_v50 = vadd.f32 %v524_v37, %v160_v49 }
 0x11c   :  { %v168_v51 = vmax.f32 %v161_v50, 0.0  ;;  %v406_v50 = vld [vmem:[%s920_s14 + $0x60] sm:$0xff] }
 0x11d   :  { %417 = vmatpush.msrb.mxu2 %v406_v50 }
 0x11e   :  { %495 = vmatmul.msk.f32.gmra.mxu2 %vm124_vm1, %v168_v51 }
 0x121   :  { %v163_v52 = vpop.f32.mrf.mxu1 }
 0x122   :  { %v164_v53 = vadd.f32 %v524_v37, %v163_v52  ;;  %v344_v37 = vld [vmem:[%s918_s12 + $0x18] sm:$0xff] }
 0x123   :  { %373 = vmatpush.msrb.mxu1 %v344_v37  ;;  %518 = vmatpush.msrb.mxu3 %v344_v37  ;;  %v405_v52 = vld [vmem:[%s920_s14 + $0x58] sm:$0xff] }
 0x124   :  { %v169_v54 = vmax.f32 %v164_v53, 0.0  ;;  %v404_v53 = vld [vmem:[%s920_s14 + $0x50] sm:$0xff]  ;;  %418 = vmatpush.msrb.mxu2 %v405_v52 }
 0x125   :  { %374 = vmatpush.msrb.mxu1 %v343_v41  ;;  %519 = vmatpush.msrb.mxu3 %v343_v41 }
 0x126   :  { %496 = vmatmul.msk.f32.gmra.mxu2 %vm124_vm1, %v169_v54  ;;  %v403_v54 = vld [vmem:[%s920_s14 + $0x48] sm:$0xff] }
 0x127   :  { %375 = vmatpush.msrb.mxu1 %v342_v42  ;;  %520 = vmatpush.msrb.mxu3 %v342_v42 }
 0x128   :  { %419 = vmatpush.msrb.mxu2 %v404_v53 }
 0x129   :  { %376 = vmatpush.msrb.mxu1 %v341_v43  ;;  %521 = vmatpush.msrb.mxu3 %v341_v43 }
 0x12a   :  { %420 = vmatpush.msrb.mxu2 %v403_v54 }
 0x12c   :  { %421 = vmatpush.msrb.mxu2 %v402_v57 }
 0x12e   :  { %422 = vmatpush.msrb.mxu2 %v401_v59 }
 0x130   :  { %423 = vmatpush.msrb.mxu2 %v400_v60 }
 0x132   :  { %424 = vmatpush.msrb.mxu2 %v399_v61 }
 0x134   :  { %425 = vmatpush.msrb.mxu2 %v398_v0 }
 0x136   :  { %426 = vmatpush.msrb.mxu2 %v397_v2 }
 0x191   :  { %v211_v62 = vpop.f32.mrf.mxu2 }
 0x192   :  { %v212_v63 = vadd.f32 %v525_v58, %v211_v62 }
 0x194   :  { %v223_v1 = vmax.f32 %v212_v63, 0.0 }
 0x196   :  { %497 = vmatmul.msk.f32.vlgmr.msra.gmra.mxu3 %vm124_vm1, %v223_v1 }
 0x199   :  { %v214_v5 = vpop.f32.mrf.mxu2 }
 0x19a   :  { %v215_v6 = vadd.f32 %v525_v58, %v214_v5 }
 0x19c   :  { %v224_v7 = vmax.f32 %v215_v6, 0.0  ;;  %v396_v6 = vld [vmem:[%s920_s14 + $0x10] sm:$0xff] }
 0x19d   :  { %427 = vmatpush.msrb.mxu2 %v396_v6 }
 0x19e   :  { %498 = vmatmul.msk.f32.gmra.mxu3 %vm124_vm1, %v224_v7  ;;  %v395_v7 = vld [vmem:[%s920_s14 + $0x8] sm:$0xff] }
 0x19f   :  { %428 = vmatpush.msrb.mxu2 %v395_v7 }
 0x1a1   :  { %v217_v8 = vpop.f32.mrf.mxu2 }
 0x1a2   :  { %v218_v9 = vadd.f32 %v525_v58, %v217_v8  ;;  %v394_v8 = vld [vmem:[%s920_s14] sm:$0xff] }
 0x1a3   :  { %429 = vmatpush.msrb.mxu2 %v394_v8 }
 0x1a4   :  { %v225_v10 = vmax.f32 %v218_v9, 0.0  ;;  %v528_v9 = vld [vmem:[%s919_s13] ss:$0 sm:$0xff] }
 0x1a6   :  { %499 = vmatmul.msk.f32.gmra.mxu3 %vm124_vm1, %v225_v10 }
 0x1a9   :  { %v220_v11 = vpop.f32.mrf.mxu2 }
 0x1aa   :  { %v221_v12 = vadd.f32 %v525_v58, %v220_v11 }
 0x1ac   :  { %v226_v13 = vmax.f32 %v221_v12, 0.0 }
 0x1ae   :  { %500 = vmatmul.msk.f32.gmra.mxu3 %vm124_vm1, %v226_v13 }
 0x219   :  { %v268_v19 = vpop.f32.mrf.mxu3 }
 0x21a   :  { %v269_v20 = vadd.f32 %v526_v15, %v268_v19 }
 0x21c   :  { %v280_v22 = vmax.f32 %v269_v20, 0.0 }
 0x21e   :  { %501 = vmatmul.msk.f32.vlgmr.msrb.gmra.mxu0 %vm124_vm1, %v280_v22 }
 0x221   :  { %v271_v26 = vpop.f32.mrf.mxu3 }
 0x222   :  { %v272_v27 = vadd.f32 %v526_v15, %v271_v26 }
 0x224   :  { %v281_v29 = vmax.f32 %v272_v27, 0.0 }
 0x226   :  { %502 = vmatmul.msk.f32.gmra.mxu0 %vm124_vm1, %v281_v29 }
 0x229   :  { %v274_v33 = vpop.f32.mrf.mxu3 }
 0x22a   :  { %v275_v34 = vadd.f32 %v526_v15, %v274_v33 }
 0x22c   :  { %v282_v36 = vmax.f32 %v275_v34, 0.0 }
 0x22e   :  { %503 = vmatmul.msk.f32.gmra.mxu0 %vm124_vm1, %v282_v36 }
 0x231   :  { %v277_v38 = vpop.f32.mrf.mxu3 }
 0x232   :  { %v278_v39 = vadd.f32 %v526_v15, %v277_v38 }
 0x234   :  { %v283_v40 = vmax.f32 %v278_v39, 0.0 }
 0x236   :  { %504 = vmatmul.msk.f32.gmra.mxu0 %vm124_vm1, %v283_v40 }
 0x29b   :  { %v325_v48 = vpop.f32.mrf.mxu0 }
 0x29c   :  { %v326_v49 = vadd.f32 %v527_v44, %v325_v48 }
 0x29e   :  { %v337_v51 = vmax.f32 %v326_v49, 0.0 }
 0x2a0   :  { %377 = vmatmul.f32.vlgmr.msrb.gmra.mxu1 %v337_v51 }
 0x2a3   :  { %v328_v55 = vpop.f32.mrf.mxu0 }
 0x2a4   :  { %v329_v56 = vadd.f32 %v527_v44, %v328_v55 }
 0x2a6   :  { %v338_v58 = vmax.f32 %v329_v56, 0.0 }
 0x2a8   :  { %380 = vmatmul.f32.gmra.mxu1 %v338_v58 }
 0x2ab   :  { %v331_v62 = vpop.f32.mrf.mxu0 }
 0x2ac   :  { %v332_v63 = vadd.f32 %v527_v44, %v331_v62 }
 0x2ae   :  { %v339_v1 = vmax.f32 %v332_v63, 0.0 }
 0x2b0   :  { %383 = vmatmul.f32.gmra.mxu1 %v339_v1 }
 0x2b3   :  { %v334_v3 = vpop.f32.mrf.mxu0 }
 0x2b4   :  { %v335_v4 = vadd.f32 %v527_v44, %v334_v3 }
 0x2b6   :  { %v340_v5 = vmax.f32 %v335_v4, 0.0 }
 0x2b8   :  { %386 = vmatmul.f32.vlgmr.msrb.gmra.mxu3 %v340_v5 }
 0x31d   :  { %v378_v10 = vpop.f32.mrf.mxu1 }
 0x31e   :  { %v379_v11 = vadd.f32 %v528_v9, %v378_v10 }
 0x320   :  { %v390_v12 = vmax.f32 %v379_v11, 0.0 }
 0x322   :  { %430 = vmatmul.f32.vlgmr.msrb.gmra.mxu2 %v390_v12 }
 0x325   :  { %v381_v13 = vpop.f32.mrf.mxu1 }
 0x326   :  { %v382_v14 = vadd.f32 %v528_v9, %v381_v13 }
 0x328   :  { %v391_v15 = vmax.f32 %v382_v14, 0.0 }
 0x32a   :  { %433 = vmatmul.f32.gmra.mxu2 %v391_v15 }
 0x32d   :  { %v384_v16 = vpop.f32.mrf.mxu1 }
 0x32e   :  { %v385_v17 = vadd.f32 %v528_v9, %v384_v16 }
 0x330   :  { %v392_v18 = vmax.f32 %v385_v17, 0.0 }
 0x332   :  { %436 = vmatmul.f32.gmra.mxu2 %v392_v18 }
 0x33b   :  { %v387_v19 = vpop.f32.mrf.mxu3 }
 0x33c   :  { %v388_v20 = vadd.f32 %v528_v9, %v387_v19 }
 0x33e   :  { %v393_v21 = vmax.f32 %v388_v20, 0.0 }
 0x340   :  { %439 = vmatmul.f32.gmra.mxu2 %v393_v21 }
 0x3a5   :  { %v431_v22 = vpop.f32.mrf.mxu2 }
 0x3a6   :  { %v432_v30 = vadd.f32 %v529_v25, %v431_v22 }
 0x3ad   :  { %v434_v23 = vpop.f32.mrf.mxu2 }
 0x3ae   :  { %v435_v29 = vadd.f32 %v529_v25, %v434_v23 }
 0x3b5   :  { %v437_v24 = vpop.f32.mrf.mxu2 }
 0x3b6   :  { %v438_v28 = vadd.f32 %v529_v25, %v437_v24 }
 0x3c3   :  { %v440_v26 = vpop.f32.mrf.mxu2 }
 0x3c4   :  { %v441_v27 = vadd.f32 %v529_v25, %v440_v26 }
 0x3c6   :  { %459 = vmatpush.msra.mxu3 %v441_v27 }
 0x3c8   :  { %460 = vmatpush.msra.mxu3 %v438_v28 }
 0x3ca   :  { %461 = vmatpush.msra.mxu3 %v435_v29 }
 0x3cc   :  { %462 = vmatpush.msra.mxu3 %v432_v30 }
 0x3cd   :  { %505 = vmatmul.msk.f32.vlgmr.msra.gmra.mxu3 %vm66_vm0, %v443_v31 }
 0x450   :  { %v464_v32 = vpop.f32.mrf.mxu3 }
 0x451   :  { %468 = vst.msk [vmem:[#allocation2] sm:$0x3] %vm467_vm2, %v464_v32 }
 0x452   :  { %479 = dma.vmem_to_hbm [thread:$0]  %s475_s30, 32, %s477_s15, [#allocation3]  }
 0x453   :  { %554 = dma.done.wait [#allocation3], 32  }
 0x454   :  { %555 = vsyncadd [#allocation3], 4294967264 }
 0x455   :  { %484 = vsyncpa [#allocation3], 1 }

</bundles_post_ra>
